<compile_context>
chip_gen: v7x
topology: tpu7x:2x2x1
jax: 0.10.0
libtpu: 0.0.40
codegen_flags: <defaults>
</compile_context>

<pallas_src>
import jax
import jax.numpy as jnp
import numpy as np
from jax.experimental import pallas as pl
from jax.experimental.pallas import tpu as pltpu

IMG_SIZES = [56, 28, 14, 7]
OUT_DIMS = [64, 128, 256, 512]
N = 128          # number of mesh vertices (sublane- and lane-aligned)
DIM = 3          # xyz coordinates per vertex
TOTAL_DIM = DIM + sum(OUT_DIMS)   # 963


def _fused_kernel(inp_ref, f0_hbm, f1_hbm, f2_hbm, f3_hbm,
                  out_xyz, out_f0, out_f1, out_f2, out_f3,
                  buf0, buf1, buf2, buf3, sem):
    feat_hbm = (f0_hbm, f1_hbm, f2_hbm, f3_hbm)
    bufs = (buf0, buf1, buf2, buf3)
    outs = (out_f0, out_f1, out_f2, out_f3)
    n = inp_ref.shape[0]

    # Kick off all feature HBM->VMEM copies up front, in the order they will
    # be consumed (smallest level first) so each wait only blocks on bytes it
    # actually needs; the large level-0 copy is hidden behind the projection
    # math and levels 3..1.
    copies = [None] * 4
    for lvl in (3, 2, 1, 0):
        copies[lvl] = pltpu.make_async_copy(feat_hbm[lvl], bufs[lvl],
                                            sem.at[lvl])
        copies[lvl].start()

    # Vertex coordinates verbatim into their own (lane-0 aligned) output.
    out_xyz[...] = inp_ref[...]

    # Perspective projection, per-vertex as (n, 1) columns (tiny: ~16 vregs).
    px = inp_ref[:, 0:1]
    py = inp_ref[:, 1:2]
    pz = inp_ref[:, 2:3]
    h = 248.0 * (py / pz) + 111.5
    w = 248.0 * (px / (-pz)) + 111.5
    h = jnp.clip(h, 0.0, 223.0)
    w = jnp.clip(w, 0.0, 223.0)

    for lvl in (3, 2, 1, 0):                   # smallest feature map first
        img_size = IMG_SIZES[lvl]
        s = img_size * img_size
        # 224 / img_size is a power of two, so multiply == divide bit-exactly.
        inv_scale = float(img_size) / 224.0
        x = h * inv_scale                      # (n, 1), in [0, img_size-0.25]
        y = w * inv_scale

        x1 = jnp.floor(x).astype(jnp.int32)
        x2 = jnp.minimum(jnp.ceil(x).astype(jnp.int32), img_size - 1)
        y1 = jnp.floor(y).astype(jnp.int32)
        y2 = jnp.minimum(jnp.ceil(y).astype(jnp.int32), img_size - 1)

        # torch uses x.long()/y.long() == floor(x)/floor(y) for x, y >= 0, so
        # the w12/w21/w22 weights are identically zero and
        # w11 = (x2 - x1) * (y2 - y1) is 0 or 1.  Encode the zero case by
        # pointing the one-hot at an impossible flat index (-1).
        w11 = (x2 - x1) * (y2 - y1)                          # (n,1) in {0,1}
        idx = jnp.where(w11 > 0, x1 * img_size + y1, -1)     # (n,1) int32

        # (n, s) selection matrix: at most one 1.0 per row.  Single compare +
        # select on the lane axis -- the dominant VPU cost, now minimal.
        iota = jax.lax.broadcasted_iota(jnp.int32, (n, s), 1)
        m = jnp.where(iota == idx, 1.0, 0.0)                 # (n, s) f32

        copies[lvl].wait()
        # Gather + weight-combine on the MXU: (n, s) @ (s, C) -> (n, C),
        # written lane-aligned starting at column 0 of its own output.
        outs[lvl][...] = jnp.dot(m, bufs[lvl][...],
                                 preferred_element_type=jnp.float32)


@jax.jit
def graph_projection(img_features, inp):
    """JAX/Pallas equivalent of GraphProjection.forward.

    img_features: list of 4 arrays, shapes (64,56,56), (128,28,28),
                  (256,14,14), (512,7,7)   (NCHW-per-level, no batch dim)
    inp:          (N, 3) vertex coordinates
    returns:      (N, 3 + 64 + 128 + 256 + 512) = (N, 963)
    """
    n = inp.shape[0]
    # (C, H, W) -> (H*W, C): one small XLA transpose per level (~1.5 MB total)
    # so the kernel matmul emits (n, C) directly, no in-kernel transpose.
    feats_t = [f.reshape(f.shape[0], -1).T for f in img_features]

    in_specs = ([pl.BlockSpec((n, DIM), lambda: (0, 0))] +
                [pl.BlockSpec(memory_space=pl.ANY)] * 4)

    out_shape = tuple(
        [jax.ShapeDtypeStruct((n, DIM), jnp.float32)] +
        [jax.ShapeDtypeStruct((n, OUT_DIMS[i]), jnp.float32) for i in range(4)])
    out_specs = tuple(
        [pl.BlockSpec((n, DIM), lambda: (0, 0))] +
        [pl.BlockSpec((n, OUT_DIMS[i]), lambda: (0, 0)) for i in range(4)])

    scratch_shapes = (
        [pltpu.VMEM((IMG_SIZES[i] * IMG_SIZES[i], OUT_DIMS[i]), jnp.float32)
         for i in range(4)] +
        [pltpu.SemaphoreType.DMA((4,))])

    outs = pl.pallas_call(
        _fused_kernel,
        out_shape=out_shape,
        in_specs=in_specs,
        out_specs=out_specs,
        scratch_shapes=scratch_shapes,
    )(inp, *feats_t)

    # Module-order concat: [xyz | 64 | 128 | 256 | 512].
    return jnp.concatenate(outs, axis=1)


def _reference(img_features, inp):
    """Pure-JAX reference (same semantics as the PyTorch module)."""
    h = 248.0 * (inp[:, 1] / inp[:, 2]) + 111.5
    w = 248.0 * (inp[:, 0] / (-inp[:, 2])) + 111.5
    h = jnp.clip(h, 0.0, 223.0)
    w = jnp.clip(w, 0.0, 223.0)
    feats = [inp]
    for i in range(4):
        img_size, feat = IMG_SIZES[i], img_features[i]
        x = h / (224.0 / img_size)
        y = w / (224.0 / img_size)
        x1 = jnp.floor(x).astype(jnp.int32)
        x2 = jnp.minimum(jnp.ceil(x).astype(jnp.int32), img_size - 1)
        y1 = jnp.floor(y).astype(jnp.int32)
        y2 = jnp.minimum(jnp.ceil(y).astype(jnp.int32), img_size - 1)
        xl = x.astype(jnp.int32)
        yl = y.astype(jnp.int32)
        q11 = feat[:, x1, y1].T
        q12 = feat[:, x1, y2].T
        q21 = feat[:, x2, y1].T
        q22 = feat[:, x2, y2].T
        w11 = ((x2 - xl) * (y2 - yl)).astype(jnp.float32)[:, None]
        w12 = ((x2 - xl) * (yl - y1)).astype(jnp.float32)[:, None]
        w21 = ((xl - x1) * (y2 - yl)).astype(jnp.float32)[:, None]
        w22 = ((xl - x1) * (yl - y1)).astype(jnp.float32)[:, None]
        feats.append(w11 * q11 + w21 * q21 + w12 * q12 + w22 * q22)
    return jnp.concatenate(feats, axis=1)


if __name__ == "__main__":
    key = jax.random.PRNGKey(0)
    k_in, k0, k1, k2, k3 = jax.random.split(key, 5)

    # Vertex coordinates: z bounded away from 0 (positive, like torch.rand).
    inp = jax.random.uniform(k_in, (N, DIM), jnp.float32,
                             minval=0.1, maxval=1.0)

    # Deterministic synthetic feature pyramid (the module takes these as inputs).
    img_features = [
        jax.random.normal(k0, (OUT_DIMS[0], IMG_SIZES[0], IMG_SIZES[0]), jnp.float32),
        jax.random.normal(k1, (OUT_DIMS[1], IMG_SIZES[1], IMG_SIZES[1]), jnp.float32),
        jax.random.normal(k2, (OUT_DIMS[2], IMG_SIZES[2], IMG_SIZES[2]), jnp.float32),
        jax.random.normal(k3, (OUT_DIMS[3], IMG_SIZES[3], IMG_SIZES[3]), jnp.float32),
    ]

    out = graph_projection(img_features, inp)
    out = jax.block_until_ready(out)

    ref = _reference(img_features, inp)
    assert out.shape == (N, TOTAL_DIM), out.shape
    np.testing.assert_allclose(np.asarray(out), np.asarray(ref),
                               rtol=1e-5, atol=1e-5)

    print("KERNEL_OK")
</pallas_src>

<mosaic_0001>
module attributes {stable_mosaic.version = 11 : i64} {
  func.func @_fused_kernel(%arg0: memref<128x3xf32, #tpu.memory_space<vmem>>, %arg1: memref<3136x64xf32, #tpu.memory_space<any>>, %arg2: memref<784x128xf32, #tpu.memory_space<any>>, %arg3: memref<196x256xf32, #tpu.memory_space<any>>, %arg4: memref<49x512xf32, #tpu.memory_space<any>>, %arg5: memref<128x3xf32, #tpu.memory_space<vmem>>, %arg6: memref<128x64xf32, #tpu.memory_space<vmem>>, %arg7: memref<128x128xf32, #tpu.memory_space<vmem>>, %arg8: memref<128x256xf32, #tpu.memory_space<vmem>>, %arg9: memref<128x512xf32, #tpu.memory_space<vmem>>, %arg10: memref<3136x64xf32, #tpu.memory_space<vmem>>, %arg11: memref<784x128xf32, #tpu.memory_space<vmem>>, %arg12: memref<196x256xf32, #tpu.memory_space<vmem>>, %arg13: memref<49x512xf32, #tpu.memory_space<vmem>>, %arg14: memref<4x!tpu.dma_semaphore, #tpu.memory_space<semaphore_mem>>) attributes {dimension_semantics = [], scalar_prefetch = 0 : i64, scratch_operands = 5 : i64, tpu.core_type = #tpu.core_type<tc>} {
    %c3_i32 = arith.constant 3 : i32
    %0 = tpu.memref_slice %arg14[%c3_i32] : memref<4x!tpu.dma_semaphore, #tpu.memory_space<semaphore_mem>> -> memref<1x!tpu.dma_semaphore, #tpu.memory_space<semaphore_mem>>
    %1 = tpu.memref_squeeze %0 : memref<1x!tpu.dma_semaphore, #tpu.memory_space<semaphore_mem>> -> memref<!tpu.dma_semaphore, #tpu.memory_space<semaphore_mem>>
    tpu.enqueue_dma source(%arg4 : memref<49x512xf32, #tpu.memory_space<any>>) target(%arg13 : memref<49x512xf32, #tpu.memory_space<vmem>>) target_semaphore(%1 : memref<!tpu.dma_semaphore, #tpu.memory_space<semaphore_mem>>)
    %c2_i32 = arith.constant 2 : i32
    %2 = tpu.memref_slice %arg14[%c2_i32] : memref<4x!tpu.dma_semaphore, #tpu.memory_space<semaphore_mem>> -> memref<1x!tpu.dma_semaphore, #tpu.memory_space<semaphore_mem>>
    %3 = tpu.memref_squeeze %2 : memref<1x!tpu.dma_semaphore, #tpu.memory_space<semaphore_mem>> -> memref<!tpu.dma_semaphore, #tpu.memory_space<semaphore_mem>>
    tpu.enqueue_dma source(%arg3 : memref<196x256xf32, #tpu.memory_space<any>>) target(%arg12 : memref<196x256xf32, #tpu.memory_space<vmem>>) target_semaphore(%3 : memref<!tpu.dma_semaphore, #tpu.memory_space<semaphore_mem>>)
    %c1_i32 = arith.constant 1 : i32
    %4 = tpu.memref_slice %arg14[%c1_i32] : memref<4x!tpu.dma_semaphore, #tpu.memory_space<semaphore_mem>> -> memref<1x!tpu.dma_semaphore, #tpu.memory_space<semaphore_mem>>
    %5 = tpu.memref_squeeze %4 : memref<1x!tpu.dma_semaphore, #tpu.memory_space<semaphore_mem>> -> memref<!tpu.dma_semaphore, #tpu.memory_space<semaphore_mem>>
    tpu.enqueue_dma source(%arg2 : memref<784x128xf32, #tpu.memory_space<any>>) target(%arg11 : memref<784x128xf32, #tpu.memory_space<vmem>>) target_semaphore(%5 : memref<!tpu.dma_semaphore, #tpu.memory_space<semaphore_mem>>)
    %c0_i32 = arith.constant 0 : i32
    %6 = tpu.memref_slice %arg14[%c0_i32] : memref<4x!tpu.dma_semaphore, #tpu.memory_space<semaphore_mem>> -> memref<1x!tpu.dma_semaphore, #tpu.memory_space<semaphore_mem>>
    %7 = tpu.memref_squeeze %6 : memref<1x!tpu.dma_semaphore, #tpu.memory_space<semaphore_mem>> -> memref<!tpu.dma_semaphore, #tpu.memory_space<semaphore_mem>>
    tpu.enqueue_dma source(%arg1 : memref<3136x64xf32, #tpu.memory_space<any>>) target(%arg10 : memref<3136x64xf32, #tpu.memory_space<vmem>>) target_semaphore(%7 : memref<!tpu.dma_semaphore, #tpu.memory_space<semaphore_mem>>)
    %c0 = arith.constant 0 : index
    %c0_0 = arith.constant 0 : index
    %8 = vector.load %arg0[%c0, %c0_0] : memref<128x3xf32, #tpu.memory_space<vmem>>, vector<128x3xf32>
    %c0_1 = arith.constant 0 : index
    %c0_2 = arith.constant 0 : index
    %9 = vector.load %arg5[%c0_1, %c0_2] : memref<128x3xf32, #tpu.memory_space<vmem>>, vector<128x3xf32>
    tpu.vector_store %arg5[%c0_1, %c0_2], %8 {strides = array<i32>} : memref<128x3xf32, #tpu.memory_space<vmem>>, vector<128x3xf32>,
    %c0_3 = arith.constant 0 : index
    %c0_4 = arith.constant 0 : index
    %10 = vector.load %arg0[%c0_3, %c0_4] : memref<128x3xf32, #tpu.memory_space<vmem>>, vector<128x1xf32>
    %c0_5 = arith.constant 0 : index
    %c1 = arith.constant 1 : index
    %11 = vector.load %arg0[%c0_5, %c1] : memref<128x3xf32, #tpu.memory_space<vmem>>, vector<128x1xf32>
    %c0_6 = arith.constant 0 : index
    %c2 = arith.constant 2 : index
    %12 = vector.load %arg0[%c0_6, %c2] : memref<128x3xf32, #tpu.memory_space<vmem>>, vector<128x1xf32>
    %13 = arith.divf %11, %12 : vector<128x1xf32>
    %cst = arith.constant 2.480000e+02 : f32
    %14 = vector.broadcast %cst : f32 to vector<128x1xf32>
    %15 = arith.mulf %14, %13 : vector<128x1xf32>
    %cst_7 = arith.constant 1.115000e+02 : f32
    %16 = vector.broadcast %cst_7 : f32 to vector<128x1xf32>
    %17 = arith.addf %15, %16 : vector<128x1xf32>
    %cst_8 = arith.constant 0.000000e+00 : f32
    %18 = vector.broadcast %cst_8 : f32 to vector<128x1xf32>
    %19 = arith.subf %18, %12 : vector<128x1xf32>
    %20 = arith.divf %10, %19 : vector<128x1xf32>
    %cst_9 = arith.constant 2.480000e+02 : f32
    %21 = vector.broadcast %cst_9 : f32 to vector<128x1xf32>
    %22 = arith.mulf %21, %20 : vector<128x1xf32>
    %cst_10 = arith.constant 1.115000e+02 : f32
    %23 = vector.broadcast %cst_10 : f32 to vector<128x1xf32>
    %24 = arith.addf %22, %23 : vector<128x1xf32>
    %cst_11 = arith.constant 0.000000e+00 : f32
    %cst_12 = arith.constant 2.230000e+02 : f32
    %25 = vector.broadcast %cst_11 : f32 to vector<128x1xf32>
    %26 = arith.maximumf %25, %17 : vector<128x1xf32>
    %27 = vector.broadcast %cst_12 : f32 to vector<128x1xf32>
    %28 = arith.minimumf %27, %26 : vector<128x1xf32>
    %cst_13 = arith.constant 0.000000e+00 : f32
    %cst_14 = arith.constant 2.230000e+02 : f32
    %29 = vector.broadcast %cst_13 : f32 to vector<128x1xf32>
    %30 = arith.maximumf %29, %24 : vector<128x1xf32>
    %31 = vector.broadcast %cst_14 : f32 to vector<128x1xf32>
    %32 = arith.minimumf %31, %30 : vector<128x1xf32>
    %cst_15 = arith.constant 3.125000e-02 : f32
    %33 = vector.broadcast %cst_15 : f32 to vector<128x1xf32>
    %34 = arith.mulf %28, %33 : vector<128x1xf32>
    %cst_16 = arith.constant 3.125000e-02 : f32
    %35 = vector.broadcast %cst_16 : f32 to vector<128x1xf32>
    %36 = arith.mulf %32, %35 : vector<128x1xf32>
    %37 = math.floor %34 : vector<128x1xf32>
    %38 = arith.fptosi %37 : vector<128x1xf32> to vector<128x1xi32>
    %39 = math.ceil %34 : vector<128x1xf32>
    %40 = arith.fptosi %39 : vector<128x1xf32> to vector<128x1xi32>
    %c6_i32 = arith.constant 6 : i32
    %41 = vector.broadcast %c6_i32 : i32 to vector<128x1xi32>
    %42 = arith.minsi %40, %41 : vector<128x1xi32>
    %43 = math.floor %36 : vector<128x1xf32>
    %44 = arith.fptosi %43 : vector<128x1xf32> to vector<128x1xi32>
    %45 = math.ceil %36 : vector<128x1xf32>
    %46 = arith.fptosi %45 : vector<128x1xf32> to vector<128x1xi32>
    %c6_i32_17 = arith.constant 6 : i32
    %47 = vector.broadcast %c6_i32_17 : i32 to vector<128x1xi32>
    %48 = arith.minsi %46, %47 : vector<128x1xi32>
    %49 = arith.subi %42, %38 : vector<128x1xi32>
    %50 = arith.subi %48, %44 : vector<128x1xi32>
    %51 = arith.muli %49, %50 : vector<128x1xi32>
    %c0_i32_18 = arith.constant 0 : i32
    %52 = vector.broadcast %c0_i32_18 : i32 to vector<128x1xi32>
    %53 = arith.cmpi sgt, %51, %52 : vector<128x1xi32>
    %c7_i32 = arith.constant 7 : i32
    %54 = vector.broadcast %c7_i32 : i32 to vector<128x1xi32>
    %55 = arith.muli %38, %54 : vector<128x1xi32>
    %56 = arith.addi %55, %44 : vector<128x1xi32>
    %c-1_i32 = arith.constant -1 : i32
    %57 = vector.broadcast %c-1_i32 : i32 to vector<128x1xi32>
    %58 = arith.select %53, %56, %57 : vector<128x1xi1>, vector<128x1xi32>
    %59 = tpu.iota {dimensions = array<i32: 1>} : vector<128x49xi32>
    %60 = vector.broadcast %58 : vector<128x1xi32> to vector<128x49xi32>
    %61 = arith.cmpi eq, %59, %60 : vector<128x49xi32>
    %cst_19 = arith.constant 1.000000e+00 : f32
    %cst_20 = arith.constant 0.000000e+00 : f32
    %62 = vector.broadcast %cst_19 : f32 to vector<128x49xf32>
    %63 = vector.broadcast %cst_20 : f32 to vector<128x49xf32>
    %64 = arith.select %61, %62, %63 : vector<128x49xi1>, vector<128x49xf32>
    %c3_i32_21 = arith.constant 3 : i32
    %65 = tpu.memref_slice %arg14[%c3_i32_21] : memref<4x!tpu.dma_semaphore, #tpu.memory_space<semaphore_mem>> -> memref<1x!tpu.dma_semaphore, #tpu.memory_space<semaphore_mem>>
    %66 = tpu.memref_squeeze %65 : memref<1x!tpu.dma_semaphore, #tpu.memory_space<semaphore_mem>> -> memref<!tpu.dma_semaphore, #tpu.memory_space<semaphore_mem>>
    tpu.wait_dma2 semaphore(%66 : memref<!tpu.dma_semaphore, #tpu.memory_space<semaphore_mem>>) src(%arg4 : memref<49x512xf32, #tpu.memory_space<any>>) dst(%arg13 : memref<49x512xf32, #tpu.memory_space<vmem>>)
    %c0_22 = arith.constant 0 : index
    %c0_23 = arith.constant 0 : index
    %67 = vector.load %arg13[%c0_22, %c0_23] : memref<49x512xf32, #tpu.memory_space<vmem>>, vector<49x512xf32>
    %cst_24 = arith.constant dense<0.000000e+00> : vector<128x512xf32>
    %68 = tpu.matmul %64, %67, %cst_24 {dimension_numbers = #tpu.dot_dimension_numbers<[1], [0], [0], [1], [0, 0, 1, 1], [], []>} : vector<128x49xf32>, vector<49x512xf32>, vector<128x512xf32> -> vector<128x512xf32>
    %c0_25 = arith.constant 0 : index
    %c0_26 = arith.constant 0 : index
    %69 = vector.load %arg9[%c0_25, %c0_26] : memref<128x512xf32, #tpu.memory_space<vmem>>, vector<128x512xf32>
    tpu.vector_store %arg9[%c0_25, %c0_26], %68 {strides = array<i32>} : memref<128x512xf32, #tpu.memory_space<vmem>>, vector<128x512xf32>,
    %cst_27 = arith.constant 6.250000e-02 : f32
    %70 = vector.broadcast %cst_27 : f32 to vector<128x1xf32>
    %71 = arith.mulf %28, %70 : vector<128x1xf32>
    %cst_28 = arith.constant 6.250000e-02 : f32
    %72 = vector.broadcast %cst_28 : f32 to vector<128x1xf32>
    %73 = arith.mulf %32, %72 : vector<128x1xf32>
    %74 = math.floor %71 : vector<128x1xf32>
    %75 = arith.fptosi %74 : vector<128x1xf32> to vector<128x1xi32>
    %76 = math.ceil %71 : vector<128x1xf32>
    %77 = arith.fptosi %76 : vector<128x1xf32> to vector<128x1xi32>
    %c13_i32 = arith.constant 13 : i32
    %78 = vector.broadcast %c13_i32 : i32 to vector<128x1xi32>
    %79 = arith.minsi %77, %78 : vector<128x1xi32>
    %80 = math.floor %73 : vector<128x1xf32>
    %81 = arith.fptosi %80 : vector<128x1xf32> to vector<128x1xi32>
    %82 = math.ceil %73 : vector<128x1xf32>
    %83 = arith.fptosi %82 : vector<128x1xf32> to vector<128x1xi32>
    %c13_i32_29 = arith.constant 13 : i32
    %84 = vector.broadcast %c13_i32_29 : i32 to vector<128x1xi32>
    %85 = arith.minsi %83, %84 : vector<128x1xi32>
    %86 = arith.subi %79, %75 : vector<128x1xi32>
    %87 = arith.subi %85, %81 : vector<128x1xi32>
    %88 = arith.muli %86, %87 : vector<128x1xi32>
    %c0_i32_30 = arith.constant 0 : i32
    %89 = vector.broadcast %c0_i32_30 : i32 to vector<128x1xi32>
    %90 = arith.cmpi sgt, %88, %89 : vector<128x1xi32>
    %c14_i32 = arith.constant 14 : i32
    %91 = vector.broadcast %c14_i32 : i32 to vector<128x1xi32>
    %92 = arith.muli %75, %91 : vector<128x1xi32>
    %93 = arith.addi %92, %81 : vector<128x1xi32>
    %c-1_i32_31 = arith.constant -1 : i32
    %94 = vector.broadcast %c-1_i32_31 : i32 to vector<128x1xi32>
    %95 = arith.select %90, %93, %94 : vector<128x1xi1>, vector<128x1xi32>
    %96 = tpu.iota {dimensions = array<i32: 1>} : vector<128x196xi32>
    %97 = vector.broadcast %95 : vector<128x1xi32> to vector<128x196xi32>
    %98 = arith.cmpi eq, %96, %97 : vector<128x196xi32>
    %cst_32 = arith.constant 1.000000e+00 : f32
    %cst_33 = arith.constant 0.000000e+00 : f32
    %99 = vector.broadcast %cst_32 : f32 to vector<128x196xf32>
    %100 = vector.broadcast %cst_33 : f32 to vector<128x196xf32>
    %101 = arith.select %98, %99, %100 : vector<128x196xi1>, vector<128x196xf32>
    %c2_i32_34 = arith.constant 2 : i32
    %102 = tpu.memref_slice %arg14[%c2_i32_34] : memref<4x!tpu.dma_semaphore, #tpu.memory_space<semaphore_mem>> -> memref<1x!tpu.dma_semaphore, #tpu.memory_space<semaphore_mem>>
    %103 = tpu.memref_squeeze %102 : memref<1x!tpu.dma_semaphore, #tpu.memory_space<semaphore_mem>> -> memref<!tpu.dma_semaphore, #tpu.memory_space<semaphore_mem>>
    tpu.wait_dma2 semaphore(%103 : memref<!tpu.dma_semaphore, #tpu.memory_space<semaphore_mem>>) src(%arg3 : memref<196x256xf32, #tpu.memory_space<any>>) dst(%arg12 : memref<196x256xf32, #tpu.memory_space<vmem>>)
    %c0_35 = arith.constant 0 : index
    %c0_36 = arith.constant 0 : index
    %104 = vector.load %arg12[%c0_35, %c0_36] : memref<196x256xf32, #tpu.memory_space<vmem>>, vector<196x256xf32>
    %cst_37 = arith.constant dense<0.000000e+00> : vector<128x256xf32>
    %105 = tpu.matmul %101, %104, %cst_37 {dimension_numbers = #tpu.dot_dimension_numbers<[1], [0], [0], [1], [0, 0, 1, 1], [], []>} : vector<128x196xf32>, vector<196x256xf32>, vector<128x256xf32> -> vector<128x256xf32>
    %c0_38 = arith.constant 0 : index
    %c0_39 = arith.constant 0 : index
    %106 = vector.load %arg8[%c0_38, %c0_39] : memref<128x256xf32, #tpu.memory_space<vmem>>, vector<128x256xf32>
    tpu.vector_store %arg8[%c0_38, %c0_39], %105 {strides = array<i32>} : memref<128x256xf32, #tpu.memory_space<vmem>>, vector<128x256xf32>,
    %cst_40 = arith.constant 1.250000e-01 : f32
    %107 = vector.broadcast %cst_40 : f32 to vector<128x1xf32>
    %108 = arith.mulf %28, %107 : vector<128x1xf32>
    %cst_41 = arith.constant 1.250000e-01 : f32
    %109 = vector.broadcast %cst_41 : f32 to vector<128x1xf32>
    %110 = arith.mulf %32, %109 : vector<128x1xf32>
    %111 = math.floor %108 : vector<128x1xf32>
    %112 = arith.fptosi %111 : vector<128x1xf32> to vector<128x1xi32>
    %113 = math.ceil %108 : vector<128x1xf32>
    %114 = arith.fptosi %113 : vector<128x1xf32> to vector<128x1xi32>
    %c27_i32 = arith.constant 27 : i32
    %115 = vector.broadcast %c27_i32 : i32 to vector<128x1xi32>
    %116 = arith.minsi %114, %115 : vector<128x1xi32>
    %117 = math.floor %110 : vector<128x1xf32>
    %118 = arith.fptosi %117 : vector<128x1xf32> to vector<128x1xi32>
    %119 = math.ceil %110 : vector<128x1xf32>
    %120 = arith.fptosi %119 : vector<128x1xf32> to vector<128x1xi32>
    %c27_i32_42 = arith.constant 27 : i32
    %121 = vector.broadcast %c27_i32_42 : i32 to vector<128x1xi32>
    %122 = arith.minsi %120, %121 : vector<128x1xi32>
    %123 = arith.subi %116, %112 : vector<128x1xi32>
    %124 = arith.subi %122, %118 : vector<128x1xi32>
    %125 = arith.muli %123, %124 : vector<128x1xi32>
    %c0_i32_43 = arith.constant 0 : i32
    %126 = vector.broadcast %c0_i32_43 : i32 to vector<128x1xi32>
    %127 = arith.cmpi sgt, %125, %126 : vector<128x1xi32>
    %c28_i32 = arith.constant 28 : i32
    %128 = vector.broadcast %c28_i32 : i32 to vector<128x1xi32>
    %129 = arith.muli %112, %128 : vector<128x1xi32>
    %130 = arith.addi %129, %118 : vector<128x1xi32>
    %c-1_i32_44 = arith.constant -1 : i32
    %131 = vector.broadcast %c-1_i32_44 : i32 to vector<128x1xi32>
    %132 = arith.select %127, %130, %131 : vector<128x1xi1>, vector<128x1xi32>
    %133 = tpu.iota {dimensions = array<i32: 1>} : vector<128x784xi32>
    %134 = vector.broadcast %132 : vector<128x1xi32> to vector<128x784xi32>
    %135 = arith.cmpi eq, %133, %134 : vector<128x784xi32>
    %cst_45 = arith.constant 1.000000e+00 : f32
    %cst_46 = arith.constant 0.000000e+00 : f32
    %136 = vector.broadcast %cst_45 : f32 to vector<128x784xf32>
    %137 = vector.broadcast %cst_46 : f32 to vector<128x784xf32>
    %138 = arith.select %135, %136, %137 : vector<128x784xi1>, vector<128x784xf32>
    %c1_i32_47 = arith.constant 1 : i32
    %139 = tpu.memref_slice %arg14[%c1_i32_47] : memref<4x!tpu.dma_semaphore, #tpu.memory_space<semaphore_mem>> -> memref<1x!tpu.dma_semaphore, #tpu.memory_space<semaphore_mem>>
    %140 = tpu.memref_squeeze %139 : memref<1x!tpu.dma_semaphore, #tpu.memory_space<semaphore_mem>> -> memref<!tpu.dma_semaphore, #tpu.memory_space<semaphore_mem>>
    tpu.wait_dma2 semaphore(%140 : memref<!tpu.dma_semaphore, #tpu.memory_space<semaphore_mem>>) src(%arg2 : memref<784x128xf32, #tpu.memory_space<any>>) dst(%arg11 : memref<784x128xf32, #tpu.memory_space<vmem>>)
    %c0_48 = arith.constant 0 : index
    %c0_49 = arith.constant 0 : index
    %141 = vector.load %arg11[%c0_48, %c0_49] : memref<784x128xf32, #tpu.memory_space<vmem>>, vector<784x128xf32>
    %cst_50 = arith.constant dense<0.000000e+00> : vector<128x128xf32>
    %142 = tpu.matmul %138, %141, %cst_50 {dimension_numbers = #tpu.dot_dimension_numbers<[1], [0], [0], [1], [0, 0, 1, 1], [], []>} : vector<128x784xf32>, vector<784x128xf32>, vector<128x128xf32> -> vector<128x128xf32>
    %c0_51 = arith.constant 0 : index
    %c0_52 = arith.constant 0 : index
    %143 = vector.load %arg7[%c0_51, %c0_52] : memref<128x128xf32, #tpu.memory_space<vmem>>, vector<128x128xf32>
    tpu.vector_store %arg7[%c0_51, %c0_52], %142 {strides = array<i32>} : memref<128x128xf32, #tpu.memory_space<vmem>>, vector<128x128xf32>,
    %cst_53 = arith.constant 2.500000e-01 : f32
    %144 = vector.broadcast %cst_53 : f32 to vector<128x1xf32>
    %145 = arith.mulf %28, %144 : vector<128x1xf32>
    %cst_54 = arith.constant 2.500000e-01 : f32
    %146 = vector.broadcast %cst_54 : f32 to vector<128x1xf32>
    %147 = arith.mulf %32, %146 : vector<128x1xf32>
    %148 = math.floor %145 : vector<128x1xf32>
    %149 = arith.fptosi %148 : vector<128x1xf32> to vector<128x1xi32>
    %150 = math.ceil %145 : vector<128x1xf32>
    %151 = arith.fptosi %150 : vector<128x1xf32> to vector<128x1xi32>
    %c55_i32 = arith.constant 55 : i32
    %152 = vector.broadcast %c55_i32 : i32 to vector<128x1xi32>
    %153 = arith.minsi %151, %152 : vector<128x1xi32>
    %154 = math.floor %147 : vector<128x1xf32>
    %155 = arith.fptosi %154 : vector<128x1xf32> to vector<128x1xi32>
    %156 = math.ceil %147 : vector<128x1xf32>
    %157 = arith.fptosi %156 : vector<128x1xf32> to vector<128x1xi32>
    %c55_i32_55 = arith.constant 55 : i32
    %158 = vector.broadcast %c55_i32_55 : i32 to vector<128x1xi32>
    %159 = arith.minsi %157, %158 : vector<128x1xi32>
    %160 = arith.subi %153, %149 : vector<128x1xi32>
    %161 = arith.subi %159, %155 : vector<128x1xi32>
    %162 = arith.muli %160, %161 : vector<128x1xi32>
    %c0_i32_56 = arith.constant 0 : i32
    %163 = vector.broadcast %c0_i32_56 : i32 to vector<128x1xi32>
    %164 = arith.cmpi sgt, %162, %163 : vector<128x1xi32>
    %c56_i32 = arith.constant 56 : i32
    %165 = vector.broadcast %c56_i32 : i32 to vector<128x1xi32>
    %166 = arith.muli %149, %165 : vector<128x1xi32>
    %167 = arith.addi %166, %155 : vector<128x1xi32>
    %c-1_i32_57 = arith.constant -1 : i32
    %168 = vector.broadcast %c-1_i32_57 : i32 to vector<128x1xi32>
    %169 = arith.select %164, %167, %168 : vector<128x1xi1>, vector<128x1xi32>
    %170 = tpu.iota {dimensions = array<i32: 1>} : vector<128x3136xi32>
    %171 = vector.broadcast %169 : vector<128x1xi32> to vector<128x3136xi32>
    %172 = arith.cmpi eq, %170, %171 : vector<128x3136xi32>
    %cst_58 = arith.constant 1.000000e+00 : f32
    %cst_59 = arith.constant 0.000000e+00 : f32
    %173 = vector.broadcast %cst_58 : f32 to vector<128x3136xf32>
    %174 = vector.broadcast %cst_59 : f32 to vector<128x3136xf32>
    %175 = arith.select %172, %173, %174 : vector<128x3136xi1>, vector<128x3136xf32>
    %c0_i32_60 = arith.constant 0 : i32
    %176 = tpu.memref_slice %arg14[%c0_i32_60] : memref<4x!tpu.dma_semaphore, #tpu.memory_space<semaphore_mem>> -> memref<1x!tpu.dma_semaphore, #tpu.memory_space<semaphore_mem>>
    %177 = tpu.memref_squeeze %176 : memref<1x!tpu.dma_semaphore, #tpu.memory_space<semaphore_mem>> -> memref<!tpu.dma_semaphore, #tpu.memory_space<semaphore_mem>>
    tpu.wait_dma2 semaphore(%177 : memref<!tpu.dma_semaphore, #tpu.memory_space<semaphore_mem>>) src(%arg1 : memref<3136x64xf32, #tpu.memory_space<any>>) dst(%arg10 : memref<3136x64xf32, #tpu.memory_space<vmem>>)
    %c0_61 = arith.constant 0 : index
    %c0_62 = arith.constant 0 : index
    %178 = vector.load %arg10[%c0_61, %c0_62] : memref<3136x64xf32, #tpu.memory_space<vmem>>, vector<3136x64xf32>
    %cst_63 = arith.constant dense<0.000000e+00> : vector<128x64xf32>
    %179 = tpu.matmul %175, %178, %cst_63 {dimension_numbers = #tpu.dot_dimension_numbers<[1], [0], [0], [1], [0, 0, 1, 1], [], []>} : vector<128x3136xf32>, vector<3136x64xf32>, vector<128x64xf32> -> vector<128x64xf32>
    %c0_64 = arith.constant 0 : index
    %c0_65 = arith.constant 0 : index
    %180 = vector.load %arg6[%c0_64, %c0_65] : memref<128x64xf32, #tpu.memory_space<vmem>>, vector<128x64xf32>
    tpu.vector_store %arg6[%c0_64, %c0_65], %179 {strides = array<i32>} : memref<128x64xf32, #tpu.memory_space<vmem>>, vector<128x64xf32>,
    return
  }
}

</mosaic_0001>

<bundles_post_ra>
// kernel: graph_projection.1
= control target key start
LH: loop header
LB: loop body
LE: loop exit
PB: predicated region body
PF: predicated region fallthrough
CT: control target
= control target key end

     0   :  { %s18550_s0 = inlined_call_operand.vmem [shape: f32[128,3], index: 0, kind: input, shape index: {}]   ;;  %s18551_s1 = inlined_call_operand.hbm [shape: f32[3136,64], index: 1, kind: input, shape index: {}]   ;;  %s18552_s2 = inlined_call_operand.vmem [shape: f32[784,128], index: 2, kind: input, shape index: {}]   ;;  %s18553_s3 = inlined_call_operand.vmem [shape: f32[196,256], index: 3, kind: input, shape index: {}]   ;;  %s18554_s4 = inlined_call_operand.vmem [shape: f32[49,512], index: 4, kind: input, shape index: {}]   ;;  %s18555_s5 = inlined_call_operand.vmem [shape: f32[128,3], index: 5, kind: output, shape index: {0}]   ;;  %s18556_s6 = inlined_call_operand.vmem [shape: f32[128,64], index: 6, kind: output, shape index: {1}]   ;;  %s18557_s7 = inlined_call_operand.vmem [shape: f32[128,128], index: 7, kind: output, shape index: {2}]   ;;  %s18558_s8 = inlined_call_operand.vmem [shape: f32[128,256], index: 8, kind: output, shape index: {3}]   ;;  %s18559_s9 = inlined_call_operand.vmem [shape: f32[128,512], index: 9, kind: output, shape index: {4}]  }
   0x1   :  { %v50_v0 = vld [vmem:[%s18554_s4] sm:$0xff]  ;;  %v52_v1 = vld [vmem:[%s18554_s4 + $0x8] sm:$0xff]  ;;  %v54_v2 = vld [vmem:[%s18554_s4 + $0x10] sm:$0xff] }
   0x2   :  { %51 = vst [vmem:[#allocation5] sm:$0xff] %v50_v0  ;;  %53 = vst [vmem:[#allocation5 + $0x8] sm:$0xff] %v52_v1  ;;  %v56_v3 = vld [vmem:[%s18554_s4 + $0x18] sm:$0xff]  ;;  %v58_v4 = vld [vmem:[%s18554_s4 + $0x20] sm:$0xff] }
   0x3   :  { %55 = vst [vmem:[#allocation5 + $0x10] sm:$0xff] %v54_v2  ;;  %v60_v5 = vld [vmem:[%s18554_s4 + $0x28] sm:$0xff]  ;;  %57 = vst [vmem:[#allocation5 + $0x18] sm:$0xff] %v56_v3  ;;  %v62_v6 = vld [vmem:[%s18554_s4 + $0x30] sm:$0xff] }
   0x4   :  { %59 = vst [vmem:[#allocation5 + $0x20] sm:$0xff] %v58_v4  ;;  %61 = vst [vmem:[#allocation5 + $0x28] sm:$0xff] %v60_v5  ;;  %v64_v7 = vld [vmem:[%s18554_s4 + $0x38] sm:$0xff]  ;;  %v66_v8 = vld [vmem:[%s18554_s4 + $0x40] sm:$0xff] }
   0x5   :  { %63 = vst [vmem:[#allocation5 + $0x30] sm:$0xff] %v62_v6  ;;  %65 = vst [vmem:[#allocation5 + $0x38] sm:$0xff] %v64_v7  ;;  %v68_v9 = vld [vmem:[%s18554_s4 + $0x48] sm:$0xff]  ;;  %v70_v10 = vld [vmem:[%s18554_s4 + $0x50] sm:$0xff] }
   0x6   :  { %67 = vst [vmem:[#allocation5 + $0x40] sm:$0xff] %v66_v8  ;;  %v72_v11 = vld [vmem:[%s18554_s4 + $0x58] sm:$0xff]  ;;  %69 = vst [vmem:[#allocation5 + $0x48] sm:$0xff] %v68_v9  ;;  %v74_v12 = vld [vmem:[%s18554_s4 + $0x60] sm:$0xff] }
   0x7   :  { %71 = vst [vmem:[#allocation5 + $0x50] sm:$0xff] %v70_v10  ;;  %73 = vst [vmem:[#allocation5 + $0x58] sm:$0xff] %v72_v11  ;;  %v76_v13 = vld [vmem:[%s18554_s4 + $0x68] sm:$0xff]  ;;  %v78_v14 = vld [vmem:[%s18554_s4 + $0x70] sm:$0xff] }
   0x8   :  { %75 = vst [vmem:[#allocation5 + $0x60] sm:$0xff] %v74_v12  ;;  %77 = vst [vmem:[#allocation5 + $0x68] sm:$0xff] %v76_v13  ;;  %v80_v15 = vld [vmem:[%s18554_s4 + $0x78] sm:$0xff]  ;;  %v82_v16 = vld [vmem:[%s18554_s4 + $0x80] sm:$0xff] }
   0x9   :  { %79 = vst [vmem:[#allocation5 + $0x70] sm:$0xff] %v78_v14  ;;  %v84_v17 = vld [vmem:[%s18554_s4 + $0x88] sm:$0xff]  ;;  %81 = vst [vmem:[#allocation5 + $0x78] sm:$0xff] %v80_v15  ;;  %v86_v18 = vld [vmem:[%s18554_s4 + $0x90] sm:$0xff] }
   0xa   :  { %83 = vst [vmem:[#allocation5 + $0x80] sm:$0xff] %v82_v16  ;;  %85 = vst [vmem:[#allocation5 + $0x88] sm:$0xff] %v84_v17  ;;  %v88_v19 = vld [vmem:[%s18554_s4 + $0x98] sm:$0xff]  ;;  %v90_v20 = vld [vmem:[%s18554_s4 + $0xa0] sm:$0xff] }
   0xb   :  { %87 = vst [vmem:[#allocation5 + $0x90] sm:$0xff] %v86_v18  ;;  %89 = vst [vmem:[#allocation5 + $0x98] sm:$0xff] %v88_v19  ;;  %v92_v21 = vld [vmem:[%s18554_s4 + $0xa8] sm:$0xff]  ;;  %v94_v22 = vld [vmem:[%s18554_s4 + $0xb0] sm:$0xff] }
   0xc   :  { %91 = vst [vmem:[#allocation5 + $0xa0] sm:$0xff] %v90_v20  ;;  %v96_v23 = vld [vmem:[%s18554_s4 + $0xb8] sm:$0xff]  ;;  %93 = vst [vmem:[#allocation5 + $0xa8] sm:$0xff] %v92_v21  ;;  %v98_v24 = vld [vmem:[%s18554_s4 + $0xc0] sm:$0xff] }
   0xd   :  { %95 = vst [vmem:[#allocation5 + $0xb0] sm:$0xff] %v94_v22  ;;  %97 = vst [vmem:[#allocation5 + $0xb8] sm:$0xff] %v96_v23  ;;  %v100_v25 = vld [vmem:[%s18554_s4 + $0xc8] sm:$0xff]  ;;  %v102_v26 = vld [vmem:[%s18554_s4 + $0xd0] sm:$0xff] }
   0xe   :  { %99 = vst [vmem:[#allocation5 + $0xc0] sm:$0xff] %v98_v24  ;;  %101 = vst [vmem:[#allocation5 + $0xc8] sm:$0xff] %v100_v25  ;;  %v104_v27 = vld [vmem:[%s18554_s4 + $0xd8] sm:$0xff] }
   0xf   :  { %103 = vst [vmem:[#allocation5 + $0xd0] sm:$0xff] %v102_v26  ;;  %105 = vst [vmem:[#allocation5 + $0xd8] sm:$0xff] %v104_v27 }
  0x10   :  { %113 = vsyncadd [#allocation6 + $0x3], 3584  ;;  %v147_v28 = vld [vmem:[%s18553_s3] sm:$0xff]  ;;  %v149_v29 = vld [vmem:[%s18553_s3 + $0x8] sm:$0xff] }
  0x11   :  { %148 = vst [vmem:[#allocation4] sm:$0xff] %v147_v28  ;;  %150 = vst [vmem:[#allocation4 + $0x8] sm:$0xff] %v149_v29  ;;  %v151_v30 = vld [vmem:[%s18553_s3 + $0x10] sm:$0xff]  ;;  %v153_v31 = vld [vmem:[%s18553_s3 + $0x18] sm:$0xff] }
  0x12   :  { %v155_v32 = vld [vmem:[%s18553_s3 + $0x20] sm:$0xff]  ;;  %152 = vst [vmem:[#allocation4 + $0x10] sm:$0xff] %v151_v30  ;;  %154 = vst [vmem:[#allocation4 + $0x18] sm:$0xff] %v153_v31  ;;  %v157_v33 = vld [vmem:[%s18553_s3 + $0x28] sm:$0xff] }
  0x13   :  { %156 = vst [vmem:[#allocation4 + $0x20] sm:$0xff] %v155_v32  ;;  %v159_v34 = vld [vmem:[%s18553_s3 + $0x30] sm:$0xff]  ;;  %v161_v35 = vld [vmem:[%s18553_s3 + $0x38] sm:$0xff]  ;;  %158 = vst [vmem:[#allocation4 + $0x28] sm:$0xff] %v157_v33 }
  0x14   :  { %160 = vst [vmem:[#allocation4 + $0x30] sm:$0xff] %v159_v34  ;;  %162 = vst [vmem:[#allocation4 + $0x38] sm:$0xff] %v161_v35  ;;  %v163_v36 = vld [vmem:[%s18553_s3 + $0x40] sm:$0xff]  ;;  %v165_v37 = vld [vmem:[%s18553_s3 + $0x48] sm:$0xff] }
  0x15   :  { %v167_v38 = vld [vmem:[%s18553_s3 + $0x50] sm:$0xff]  ;;  %164 = vst [vmem:[#allocation4 + $0x40] sm:$0xff] %v163_v36  ;;  %166 = vst [vmem:[#allocation4 + $0x48] sm:$0xff] %v165_v37  ;;  %v169_v39 = vld [vmem:[%s18553_s3 + $0x58] sm:$0xff] }
  0x16   :  { %168 = vst [vmem:[#allocation4 + $0x50] sm:$0xff] %v167_v38  ;;  %v171_v40 = vld [vmem:[%s18553_s3 + $0x60] sm:$0xff]  ;;  %v173_v41 = vld [vmem:[%s18553_s3 + $0x68] sm:$0xff]  ;;  %170 = vst [vmem:[#allocation4 + $0x58] sm:$0xff] %v169_v39 }
  0x17   :  { %172 = vst [vmem:[#allocation4 + $0x60] sm:$0xff] %v171_v40  ;;  %174 = vst [vmem:[#allocation4 + $0x68] sm:$0xff] %v173_v41  ;;  %v175_v42 = vld [vmem:[%s18553_s3 + $0x70] sm:$0xff]  ;;  %v177_v43 = vld [vmem:[%s18553_s3 + $0x78] sm:$0xff] }
  0x18   :  { %v179_v44 = vld [vmem:[%s18553_s3 + $0x80] sm:$0xff]  ;;  %176 = vst [vmem:[#allocation4 + $0x70] sm:$0xff] %v175_v42  ;;  %178 = vst [vmem:[#allocation4 + $0x78] sm:$0xff] %v177_v43  ;;  %v181_v45 = vld [vmem:[%s18553_s3 + $0x88] sm:$0xff] }
  0x19   :  { %180 = vst [vmem:[#allocation4 + $0x80] sm:$0xff] %v179_v44  ;;  %v183_v46 = vld [vmem:[%s18553_s3 + $0x90] sm:$0xff]  ;;  %v185_v47 = vld [vmem:[%s18553_s3 + $0x98] sm:$0xff]  ;;  %182 = vst [vmem:[#allocation4 + $0x88] sm:$0xff] %v181_v45 }
  0x1a   :  { %184 = vst [vmem:[#allocation4 + $0x90] sm:$0xff] %v183_v46  ;;  %186 = vst [vmem:[#allocation4 + $0x98] sm:$0xff] %v185_v47  ;;  %v187_v48 = vld [vmem:[%s18553_s3 + $0xa0] sm:$0xff]  ;;  %v189_v49 = vld [vmem:[%s18553_s3 + $0xa8] sm:$0xff] }
  0x1b   :  { %v191_v50 = vld [vmem:[%s18553_s3 + $0xb0] sm:$0xff]  ;;  %188 = vst [vmem:[#allocation4 + $0xa0] sm:$0xff] %v187_v48  ;;  %190 = vst [vmem:[#allocation4 + $0xa8] sm:$0xff] %v189_v49  ;;  %v193_v51 = vld [vmem:[%s18553_s3 + $0xb8] sm:$0xff] }
  0x1c   :  { %192 = vst [vmem:[#allocation4 + $0xb0] sm:$0xff] %v191_v50  ;;  %v195_v52 = vld [vmem:[%s18553_s3 + $0xc0] sm:$0xff]  ;;  %v197_v53 = vld [vmem:[%s18553_s3 + $0xc8] sm:$0xff]  ;;  %194 = vst [vmem:[#allocation4 + $0xb8] sm:$0xff] %v193_v51 }
  0x1d   :  { %196 = vst [vmem:[#allocation4 + $0xc0] sm:$0xff] %v195_v52  ;;  %198 = vst [vmem:[#allocation4 + $0xc8] sm:$0xff] %v197_v53  ;;  %v199_v54 = vld [vmem:[%s18553_s3 + $0xd0] sm:$0xff]  ;;  %v201_v55 = vld [vmem:[%s18553_s3 + $0xd8] sm:$0xff] }
  0x1e   :  { %v203_v56 = vld [vmem:[%s18553_s3 + $0xe0] sm:$0xff]  ;;  %200 = vst [vmem:[#allocation4 + $0xd0] sm:$0xff] %v199_v54  ;;  %202 = vst [vmem:[#allocation4 + $0xd8] sm:$0xff] %v201_v55  ;;  %v205_v57 = vld [vmem:[%s18553_s3 + $0xe8] sm:$0xff] }
  0x1f   :  { %204 = vst [vmem:[#allocation4 + $0xe0] sm:$0xff] %v203_v56  ;;  %v207_v58 = vld [vmem:[%s18553_s3 + $0xf0] sm:$0xff]  ;;  %v209_v59 = vld [vmem:[%s18553_s3 + $0xf8] sm:$0xff]  ;;  %206 = vst [vmem:[#allocation4 + $0xe8] sm:$0xff] %v205_v57 }
  0x20   :  { %208 = vst [vmem:[#allocation4 + $0xf0] sm:$0xff] %v207_v58  ;;  %210 = vst [vmem:[#allocation4 + $0xf8] sm:$0xff] %v209_v59  ;;  %v211_v60 = vld [vmem:[%s18553_s3 + $0x100] sm:$0xff]  ;;  %v213_v61 = vld [vmem:[%s18553_s3 + $0x108] sm:$0xff] }
  0x21   :  { %v215_v62 = vld [vmem:[%s18553_s3 + $0x110] sm:$0xff]  ;;  %212 = vst [vmem:[#allocation4 + $0x100] sm:$0xff] %v211_v60  ;;  %214 = vst [vmem:[#allocation4 + $0x108] sm:$0xff] %v213_v61  ;;  %v217_v63 = vld [vmem:[%s18553_s3 + $0x118] sm:$0xff] }
  0x22   :  { %216 = vst [vmem:[#allocation4 + $0x110] sm:$0xff] %v215_v62  ;;  %v219_v0 = vld [vmem:[%s18553_s3 + $0x120] sm:$0xff]  ;;  %v221_v1 = vld [vmem:[%s18553_s3 + $0x128] sm:$0xff]  ;;  %218 = vst [vmem:[#allocation4 + $0x118] sm:$0xff] %v217_v63 }
  0x23   :  { %220 = vst [vmem:[#allocation4 + $0x120] sm:$0xff] %v219_v0  ;;  %222 = vst [vmem:[#allocation4 + $0x128] sm:$0xff] %v221_v1  ;;  %v223_v2 = vld [vmem:[%s18553_s3 + $0x130] sm:$0xff]  ;;  %v225_v3 = vld [vmem:[%s18553_s3 + $0x138] sm:$0xff] }
  0x24   :  { %v227_v4 = vld [vmem:[%s18553_s3 + $0x140] sm:$0xff]  ;;  %224 = vst [vmem:[#allocation4 + $0x130] sm:$0xff] %v223_v2  ;;  %226 = vst [vmem:[#allocation4 + $0x138] sm:$0xff] %v225_v3  ;;  %v229_v5 = vld [vmem:[%s18553_s3 + $0x148] sm:$0xff] }
  0x25   :  { %228 = vst [vmem:[#allocation4 + $0x140] sm:$0xff] %v227_v4  ;;  %v231_v6 = vld [vmem:[%s18553_s3 + $0x150] sm:$0xff]  ;;  %v233_v7 = vld [vmem:[%s18553_s3 + $0x158] sm:$0xff]  ;;  %230 = vst [vmem:[#allocation4 + $0x148] sm:$0xff] %v229_v5 }
  0x26   :  { %232 = vst [vmem:[#allocation4 + $0x150] sm:$0xff] %v231_v6  ;;  %234 = vst [vmem:[#allocation4 + $0x158] sm:$0xff] %v233_v7  ;;  %v235_v8 = vld [vmem:[%s18553_s3 + $0x160] sm:$0xff]  ;;  %v237_v9 = vld [vmem:[%s18553_s3 + $0x168] sm:$0xff] }
  0x27   :  { %v239_v10 = vld [vmem:[%s18553_s3 + $0x170] sm:$0xff]  ;;  %236 = vst [vmem:[#allocation4 + $0x160] sm:$0xff] %v235_v8  ;;  %238 = vst [vmem:[#allocation4 + $0x168] sm:$0xff] %v237_v9  ;;  %v241_v11 = vld [vmem:[%s18553_s3 + $0x178] sm:$0xff] }
  0x28   :  { %240 = vst [vmem:[#allocation4 + $0x170] sm:$0xff] %v239_v10  ;;  %v243_v12 = vld [vmem:[%s18553_s3 + $0x180] sm:$0xff]  ;;  %v245_v13 = vld [vmem:[%s18553_s3 + $0x188] sm:$0xff]  ;;  %242 = vst [vmem:[#allocation4 + $0x178] sm:$0xff] %v241_v11 }
  0x29   :  { %244 = vst [vmem:[#allocation4 + $0x180] sm:$0xff] %v243_v12  ;;  %246 = vst [vmem:[#allocation4 + $0x188] sm:$0xff] %v245_v13 }
  0x2a   :  { %254 = vsyncadd [#allocation6 + $0x2], 6400  ;;  %v11156_v14 = vld [vmem:[%s18552_s2] sm:$0xff]  ;;  %v11161_v15 = vld [vmem:[%s18552_s2 + $0x8] sm:$0xff]  ;;  %s10862_s4 = smov 126  }
  0x2b   :  { %18790 = vst [vmem:[#allocation18_spill] sm:$0xff] %v11156_v14  ;;  %18791 = vst [vmem:[#allocation19_spill] sm:$0xff] %v11161_v15  ;;  %v11166_v16 = vld [vmem:[%s18552_s2 + $0x10] sm:$0xff]  ;;  %v11171_v17 = vld [vmem:[%s18552_s2 + $0x18] sm:$0xff] }
  0x2c   :  { %18792 = vst [vmem:[#allocation20_spill] sm:$0xff] %v11166_v16  ;;  %18793 = vst [vmem:[#allocation21_spill] sm:$0xff] %v11171_v17  ;;  %v11176_v18 = vld [vmem:[%s18552_s2 + $0x20] sm:$0xff]  ;;  %v11181_v19 = vld [vmem:[%s18552_s2 + $0x28] sm:$0xff] }
  0x2d   :  { %18794 = vst [vmem:[#allocation22_spill] sm:$0xff] %v11176_v18  ;;  %18795 = vst [vmem:[#allocation23_spill] sm:$0xff] %v11181_v19  ;;  %v11186_v20 = vld [vmem:[%s18552_s2 + $0x30] sm:$0xff]  ;;  %v11191_v21 = vld [vmem:[%s18552_s2 + $0x38] sm:$0xff] }
  0x2e   :  { %18796 = vst [vmem:[#allocation24_spill] sm:$0xff] %v11186_v20  ;;  %18797 = vst [vmem:[#allocation25_spill] sm:$0xff] %v11191_v21  ;;  %v11196_v22 = vld [vmem:[%s18552_s2 + $0x40] sm:$0xff]  ;;  %v11201_v23 = vld [vmem:[%s18552_s2 + $0x48] sm:$0xff] }
  0x2f   :  { %18798 = vst [vmem:[#allocation26_spill] sm:$0xff] %v11196_v22  ;;  %18799 = vst [vmem:[#allocation27_spill] sm:$0xff] %v11201_v23  ;;  %v11206_v24 = vld [vmem:[%s18552_s2 + $0x50] sm:$0xff]  ;;  %v11211_v25 = vld [vmem:[%s18552_s2 + $0x58] sm:$0xff] }
  0x30   :  { %18800 = vst [vmem:[#allocation28_spill] sm:$0xff] %v11206_v24  ;;  %18801 = vst [vmem:[#allocation29_spill] sm:$0xff] %v11211_v25  ;;  %v11216_v26 = vld [vmem:[%s18552_s2 + $0x60] sm:$0xff]  ;;  %v11221_v27 = vld [vmem:[%s18552_s2 + $0x68] sm:$0xff] }
  0x31   :  { %18802 = vst [vmem:[#allocation30_spill] sm:$0xff] %v11216_v26  ;;  %18803 = vst [vmem:[#allocation31_spill] sm:$0xff] %v11221_v27  ;;  %v11226_v28 = vld [vmem:[%s18552_s2 + $0x70] sm:$0xff]  ;;  %v11231_v29 = vld [vmem:[%s18552_s2 + $0x78] sm:$0xff] }
  0x32   :  { %18804 = vst [vmem:[#allocation32_spill] sm:$0xff] %v11226_v28  ;;  %18805 = vst [vmem:[#allocation33_spill] sm:$0xff] %v11231_v29  ;;  %v11236_v30 = vld [vmem:[%s18552_s2 + $0x80] sm:$0xff]  ;;  %v11241_v31 = vld [vmem:[%s18552_s2 + $0x88] sm:$0xff] }
  0x33   :  { %18806 = vst [vmem:[#allocation34_spill] sm:$0xff] %v11236_v30  ;;  %18807 = vst [vmem:[#allocation35_spill] sm:$0xff] %v11241_v31  ;;  %v11246_v32 = vld [vmem:[%s18552_s2 + $0x90] sm:$0xff]  ;;  %v11251_v33 = vld [vmem:[%s18552_s2 + $0x98] sm:$0xff] }
  0x34   :  { %18808 = vst [vmem:[#allocation36_spill] sm:$0xff] %v11246_v32  ;;  %18809 = vst [vmem:[#allocation37_spill] sm:$0xff] %v11251_v33  ;;  %v11256_v34 = vld [vmem:[%s18552_s2 + $0xa0] sm:$0xff]  ;;  %v11261_v35 = vld [vmem:[%s18552_s2 + $0xa8] sm:$0xff] }
  0x35   :  { %18810 = vst [vmem:[#allocation38_spill] sm:$0xff] %v11256_v34  ;;  %18811 = vst [vmem:[#allocation39_spill] sm:$0xff] %v11261_v35  ;;  %v11266_v36 = vld [vmem:[%s18552_s2 + $0xb0] sm:$0xff]  ;;  %v11271_v37 = vld [vmem:[%s18552_s2 + $0xb8] sm:$0xff] }
  0x36   :  { %18812 = vst [vmem:[#allocation40_spill] sm:$0xff] %v11266_v36  ;;  %18813 = vst [vmem:[#allocation41_spill] sm:$0xff] %v11271_v37  ;;  %v11276_v38 = vld [vmem:[%s18552_s2 + $0xc0] sm:$0xff]  ;;  %v11281_v39 = vld [vmem:[%s18552_s2 + $0xc8] sm:$0xff] }
  0x37   :  { %18814 = vst [vmem:[#allocation42_spill] sm:$0xff] %v11276_v38  ;;  %18815 = vst [vmem:[#allocation43_spill] sm:$0xff] %v11281_v39  ;;  %v11286_v40 = vld [vmem:[%s18552_s2 + $0xd0] sm:$0xff]  ;;  %v11291_v41 = vld [vmem:[%s18552_s2 + $0xd8] sm:$0xff] }
  0x38   :  { %18816 = vst [vmem:[#allocation44_spill] sm:$0xff] %v11286_v40  ;;  %18817 = vst [vmem:[#allocation45_spill] sm:$0xff] %v11291_v41  ;;  %v11296_v42 = vld [vmem:[%s18552_s2 + $0xe0] sm:$0xff]  ;;  %v11301_v43 = vld [vmem:[%s18552_s2 + $0xe8] sm:$0xff] }
  0x39   :  { %18818 = vst [vmem:[#allocation46_spill] sm:$0xff] %v11296_v42  ;;  %18819 = vst [vmem:[#allocation47_spill] sm:$0xff] %v11301_v43  ;;  %v11306_v44 = vld [vmem:[%s18552_s2 + $0xf0] sm:$0xff]  ;;  %v11311_v45 = vld [vmem:[%s18552_s2 + $0xf8] sm:$0xff] }
  0x3a   :  { %18820 = vst [vmem:[#allocation48_spill] sm:$0xff] %v11306_v44  ;;  %18821 = vst [vmem:[#allocation49_spill] sm:$0xff] %v11311_v45  ;;  %v11316_v46 = vld [vmem:[%s18552_s2 + $0x100] sm:$0xff]  ;;  %v11321_v47 = vld [vmem:[%s18552_s2 + $0x108] sm:$0xff] }
  0x3b   :  { %18822 = vst [vmem:[#allocation50_spill] sm:$0xff] %v11316_v46  ;;  %18823 = vst [vmem:[#allocation51_spill] sm:$0xff] %v11321_v47  ;;  %v11326_v48 = vld [vmem:[%s18552_s2 + $0x110] sm:$0xff]  ;;  %v11331_v49 = vld [vmem:[%s18552_s2 + $0x118] sm:$0xff] }
  0x3c   :  { %18824 = vst [vmem:[#allocation52_spill] sm:$0xff] %v11326_v48  ;;  %18825 = vst [vmem:[#allocation53_spill] sm:$0xff] %v11331_v49  ;;  %v11336_v50 = vld [vmem:[%s18552_s2 + $0x120] sm:$0xff]  ;;  %v11341_v51 = vld [vmem:[%s18552_s2 + $0x128] sm:$0xff] }
  0x3d   :  { %18826 = vst [vmem:[#allocation54_spill] sm:$0xff] %v11336_v50  ;;  %18827 = vst [vmem:[#allocation55_spill] sm:$0xff] %v11341_v51  ;;  %v11346_v52 = vld [vmem:[%s18552_s2 + $0x130] sm:$0xff]  ;;  %v11351_v53 = vld [vmem:[%s18552_s2 + $0x138] sm:$0xff] }
  0x3e   :  { %18828 = vst [vmem:[#allocation56_spill] sm:$0xff] %v11346_v52  ;;  %18829 = vst [vmem:[#allocation57_spill] sm:$0xff] %v11351_v53  ;;  %v11356_v54 = vld [vmem:[%s18552_s2 + $0x140] sm:$0xff]  ;;  %v11361_v55 = vld [vmem:[%s18552_s2 + $0x148] sm:$0xff] }
  0x3f   :  { %18830 = vst [vmem:[#allocation58_spill] sm:$0xff] %v11356_v54  ;;  %18831 = vst [vmem:[#allocation59_spill] sm:$0xff] %v11361_v55  ;;  %v11366_v56 = vld [vmem:[%s18552_s2 + $0x150] sm:$0xff]  ;;  %v11371_v57 = vld [vmem:[%s18552_s2 + $0x158] sm:$0xff] }
  0x40   :  { %18832 = vst [vmem:[#allocation60_spill] sm:$0xff] %v11366_v56  ;;  %18833 = vst [vmem:[#allocation61_spill] sm:$0xff] %v11371_v57  ;;  %v11376_v58 = vld [vmem:[%s18552_s2 + $0x160] sm:$0xff]  ;;  %v11381_v59 = vld [vmem:[%s18552_s2 + $0x168] sm:$0xff] }
  0x41   :  { %18834 = vst [vmem:[#allocation62_spill] sm:$0xff] %v11376_v58  ;;  %18835 = vst [vmem:[#allocation63_spill] sm:$0xff] %v11381_v59  ;;  %v11386_v60 = vld [vmem:[%s18552_s2 + $0x170] sm:$0xff]  ;;  %v11391_v61 = vld [vmem:[%s18552_s2 + $0x178] sm:$0xff] }
  0x42   :  { %18836 = vst [vmem:[#allocation64_spill] sm:$0xff] %v11386_v60  ;;  %18837 = vst [vmem:[#allocation65_spill] sm:$0xff] %v11391_v61  ;;  %v11396_v62 = vld [vmem:[%s18552_s2 + $0x180] sm:$0xff]  ;;  %v11401_v63 = vld [vmem:[%s18552_s2 + $0x188] sm:$0xff] }
  0x43   :  { %18838 = vst [vmem:[#allocation66_spill] sm:$0xff] %v11396_v62  ;;  %18839 = vst [vmem:[#allocation67_spill] sm:$0xff] %v11401_v63  ;;  %v11406_v0 = vld [vmem:[%s18552_s2 + $0x190] sm:$0xff]  ;;  %v11411_v1 = vld [vmem:[%s18552_s2 + $0x198] sm:$0xff] }
  0x44   :  { %18840 = vst [vmem:[#allocation68_spill] sm:$0xff] %v11406_v0  ;;  %18841 = vst [vmem:[#allocation69_spill] sm:$0xff] %v11411_v1  ;;  %v11416_v2 = vld [vmem:[%s18552_s2 + $0x1a0] sm:$0xff]  ;;  %v11421_v3 = vld [vmem:[%s18552_s2 + $0x1a8] sm:$0xff] }
  0x45   :  { %18842 = vst [vmem:[#allocation70_spill] sm:$0xff] %v11416_v2  ;;  %18843 = vst [vmem:[#allocation71_spill] sm:$0xff] %v11421_v3  ;;  %v11426_v4 = vld [vmem:[%s18552_s2 + $0x1b0] sm:$0xff]  ;;  %v11431_v5 = vld [vmem:[%s18552_s2 + $0x1b8] sm:$0xff] }
  0x46   :  { %18844 = vst [vmem:[#allocation72_spill] sm:$0xff] %v11426_v4  ;;  %18845 = vst [vmem:[#allocation73_spill] sm:$0xff] %v11431_v5  ;;  %v11436_v6 = vld [vmem:[%s18552_s2 + $0x1c0] sm:$0xff]  ;;  %v11441_v7 = vld [vmem:[%s18552_s2 + $0x1c8] sm:$0xff] }
  0x47   :  { %18846 = vst [vmem:[#allocation74_spill] sm:$0xff] %v11436_v6  ;;  %18847 = vst [vmem:[#allocation75_spill] sm:$0xff] %v11441_v7  ;;  %v11446_v8 = vld [vmem:[%s18552_s2 + $0x1d0] sm:$0xff]  ;;  %v11451_v9 = vld [vmem:[%s18552_s2 + $0x1d8] sm:$0xff] }
  0x48   :  { %18848 = vst [vmem:[#allocation76_spill] sm:$0xff] %v11446_v8  ;;  %18849 = vst [vmem:[#allocation77_spill] sm:$0xff] %v11451_v9  ;;  %v11456_v10 = vld [vmem:[%s18552_s2 + $0x1e0] sm:$0xff]  ;;  %v11461_v11 = vld [vmem:[%s18552_s2 + $0x1e8] sm:$0xff] }
  0x49   :  { %18850 = vst [vmem:[#allocation78_spill] sm:$0xff] %v11456_v10  ;;  %18851 = vst [vmem:[#allocation79_spill] sm:$0xff] %v11461_v11  ;;  %v11466_v12 = vld [vmem:[%s18552_s2 + $0x1f0] sm:$0xff]  ;;  %v11471_v13 = vld [vmem:[%s18552_s2 + $0x1f8] sm:$0xff] }
  0x4a   :  { %18852 = vst [vmem:[#allocation80_spill] sm:$0xff] %v11466_v12  ;;  %18853 = vst [vmem:[#allocation81_spill] sm:$0xff] %v11471_v13  ;;  %v11476_v61 = vld [vmem:[%s18552_s2 + $0x200] sm:$0xff]  ;;  %v11481_v60 = vld [vmem:[%s18552_s2 + $0x208] sm:$0xff] }
  0x4b   :  { %18854 = vst [vmem:[#allocation82_spill] sm:$0xff] %v11476_v61  ;;  %18855 = vst [vmem:[#allocation83_spill] sm:$0xff] %v11481_v60  ;;  %v11486_v29 = vld [vmem:[%s18552_s2 + $0x210] sm:$0xff]  ;;  %v11491_v28 = vld [vmem:[%s18552_s2 + $0x218] sm:$0xff] }
  0x4c   :  { %18856 = vst [vmem:[#allocation84_spill] sm:$0xff] %v11486_v29  ;;  %18857 = vst [vmem:[#allocation85_spill] sm:$0xff] %v11491_v28  ;;  %v11496_v13 = vld [vmem:[%s18552_s2 + $0x220] sm:$0xff]  ;;  %v11501_v61 = vld [vmem:[%s18552_s2 + $0x228] sm:$0xff] }
  0x4d   :  { %18858 = vst [vmem:[#allocation86_spill] sm:$0xff] %v11496_v13  ;;  %18859 = vst [vmem:[#allocation87_spill] sm:$0xff] %v11501_v61  ;;  %v11506_v60 = vld [vmem:[%s18552_s2 + $0x230] sm:$0xff]  ;;  %v11511_v29 = vld [vmem:[%s18552_s2 + $0x238] sm:$0xff] }
  0x4e   :  { %18860 = vst [vmem:[#allocation88_spill] sm:$0xff] %v11506_v60  ;;  %18861 = vst [vmem:[#allocation89_spill] sm:$0xff] %v11511_v29  ;;  %v11516_v28 = vld [vmem:[%s18552_s2 + $0x240] sm:$0xff]  ;;  %v11521_v13 = vld [vmem:[%s18552_s2 + $0x248] sm:$0xff] }
  0x4f   :  { %18862 = vst [vmem:[#allocation90_spill] sm:$0xff] %v11516_v28  ;;  %18863 = vst [vmem:[#allocation91_spill] sm:$0xff] %v11521_v13  ;;  %v11526_v61 = vld [vmem:[%s18552_s2 + $0x250] sm:$0xff]  ;;  %v11531_v60 = vld [vmem:[%s18552_s2 + $0x258] sm:$0xff] }
  0x50   :  { %18864 = vst [vmem:[#allocation92_spill] sm:$0xff] %v11526_v61  ;;  %18865 = vst [vmem:[#allocation93_spill] sm:$0xff] %v11531_v60  ;;  %v11536_v29 = vld [vmem:[%s18552_s2 + $0x260] sm:$0xff]  ;;  %v11541_v28 = vld [vmem:[%s18552_s2 + $0x268] sm:$0xff] }
  0x51   :  { %18866 = vst [vmem:[#allocation94_spill] sm:$0xff] %v11536_v29  ;;  %18867 = vst [vmem:[#allocation95_spill] sm:$0xff] %v11541_v28  ;;  %v11546_v13 = vld [vmem:[%s18552_s2 + $0x270] sm:$0xff]  ;;  %v11551_v61 = vld [vmem:[%s18552_s2 + $0x278] sm:$0xff] }
  0x52   :  { %18868 = vst [vmem:[#allocation96_spill] sm:$0xff] %v11546_v13  ;;  %18869 = vst [vmem:[#allocation97_spill] sm:$0xff] %v11551_v61  ;;  %v11556_v60 = vld [vmem:[%s18552_s2 + $0x280] sm:$0xff]  ;;  %v11561_v29 = vld [vmem:[%s18552_s2 + $0x288] sm:$0xff] }
  0x53   :  { %18870 = vst [vmem:[#allocation98_spill] sm:$0xff] %v11556_v60  ;;  %18871 = vst [vmem:[#allocation99_spill] sm:$0xff] %v11561_v29  ;;  %v11566_v28 = vld [vmem:[%s18552_s2 + $0x290] sm:$0xff]  ;;  %v11571_v13 = vld [vmem:[%s18552_s2 + $0x298] sm:$0xff] }
  0x54   :  { %18872 = vst [vmem:[#allocation100_spill] sm:$0xff] %v11566_v28  ;;  %18873 = vst [vmem:[#allocation101_spill] sm:$0xff] %v11571_v13  ;;  %v11576_v61 = vld [vmem:[%s18552_s2 + $0x2a0] sm:$0xff]  ;;  %v11581_v60 = vld [vmem:[%s18552_s2 + $0x2a8] sm:$0xff] }
  0x55   :  { %18874 = vst [vmem:[#allocation102_spill] sm:$0xff] %v11576_v61  ;;  %18875 = vst [vmem:[#allocation103_spill] sm:$0xff] %v11581_v60  ;;  %v11586_v29 = vld [vmem:[%s18552_s2 + $0x2b0] sm:$0xff]  ;;  %v11591_v28 = vld [vmem:[%s18552_s2 + $0x2b8] sm:$0xff] }
  0x56   :  { %18876 = vst [vmem:[#allocation104_spill] sm:$0xff] %v11586_v29  ;;  %18877 = vst [vmem:[#allocation105_spill] sm:$0xff] %v11591_v28  ;;  %v11596_v13 = vld [vmem:[%s18552_s2 + $0x2c0] sm:$0xff]  ;;  %v11601_v61 = vld [vmem:[%s18552_s2 + $0x2c8] sm:$0xff] }
  0x57   :  { %18878 = vst [vmem:[#allocation106_spill] sm:$0xff] %v11596_v13  ;;  %18879 = vst [vmem:[#allocation107_spill] sm:$0xff] %v11601_v61  ;;  %v11606_v60 = vld [vmem:[%s18552_s2 + $0x2d0] sm:$0xff]  ;;  %v11611_v29 = vld [vmem:[%s18552_s2 + $0x2d8] sm:$0xff] }
  0x58   :  { %18880 = vst [vmem:[#allocation108_spill] sm:$0xff] %v11606_v60  ;;  %18881 = vst [vmem:[#allocation109_spill] sm:$0xff] %v11611_v29  ;;  %v11616_v28 = vld [vmem:[%s18552_s2 + $0x2e0] sm:$0xff]  ;;  %v11621_v13 = vld [vmem:[%s18552_s2 + $0x2e8] sm:$0xff] }
  0x59   :  { %18882 = vst [vmem:[#allocation110_spill] sm:$0xff] %v11616_v28  ;;  %18883 = vst [vmem:[#allocation111_spill] sm:$0xff] %v11621_v13  ;;  %v11626_v61 = vld [vmem:[%s18552_s2 + $0x2f0] sm:$0xff]  ;;  %v11631_v60 = vld [vmem:[%s18552_s2 + $0x2f8] sm:$0xff] }
  0x5a   :  { %18884 = vst [vmem:[#allocation112_spill] sm:$0xff] %v11626_v61  ;;  %18885 = vst [vmem:[#allocation113_spill] sm:$0xff] %v11631_v60  ;;  %v11636_v29 = vld [vmem:[%s18552_s2 + $0x300] sm:$0xff]  ;;  %v11641_v28 = vld [vmem:[%s18552_s2 + $0x308] sm:$0xff] }
  0x5b   :  { %18886 = vst [vmem:[#allocation114_spill] sm:$0xff] %v11636_v29  ;;  %18887 = vst [vmem:[#allocation115_spill] sm:$0xff] %v11641_v28  ;;  %v11646_v13 = vld [vmem:[%s18550_s0] sm:$0xff]  ;;  %v11651_v61 = vld [vmem:[%s18550_s0 + $0x10] sm:$0xff] }
  0x5c   :  { %v11656_v60 = vld [vmem:[%s18550_s0 + $0x8] sm:$0xff]  ;;  %v680_v29 = vsub.f32 0.0, %v11646_v13  ;;  %v682_v12 = vsub.f32 0.0, %v11651_v61  ;;  %v11663_v28 = vld [vmem:[%s18550_s0 + $0x18] sm:$0xff]  ;;  %v11672_v59 = vld [vmem:[%s18550_s0 + $0x20] sm:$0xff] }
  0x5d   :  { %v681_v45 = vsub.f32 0.0, %v11656_v60  ;;  %v683_v44 = vsub.f32 0.0, %v11663_v28  ;;  %v11677_v58 = vld [vmem:[%s18550_s0 + $0x28] sm:$0xff] }
  0x5e   :  { %712 = vrot.lane.b32.xlu0 %v680_v29, %s10862_s4  ;;  %716 = vrot.lane.b32.xlu1 %v682_v12, %s10862_s4 }
  0x5f   :  { %491 = vsyncadd [#allocation6 + $0x1], 12544  ;;  %v684_v29 = vsub.f32 0.0, %v11672_v59  ;;  %v685_v12 = vsub.f32 0.0, %v11677_v58  ;;  %v11686_v27 = vld [vmem:[%s18550_s0 + $0x30] sm:$0xff]  ;;  %v11691_v26 = vld [vmem:[%s18550_s0 + $0x38] sm:$0xff] }
  0x60   :  { %v11700_v11 = vld [vmem:[%s18550_s0 + $0x40] sm:$0xff]  ;;  %v11705_v10 = vld [vmem:[%s18550_s0 + $0x48] sm:$0xff]  ;;  %v11714_v43 = vld [vmem:[%s18550_s0 + $0x50] sm:$0xff]  ;;  %s10863_s11 = smov 127   ;;  %s10866_s21 = smov [#allocation2]  }
  0x61   :  { %v11719_v42 = vld [vmem:[%s18550_s0 + $0x58] sm:$0xff]  ;;  %v11728_v57 = vld [vmem:[%s18550_s0 + $0x60] sm:$0xff]  ;;  %v11733_v56 = vld [vmem:[%s18550_s0 + $0x68] sm:$0xff]  ;;  %s499_s22 = sshll.u32 %s10866_s21, 4  ;;  %s10832_s27 = scalar_lea.hbm %s18551_s1, 50176  ;;  %s500_s22 = int_to_ptr.vmem [resolvable:$true] %s499_s22 }
  0x62   :  { %714 = vrot.lane.b32.xlu0 %v681_v45, %s10862_s4  ;;  %718 = vrot.lane.b32.xlu1 %v683_v44, %s10862_s4  ;;  %v686_v44 = vsub.f32 0.0, %v11686_v27  ;;  %v687_v45 = vsub.f32 0.0, %v11691_v26  ;;  %v11742_v25 = vld [vmem:[%s18550_s0 + $0x70] sm:$0xff]  ;;  %v11747_v24 = vld [vmem:[%s18550_s0 + $0x78] sm:$0xff]  ;;  %p10833_p0 = scmp.ne.s32.totalorder %s18551_s1, %s10832_s27  ;;  %p10836_p1 = scmp.lt.u32.totalorder %s10832_s27, %s18551_s1 }
  0x64   :  { %p10838_p2 = pnand %p10836_p1, %p10833_p0 }
  0x66   :  { %720 = vrot.lane.b32.xlu0 %v684_v29, %s10862_s4  ;;  %722 = vrot.lane.b32.xlu1 %v685_v12, %s10862_s4  ;;  %v688_v29 = vsub.f32 0.0, %v11700_v11  ;;  %v689_v12 = vsub.f32 0.0, %v11705_v10 }
  0x6a   :  { %724 = vrot.lane.b32.xlu0 %v686_v44, %s10862_s4  ;;  %726 = vrot.lane.b32.xlu1 %v687_v45, %s10862_s4  ;;  %v690_v44 = vsub.f32 0.0, %v11714_v43  ;;  %v691_v45 = vsub.f32 0.0, %v11719_v42 }
  0x6e   :  { %728 = vrot.lane.b32.xlu0 %v688_v29, %s10862_s4  ;;  %730 = vrot.lane.b32.xlu1 %v689_v12, %s10862_s4  ;;  %v692_v29 = vsub.f32 0.0, %v11728_v57  ;;  %v693_v12 = vsub.f32 0.0, %v11733_v56 }
  0x72   :  { %732 = vrot.lane.b32.xlu0 %v690_v44, %s10862_s4  ;;  %734 = vrot.lane.b32.xlu1 %v691_v45, %s10862_s4  ;;  %v694_v44 = vsub.f32 0.0, %v11742_v25  ;;  %v695_v45 = vsub.f32 0.0, %v11747_v24 }
  0x76   :  { %736 = vrot.lane.b32.xlu0 %v692_v29, %s10862_s4  ;;  %738 = vrot.lane.b32.xlu1 %v693_v12, %s10862_s4 }
  0x7a   :  { %740 = vrot.lane.b32.xlu0 %v694_v44, %s10862_s4  ;;  %742 = vrot.lane.b32.xlu1 %v695_v45, %s10862_s4  ;;  %s10864_s4 = smov 1  }
  0x7e   :  { %568 = vrot.lane.b32.xlu0 %v11646_v13, %s10863_s11  ;;  %570 = vrot.lane.b32.xlu1 %v11656_v60, %s10863_s11 }
  0x82   :  { %572 = vrot.lane.b32.xlu0 %v11651_v61, %s10863_s11  ;;  %574 = vrot.lane.b32.xlu1 %v11663_v28, %s10863_s11 }
  0x86   :  { %576 = vrot.lane.b32.xlu0 %v11672_v59, %s10863_s11  ;;  %578 = vrot.lane.b32.xlu1 %v11677_v58, %s10863_s11 }
  0x8a   :  { %580 = vrot.lane.b32.xlu0 %v11686_v27, %s10863_s11  ;;  %582 = vrot.lane.b32.xlu1 %v11691_v26, %s10863_s11 }
  0x8e   :  { %584 = vrot.lane.b32.xlu0 %v11700_v11, %s10863_s11  ;;  %586 = vrot.lane.b32.xlu1 %v11705_v10, %s10863_s11 }
  0x92   :  { %588 = vrot.lane.b32.xlu0 %v11714_v43, %s10863_s11  ;;  %590 = vrot.lane.b32.xlu1 %v11719_v42, %s10863_s11 }
  0x96   :  { %592 = vrot.lane.b32.xlu0 %v11728_v57, %s10863_s11  ;;  %594 = vrot.lane.b32.xlu1 %v11733_v56, %s10863_s11 }
  0x9a   :  { %596 = vrot.lane.b32.xlu0 %v11742_v25, %s10863_s11  ;;  %598 = vrot.lane.b32.xlu1 %v11747_v24, %s10863_s11 }
  0xd0   :  { %v713_v29 = vpop.permute.xlu0 %712  ;;  %v717_v12 = vpop.permute.xlu1 %716 }
  0xd1   :  { %10760 = vrcp.f32 %v713_v29 }
  0xd2   :  { %10762 = vrcp.f32 %v717_v12 }
  0xd4   :  { %v715_v44 = vpop.permute.xlu0 %714  ;;  %v719_v45 = vpop.permute.xlu1 %718 }
  0xd5   :  { %10764 = vrcp.f32 %v715_v44 }
  0xd6   :  { %10766 = vrcp.f32 %v719_v45 }
  0xd8   :  { %v721_v9 = vpop.permute.xlu0 %720  ;;  %v723_v8 = vpop.permute.xlu1 %722 }
  0xd9   :  { %10768 = vrcp.f32 %v721_v9 }
  0xda   :  { %10770 = vrcp.f32 %v723_v8 }
  0xdb   :  { %v10761_v41 = vpop.eup %10760 }
  0xdc   :  { %v10763_v40 = vpop.eup %10762  ;;  %v725_v55 = vpop.permute.xlu0 %724  ;;  %v761_v23 = vmul.f32 %v10761_v41, %v11646_v13 }
  0xdd   :  { %v727_v54 = vpop.permute.xlu1 %726  ;;  %10772 = vrcp.f32 %v725_v55  ;;  %v765_v22 = vmul.f32 %v10763_v40, %v11651_v61 }
  0xde   :  { %v792_v7 = vmul.f32 248.0, %v761_v23  ;;  %10774 = vrcp.f32 %v727_v54 }
  0xdf   :  { %v10765_v29 = vpop.eup %10764  ;;  %v794_v12 = vmul.f32 248.0, %v765_v22 }
  0xe0   :  { %v10767_v6 = vpop.eup %10766  ;;  %v729_v44 = vpop.permute.xlu0 %728  ;;  %v808_v39 = vadd.f32 111.5, %v792_v7  ;;  %v763_v9 = vmul.f32 %v10765_v29, %v11656_v60 }
  0xe1   :  { %v731_v45 = vpop.permute.xlu1 %730  ;;  %10776 = vrcp.f32 %v729_v44  ;;  %v810_v8 = vadd.f32 111.5, %v794_v12  ;;  %v767_v38 = vmul.f32 %v10767_v6, %v11663_v28 }
  0xe2   :  { %10778 = vrcp.f32 %v731_v45  ;;  %v856_v53 = vmax.f32 %v808_v39, 0.0  ;;  %v793_v41 = vmul.f32 248.0, %v763_v9 }
  0xe3   :  { %v10769_v55 = vpop.eup %10768  ;;  %v858_v52 = vmax.f32 %v810_v8, 0.0  ;;  %v795_v40 = vmul.f32 248.0, %v767_v38 }
  0xe4   :  { %v10771_v23 = vpop.eup %10770  ;;  %v733_v21 = vpop.permute.xlu0 %732  ;;  %v11775_v22 = vmin.f32 %v856_v53, 223.0  ;;  %v809_v20 = vadd.f32 111.5, %v793_v41  ;;  %v769_v7 = vmul.f32 %v10769_v55, %v11672_v59 }
  0xe5   :  { %v735_v54 = vpop.permute.xlu1 %734  ;;  %10780 = vrcp.f32 %v733_v21  ;;  %v11778_v29 = vmin.f32 %v858_v52, 223.0  ;;  %v811_v12 = vadd.f32 111.5, %v795_v40  ;;  %v771_v6 = vmul.f32 %v10771_v23, %v11677_v58 }
  0xe6   :  { %18888 = vst [vmem:[#allocation116_spill] sm:$0xff] %v11775_v22  ;;  %v11782_v39 = vmul.f32 0.03125, %v11775_v22  ;;  %v857_v44 = vmax.f32 %v809_v20, 0.0  ;;  %v796_v45 = vmul.f32 248.0, %v769_v7  ;;  %10782 = vrcp.f32 %v735_v54 }
  0xe7   :  { %18889 = vst [vmem:[#allocation117_spill] sm:$0xff] %v11778_v29  ;;  %v10773_v38 = vpop.eup %10772  ;;  %v11785_v9 = vmul.f32 0.03125, %v11778_v29  ;;  %v859_v53 = vmax.f32 %v811_v12, 0.0  ;;  %v797_v8 = vmul.f32 248.0, %v771_v6 }
  0xe8   :  { %v737_v41 = vpop.permute.xlu0 %736  ;;  %v1016_v21 = vfloor.f32 %v11782_v39  ;;  %v11788_v52 = vmin.f32 %v857_v44, 223.0  ;;  %v812_v40 = vadd.f32 111.5, %v796_v45  ;;  %v773_v23 = vmul.f32 %v10773_v38, %v11686_v27  ;;  %v10775_v5 = vpop.eup %10774 }
  0xe9   :  { %v739_v55 = vpop.permute.xlu1 %738  ;;  %10784 = vrcp.f32 %v737_v41  ;;  %v1018_v20 = vfloor.f32 %v11785_v9  ;;  %v11792_v7 = vmin.f32 %v859_v53, 223.0  ;;  %v813_v54 = vadd.f32 111.5, %v797_v8 }
  0xea   :  { %18890 = vst [vmem:[#allocation118_spill] sm:$0xff] %v11788_v52  ;;  %10786 = vrcp.f32 %v739_v55  ;;  %v11794_v4 = vtrunc.f32 %v1016_v21  ;;  %v11797_v12 = vmul.f32 0.03125, %v11788_v52  ;;  %v860_v6 = vmax.f32 %v812_v40, 0.0 }
  0xeb   :  { %18891 = vst [vmem:[#allocation119_spill] sm:$0xff] %v11792_v7  ;;  %v10777_v37 = vpop.eup %10776  ;;  %v11799_v44 = vtrunc.f32 %v1018_v20  ;;  %v11802_v45 = vmul.f32 0.03125, %v11792_v7  ;;  %v861_v38 = vmax.f32 %v813_v54, 0.0  ;;  %v798_v41 = vmul.f32 248.0, %v773_v23 }
  0xec   :  { %v10779_v36 = vpop.eup %10778  ;;  %v18600_v53 = vcvt.f32.s32 %v11794_v4  ;;  %v1017_v8 = vfloor.f32 %v11797_v12  ;;  %v11806_v55 = vmin.f32 %v860_v6, 223.0  ;;  %v775_v21 = vmul.f32 %v10775_v5, %v11691_v26 }
  0xed   :  { %v1019_v40 = vfloor.f32 %v11802_v45  ;;  %v11811_v20 = vmin.f32 %v861_v38, 223.0  ;;  %v814_v50 = vadd.f32 111.5, %v798_v41  ;;  %v777_v5 = vmul.f32 %v10777_v37, %v11700_v11 }
  0xee   :  { %18892 = vst [vmem:[#allocation120_spill] sm:$0xff] %v11806_v55  ;;  %1224 = vrot.lane.b32.xlu0 %v18600_v53, %s10864_s4  ;;  %v11816_v23 = vtrunc.f32 %v1017_v8  ;;  %v11819_v54 = vmul.f32 0.03125, %v11806_v55  ;;  %v799_v6 = vmul.f32 248.0, %v775_v21  ;;  %v779_v18 = vmul.f32 %v10779_v36, %v11705_v10 }
  0xef   :  { %18893 = vst [vmem:[#allocation121_spill] sm:$0xff] %v11811_v20  ;;  %v10781_v19 = vpop.eup %10780  ;;  %v11822_v51 = vtrunc.f32 %v1019_v40  ;;  %v11825_v38 = vmul.f32 0.03125, %v11811_v20  ;;  %v862_v41 = vmax.f32 %v814_v50, 0.0  ;;  %v800_v2 = vmul.f32 248.0, %v777_v5 }
  0xf0   :  { %v18601_v3 = vcvt.f32.s32 %v11816_v23  ;;  %v1020_v8 = vfloor.f32 %v11819_v54  ;;  %v815_v53 = vadd.f32 111.5, %v799_v6  ;;  %v10783_v35 = vpop.eup %10782  ;;  %v801_v40 = vmul.f32 248.0, %v779_v18 }
  0xf1   :  { %v1021_v37 = vfloor.f32 %v11825_v38  ;;  %v11832_v34 = vmin.f32 %v862_v41, 223.0  ;;  %v18895_v49 = vcvt.f32.s32 %v11799_v44  ;;  %v816_v6 = vadd.f32 111.5, %v800_v2 }
  0xf2   :  { %1226 = vrot.lane.b32.xlu1 %v18601_v3, %s10864_s4  ;;  %v11840_v36 = vtrunc.f32 %v1020_v8  ;;  %v863_v50 = vmax.f32 %v815_v53, 0.0  ;;  %v781_v5 = vmul.f32 %v10781_v19, %v11714_v43  ;;  %v817_v18 = vadd.f32 111.5, %v801_v40 }
  0xf3   :  { %18894 = vst [vmem:[#allocation122_spill] sm:$0xff] %v11832_v34  ;;  %1228 = vrot.lane.b32.xlu0 %v18895_v49, %s10864_s4  ;;  %v10785_v21 = vpop.eup %10784  ;;  %v11843_v48 = vtrunc.f32 %v1021_v37  ;;  %v11846_v41 = vmul.f32 0.03125, %v11832_v34  ;;  %v864_v1 = vmax.f32 %v816_v6, 0.0  ;;  %v18897_v19 = vcvt.f32.s32 %v11822_v51 }
  0xf4   :  { %v10787_v17 = vpop.eup %10786  ;;  %v18602_v49 = vcvt.f32.s32 %v11840_v36  ;;  %v11849_v16 = vmin.f32 %v863_v50, 223.0  ;;  %v802_v3 = vmul.f32 248.0, %v781_v5  ;;  %v865_v53 = vmax.f32 %v817_v18, 0.0 }
  0xf5   :  { %v1022_v2 = vfloor.f32 %v11846_v41  ;;  %v11862_v40 = vmin.f32 %v864_v1, 223.0  ;;  %v783_v6 = vmul.f32 %v10783_v35, %v11719_v42  ;;  %v785_v18 = vmul.f32 %v10785_v21, %v11728_v57 }
  0xf6   :  { %18896 = vst [vmem:[#allocation123_spill] sm:$0xff] %v11849_v16  ;;  %1230 = vrot.lane.b32.xlu1 %v18897_v19, %s10864_s4  ;;  %v11860_v37 = vmul.f32 0.03125, %v11849_v16  ;;  %v818_v50 = vadd.f32 111.5, %v802_v3  ;;  %v11867_v8 = vmin.f32 %v865_v53, 223.0  ;;  %v787_v19 = vmul.f32 %v10787_v17, %v11733_v56 }
  0xf7   :  { %1232 = vrot.lane.b32.xlu0 %v18602_v49, %s10864_s4  ;;  %18898 = vst [vmem:[#allocation124_spill] sm:$0xff] %v11862_v40  ;;  %v11865_v5 = vtrunc.f32 %v1022_v2  ;;  %v11873_v49 = vmul.f32 0.03125, %v11862_v40  ;;  %v803_v32 = vmul.f32 248.0, %v783_v6  ;;  %v804_v35 = vmul.f32 248.0, %v785_v18 }
  0xf8   :  { %18899 = vst [vmem:[#allocation125_spill] sm:$0xff] %v11867_v8  ;;  %v1023_v0 = vfloor.f32 %v11860_v37  ;;  %v866_v33 = vmax.f32 %v818_v50, 0.0  ;;  %v11877_v3 = vmul.f32 0.03125, %v11867_v8  ;;  %v805_v2 = vmul.f32 248.0, %v787_v19 }
  0xf9   :  { %v18603_v1 = vcvt.f32.s32 %v11865_v5  ;;  %v18900_v53 = vcvt.f32.s32 %v11843_v48  ;;  %v1024_v17 = vfloor.f32 %v11873_v49  ;;  %v819_v46 = vadd.f32 111.5, %v803_v32 }
  0xfa   :  { %v11882_v21 = vtrunc.f32 %v1023_v0  ;;  %v11885_v47 = vmin.f32 %v866_v33, 223.0  ;;  %v1025_v50 = vfloor.f32 %v11877_v3  ;;  %v820_v6 = vadd.f32 111.5, %v804_v35 }
  0xfb   :  { %1234 = vrot.lane.b32.xlu1 %v18900_v53, %s10864_s4  ;;  %1236 = vrot.lane.b32.xlu0 %v18603_v1, %s10864_s4  ;;  %v821_v18 = vadd.f32 111.5, %v805_v2  ;;  %v1048_v19 = vceil.f32 %v11782_v39  ;;  %v11893_v53 = vtrunc.f32 %v1024_v17  ;;  %v867_v33 = vmax.f32 %v819_v46, 0.0 }
  0xfc   :  { %18901 = vst [vmem:[#allocation126_spill] sm:$0xff] %v11885_v47  ;;  %v18604_v15 = vcvt.f32.s32 %v11882_v21  ;;  %v11896_v0 = vmul.f32 0.03125, %v11885_v47  ;;  %v11898_v14 = vtrunc.f32 %v1025_v50  ;;  %v868_v32 = vmax.f32 %v820_v6, 0.0 }
  0xfd   :  { %v869_v63 = vmax.f32 %v821_v18, 0.0  ;;  %v10335_v62 = vtrunc.f32 %v1048_v19  ;;  %v18605_v35 = vcvt.f32.s32 %v11893_v53  ;;  %v11905_v2 = vmin.f32 %v867_v33, 223.0 }
  0xfe   :  { %v1026_v39 = vfloor.f32 %v11896_v0  ;;  %v1049_v17 = vceil.f32 %v11797_v12  ;;  %v11909_v46 = vmin.f32 %v868_v32, 223.0  ;;  %v741_v12 = vpop.permute.xlu0 %740  ;;  %v18905_v32 = vcvt.f32.s32 %v11898_v14 }
  0xff   :  { %1238 = vrot.lane.b32.xlu1 %v18604_v15, %s10864_s4  ;;  %18902 = vst [vmem:[#allocation127_spill] sm:$0xff] %v11905_v2  ;;  %v11911_v50 = vmin.f32 %v869_v63, 223.0  ;;  %v10336_v6 = vcvt.f32.s32 %v10335_v62  ;;  %1240 = vrot.lane.b32.xlu0 %v18605_v35, %s10864_s4  ;;  %v11919_v19 = vmul.f32 0.03125, %v11905_v2  ;;  %v1050_v15 = vceil.f32 %v11785_v9 }
 0x100   :  { %18903 = vst [vmem:[#allocation128_spill] sm:$0xff] %v11909_v46  ;;  %v11916_v18 = vtrunc.f32 %v1026_v39  ;;  %v10337_v33 = vtrunc.f32 %v1049_v17  ;;  %v11923_v1 = vmul.f32 0.03125, %v11909_v46  ;;  %v1051_v62 = vceil.f32 %v11802_v45  ;;  %v743_v45 = vpop.permute.xlu1 %742 }
 0x101   :  { %18904 = vst [vmem:[#allocation129_spill] sm:$0xff] %v11911_v50  ;;  %v11926_v63 = vmul.f32 0.03125, %v11911_v50  ;;  %v1027_v35 = vfloor.f32 %v11919_v19  ;;  %vm1080_vm0 = vcmp.lt.s32.totalorder %v10336_v6, 6  ;;  %v10339_v30 = vtrunc.f32 %v1050_v15 }
 0x102   :  { %v18621_v39 = vcvt.f32.s32 %v11916_v18  ;;  %v10338_v17 = vcvt.f32.s32 %v10337_v33  ;;  %v1028_v9 = vfloor.f32 %v11923_v1  ;;  %10788 = vrcp.f32 %v741_v12 }
 0x103   :  { %1242 = vrot.lane.b32.xlu1 %v18905_v32, %s10864_s4  ;;  %v1029_v31 = vfloor.f32 %v11926_v63  ;;  %v11939_v46 = vtrunc.f32 %v1027_v35  ;;  %v10341_v32 = vtrunc.f32 %v1051_v62  ;;  %v1052_v50 = vceil.f32 %v11819_v54 }
 0x104   :  { %1244 = vrot.lane.b32.xlu0 %v18621_v39, %s10864_s4  ;;  %v11942_v47 = vtrunc.f32 %v1028_v9  ;;  %v1081_v33 = vsel %vm1080_vm0, %v10336_v6, 6  ;;  %v10340_v40 = vcvt.f32.s32 %v10339_v30  ;;  %vm1082_vm1 = vcmp.lt.s32.totalorder %v10338_v17, 6 }
 0x105   :  { %v11944_v2 = vtrunc.f32 %v1029_v31  ;;  %v18620_v8 = vcvt.f32.s32 %v11939_v46  ;;  %v10342_v15 = vcvt.f32.s32 %v10341_v32  ;;  %v10343_v34 = vtrunc.f32 %v1052_v50 }
 0x106   :  { %10790 = vrcp.f32 %v743_v45  ;;  %v10328_v12 = vcvt.f32.s32 %v11942_v47  ;;  %vm1084_vm2 = vcmp.lt.s32.totalorder %v10340_v40, 6  ;;  %v1053_v35 = vceil.f32 %v11825_v38 }
 0x107   :  { %1246 = vrot.lane.b32.xlu1 %v18620_v8, %s10864_s4  ;;  %v10330_v31 = vcvt.f32.s32 %v11944_v2  ;;  %v10344_v54 = vcvt.f32.s32 %v10343_v34  ;;  %v1054_v30 = vceil.f32 %v11846_v41  ;;  %v18906_v50 = vcvt.f32.s32 %v11794_v4 }
 0x108   :  { %1248 = vrot.lane.b32.xlu0 %v10328_v12, %s10864_s4  ;;  %v1083_v62 = vsel %vm1082_vm1, %v10338_v17, 6  ;;  %v10345_v9 = vtrunc.f32 %v1053_v35  ;;  %v1055_v38 = vceil.f32 %v11860_v37  ;;  %v1085_v45 = vsel %vm1084_vm2, %v10340_v40, 6 }
 0x109   :  { %v1128_v6 = vsub.s32 %v1081_v33, %v18906_v50  ;;  %vm1086_vm3 = vcmp.lt.s32.totalorder %v10342_v15, 6  ;;  %v10347_v32 = vtrunc.f32 %v1054_v30  ;;  %v1056_v8 = vceil.f32 %v11873_v49 }
 0x10a   :  { %vm1088_vm4 = vcmp.lt.s32.totalorder %v10344_v54, 6  ;;  %v10346_v34 = vcvt.f32.s32 %v10345_v9  ;;  %v10349_v39 = vtrunc.f32 %v1055_v38  ;;  %v1057_v41 = vceil.f32 %v11877_v3 }
 0x10b   :  { %1250 = vrot.lane.b32.xlu1 %v10330_v31, %s10864_s4  ;;  %v10348_v4 = vcvt.f32.s32 %v10347_v32  ;;  %v10351_v33 = vtrunc.f32 %v1056_v8  ;;  %v18907_v37 = vcvt.f32.s32 %v11816_v23  ;;  %v1058_v17 = vceil.f32 %v11896_v0 }
 0x10c   :  { %1144 = vrot.lane.b32.xlu0 %v1128_v6, %s10864_s4  ;;  %v10789_v35 = vpop.eup %10788  ;;  %v18908_v49 = vcvt.f32.s32 %v11799_v44  ;;  %v1087_v50 = vsel %vm1086_vm3, %v10342_v15, 6  ;;  %v1089_v9 = vsel %vm1088_vm4, %v10344_v54, 6  ;;  %vm1090_vm5 = vcmp.lt.s32.totalorder %v10346_v34, 6 }
 0x10d   :  { %v1129_v40 = vsub.s32 %v1083_v62, %v18907_v37  ;;  %vm1092_vm6 = vcmp.lt.s32.totalorder %v10348_v4, 6  ;;  %v10350_v3 = vcvt.f32.s32 %v10349_v39  ;;  %v10353_v38 = vtrunc.f32 %v1057_v41 }
 0x10e   :  { %v1130_v30 = vsub.s32 %v1085_v45, %v18908_v49  ;;  %v1059_v32 = vceil.f32 %v11919_v19  ;;  %v10352_v8 = vcvt.f32.s32 %v10351_v33  ;;  %v18909_v23 = vcvt.f32.s32 %v11822_v51 }
 0x10f   :  { %1146 = vrot.lane.b32.xlu1 %v1129_v40, %s10864_s4  ;;  %v10355_v62 = vtrunc.f32 %v1058_v17  ;;  %v18910_v44 = vcvt.f32.s32 %v11840_v36  ;;  %v1091_v54 = vsel %vm1090_vm5, %v10346_v34, 6  ;;  %v1093_v45 = vsel %vm1092_vm6, %v10348_v4, 6 }
 0x110   :  { %v10791_v6 = vpop.eup %10790  ;;  %1148 = vrot.lane.b32.xlu0 %v1130_v30, %s10864_s4  ;;  %v1131_v0 = vsub.s32 %v1087_v50, %v18909_v23  ;;  %v1060_v39 = vceil.f32 %v11923_v1  ;;  %vm11979_vm7 = vcmp.lt.s32.totalorder %v10350_v3, 6  ;;  %v10354_v19 = vcvt.f32.s32 %v10353_v38 }
 0x111   :  { %v1132_v15 = vsub.s32 %v1089_v9, %v18910_v44  ;;  %v10357_v33 = vtrunc.f32 %v1059_v32  ;;  %v1061_v37 = vceil.f32 %v11926_v63  ;;  %vm1096_vm8 = vcmp.lt.s32.totalorder %v10352_v8, 6 }
 0x112   :  { %v10359_v51 = vtrunc.f32 %v1060_v39  ;;  %v789_v40 = vmul.f32 %v10789_v35, %v11742_v25  ;;  %v791_v36 = vmul.f32 %v10791_v6, %v11747_v24  ;;  %v10356_v34 = vcvt.f32.s32 %v10355_v62 }
 0x113   :  { %1150 = vrot.lane.b32.xlu1 %v1131_v0, %s10864_s4  ;;  %v18913_v1 = vcvt.f32.s32 %v11843_v48  ;;  %v18914_v17 = vcvt.f32.s32 %v11865_v5  ;;  %v18622_v63 = vmov 1   ;;  %v1095_v25 = vsel %vm11979_vm7, %v10350_v3, 6 }
 0x114   :  { %1152 = vrot.lane.b32.xlu0 %v1132_v15, %s10864_s4  ;;  %v806_v30 = vmul.f32 248.0, %v789_v40  ;;  %v807_v50 = vmul.f32 248.0, %v791_v36  ;;  %10759 = vset.pattern.permute.xlu1 %v18622_v63  ;;  %v1097_v24 = vsel %vm1096_vm8, %v10352_v8, 6  ;;  %v10358_v35 = vcvt.f32.s32 %v10357_v33 }
 0x115   :  { %v1133_v4 = vsub.s32 %v1091_v54, %v18913_v1  ;;  %v1134_v49 = vsub.s32 %v1093_v45, %v18914_v17  ;;  %10758 = vset.pattern.permute.xlu0 %v18622_v63  ;;  %v10361_v9 = vtrunc.f32 %v1061_v37  ;;  %vm1098_vm9 = vcmp.lt.s32.totalorder %v10354_v19, 6 }
 0x116   :  { %v10360_v48 = vcvt.f32.s32 %v10359_v51  ;;  %v822_v38 = vadd.f32 111.5, %v806_v30  ;;  %v823_v5 = vadd.f32 111.5, %v807_v50  ;;  %vm1100_vm10 = vcmp.lt.s32.totalorder %v10356_v34, 6 }
 0x117   :  { %1154 = vrot.lane.b32.xlu1 %v1133_v4, %s10864_s4  ;;  %v18915_v32 = vcvt.f32.s32 %v11882_v21  ;;  %v18916_v62 = vcvt.f32.s32 %v11893_v53  ;;  %v1099_v8 = vsel %vm1098_vm9, %v10354_v19, 6  ;;  %vm1102_vm11 = vcmp.lt.s32.totalorder %v10358_v35, 6 }
 0x118   :  { %1156 = vrot.lane.b32.xlu0 %v1134_v49, %s10864_s4  ;;  %v870_v23 = vmax.f32 %v822_v38, 0.0  ;;  %v871_v0 = vmax.f32 %v823_v5, 0.0  ;;  %v10362_v44 = vcvt.f32.s32 %v10361_v9  ;;  %v1101_v15 = vsel %vm1100_vm10, %v10356_v34, 6 }
 0x119   :  { %v1135_v6 = vsub.s32 %v1095_v25, %v18915_v32  ;;  %v1136_v3 = vsub.s32 %v1097_v24, %v18916_v62  ;;  %vm1104_vm12 = vcmp.lt.s32.totalorder %v10360_v48, 6  ;;  %v18919_v21 = vcvt.f32.s32 %v11898_v14 }
 0x11a   :  { %v12003_v54 = vmin.f32 %v870_v23, 223.0  ;;  %v12005_v45 = vmin.f32 %v871_v0, 223.0  ;;  %v1103_v41 = vsel %vm1102_vm11, %v10358_v35, 6  ;;  %v18920_v33 = vcvt.f32.s32 %v11916_v18 }
 0x11b   :  { %1158 = vrot.lane.b32.xlu1 %v1135_v6, %s10864_s4  ;;  %v1137_v39 = vsub.s32 %v1099_v8, %v18919_v21  ;;  %v1105_v51 = vsel %vm1104_vm12, %v10360_v48, 6  ;;  %vm1106_vm13 = vcmp.lt.s32.totalorder %v10362_v44, 6  ;;  %v18921_v14 = vcvt.f32.s32 %v11939_v46  ;;  %v571_v6 = vpop.permute.xlu1 %570 }
 0x11c   :  { %18917 = vst [vmem:[#allocation130_spill] sm:$0xff] %v12003_v54  ;;  %18918 = vst [vmem:[#allocation131_spill] sm:$0xff] %v12005_v45  ;;  %1160 = vrot.lane.b32.xlu0 %v1136_v3, %s10864_s4  ;;  %v918_v53 = vmul.f32 0.03125, %v12003_v54  ;;  %v919_v19 = vmul.f32 0.03125, %v12005_v45  ;;  %v1138_v37 = vsub.s32 %v1101_v15, %v18920_v33  ;;  %v1140_v18 = vsub.s32 %v1105_v51, %v10328_v12  ;;  %v569_v12 = vpop.permute.xlu0 %568 }
 0x11d   :  { %v1139_v4 = vsub.s32 %v1103_v41, %v18921_v14  ;;  %v1107_v25 = vsel %vm1106_vm13, %v10362_v44, 6  ;;  %10792 = vrcp.f32 %v569_v12 }
 0x11e   :  { %v1030_v40 = vfloor.f32 %v918_v53  ;;  %v1062_v36 = vceil.f32 %v918_v53  ;;  %v1031_v34 = vfloor.f32 %v919_v19  ;;  %v1063_v1 = vceil.f32 %v919_v19 }
 0x11f   :  { %1162 = vrot.lane.b32.xlu1 %v1137_v39, %s10864_s4  ;;  %v1141_v48 = vsub.s32 %v1107_v25, %v10330_v31  ;;  %v575_v2 = vpop.permute.xlu1 %574 }
 0x120   :  { %1164 = vrot.lane.b32.xlu0 %v1138_v37, %s10864_s4  ;;  %v10331_v17 = vtrunc.f32 %v1030_v40  ;;  %v10363_v49 = vtrunc.f32 %v1062_v36  ;;  %v10333_v30 = vtrunc.f32 %v1031_v34  ;;  %v10365_v50 = vtrunc.f32 %v1063_v1  ;;  %v573_v23 = vpop.permute.xlu0 %572 }
 0x121   :  { %10794 = vrcp.f32 %v573_v23 }
 0x122   :  { %v10332_v24 = vcvt.f32.s32 %v10331_v17  ;;  %v10364_v35 = vcvt.f32.s32 %v10363_v49  ;;  %v10366_v9 = vcvt.f32.s32 %v10365_v50  ;;  %v10334_v46 = vcvt.f32.s32 %v10333_v30 }
 0x123   :  { %1166 = vrot.lane.b32.xlu1 %v1139_v4, %s10864_s4  ;;  %10796 = vrcp.f32 %v571_v6  ;;  %v579_v0 = vpop.permute.xlu1 %578 }
 0x124   :  { %1168 = vrot.lane.b32.xlu0 %v1140_v18, %s10864_s4  ;;  %vm1108_vm14 = vcmp.lt.s32.totalorder %v10364_v35, 6  ;;  %vm1110_vm15 = vcmp.lt.s32.totalorder %v10366_v9, 6  ;;  %v577_v31 = vpop.permute.xlu0 %576  ;;  %10798 = vrcp.f32 %v575_v2 }
 0x125   :  { %v1109_v38 = vsel %vm1108_vm14, %v10364_v35, 6  ;;  %v1111_v5 = vsel %vm1110_vm15, %v10366_v9, 6  ;;  %10800 = vrcp.f32 %v577_v31 }
 0x126   :  { %v1142_v47 = vsub.s32 %v1109_v38, %v10332_v24  ;;  %v1143_v32 = vsub.s32 %v1111_v5, %v10334_v46  ;;  %10802 = vrcp.f32 %v579_v0 }
 0x127   :  { %1170 = vrot.lane.b32.xlu1 %v1141_v48, %s10864_s4  ;;  %v10793_v3 = vpop.eup %10792  ;;  %v583_v8 = vpop.permute.xlu1 %582 }
 0x128   :  { %1172 = vrot.lane.b32.xlu0 %v1142_v47, %s10864_s4  ;;  %v581_v62 = vpop.permute.xlu0 %580  ;;  %v617_v44 = vmul.f32 %v10793_v3, %v11646_v13 }
 0x129   :  { %10804 = vrcp.f32 %v581_v62 }
 0x12a   :  { %10806 = vrcp.f32 %v583_v8  ;;  %v648_v19 = vmul.f32 248.0, %v617_v44 }
 0x12b   :  { %1174 = vrot.lane.b32.xlu1 %v1143_v32, %s10864_s4  ;;  %v10795_v15 = vpop.eup %10794  ;;  %v587_v53 = vpop.permute.xlu1 %586 }
 0x12c   :  { %1252 = vrot.lane.b32.xlu0 %v10332_v24, %s10864_s4  ;;  %v585_v21 = vpop.permute.xlu0 %584  ;;  %v621_v33 = vmul.f32 %v10795_v15, %v11651_v61  ;;  %v664_v1 = vadd.f32 111.5, %v648_v19 }
 0x12d   :  { %v10797_v39 = vpop.eup %10796  ;;  %10808 = vrcp.f32 %v585_v21 }
 0x12e   :  { %v10799_v41 = vpop.eup %10798  ;;  %v619_v37 = vmul.f32 %v10797_v39, %v11656_v60  ;;  %v650_v14 = vmul.f32 248.0, %v621_v33  ;;  %10810 = vrcp.f32 %v587_v53  ;;  %v824_v60 = vmax.f32 %v664_v1, 0.0 }
 0x12f   :  { %1254 = vrot.lane.b32.xlu1 %v10334_v46, %s10864_s4  ;;  %v10801_v51 = vpop.eup %10800  ;;  %v623_v34 = vmul.f32 %v10799_v41, %v11663_v28  ;;  %v591_v17 = vpop.permute.xlu1 %590 }
 0x130   :  { %v10803_v40 = vpop.eup %10802  ;;  %v589_v36 = vpop.permute.xlu0 %588  ;;  %v649_v13 = vmul.f32 248.0, %v619_v37  ;;  %v625_v49 = vmul.f32 %v10801_v51, %v11672_v59  ;;  %v666_v18 = vadd.f32 111.5, %v650_v14  ;;  %v12037_v38 = vmin.f32 %v824_v60, 223.0 }
 0x131   :  { %v627_v30 = vmul.f32 %v10803_v40, %v11677_v58  ;;  %v651_v61 = vmul.f32 248.0, %v623_v34  ;;  %10812 = vrcp.f32 %v589_v36 }
 0x132   :  { %10814 = vrcp.f32 %v591_v17  ;;  %v665_v24 = vadd.f32 111.5, %v649_v13  ;;  %v652_v35 = vmul.f32 248.0, %v625_v49  ;;  %18922 = vst [vmem:[#allocation132_spill] sm:$0xff] %v12037_v38  ;;  %v826_v59 = vmax.f32 %v666_v18, 0.0 }
 0x133   :  { %v10805_v4 = vpop.eup %10804  ;;  %v653_v9 = vmul.f32 248.0, %v627_v30  ;;  %v667_v46 = vadd.f32 111.5, %v651_v61  ;;  %v595_v58 = vpop.permute.xlu1 %594 }
 0x134   :  { %v10807_v50 = vpop.eup %10806  ;;  %v593_v25 = vpop.permute.xlu0 %592  ;;  %v629_v28 = vmul.f32 %v10805_v4, %v11686_v27  ;;  %v825_v5 = vmax.f32 %v665_v24, 0.0  ;;  %v668_v32 = vadd.f32 111.5, %v652_v35  ;;  %v12040_v27 = vmul.f32 0.03125, %v12037_v38 }
 0x135   :  { %10816 = vrcp.f32 %v593_v25  ;;  %v631_v48 = vmul.f32 %v10807_v50, %v11691_v26  ;;  %v669_v6 = vadd.f32 111.5, %v653_v9  ;;  %v827_v2 = vmax.f32 %v667_v46, 0.0 }
 0x136   :  { %v654_v47 = vmul.f32 248.0, %v629_v28  ;;  %10818 = vrcp.f32 %v595_v58  ;;  %v12042_v0 = vmin.f32 %v826_v59, 223.0  ;;  %v12044_v26 = vmin.f32 %v825_v5, 223.0 }
 0x137   :  { %v10809_v12 = vpop.eup %10808  ;;  %v655_v23 = vmul.f32 248.0, %v631_v48  ;;  %v828_v44 = vmax.f32 %v668_v32, 0.0  ;;  %v829_v15 = vmax.f32 %v669_v6, 0.0  ;;  %v12047_v41 = vmin.f32 %v827_v2, 223.0  ;;  %v599_v61 = vpop.permute.xlu1 %598 }
 0x138   :  { %v10811_v31 = vpop.eup %10810  ;;  %18923 = vst [vmem:[#allocation133_spill] sm:$0xff] %v12042_v0  ;;  %18924 = vst [vmem:[#allocation134_spill] sm:$0xff] %v12044_v26  ;;  %v670_v62 = vadd.f32 111.5, %v654_v47  ;;  %v633_v3 = vmul.f32 %v10809_v12, %v11700_v11  ;;  %v920_v33 = vfloor.f32 %v12040_v27  ;;  %v12052_v37 = vmul.f32 0.03125, %v12042_v0  ;;  %v597_v13 = vpop.permute.xlu0 %596 }
 0x139   :  { %v671_v21 = vadd.f32 111.5, %v655_v23  ;;  %18925 = vst [vmem:[#allocation135_spill] sm:$0xff] %v12047_v41  ;;  %v635_v53 = vmul.f32 %v10811_v31, %v11705_v10  ;;  %v12055_v51 = vmul.f32 0.03125, %v12044_v26  ;;  %v12058_v34 = vmin.f32 %v828_v44, 223.0 }
 0x13a   :  { %v830_v40 = vmax.f32 %v670_v62, 0.0  ;;  %v656_v11 = vmul.f32 248.0, %v633_v3  ;;  %v12060_v1 = vmin.f32 %v829_v15, 223.0  ;;  %v12065_v17 = vmul.f32 0.03125, %v12047_v41 }
 0x13b   :  { %v10813_v8 = vpop.eup %10812  ;;  %18926 = vst [vmem:[#allocation136_spill] sm:$0xff] %v12058_v34  ;;  %v831_v14 = vmax.f32 %v671_v21, 0.0  ;;  %v921_v4 = vfloor.f32 %v12055_v51  ;;  %v657_v49 = vmul.f32 248.0, %v635_v53  ;;  %v12068_v50 = vtrunc.f32 %v920_v33 }
 0x13c   :  { %v10815_v39 = vpop.eup %10814  ;;  %v637_v36 = vmul.f32 %v10813_v8, %v11714_v43  ;;  %18927 = vst [vmem:[#allocation137_spill] sm:$0xff] %v12060_v1  ;;  %v922_v43 = vfloor.f32 %v12052_v37  ;;  %v923_v60 = vfloor.f32 %v12065_v17  ;;  %v12072_v18 = vmin.f32 %v830_v40, 223.0 }
 0x13d   :  { %v639_v10 = vmul.f32 %v10815_v39, %v11719_v42  ;;  %v672_v25 = vadd.f32 111.5, %v656_v11  ;;  %v12075_v28 = vmul.f32 0.03125, %v12058_v34  ;;  %v12078_v35 = vmul.f32 0.03125, %v12060_v1 }
 0x13e   :  { %18928 = vst [vmem:[#allocation138_spill] sm:$0xff] %v12072_v18  ;;  %v658_v42 = vmul.f32 248.0, %v637_v36  ;;  %v12080_v9 = vmin.f32 %v831_v14, 223.0  ;;  %10820 = vrcp.f32 %v597_v13  ;;  %v12082_v48 = vtrunc.f32 %v921_v4 }
 0x13f   :  { %v10817_v19 = vpop.eup %10816  ;;  %v673_v46 = vadd.f32 111.5, %v657_v49  ;;  %10822 = vrcp.f32 %v599_v61  ;;  %v18627_v58 = vcvt.f32.s32 %v12068_v50  ;;  %v924_v5 = vfloor.f32 %v12075_v28 }
 0x140   :  { %v641_v30 = vmul.f32 %v10817_v19, %v11728_v57  ;;  %v10819_v24 = vpop.eup %10818  ;;  %18929 = vst [vmem:[#allocation139_spill] sm:$0xff] %v12080_v9  ;;  %v659_v57 = vmul.f32 248.0, %v639_v10  ;;  %v925_v47 = vfloor.f32 %v12078_v35  ;;  %v12090_v32 = vmul.f32 0.03125, %v12072_v18 }
 0x141   :  { %v832_v6 = vmax.f32 %v672_v25, 0.0  ;;  %v674_v23 = vadd.f32 111.5, %v658_v42  ;;  %v643_v2 = vmul.f32 %v10819_v24, %v11733_v56  ;;  %v12093_v31 = vtrunc.f32 %v922_v43 }
 0x142   :  { %v660_v59 = vmul.f32 248.0, %v641_v30  ;;  %v12095_v62 = vtrunc.f32 %v923_v60  ;;  %v12098_v3 = vmul.f32 0.03125, %v12080_v9  ;;  %v675_v8 = vadd.f32 111.5, %v659_v57 }
 0x143   :  { %v18626_v44 = vcvt.f32.s32 %v12082_v48  ;;  %v926_v15 = vfloor.f32 %v12090_v32  ;;  %v833_v21 = vmax.f32 %v673_v46, 0.0  ;;  %v12102_v53 = vtrunc.f32 %v924_v5 }
 0x144   :  { %v676_v39 = vadd.f32 111.5, %v660_v59  ;;  %v12104_v19 = vtrunc.f32 %v925_v47  ;;  %v927_v56 = vfloor.f32 %v12098_v3  ;;  %v952_v33 = vceil.f32 %v12040_v27 }
 0x145   :  { %v12112_v36 = vmin.f32 %v832_v6, 223.0  ;;  %v834_v14 = vmax.f32 %v674_v23, 0.0  ;;  %v661_v10 = vmul.f32 248.0, %v643_v2  ;;  %v953_v13 = vceil.f32 %v12055_v51 }
 0x146   :  { %v12117_v4 = vmul.u32 7, %v18627_v58  ;;  %v18625_v49 = vcvt.f32.s32 %v12093_v31  ;;  %v18624_v30 = vcvt.f32.s32 %v12095_v62  ;;  %v835_v43 = vmax.f32 %v675_v8, 0.0 }
 0x147   :  { %18930 = vst [vmem:[#allocation140_spill] sm:$0xff] %v12112_v36  ;;  %v12123_v27 = vmul.u32 7, %v18626_v44  ;;  %v12125_v61 = vtrunc.f32 %v926_v15  ;;  %v12127_v60 = vmin.f32 %v833_v21, 223.0  ;;  %v836_v25 = vmax.f32 %v676_v39, 0.0 }
 0x148   :  { %v18630_v51 = vcvt.f32.s32 %v12102_v53  ;;  %v18631_v42 = vcvt.f32.s32 %v12104_v19  ;;  %v12131_v24 = vtrunc.f32 %v927_v56  ;;  %v10271_v57 = vtrunc.f32 %v952_v33  ;;  %v10821_v46 = vpop.eup %10820 }
 0x149   :  { %18931 = vst [vmem:[#allocation141_spill] sm:$0xff] %v12127_v60  ;;  %v12138_v47 = vmul.f32 0.03125, %v12112_v36  ;;  %v12140_v6 = vmin.f32 %v834_v14, 223.0  ;;  %v677_v23 = vadd.f32 111.5, %v661_v10  ;;  %v10273_v2 = vtrunc.f32 %v953_v13  ;;  %v10823_v8 = vpop.eup %10822 }
 0x14a   :  { %v12144_v15 = vmul.u32 7, %v18625_v49  ;;  %v12148_v21 = vmul.u32 7, %v18624_v30  ;;  %v12150_v39 = vmin.f32 %v835_v43, 223.0  ;;  %v12155_v14 = vmul.f32 0.03125, %v12127_v60 }
 0x14b   :  { %18932 = vst [vmem:[#allocation142_spill] sm:$0xff] %v12140_v6  ;;  %v928_v33 = vfloor.f32 %v12138_v47  ;;  %v12157_v10 = vmin.f32 %v836_v25, 223.0  ;;  %v12161_v13 = vmul.u32 7, %v18630_v51  ;;  %v12165_v63 = vmul.u32 7, %v18631_v42 }
 0x14c   :  { %18933 = vst [vmem:[#allocation143_spill] sm:$0xff] %v12150_v39  ;;  %v10272_v30 = vcvt.f32.s32 %v10271_v57  ;;  %v929_v44 = vfloor.f32 %v12155_v14  ;;  %v12172_v58 = vmul.f32 0.03125, %v12140_v6  ;;  %v837_v25 = vmax.f32 %v677_v23, 0.0 }
 0x14d   :  { %18934 = vst [vmem:[#allocation144_spill] sm:$0xff] %v12157_v10  ;;  %v10274_v56 = vcvt.f32.s32 %v10273_v2  ;;  %v12177_v51 = vmul.f32 0.03125, %v12150_v39  ;;  %v954_v42 = vceil.f32 %v12052_v37  ;;  %v955_v60 = vceil.f32 %v12065_v17 }
 0x14e   :  { %v956_v57 = vceil.f32 %v12075_v28  ;;  %v18935_v43 = vcvt.f32.s32 %v12125_v61  ;;  %v12186_v9 = vtrunc.f32 %v928_v33  ;;  %v12189_v23 = vmul.f32 0.03125, %v12157_v10 }
 0x14f   :  { %v957_v2 = vceil.f32 %v12078_v35  ;;  %v18936_v6 = vcvt.f32.s32 %v12131_v24  ;;  %v930_v37 = vfloor.f32 %v12172_v58  ;;  %v931_v17 = vfloor.f32 %v12177_v51 }
 0x150   :  { %v12184_v18 = vmul.u32 7, %v18935_v43  ;;  %vm12198_vm0 = vcmp.lt.s32.totalorder %v10272_v30, 6  ;;  %v12204_v33 = vtrunc.f32 %v929_v44  ;;  %v932_v10 = vfloor.f32 %v12189_v23  ;;  %v10824_v44 = vld [vmem:[%s18550_s0 + $0x70] sm:$0xff] }
 0x151   :  { %v12194_v39 = vmul.u32 7, %v18936_v6  ;;  %v12207_v34 = vmin.f32 %v837_v25, 223.0  ;;  %vm986_vm1 = vcmp.lt.s32.totalorder %v10274_v56, 6  ;;  %v10275_v35 = vtrunc.f32 %v954_v42 }
 0x152   :  { %v10277_v6 = vtrunc.f32 %v955_v60  ;;  %v10279_v1 = vtrunc.f32 %v956_v57  ;;  %v958_v26 = vceil.f32 %v12090_v32  ;;  %v10281_v0 = vtrunc.f32 %v957_v2 }
 0x153   :  { %18939 = vst [vmem:[#allocation145_spill] sm:$0xff] %v12207_v34  ;;  %v959_v54 = vceil.f32 %v12098_v3  ;;  %v645_v45 = vmul.f32 %v10824_v44, %v10821_v46  ;;  %v12217_v25 = vtrunc.f32 %v930_v37  ;;  %v12219_v16 = vtrunc.f32 %v931_v17  ;;  %v10825_v46 = vld [vmem:[%s18550_s0 + $0x78] sm:$0xff] }
 0x154   :  { %v985_v60 = vsel %vm12198_vm0, %v10272_v30, 6  ;;  %v987_v32 = vsel %vm986_vm1, %v10274_v56, 6  ;;  %v12226_v2 = vtrunc.f32 %v932_v10  ;;  %v12229_v3 = vmul.f32 0.03125, %v12207_v34 }
 0x155   :  { %v647_v37 = vmul.f32 %v10825_v46, %v10823_v8  ;;  %v10276_v17 = vcvt.f32.s32 %v10275_v35  ;;  %v10278_v44 = vcvt.f32.s32 %v10277_v6  ;;  %v10280_v41 = vcvt.f32.s32 %v10279_v1 }
 0x156   :  { %v10283_v28 = vtrunc.f32 %v958_v26  ;;  %v18940_v30 = vcvt.f32.s32 %v12186_v9  ;;  %v10282_v10 = vcvt.f32.s32 %v10281_v0  ;;  %v10285_v55 = vtrunc.f32 %v959_v54 }
 0x157   :  { %v662_v20 = vmul.f32 248.0, %v645_v45  ;;  %v18674_v34 = vcvt.f32.s32 %v12217_v25  ;;  %v933_v7 = vfloor.f32 %v12229_v3  ;;  %v18942_v8 = vcvt.f32.s32 %v12068_v50 }
 0x158   :  { %v12236_v56 = vmul.u32 7, %v18940_v30  ;;  %v18943_v26 = vcvt.f32.s32 %v12204_v33  ;;  %v18944_v46 = vcvt.f32.s32 %v12082_v48  ;;  %v663_v54 = vmul.f32 248.0, %v647_v37 }
 0x159   :  { %v1112_v35 = vsub.s32 %v985_v60, %v18942_v8  ;;  %vm988_vm2 = vcmp.lt.s32.totalorder %v10276_v17, 6  ;;  %vm990_vm3 = vcmp.lt.s32.totalorder %v10278_v44, 6  ;;  %vm992_vm4 = vcmp.lt.s32.totalorder %v10280_v41, 6 }
 0x15a   :  { %v12247_v1 = vmul.u32 7, %v18943_v26  ;;  %v1113_v0 = vsub.s32 %v987_v32, %v18944_v46  ;;  %v10284_v45 = vcvt.f32.s32 %v10283_v28  ;;  %vm994_vm5 = vcmp.lt.s32.totalorder %v10282_v10, 6 }
 0x15b   :  { %v10286_v52 = vcvt.f32.s32 %v10285_v55  ;;  %v960_v50 = vceil.f32 %v12138_v47  ;;  %v678_v60 = vadd.f32 111.5, %v662_v20  ;;  %v12257_v8 = vmul.u32 7, %v18674_v34 }
 0x15c   :  { %v18947_v26 = vcvt.f32.s32 %v12219_v16  ;;  %v12265_v37 = vtrunc.f32 %v933_v7  ;;  %v961_v28 = vceil.f32 %v12155_v14  ;;  %v989_v46 = vsel %vm988_vm2, %v10276_v17, 6 }
 0x15d   :  { %18946 = vst [vmem:[#allocation148_spill] sm:$0xff] %v12257_v8  ;;  %v991_v6 = vsel %vm990_vm3, %v10278_v44, 6  ;;  %v993_v55 = vsel %vm992_vm4, %v10280_v41, 6  ;;  %v679_v22 = vadd.f32 111.5, %v663_v54  ;;  %v18950_v20 = vcvt.f32.s32 %v12226_v2 }
 0x15e   :  { %v12261_v48 = vmul.u32 7, %v18947_v26  ;;  %v995_v34 = vsel %vm994_vm5, %v10282_v10, 6  ;;  %vm996_vm6 = vcmp.lt.s32.totalorder %v10284_v45, 6  ;;  %v962_v29 = vceil.f32 %v12172_v58 }
 0x15f   :  { %v12270_v47 = vmul.u32 7, %v18950_v20  ;;  %vm998_vm7 = vcmp.lt.s32.totalorder %v10286_v52, 6  ;;  %v963_v7 = vceil.f32 %v12177_v51  ;;  %v18953_v17 = vcvt.f32.s32 %v12093_v31 }
 0x160   :  { %v12087_v12 = vpop.permute.xlu0 %1224  ;;  %18948 = vst [vmem:[#allocation149_spill] sm:$0xff] %v12261_v48  ;;  %v18954_v44 = vcvt.f32.s32 %v12095_v62  ;;  %v18955_v20 = vcvt.f32.s32 %v12102_v53  ;;  %v18956_v58 = vcvt.f32.s32 %v12104_v19  ;;  %v10291_v8 = vtrunc.f32 %v962_v29 }
 0x161   :  { %18951 = vst [vmem:[#allocation151_spill] sm:$0xff] %v12270_v47  ;;  %v1114_v41 = vsub.s32 %v989_v46, %v18953_v17  ;;  %v10289_v47 = vtrunc.f32 %v961_v28  ;;  %v1256_v51 = vadd.s32 %v12087_v12, %v12117_v4  ;;  %v964_v31 = vceil.f32 %v12189_v23 }
 0x162   :  { %v1115_v54 = vsub.s32 %v991_v6, %v18954_v44  ;;  %v1116_v10 = vsub.s32 %v993_v55, %v18955_v20  ;;  %v10293_v46 = vtrunc.f32 %v963_v7  ;;  %v18958_v29 = vcvt.f32.s32 %v12125_v61 }
 0x163   :  { %v10290_v19 = vcvt.f32.s32 %v10289_v47  ;;  %v18960_v23 = vcvt.f32.s32 %v12131_v24 }
 0x164   :  { %v12108_v40 = vpop.permute.xlu1 %1226 }
 0x165   :  { %v12110_v11 = vpop.permute.xlu0 %1228  ;;  %vm12305_vm12 = vcmp.lt.s32.totalorder %v10290_v19, 6 }
 0x168   :  { %v12133_v59 = vpop.permute.xlu1 %1230 }
 0x169   :  { %v12135_v5 = vpop.permute.xlu0 %1232  ;;  %v1259_v7 = vadd.s32 %v12133_v59, %v12148_v21 }
 0x16d   :  { %v12168_v49 = vpop.permute.xlu1 %1234  ;;  %v12174_v36 = vpop.permute.xlu0 %1236 }
 0x171   :  { %v12202_v43 = vpop.permute.xlu1 %1238  ;;  %v12211_v38 = vpop.permute.xlu0 %1240 }
 0x175   :  { %v12224_v57 = vpop.permute.xlu1 %1242 }
 0x176   :  { %v12238_v42 = vpop.permute.xlu0 %1244 }
 0x177   :  { %18941 = vst [vmem:[#allocation146_spill] sm:$0xff] %v12238_v42  ;;  %v997_v42 = vsel %vm996_vm6, %v10284_v45, 6 }
 0x179   :  { %v12252_v30 = vpop.permute.xlu1 %1246 }
 0x17a   :  { %18945 = vst [vmem:[#allocation147_spill] sm:$0xff] %v12252_v30  ;;  %v12263_v32 = vpop.permute.xlu0 %1248  ;;  %v838_v30 = vmax.f32 %v678_v60, 0.0  ;;  %v999_v60 = vsel %vm998_vm7, %v10286_v52, 6  ;;  %v1118_v52 = vsub.s32 %v997_v42, %v18958_v29  ;;  %v1264_v42 = vadd.s32 %v12211_v38, %v12236_v56 }
 0x17b   :  { %18949 = vst [vmem:[#allocation150_spill] sm:$0xff] %v12263_v32  ;;  %v10287_v32 = vtrunc.f32 %v960_v50  ;;  %v839_v50 = vmax.f32 %v679_v22, 0.0  ;;  %v1257_v22 = vadd.s32 %v12108_v40, %v12123_v27  ;;  %v1119_v45 = vsub.s32 %v999_v60, %v18960_v23 }
 0x17c   :  { %v12287_v53 = vmin.f32 %v838_v30, 223.0  ;;  %v10295_v30 = vtrunc.f32 %v964_v31  ;;  %v1260_v31 = vadd.s32 %v12135_v5, %v12161_v13  ;;  %v1263_v23 = vadd.s32 %v12202_v43, %v12194_v39  ;;  %v506_v43 = vld [vmem:[%s18550_s0 + $0x18] sm:$0xff] }
 0x17d   :  { %v12273_v26 = vpop.permute.xlu1 %1250  ;;  %v10288_v6 = vcvt.f32.s32 %v10287_v32  ;;  %v12294_v4 = vmin.f32 %v839_v50, 223.0  ;;  %v10266_v39 = vcvt.f32.s32 %v12265_v37  ;;  %v18980_v37 = vcvt.f32.s32 %v12219_v16 }
 0x17e   :  { %18952 = vst [vmem:[#allocation152_spill] sm:$0xff] %v12273_v26  ;;  %v1145_v14 = vpop.permute.xlu0 %1144  ;;  %v1117_v26 = vsub.s32 %v995_v34, %v18956_v58  ;;  %18957 = vst [vmem:[#allocation153_spill] sm:$0xff] %v12287_v53  ;;  %v965_v34 = vceil.f32 %v12229_v3  ;;  %v10294_v3 = vcvt.f32.s32 %v10293_v46  ;;  %v12299_v47 = vmul.f32 0.03125, %v12287_v53 }
 0x17f   :  { %v1176_v48 = vmul.u32 %v1145_v14, %v1112_v35  ;;  %18959 = vst [vmem:[#allocation154_spill] sm:$0xff] %v12294_v4  ;;  %vm1000_vm10 = vcmp.lt.s32.totalorder %v10288_v6, 6  ;;  %v12316_v17 = vmul.f32 0.03125, %v12294_v4 }
 0x180   :  { %v12309_v24 = vtrunc.f32 %v965_v34  ;;  %vm12324_vm15 = vcmp.lt.s32.totalorder %v10294_v3, 6  ;;  %v966_v59 = vceil.f32 %v12299_v47  ;;  %v934_v29 = vfloor.f32 %v12299_v47 }
 0x181   :  { %vm1192_vm8 = vcmp.gt.s32.totalorder %v1176_v48, 0  ;;  %v1147_v62 = vpop.permute.xlu1 %1146  ;;  %v967_v46 = vceil.f32 %v12316_v17 }
 0x182   :  { %v1177_v28 = vmul.u32 %v1147_v62, %v1113_v0  ;;  %v1149_v35 = vpop.permute.xlu0 %1148  ;;  %v1272_v55 = vsel %vm1192_vm8, %v1256_v51, 4294967295  ;;  %v10292_v0 = vcvt.f32.s32 %v10291_v8  ;;  %v1258_v8 = vadd.s32 %v12110_v11, %v12144_v15  ;;  %v18985_v11 = vld [vmem:[#allocation146_spill] sm:$0xff]  ;;  %v18986_v15 = vld [vmem:[#allocation149_spill] sm:$0xff] }
 0x183   :  { %v1178_v12 = vmul.u32 %v1149_v35, %v1114_v41  ;;  %1291 = vperm.xlu0 %10758, %v1272_v55   ;;  %v1001_v41 = vsel %vm1000_vm10, %v10288_v6, 6  ;;  %v1003_v51 = vsel %vm12305_vm12, %v10290_v19, 6  ;;  %v10298_v60 = vcvt.f32.s32 %v12309_v24 }
 0x184   :  { %vm1193_vm9 = vcmp.gt.s32.totalorder %v1177_v28, 0  ;;  %vm12318_vm14 = vcmp.lt.s32.totalorder %v10292_v0, 6  ;;  %v1261_v62 = vadd.s32 %v12168_v49, %v12165_v63  ;;  %v1007_v55 = vsel %vm12324_vm15, %v10294_v3, 6 }
 0x185   :  { %v1151_v48 = vpop.permute.xlu1 %1150  ;;  %v1273_v32 = vsel %vm1193_vm9, %v1257_v22, 4294967295  ;;  %vm12301_vm11 = vcmp.gt.s32.totalorder %v1178_v12, 0  ;;  %v1005_v35 = vsel %vm12318_vm14, %v10292_v0, 6  ;;  %v10299_v63 = vtrunc.f32 %v966_v59 }
 0x186   :  { %v1179_v27 = vmul.u32 %v1151_v48, %v1115_v54  ;;  %v1153_v61 = vpop.permute.xlu0 %1152  ;;  %1294 = vperm.xlu1 %10759, %v1273_v32   ;;  %v10296_v54 = vcvt.f32.s32 %v10295_v30  ;;  %v1274_v50 = vsel %vm12301_vm11, %v1258_v8, 4294967295  ;;  %v18974_v22 = vcvt.f32.s32 %v12204_v33 }
 0x187   :  { %v1180_v14 = vmul.u32 %v1153_v61, %v1116_v10  ;;  %v10301_v30 = vtrunc.f32 %v967_v46  ;;  %v18975_v48 = vcvt.f32.s32 %v12217_v25  ;;  %vm12362_vm5 = vcmp.lt.s32.totalorder %v10298_v60, 6 }
 0x188   :  { %vm1195_vm13 = vcmp.gt.s32.totalorder %v1179_v27, 0  ;;  %vm1008_vm2 = vcmp.lt.s32.totalorder %v10296_v54, 6  ;;  %v1121_v12 = vsub.s32 %v1003_v51, %v18974_v22  ;;  %v10267_v61 = vtrunc.f32 %v934_v29 }
 0x189   :  { %v1155_v20 = vpop.permute.xlu1 %1154  ;;  %v1275_v58 = vsel %vm1195_vm13, %v1259_v7, 4294967295  ;;  %vm12329_vm0 = vcmp.gt.s32.totalorder %v1180_v14, 0  ;;  %v1009_v32 = vsel %vm1008_vm2, %v10296_v54, 6  ;;  %v1265_v24 = vadd.s32 %v12224_v57, %v12247_v1 }
 0x18a   :  { %v1181_v21 = vmul.u32 %v1155_v20, %v1117_v26  ;;  %v1157_v10 = vpop.permute.xlu0 %1156  ;;  %1300 = vperm.xlu0 %10758, %v1275_v58   ;;  %1297 = vperm.xlu1 %10759, %v1274_v50   ;;  %v18971_v26 = vcvt.f32.s32 %v12186_v9  ;;  %v1276_v5 = vsel %vm12329_vm0, %v1260_v31, 4294967295  ;;  %v10302_v7 = vcvt.f32.s32 %v10301_v30  ;;  %v18984_v50 = vld [vmem:[#allocation148_spill] sm:$0xff] }
 0x18b   :  { %v1182_v6 = vmul.u32 %v1157_v10, %v1118_v52  ;;  %v1262_v52 = vadd.s32 %v12174_v36, %v12184_v18  ;;  %v10300_v18 = vcvt.f32.s32 %v10299_v63  ;;  %v935_v36 = vfloor.f32 %v12316_v17  ;;  %v18992_v63 = vld [vmem:[#allocation152_spill] sm:$0xff] }
 0x18c   :  { %vm1197_vm1 = vcmp.gt.s32.totalorder %v1181_v21, 0  ;;  %v1120_v28 = vsub.s32 %v1001_v41, %v18971_v26  ;;  %v1123_v14 = vsub.s32 %v1007_v55, %v18980_v37  ;;  %v18981_v17 = vcvt.f32.s32 %v12226_v2  ;;  %v18987_v21 = vld [vmem:[#allocation147_spill] sm:$0xff] }
 0x18d   :  { %v1159_v19 = vpop.permute.xlu1 %1158  ;;  %v1277_v34 = vsel %vm1197_vm1, %v1261_v62, 4294967295  ;;  %vm12349_vm3 = vcmp.gt.s32.totalorder %v1182_v6, 0  ;;  %v1011_v44 = vsel %vm12362_vm5, %v10298_v60, 6  ;;  %vm1012_vm8 = vcmp.lt.s32.totalorder %v10300_v18, 6 }
 0x18e   :  { %v1183_v13 = vmul.u32 %v1159_v19, %v1119_v45  ;;  %v1161_v9 = vpop.permute.xlu0 %1160  ;;  %1306 = vperm.xlu0 %10758, %v1277_v34   ;;  %1303 = vperm.xlu1 %10759, %v1276_v5   ;;  %v1122_v45 = vsub.s32 %v1005_v35, %v18975_v48  ;;  %v1278_v47 = vsel %vm12349_vm3, %v1262_v52, 4294967295  ;;  %v1124_v41 = vsub.s32 %v1009_v32, %v18981_v17  ;;  %v18990_v19 = vld [vmem:[#allocation151_spill] sm:$0xff]  ;;  %v18991_v34 = vld [vmem:[#allocation150_spill] sm:$0xff] }
 0x18f   :  { %v1184_v0 = vmul.u32 %v1161_v9, %v1120_v28  ;;  %v10269_v56 = vtrunc.f32 %v935_v36  ;;  %v1221_v57 = vmul.u32 7, %v10266_v39  ;;  %v10268_v2 = vcvt.f32.s32 %v10267_v61  ;;  %v504_v36 = vld [vmem:[%s18550_s0 + $0x8] sm:$0xff]  ;;  %v509_v61 = vld [vmem:[%s18550_s0 + $0x30] sm:$0xff] }
 0x190   :  { %vm1199_vm4 = vcmp.gt.s32.totalorder %v1183_v13, 0  ;;  %v1266_v59 = vadd.s32 %v18985_v11, %v18984_v50  ;;  %v1267_v10 = vadd.s32 %v18987_v21, %v18986_v15  ;;  %vm1014_vm10 = vcmp.lt.s32.totalorder %v10302_v7, 6 }
 0x191   :  { %v1163_v33 = vpop.permute.xlu1 %1162  ;;  %v1279_v40 = vsel %vm1199_vm4, %v1263_v23, 4294967295  ;;  %vm12370_vm6 = vcmp.gt.s32.totalorder %v1184_v0, 0  ;;  %v1125_v60 = vsub.s32 %v1011_v44, %v10266_v39  ;;  %v1013_v31 = vsel %vm1012_vm8, %v10300_v18, 6  ;;  %v503_v18 = vld [vmem:[%s18550_s0] sm:$0xff]  ;;  %v505_v39 = vld [vmem:[%s18550_s0 + $0x10] sm:$0xff] }
 0x192   :  { %v1185_v25 = vmul.u32 %v1163_v33, %v1121_v12  ;;  %v1165_v27 = vpop.permute.xlu0 %1164  ;;  %1312 = vperm.xlu0 %10758, %v1279_v40   ;;  %1309 = vperm.xlu1 %10759, %v1278_v47   ;;  %v1280_v38 = vsel %vm12370_vm6, %v1264_v42, 4294967295  ;;  %v10270_v26 = vcvt.f32.s32 %v10269_v56  ;;  %v1015_v55 = vsel %vm1014_vm10, %v10302_v7, 6  ;;  %v510_v42 = vld [vmem:[%s18550_s0 + $0x38] sm:$0xff] }
 0x193   :  { %v1186_v8 = vmul.u32 %v1165_v27, %v1122_v45  ;;  %v1268_v5 = vadd.s32 %v18991_v34, %v18990_v19  ;;  %v1269_v49 = vadd.s32 %v18992_v63, %v1221_v57  ;;  %v1126_v13 = vsub.s32 %v1013_v31, %v10268_v2  ;;  %v508_v27 = vld [vmem:[%s18550_s0 + $0x28] sm:$0xff] }
 0x194   :  { %vm1201_vm7 = vcmp.gt.s32.totalorder %v1185_v25, 0  ;;  %v1127_v12 = vsub.s32 %v1015_v55, %v10270_v26  ;;  %v1222_v0 = vmul.u32 7, %v10268_v2  ;;  %v1223_v32 = vmul.u32 7, %v10270_v26  ;;  %v507_v25 = vld [vmem:[%s18550_s0 + $0x20] sm:$0xff] }
 0x195   :  { %v1167_v54 = vpop.permute.xlu1 %1166  ;;  %v1281_v20 = vsel %vm1201_vm7, %v1265_v24, 4294967295  ;;  %vm12386_vm9 = vcmp.gt.s32.totalorder %v1186_v8, 0  ;;  %vm519_vm0 = vcmask 23552   ;;  %v511_v24 = vld [vmem:[%s18550_s0 + $0x40] sm:$0xff] }
 0x196   :  { %v1187_v16 = vmul.u32 %v1167_v54, %v1123_v14  ;;  %v1169_v58 = vpop.permute.xlu0 %1168  ;;  %1318 = vperm.xlu0 %10758, %v1281_v20   ;;  %1315 = vperm.xlu1 %10759, %v1280_v38   ;;  %v1282_v46 = vsel %vm12386_vm9, %v1266_v59, 4294967295  ;;  %520 = vst.msk [vmem:[%s18555_s5] sm:$0xff] %vm519_vm0, %v503_v18  ;;  %521 = vst.msk [vmem:[%s18555_s5 + $0x8] sm:$0xff] %vm519_vm0, %v504_v36 }
 0x197   :  { %v1188_v51 = vmul.u32 %v1169_v58, %v1124_v41  ;;  %522 = vst.msk [vmem:[%s18555_s5 + $0x10] sm:$0xff] %vm519_vm0, %v505_v39  ;;  %523 = vst.msk [vmem:[%s18555_s5 + $0x18] sm:$0xff] %vm519_vm0, %v506_v43 }
 0x198   :  { %vm1203_vm11 = vcmp.gt.s32.totalorder %v1187_v16, 0  ;;  %524 = vst.msk [vmem:[%s18555_s5 + $0x20] sm:$0xff] %vm519_vm0, %v507_v25  ;;  %525 = vst.msk [vmem:[%s18555_s5 + $0x28] sm:$0xff] %vm519_vm0, %v508_v27 }
 0x199   :  { %v1171_v62 = vpop.permute.xlu1 %1170  ;;  %v1283_v6 = vsel %vm1203_vm11, %v1267_v10, 4294967295  ;;  %vm12396_vm12 = vcmp.gt.s32.totalorder %v1188_v51, 0 }
 0x19a   :  { %v1189_v35 = vmul.u32 %v1171_v62, %v1125_v60  ;;  %1324 = vperm.xlu0 %10758, %v1283_v6   ;;  %1321 = vperm.xlu1 %10759, %v1282_v46   ;;  %v1173_v9 = vpop.permute.xlu0 %1172  ;;  %v1284_v23 = vsel %vm12396_vm12, %v1268_v5, 4294967295 }
 0x19b   :  { %v1190_v22 = vmul.u32 %v1173_v9, %v1126_v13 }
 0x19c   :  { %vm1205_vm13 = vcmp.gt.s32.totalorder %v1189_v35, 0 }
 0x19d   :  { %v1175_v29 = vpop.permute.xlu1 %1174  ;;  %v1285_v52 = vsel %vm1205_vm13, %v1269_v49, 4294967295  ;;  %vm1206_vm14 = vcmp.gt.s32.totalorder %v1190_v22, 0 }
 0x19e   :  { %1330 = vperm.xlu0 %10758, %v1285_v52   ;;  %1327 = vperm.xlu1 %10759, %v1284_v23   ;;  %v1191_v30 = vmul.u32 %v1175_v29, %v1127_v12  ;;  %v1253_v48 = vpop.permute.xlu0 %1252 }
 0x19f   :  { %v1270_v45 = vadd.s32 %v1253_v48, %v1222_v0 }
 0x1a0   :  { %vm1207_vm15 = vcmp.gt.s32.totalorder %v1191_v30, 0 }
 0x1a1   :  { %v1255_v3 = vpop.permute.xlu1 %1254  ;;  %v1286_v40 = vsel %vm1206_vm14, %v1270_v45, 4294967295 }
 0x1a2   :  { %v1271_v33 = vadd.s32 %v1255_v3, %v1223_v32  ;;  %1333 = vperm.xlu1 %10759, %v1286_v40  }
 0x1a4   :  { %v1287_v47 = vsel %vm1207_vm15, %v1271_v33, 4294967295 }
 0x1a5   :  { %1336 = vperm.xlu0 %10758, %v1287_v47  }
 0x1a6   :  { %10841 = shalt.err (!%p10838_p2)  }
 0x1a7   :  { %s10842_s10 = scalar_lea.vmem %s500_s22, 50176  ;;  %p10847_p4 = scmp.lt.s32.totalorder %s500_s22, %s500_s22 }
 0x1a8   :  { %p10843_p3 = scmp.ne.s32.totalorder %s500_s22, %s10842_s10  ;;  %p10848_p5 = scmp.lt.s32.totalorder %s10842_s10, %s10842_s10 }
 0x1aa   :  { %p10849_p6 = por %p10848_p5, %p10847_p4 }
 0x1ac   :  { %p10850_p7 = pnand %p10849_p6, %p10843_p3 }
 0x1ae   :  { %10853 = shalt.err (!%p10850_p7)  }
 0x1af   :  { %502 = dma.hbm_to_vmem [thread:$0]  %s18551_s1, 50176, %s500_s22, [#allocation6]  ;;  %v512_v8 = vld [vmem:[%s18550_s0 + $0x48] sm:$0xff]  ;;  %v513_v7 = vld [vmem:[%s18550_s0 + $0x50] sm:$0xff]  ;;  %v514_v37 = vld [vmem:[%s18550_s0 + $0x58] sm:$0xff]  ;;  %526 = vst.msk [vmem:[%s18555_s5 + $0x30] sm:$0xff] %vm519_vm0, %v509_v61  ;;  %v1288_v54 = vlaneseq }
 0x1b0   :  { %527 = vst.msk [vmem:[%s18555_s5 + $0x38] sm:$0xff] %vm519_vm0, %v510_v42  ;;  %528 = vst.msk [vmem:[%s18555_s5 + $0x40] sm:$0xff] %vm519_vm0, %v511_v24  ;;  %v515_v14 = vld [vmem:[%s18550_s0 + $0x60] sm:$0xff]  ;;  %v516_v17 = vld [vmem:[%s18550_s0 + $0x68] sm:$0xff]  ;;  %v18683_v56 = vmov 0.0  }
 0x1b1   :  { %v517_v41 = vld [vmem:[%s18550_s0 + $0x70] sm:$0xff]  ;;  %529 = vst.msk [vmem:[%s18555_s5 + $0x48] sm:$0xff] %vm519_vm0, %v512_v8  ;;  %530 = vst.msk [vmem:[%s18555_s5 + $0x50] sm:$0xff] %vm519_vm0, %v513_v7  ;;  %v518_v44 = vld [vmem:[%s18550_s0 + $0x78] sm:$0xff]  ;;  %v12529_v20 = vand.u32 127, %v1288_v54 }
 0x1b2   :  { %531 = vst.msk [vmem:[%s18555_s5 + $0x58] sm:$0xff] %vm519_vm0, %v514_v37  ;;  %532 = vst.msk [vmem:[%s18555_s5 + $0x60] sm:$0xff] %vm519_vm0, %v515_v14  ;;  %v18993_v52 = vld [vmem:[#allocation117_spill] sm:$0xff]  ;;  %v18994_v0 = vld [vmem:[#allocation116_spill] sm:$0xff] }
 0x1b3   :  { %533 = vst.msk [vmem:[%s18555_s5 + $0x68] sm:$0xff] %vm519_vm0, %v516_v17  ;;  %534 = vst.msk [vmem:[%s18555_s5 + $0x70] sm:$0xff] %vm519_vm0, %v517_v41  ;;  %v1868_v23 = vmul.f32 0.0625, %v18993_v52  ;;  %v1866_v30 = vmul.f32 0.0625, %v18994_v0  ;;  %v18995_v48 = vld [vmem:[#allocation119_spill] sm:$0xff]  ;;  %v18996_v32 = vld [vmem:[#allocation118_spill] sm:$0xff] }
 0x1b4   :  { %535 = vst.msk [vmem:[%s18555_s5 + $0x78] sm:$0xff] %vm519_vm0, %v518_v44  ;;  %v1869_v45 = vmul.f32 0.0625, %v18995_v48  ;;  %v1867_v3 = vmul.f32 0.0625, %v18996_v32 }
 0x202   :  { %v1292_v38 = vpop.permute.xlu0 %1291 }
 0x203   :  { %vm1338_vm1 = vcmp.eq.s32.totalorder %v12529_v20, %v1292_v38 }
 0x204   :  { %v12533_v57 = vsel %vm1338_vm1, 1.0, %v18683_v56 }
 0x205   :  { %v1295_v1 = vpop.permute.xlu1 %1294 }
 0x206   :  { %vm1339_vm2 = vcmp.eq.s32.totalorder %v12529_v20, %v1295_v1 }
 0x207   :  { %v12537_v16 = vsel %vm1339_vm2, 1.0, %v18683_v56 }
 0x209   :  { %v1298_v58 = vpop.permute.xlu1 %1297  ;;  %v1301_v2 = vpop.permute.xlu0 %1300 }
 0x20a   :  { %vm1340_vm3 = vcmp.eq.s32.totalorder %v12529_v20, %v1298_v58  ;;  %vm1341_vm4 = vcmp.eq.s32.totalorder %v12529_v20, %v1301_v2 }
 0x20b   :  { %v12542_v50 = vsel %vm1340_vm3, 1.0, %v18683_v56  ;;  %v12545_v11 = vsel %vm1341_vm4, 1.0, %v18683_v56 }
 0x20d   :  { %v1304_v59 = vpop.permute.xlu1 %1303  ;;  %v1307_v15 = vpop.permute.xlu0 %1306 }
 0x20e   :  { %vm1342_vm5 = vcmp.eq.s32.totalorder %v12529_v20, %v1304_v59  ;;  %vm1343_vm6 = vcmp.eq.s32.totalorder %v12529_v20, %v1307_v15 }
 0x20f   :  { %v12550_v21 = vsel %vm1342_vm5, 1.0, %v18683_v56  ;;  %v12553_v10 = vsel %vm1343_vm6, 1.0, %v18683_v56 }
 0x211   :  { %v1310_v51 = vpop.permute.xlu1 %1309  ;;  %v1313_v60 = vpop.permute.xlu0 %1312 }
 0x212   :  { %vm1344_vm7 = vcmp.eq.s32.totalorder %v12529_v20, %v1310_v51  ;;  %vm1345_vm8 = vcmp.eq.s32.totalorder %v12529_v20, %v1313_v60 }
 0x213   :  { %v12558_v31 = vsel %vm1344_vm7, 1.0, %v18683_v56  ;;  %v12561_v62 = vsel %vm1345_vm8, 1.0, %v18683_v56 }
 0x215   :  { %v1316_v6 = vpop.permute.xlu1 %1315  ;;  %v1319_v46 = vpop.permute.xlu0 %1318 }
 0x216   :  { %vm1346_vm9 = vcmp.eq.s32.totalorder %v12529_v20, %v1316_v6  ;;  %vm1347_vm10 = vcmp.eq.s32.totalorder %v12529_v20, %v1319_v46 }
 0x217   :  { %v12566_v26 = vsel %vm1346_vm9, 1.0, %v18683_v56  ;;  %v12569_v28 = vsel %vm1347_vm10, 1.0, %v18683_v56 }
 0x219   :  { %v1322_v35 = vpop.permute.xlu1 %1321  ;;  %v1325_v55 = vpop.permute.xlu0 %1324 }
 0x21a   :  { %vm1348_vm11 = vcmp.eq.s32.totalorder %v12529_v20, %v1322_v35  ;;  %vm1349_vm12 = vcmp.eq.s32.totalorder %v12529_v20, %v1325_v55 }
 0x21b   :  { %v12574_v19 = vsel %vm1348_vm11, 1.0, %v18683_v56  ;;  %v12577_v34 = vsel %vm1349_vm12, 1.0, %v18683_v56 }
 0x21d   :  { %v1328_v5 = vpop.permute.xlu1 %1327  ;;  %v1331_v63 = vpop.permute.xlu0 %1330 }
 0x21e   :  { %vm1350_vm13 = vcmp.eq.s32.totalorder %v12529_v20, %v1328_v5  ;;  %vm1351_vm14 = vcmp.eq.s32.totalorder %v12529_v20, %v1331_v63 }
 0x21f   :  { %v12582_v49 = vsel %vm1350_vm13, 1.0, %v18683_v56  ;;  %v12585_v13 = vsel %vm1351_vm14, 1.0, %v18683_v56 }
 0x221   :  { %v1334_v9 = vpop.permute.xlu1 %1333 }
 0x222   :  { %vm1352_vm15 = vcmp.eq.s32.totalorder %v12529_v20, %v1334_v9 }
 0x223   :  { %v12589_v22 = vsel %vm1352_vm15, 1.0, %v18683_v56 }
 0x224   :  { %v1337_v12 = vpop.permute.xlu0 %1336 }
 0x225   :  { %vm1353_vm0 = vcmp.eq.s32.totalorder %v12529_v20, %v1337_v12 }
 0x226   :  { %v12593_v29 = vsel %vm1353_vm0, 1.0, %v18683_v56 }
 0x227   :  { %10854 = dma.done.wait [#allocation6 + $0x3], 3584 }
 0x228   :  { %10855 = vsyncadd [#allocation6 + $0x3], 4294963712  ;;  %1528 = vmatprep.mubr.f32.mxu0 %v18683_v56  ;;  %1689 = vmatprep.mubr.f32.mxu1 %v18683_v56  ;;  %v18997_v33 = vld [vmem:[#allocation121_spill] sm:$0xff]  ;;  %v18998_v47 = vld [vmem:[#allocation120_spill] sm:$0xff]  ;;  %v19001_v27 = vmov 1   ;;  %v1980_v61 = vfloor.f32 %v1868_v23  ;;  %v2012_v42 = vceil.f32 %v1868_v23  ;;  %v1978_v24 = vfloor.f32 %v1866_v30 }
 0x229   :  { %v1871_v40 = vmul.f32 0.0625, %v18997_v33  ;;  %v1870_v18 = vmul.f32 0.0625, %v18998_v47  ;;  %v18999_v36 = vld [vmem:[#allocation123_spill] sm:$0xff]  ;;  %v19000_v43 = vld [vmem:[#allocation122_spill] sm:$0xff]  ;;  %10827 = vset.pattern.permute.xlu1 %v19001_v27  ;;  %10826 = vset.pattern.permute.xlu0 %v19001_v27  ;;  %v2010_v8 = vceil.f32 %v1866_v30  ;;  %v1981_v7 = vfloor.f32 %v1869_v45  ;;  %v1396_v47 = vld [vmem:[#allocation5 + $0xb0] sm:$0xff] }
 0x22a   :  { %v1873_v39 = vmul.f32 0.0625, %v18999_v36  ;;  %v1872_v25 = vmul.f32 0.0625, %v19000_v43  ;;  %v2013_v37 = vceil.f32 %v1869_v45  ;;  %v1979_v14 = vfloor.f32 %v1867_v3  ;;  %v1394_v43 = vld [vmem:[#allocation5 + $0xa0] sm:$0xff]  ;;  %v1392_v36 = vld [vmem:[#allocation5 + $0x90] sm:$0xff]  ;;  %v19010_v33 = vld [vmem:[#allocation131_spill] sm:$0xff] }
 0x22b   :  { %v2011_v17 = vceil.f32 %v1867_v3  ;;  %v12607_v41 = vtrunc.f32 %v1980_v61  ;;  %v10467_v44 = vtrunc.f32 %v2012_v42  ;;  %v12609_v54 = vtrunc.f32 %v1978_v24 }
 0x22c   :  { %v10463_v38 = vtrunc.f32 %v2010_v8  ;;  %v12611_v1 = vtrunc.f32 %v1981_v7  ;;  %v10469_v58 = vtrunc.f32 %v2013_v37  ;;  %v12613_v2 = vtrunc.f32 %v1979_v14 }
 0x22d   :  { %v10465_v59 = vtrunc.f32 %v2011_v17  ;;  %v18678_v15 = vcvt.f32.s32 %v12607_v41  ;;  %v10468_v51 = vcvt.f32.s32 %v10467_v44  ;;  %v18680_v60 = vcvt.f32.s32 %v12609_v54 }
 0x22e   :  { %v10464_v6 = vcvt.f32.s32 %v10463_v38  ;;  %v18679_v46 = vcvt.f32.s32 %v12611_v1  ;;  %v10470_v35 = vcvt.f32.s32 %v10469_v58  ;;  %v18682_v55 = vcvt.f32.s32 %v12613_v2 }
 0x22f   :  { %v10466_v5 = vcvt.f32.s32 %v10465_v59  ;;  %vm2046_vm1 = vcmp.lt.s32.totalorder %v10468_v51, 13  ;;  %v1983_v63 = vfloor.f32 %v1871_v40  ;;  %v2015_v9 = vceil.f32 %v1871_v40 }
 0x230   :  { %vm2042_vm2 = vcmp.lt.s32.totalorder %v10464_v6, 13  ;;  %v2047_v12 = vsel %vm2046_vm1, %v10468_v51, 13  ;;  %vm2048_vm3 = vcmp.lt.s32.totalorder %v10470_v35, 13  ;;  %v1982_v7 = vfloor.f32 %v1870_v18 }
 0x231   :  { %v2043_v23 = vsel %vm2042_vm2, %v10464_v6, 13  ;;  %vm2044_vm4 = vcmp.lt.s32.totalorder %v10466_v5, 13  ;;  %v2092_v30 = vsub.s32 %v2047_v12, %v18678_v15  ;;  %v2049_v3 = vsel %vm2048_vm3, %v10470_v35, 13  ;;  %v19002_v12 = vld [vmem:[#allocation125_spill] sm:$0xff] }
 0x232   :  { %v2090_v45 = vsub.s32 %v2043_v23, %v18680_v60  ;;  %v2045_v61 = vsel %vm2044_vm4, %v10466_v5, 13  ;;  %v2093_v42 = vsub.s32 %v2049_v3, %v18679_v46  ;;  %v12627_v8 = vtrunc.f32 %v1983_v63  ;;  %v1379_v3 = vld [vmem:[#allocation5 + $0x28] sm:$0xff]  ;;  %v1378_v46 = vld [vmem:[#allocation5 + $0x20] sm:$0xff]  ;;  %v1376_v60 = vld [vmem:[#allocation5 + $0x10] sm:$0xff] }
 0x233   :  { %v2091_v24 = vsub.s32 %v2045_v61, %v18682_v55  ;;  %v10473_v40 = vtrunc.f32 %v2015_v9  ;;  %2110 = vrot.lane.b32.xlu1 %v2092_v30, %s10864_s4  ;;  %v2014_v37 = vceil.f32 %v1870_v18  ;;  %v1985_v14 = vfloor.f32 %v1873_v39 }
 0x234   :  { %2106 = vrot.lane.b32.xlu0 %v2090_v45, %s10864_s4  ;;  %v2017_v17 = vceil.f32 %v1873_v39  ;;  %v18677_v44 = vcvt.f32.s32 %v12627_v8  ;;  %v1984_v58 = vfloor.f32 %v1872_v25  ;;  %v2016_v59 = vceil.f32 %v1872_v25  ;;  %v1375_v45 = vld [vmem:[#allocation5 + $0x8] sm:$0xff] }
 0x235   :  { %v10474_v38 = vcvt.f32.s32 %v10473_v40  ;;  %v12632_v51 = vtrunc.f32 %v1982_v7  ;;  %v10471_v6 = vtrunc.f32 %v2014_v37  ;;  %v12634_v35 = vtrunc.f32 %v1985_v14 }
 0x236   :  { %v10477_v5 = vtrunc.f32 %v2017_v17  ;;  %v12636_v63 = vtrunc.f32 %v1984_v58  ;;  %v10475_v9 = vtrunc.f32 %v2016_v59  ;;  %v1875_v23 = vmul.f32 0.0625, %v19002_v12  ;;  %v19003_v17 = vld [vmem:[#allocation124_spill] sm:$0xff]  ;;  %v1377_v59 = vld [vmem:[#allocation5 + $0x18] sm:$0xff]  ;;  %v1387_v12 = vld [vmem:[#allocation5 + $0x68] sm:$0xff] }
 0x237   :  { %vm2052_vm5 = vcmp.lt.s32.totalorder %v10474_v38, 13  ;;  %2112 = vrot.lane.b32.xlu1 %v2093_v42, %s10864_s4  ;;  %v18681_v39 = vcvt.f32.s32 %v12632_v51  ;;  %v10472_v25 = vcvt.f32.s32 %v10471_v6  ;;  %v18685_v30 = vcvt.f32.s32 %v12634_v35  ;;  %v1381_v6 = vld [vmem:[#allocation5 + $0x38] sm:$0xff] }
 0x238   :  { %2108 = vrot.lane.b32.xlu0 %v2091_v24, %s10864_s4  ;;  %v2053_v18 = vsel %vm2052_vm5, %v10474_v38, 13  ;;  %v10478_v40 = vcvt.f32.s32 %v10477_v5  ;;  %v18686_v7 = vcvt.f32.s32 %v12636_v63  ;;  %v10476_v37 = vcvt.f32.s32 %v10475_v9  ;;  %v1374_v9 = vld [vmem:[#allocation5] sm:$0xff] }
 0x239   :  { %v2095_v61 = vsub.s32 %v2053_v18, %v18677_v44  ;;  %vm2050_vm6 = vcmp.lt.s32.totalorder %v10472_v25, 13  ;;  %v1987_v14 = vfloor.f32 %v1875_v23  ;;  %v2019_v42 = vceil.f32 %v1875_v23 }
 0x23a   :  { %v1874_v24 = vmul.f32 0.0625, %v19003_v17  ;;  %v2051_v38 = vsel %vm2050_vm6, %v10472_v25, 13  ;;  %vm2056_vm7 = vcmp.lt.s32.totalorder %v10478_v40, 13  ;;  %vm2054_vm8 = vcmp.lt.s32.totalorder %v10476_v37, 13 }
 0x23b   :  { %v9667_v58 = vpack.c.bf16 %v1379_v3, %v1375_v45  ;;  %2116 = vrot.lane.b32.xlu1 %v2095_v61, %s10864_s4  ;;  %v2094_v18 = vsub.s32 %v2051_v38, %v18681_v39  ;;  %v2057_v5 = vsel %vm2056_vm7, %v10478_v40, 13  ;;  %v2055_v44 = vsel %vm2054_vm8, %v10476_v37, 13  ;;  %v1380_v61 = vld [vmem:[#allocation5 + $0x30] sm:$0xff]  ;;  %v19004_v38 = vld [vmem:[#allocation127_spill] sm:$0xff] }
 0x23c   :  { %v12650_v15 = vtrunc.f32 %v1987_v14  ;;  %v2097_v23 = vsub.s32 %v2057_v5, %v18685_v30  ;;  %v2096_v25 = vsub.s32 %v2055_v44, %v18686_v7  ;;  %v10481_v45 = vtrunc.f32 %v2019_v42  ;;  %v19005_v5 = vld [vmem:[#allocation126_spill] sm:$0xff] }
 0x23d   :  { %v1986_v3 = vfloor.f32 %v1874_v24  ;;  %9668 = vmatprep.subr.bf16.mxu0 %v9667_v58  ;;  %2114 = vrot.lane.b32.xlu0 %v2094_v18, %s10864_s4  ;;  %v2018_v37 = vceil.f32 %v1874_v24  ;;  %v9679_v14 = vpack.c.bf16 %v1381_v6, %v1377_v59  ;;  %v1877_v39 = vmul.f32 0.0625, %v19004_v38  ;;  %v1383_v18 = vld [vmem:[#allocation5 + $0x48] sm:$0xff]  ;;  %v1382_v24 = vld [vmem:[#allocation5 + $0x40] sm:$0xff] }
 0x23e   :  { %v18687_v40 = vcvt.f32.s32 %v12650_v15  ;;  %v10482_v55 = vcvt.f32.s32 %v10481_v45  ;;  %v1876_v30 = vmul.f32 0.0625, %v19005_v5  ;;  %v9669_v17 = vpack.c.bf16 %v1378_v46, %v1374_v9  ;;  %v1385_v45 = vld [vmem:[#allocation5 + $0x58] sm:$0xff] }
 0x23f   :  { %v12659_v56 = vtrunc.f32 %v1986_v3  ;;  %2120 = vrot.lane.b32.xlu1 %v2097_v23, %s10864_s4  ;;  %v10479_v44 = vtrunc.f32 %v2018_v37  ;;  %9680 = vmatprep.subr.bf16.mxu1 %v9679_v14  ;;  %v1989_v42 = vfloor.f32 %v1877_v39  ;;  %v2021_v58 = vceil.f32 %v1877_v39  ;;  %v1389_v3 = vld [vmem:[#allocation5 + $0x78] sm:$0xff] }
 0x240   :  { %v9681_v7 = vpack.c.bf16 %v1380_v61, %v1376_v60  ;;  %vm2060_vm9 = vcmp.lt.s32.totalorder %v10482_v55, 13  ;;  %v1988_v59 = vfloor.f32 %v1876_v30  ;;  %v2020_v6 = vceil.f32 %v1876_v30  ;;  %9670 = vmatpush1.bf16.msra.mxu0 %v9669_v17  ;;  %v1386_v30 = vld [vmem:[#allocation5 + $0x60] sm:$0xff] }
 0x241   :  { %2118 = vrot.lane.b32.xlu0 %v2096_v25, %s10864_s4  ;;  %v2061_v46 = vsel %vm2060_vm9, %v10482_v55, 13  ;;  %v10480_v9 = vcvt.f32.s32 %v10479_v44  ;;  %v12665_v23 = vtrunc.f32 %v1989_v42  ;;  %v10485_v37 = vtrunc.f32 %v2021_v58  ;;  %v19006_v42 = vld [vmem:[#allocation129_spill] sm:$0xff]  ;;  %v1395_v44 = vld [vmem:[#allocation5 + $0xa8] sm:$0xff] }
 0x242   :  { %9682 = vmatpush1.bf16.msra.mxu1 %v9681_v7  ;;  %v2099_v60 = vsub.s32 %v2061_v46, %v18687_v40  ;;  %v12669_v39 = vtrunc.f32 %v1988_v59  ;;  %v10483_v61 = vtrunc.f32 %v2020_v6  ;;  %v9671_v14 = vpack.c.bf16 %v1387_v12, %v1383_v18  ;;  %v19008_v12 = vld [vmem:[#allocation128_spill] sm:$0xff] }
 0x243   :  { %vm2058_vm10 = vcmp.lt.s32.totalorder %v10480_v9, 13  ;;  %v18688_v17 = vcvt.f32.s32 %v12665_v23  ;;  %v10486_v5 = vcvt.f32.s32 %v10485_v37  ;;  %v9683_v25 = vpack.c.bf16 %v1389_v3, %v1385_v45  ;;  %v1384_v40 = vld [vmem:[#allocation5 + $0x50] sm:$0xff]  ;;  %v1391_v45 = vld [vmem:[#allocation5 + $0x88] sm:$0xff] }
 0x244   :  { %2124 = vrot.lane.b32.xlu1 %v2099_v60, %s10864_s4  ;;  %v2059_v55 = vsel %vm2058_vm10, %v10480_v9, 13  ;;  %v10484_v7 = vcvt.f32.s32 %v10483_v61  ;;  %9672 = vmatprep.subr.bf16.mxu0 %v9671_v14  ;;  %v1879_v58 = vmul.f32 0.0625, %v19006_v42  ;;  %v19007_v59 = vcvt.f32.s32 %v12659_v56  ;;  %v1388_v37 = vld [vmem:[#allocation5 + $0x70] sm:$0xff]  ;;  %v1393_v61 = vld [vmem:[#allocation5 + $0x98] sm:$0xff] }
 0x245   :  { %vm2064_vm11 = vcmp.lt.s32.totalorder %v10486_v5, 13  ;;  %9684 = vmatprep.subr.bf16.mxu1 %v9683_v25  ;;  %v1878_v18 = vmul.f32 0.0625, %v19008_v12  ;;  %v9673_v46 = vpack.c.bf16 %v1386_v30, %v1382_v24  ;;  %v1397_v14 = vld [vmem:[#allocation5 + $0xb8] sm:$0xff]  ;;  %v1390_v24 = vld [vmem:[#allocation5 + $0x80] sm:$0xff]  ;;  %v19009_v30 = vcvt.f32.s32 %v12669_v39 }
 0x246   :  { %v2098_v6 = vsub.s32 %v2059_v55, %v19007_v59  ;;  %v2065_v3 = vsel %vm2064_vm11, %v10486_v5, 13  ;;  %vm2062_vm12 = vcmp.lt.s32.totalorder %v10484_v7, 13  ;;  %v1991_v9 = vfloor.f32 %v1879_v58 }
 0x247   :  { %v2023_v60 = vceil.f32 %v1879_v58  ;;  %v2101_v55 = vsub.s32 %v2065_v3, %v18688_v17  ;;  %v2063_v59 = vsel %vm2062_vm12, %v10484_v7, 13  ;;  %v1990_v25 = vfloor.f32 %v1878_v18  ;;  %9674 = vmatpush1.bf16.msra.mxu0 %v9673_v46 }
 0x248   :  { %2122 = vrot.lane.b32.xlu0 %v2098_v6, %s10864_s4  ;;  %v2022_v42 = vceil.f32 %v1878_v18  ;;  %v2100_v12 = vsub.s32 %v2063_v59, %v19009_v30  ;;  %v12683_v5 = vtrunc.f32 %v1991_v9  ;;  %v9685_v58 = vpack.c.bf16 %v1388_v37, %v1384_v40  ;;  %v19011_v9 = vld [vmem:[#allocation130_spill] sm:$0xff] }
 0x249   :  { %v10489_v38 = vtrunc.f32 %v2023_v60  ;;  %2128 = vrot.lane.b32.xlu1 %v2101_v55, %s10864_s4  ;;  %v12686_v6 = vtrunc.f32 %v1990_v25  ;;  %v9675_v7 = vpack.c.bf16 %v1395_v44, %v1391_v45  ;;  %v9687_v17 = vpack.c.bf16 %v1397_v14, %v1393_v61  ;;  %v1399_v25 = vld [vmem:[#allocation5 + $0xc8] sm:$0x1] }
 0x24a   :  { %v10487_v3 = vtrunc.f32 %v2022_v42  ;;  %v10458_v18 = vcvt.f32.s32 %v12683_v5  ;;  %9686 = vmatpush1.bf16.msra.mxu1 %v9685_v58  ;;  %v1881_v59 = vmul.f32 0.0625, %v19010_v33  ;;  %v1880_v30 = vmul.f32 0.0625, %v19011_v9 }
 0x24b   :  { %v10490_v46 = vcvt.f32.s32 %v10489_v38  ;;  %v10456_v40 = vcvt.f32.s32 %v12686_v6  ;;  %9676 = vmatprep.subr.bf16.mxu0 %v9675_v7  ;;  %v9677_v60 = vpack.c.bf16 %v1394_v43, %v1390_v24  ;;  %v9689_v55 = vpack.c.bf16 %v1396_v47, %v1392_v36  ;;  %9688 = vmatprep.subr.bf16.mxu1 %v9687_v17  ;;  %v1401_v38 = vld [vmem:[#allocation5 + $0xd8] sm:$0x1]  ;;  %v1398_v47 = vld [vmem:[#allocation5 + $0xc0] sm:$0x1]  ;;  %v1400_v7 = vld [vmem:[#allocation5 + $0xd0] sm:$0x1] }
 0x24c   :  { %2126 = vrot.lane.b32.xlu0 %v2100_v12, %s10864_s4  ;;  %v10488_v37 = vcvt.f32.s32 %v10487_v3  ;;  %v1993_v44 = vfloor.f32 %v1881_v59  ;;  %v2025_v42 = vceil.f32 %v1881_v59  ;;  %v1992_v45 = vfloor.f32 %v1880_v30 }
 0x24d   :  { %vm2068_vm13 = vcmp.lt.s32.totalorder %v10490_v46, 13  ;;  %v2024_v14 = vceil.f32 %v1880_v30  ;;  %9678 = vmatpush1.bf16.msra.mxu0 %v9677_v60  ;;  %vm1451_vm15 = vcmask 1040384   ;;  %vm1402_vm0 = vcmask 400384  }
 0x24e   :  { %v2069_v61 = vsel %vm2068_vm13, %v10490_v46, 13  ;;  %vm2066_vm14 = vcmp.lt.s32.totalorder %v10488_v37, 13  ;;  %v12695_v3 = vtrunc.f32 %v1993_v44  ;;  %v10493_v43 = vtrunc.f32 %v2025_v42  ;;  %9690 = vmatpush1.bf16.msra.mxu1 %v9689_v55  ;;  %7771 = vmatprep.subr.msk.mxu0 %vm1451_vm15, %v1399_v25 }
 0x24f   :  { %v2103_v12 = vsub.s32 %v2069_v61, %v10458_v18  ;;  %v2067_v58 = vsel %vm2066_vm14, %v10488_v37, 13  ;;  %v12700_v17 = vtrunc.f32 %v1992_v45  ;;  %v10491_v24 = vtrunc.f32 %v2024_v14  ;;  %7789 = vmatprep.subr.msk.mxu1 %vm1451_vm15, %v1401_v38  ;;  %v19030_v61 = vld [vmem:[#allocation136_spill] sm:$0xff] }
 0x250   :  { %v2102_v36 = vsub.s32 %v2067_v58, %v10456_v40  ;;  %v10462_v46 = vcvt.f32.s32 %v12695_v3  ;;  %v10494_v59 = vcvt.f32.s32 %v10493_v43  ;;  %v19012_v55 = vmov 0.0  }
 0x251   :  { %2132 = vrot.lane.b32.xlu1 %v2103_v12, %s10864_s4  ;;  %v10460_v30 = vcvt.f32.s32 %v12700_v17  ;;  %v10492_v37 = vcvt.f32.s32 %v10491_v24  ;;  %7772 = vmatpush1.msk.msra.mxu0 %vm1451_vm15, %v1398_v47  ;;  %v19014_v45 = vcvt.f32.s32 %v12609_v54  ;;  %v19018_v54 = vcvt.f32.s32 %v12632_v51 }
 0x252   :  { %2130 = vrot.lane.b32.xlu0 %v2102_v36, %s10864_s4  ;;  %vm2072_vm1 = vcmp.lt.s32.totalorder %v10494_v59, 13  ;;  %7790 = vmatpush1.msk.msra.mxu1 %vm1451_vm15, %v1400_v7  ;;  %v1854_v14 = vmul.f32 0.0625, %v19030_v61 }
 0x253   :  { %7773 = vmatmul.mubr.msk.f32.vlgmr.msra.gmra.mrb[0].mxu0 %vm1402_vm0, %v12533_v57  ;;  %v2073_v60 = vsel %vm2072_vm1, %v10494_v59, 13  ;;  %vm2070_vm2 = vcmp.lt.s32.totalorder %v10492_v37, 13  ;;  %7791 = vmatmul.mubr.msk.f32.vlgmr.msra.gmra.mrb[0].mxu1 %vm1402_vm0, %v12533_v57  ;;  %v19013_v57 = vcvt.f32.s32 %v12613_v2  ;;  %v19016_v2 = vcvt.f32.s32 %v12607_v41 }
 0x254   :  { %1534 = vmatprep.mubr.f32.mxu0 %v19012_v55  ;;  %v2105_v25 = vsub.s32 %v2073_v60, %v10462_v46  ;;  %v2071_v44 = vsel %vm2070_vm2, %v10492_v37, 13  ;;  %1695 = vmatprep.mubr.f32.mxu1 %v19012_v55  ;;  %v19020_v41 = vcvt.f32.s32 %v12636_v63  ;;  %v1918_v59 = vceil.f32 %v1854_v14 }
 0x255   :  { %v2104_v42 = vsub.s32 %v2071_v44, %v10460_v30 }
 0x256   :  { %2136 = vrot.lane.b32.xlu1 %v2105_v25, %s10864_s4 }
 0x257   :  { %7774 = vmatmul.mubr.msk.f32.gmra.mrb[2].mxu0 %vm1402_vm0, %v12537_v16  ;;  %2134 = vrot.lane.b32.xlu0 %v2104_v42, %s10864_s4 }
 0x258   :  { %7792 = vmatmul.mubr.msk.f32.gmra.mrb[2].mxu1 %vm1402_vm0, %v12537_v16  ;;  %1540 = vmatprep.mubr.f32.mxu0 %v19012_v55  ;;  %v19015_v16 = vcvt.f32.s32 %v12611_v1  ;;  %v19022_v1 = vcvt.f32.s32 %v12659_v56  ;;  %v19025_v56 = vld [vmem:[#allocation133_spill] sm:$0xff] }
 0x259   :  { %1701 = vmatprep.mubr.f32.mxu1 %v19012_v55 }
 0x25a   :  { %2188 = vrot.lane.b32.xlu1 %v19013_v57, %s10864_s4 }
 0x25b   :  { %7775 = vmatmul.mubr.msk.f32.gmra.mrb[4].mxu0 %vm1402_vm0, %v12542_v50  ;;  %2186 = vrot.lane.b32.xlu0 %v19014_v45, %s10864_s4  ;;  %v19035_v45 = vld [vmem:[#allocation139_spill] sm:$0xff] }
 0x25c   :  { %7793 = vmatmul.mubr.msk.f32.gmra.mrb[4].mxu1 %vm1402_vm0, %v12542_v50  ;;  %1546 = vmatprep.mubr.f32.mxu0 %v19012_v55  ;;  %v19017_v50 = vcvt.f32.s32 %v12627_v8  ;;  %v19028_v8 = vld [vmem:[#allocation134_spill] sm:$0xff] }
 0x25d   :  { %1707 = vmatprep.mubr.f32.mxu1 %v19012_v55  ;;  %v1851_v51 = vmul.f32 0.0625, %v19028_v8  ;;  %v19042_v8 = vld [vmem:[#allocation145_spill] sm:$0xff] }
 0x25e   :  { %2192 = vrot.lane.b32.xlu1 %v19015_v16, %s10864_s4  ;;  %v1857_v16 = vmul.f32 0.0625, %v19035_v45 }
 0x25f   :  { %7776 = vmatmul.mubr.msk.f32.gmra.mrb[6].mxu0 %vm1402_vm0, %v12545_v11  ;;  %2190 = vrot.lane.b32.xlu0 %v19016_v2, %s10864_s4  ;;  %v1915_v6 = vceil.f32 %v1851_v51  ;;  %v1883_v57 = vfloor.f32 %v1851_v51  ;;  %v19039_v51 = vld [vmem:[#allocation143_spill] sm:$0xff] }
 0x260   :  { %7794 = vmatmul.mubr.msk.f32.gmra.mrb[6].mxu1 %vm1402_vm0, %v12545_v11  ;;  %1552 = vmatprep.mubr.f32.mxu0 %v19012_v55  ;;  %v19019_v11 = vcvt.f32.s32 %v12634_v35  ;;  %v1889_v44 = vfloor.f32 %v1857_v16 }
 0x261   :  { %1713 = vmatprep.mubr.f32.mxu1 %v19012_v55  ;;  %v10401_v17 = vtrunc.f32 %v1915_v6  ;;  %v1921_v6 = vceil.f32 %v1857_v16 }
 0x262   :  { %2196 = vrot.lane.b32.xlu1 %v19017_v50, %s10864_s4 }
 0x263   :  { %7777 = vmatmul.mubr.msk.f32.gmra.mrb[8].mxu0 %vm1402_vm0, %v12550_v21  ;;  %2194 = vrot.lane.b32.xlu0 %v19018_v54, %s10864_s4  ;;  %v10402_v2 = vcvt.f32.s32 %v10401_v17 }
 0x264   :  { %7795 = vmatmul.mubr.msk.f32.gmra.mrb[8].mxu1 %vm1402_vm0, %v12550_v21  ;;  %1558 = vmatprep.mubr.f32.mxu0 %v19012_v55  ;;  %v19021_v21 = vcvt.f32.s32 %v12650_v15  ;;  %v19024_v15 = vcvt.f32.s32 %v12669_v39 }
 0x265   :  { %1719 = vmatprep.mubr.f32.mxu1 %v19012_v55  ;;  %vm1948_vm6 = vcmp.lt.s32.totalorder %v10402_v2, 13 }
 0x266   :  { %2200 = vrot.lane.b32.xlu1 %v19019_v11, %s10864_s4  ;;  %v19036_v11 = vld [vmem:[#allocation138_spill] sm:$0xff] }
 0x267   :  { %7778 = vmatmul.mubr.msk.f32.gmra.mrb[10].mxu0 %vm1402_vm0, %v12553_v10  ;;  %2198 = vrot.lane.b32.xlu0 %v19020_v41, %s10864_s4  ;;  %v1856_v41 = vmul.f32 0.0625, %v19036_v11  ;;  %v12936_v11 = vtrunc.f32 %v1889_v44 }
 0x268   :  { %7796 = vmatmul.mubr.msk.f32.gmra.mrb[10].mxu1 %vm1402_vm0, %v12553_v10  ;;  %1564 = vmatprep.mubr.f32.mxu0 %v19012_v55  ;;  %v19023_v10 = vcvt.f32.s32 %v12665_v23 }
 0x269   :  { %1725 = vmatprep.mubr.f32.mxu1 %v19012_v55 }
 0x26a   :  { %2204 = vrot.lane.b32.xlu1 %v19021_v21, %s10864_s4  ;;  %v19037_v21 = vld [vmem:[#allocation141_spill] sm:$0xff] }
 0x26b   :  { %7779 = vmatmul.mubr.msk.f32.gmra.mrb[12].mxu0 %vm1402_vm0, %v12558_v31  ;;  %2202 = vrot.lane.b32.xlu0 %v19022_v1, %s10864_s4  ;;  %v12897_v1 = vmul.f32 0.0625, %v19037_v21  ;;  %v19040_v21 = vld [vmem:[#allocation142_spill] sm:$0xff] }
 0x26c   :  { %7797 = vmatmul.mubr.msk.f32.gmra.mrb[12].mxu1 %vm1402_vm0, %v12558_v31  ;;  %1570 = vmatprep.mubr.f32.mxu0 %v19012_v55  ;;  %v1852_v31 = vmul.f32 0.0625, %v19025_v56 }
 0x26d   :  { %1731 = vmatprep.mubr.f32.mxu1 %v19012_v55  ;;  %v1923_v17 = vceil.f32 %v12897_v1 }
 0x26e   :  { %2208 = vrot.lane.b32.xlu1 %v19023_v10, %s10864_s4  ;;  %v1884_v63 = vfloor.f32 %v1852_v31 }
 0x26f   :  { %7780 = vmatmul.mubr.msk.f32.gmra.mrb[14].mxu0 %vm1402_vm0, %v12561_v62  ;;  %2206 = vrot.lane.b32.xlu0 %v19024_v15, %s10864_s4  ;;  %v10407_v15 = vtrunc.f32 %v1918_v59 }
 0x270   :  { %7798 = vmatmul.mubr.msk.f32.gmra.mrb[14].mxu1 %vm1402_vm0, %v12561_v62  ;;  %1576 = vmatprep.mubr.f32.mxu0 %v19012_v55  ;;  %v19026_v62 = vld [vmem:[#allocation132_spill] sm:$0xff]  ;;  %v12871_v12 = vtrunc.f32 %v1884_v63 }
 0x271   :  { %1737 = vmatprep.mubr.f32.mxu1 %v19012_v55 }
 0x272   :  { %2212 = vrot.lane.b32.xlu1 %v10458_v18, %s10864_s4  ;;  %v19029_v18 = vld [vmem:[#allocation137_spill] sm:$0xff] }
 0x273   :  { %7781 = vmatmul.mubr.msk.f32.gmra.mrb[16].mxu0 %vm1402_vm0, %v12566_v26  ;;  %2210 = vrot.lane.b32.xlu0 %v10456_v40, %s10864_s4  ;;  %v1855_v40 = vmul.f32 0.0625, %v19029_v18 }
 0x274   :  { %7799 = vmatmul.mubr.msk.f32.gmra.mrb[16].mxu1 %vm1402_vm0, %v12566_v26  ;;  %1582 = vmatprep.mubr.f32.mxu0 %v19012_v55  ;;  %v1850_v26 = vmul.f32 0.0625, %v19026_v62 }
 0x275   :  { %1743 = vmatprep.mubr.f32.mxu1 %v19012_v55  ;;  %v1919_v24 = vceil.f32 %v1855_v40  ;;  %v1887_v10 = vfloor.f32 %v1855_v40 }
 0x276   :  { %2216 = vrot.lane.b32.xlu1 %v10462_v46, %s10864_s4  ;;  %v1882_v58 = vfloor.f32 %v1850_v26 }
 0x277   :  { %7782 = vmatmul.mubr.msk.f32.gmra.mrb[18].mxu0 %vm1402_vm0, %v12569_v28  ;;  %2214 = vrot.lane.b32.xlu0 %v10460_v30, %s10864_s4  ;;  %v18689_v30 = vcvt.f32.s32 %v12871_v12  ;;  %v10409_v50 = vtrunc.f32 %v1919_v24  ;;  %v10408_v24 = vcvt.f32.s32 %v10407_v15  ;;  %v10413_v15 = vtrunc.f32 %v1921_v6 }
 0x278   :  { %7800 = vmatmul.mubr.msk.f32.gmra.mrb[18].mxu1 %vm1402_vm0, %v12569_v28  ;;  %1588 = vmatprep.mubr.f32.mxu0 %v19012_v55  ;;  %v19027_v28 = vld [vmem:[#allocation135_spill] sm:$0xff]  ;;  %v12878_v37 = vtrunc.f32 %v1882_v58 }
 0x279   :  { %1749 = vmatprep.mubr.f32.mxu1 %v19012_v55  ;;  %v10410_v58 = vcvt.f32.s32 %v10409_v50  ;;  %vm1954_vm8 = vcmp.lt.s32.totalorder %v10408_v24, 13  ;;  %v10414_v6 = vcvt.f32.s32 %v10413_v15 }
 0x27a   :  { %v1955_v16 = vsel %vm1954_vm8, %v10408_v24, 13 }
 0x27b   :  { %7783 = vmatmul.mubr.msk.f32.gmra.mrb[20].mxu0 %vm1402_vm0, %v12574_v19  ;;  %vm1956_vm7 = vcmp.lt.s32.totalorder %v10410_v58, 13  ;;  %vm1960_vm9 = vcmp.lt.s32.totalorder %v10414_v6, 13 }
 0x27c   :  { %7801 = vmatmul.mubr.msk.f32.gmra.mrb[20].mxu1 %vm1402_vm0, %v12574_v19  ;;  %1594 = vmatprep.mubr.f32.mxu0 %v19012_v55  ;;  %v1853_v19 = vmul.f32 0.0625, %v19027_v28 }
 0x27d   :  { %1755 = vmatprep.mubr.f32.mxu1 %v19012_v55 }
 0x27e   :  { %v1917_v35 = vceil.f32 %v1853_v19  ;;  %v1885_v3 = vfloor.f32 %v1853_v19  ;;  %v18690_v19 = vcvt.f32.s32 %v12878_v37 }
 0x27f   :  { %7784 = vmatmul.mubr.msk.f32.gmra.mrb[22].mxu0 %vm1402_vm0, %v12577_v34 }
 0x280   :  { %7802 = vmatmul.mubr.msk.f32.gmra.mrb[22].mxu1 %vm1402_vm0, %v12577_v34  ;;  %1600 = vmatprep.mubr.f32.mxu0 %v19012_v55  ;;  %v10405_v38 = vtrunc.f32 %v1917_v35  ;;  %v12880_v60 = vtrunc.f32 %v1885_v3  ;;  %v1861_v35 = vmul.f32 0.0625, %v19039_v51  ;;  %v1920_v3 = vceil.f32 %v1856_v41 }
 0x281   :  { %1761 = vmatprep.mubr.f32.mxu1 %v19012_v55  ;;  %v1949_v51 = vsel %vm1948_vm6, %v10402_v2, 13  ;;  %v1957_v2 = vsel %vm1956_vm7, %v10410_v58, 13 }
 0x282   :  { %v10406_v46 = vcvt.f32.s32 %v10405_v38  ;;  %v1893_v61 = vfloor.f32 %v1861_v35 }
 0x283   :  { %7785 = vmatmul.mubr.msk.f32.gmra.mrb[24].mxu0 %vm1402_vm0, %v12582_v49 }
 0x284   :  { %7803 = vmatmul.mubr.msk.f32.gmra.mrb[24].mxu1 %vm1402_vm0, %v12582_v49  ;;  %1606 = vmatprep.mubr.f32.mxu0 %v19012_v55  ;;  %vm1952_vm5 = vcmp.lt.s32.totalorder %v10406_v46, 13  ;;  %v12963_v15 = vtrunc.f32 %v1893_v61 }
 0x285   :  { %1767 = vmatprep.mubr.f32.mxu1 %v19012_v55  ;;  %v1953_v38 = vsel %vm1952_vm5, %v10406_v46, 13 }
 0x287   :  { %7786 = vmatmul.mubr.msk.f32.gmra.mrb[26].mxu0 %vm1402_vm0, %v12585_v13 }
 0x288   :  { %7804 = vmatmul.mubr.msk.f32.gmra.mrb[26].mxu1 %vm1402_vm0, %v12585_v13  ;;  %1612 = vmatprep.mubr.f32.mxu0 %v19012_v55  ;;  %v1916_v13 = vceil.f32 %v1852_v31  ;;  %v19038_v31 = vld [vmem:[#allocation140_spill] sm:$0xff] }
 0x289   :  { %1773 = vmatprep.mubr.f32.mxu1 %v19012_v55 }
 0x28b   :  { %7787 = vmatmul.mubr.msk.f32.gmra.mrb[28].mxu0 %vm1402_vm0, %v12589_v22 }
 0x28c   :  { %7805 = vmatmul.mubr.msk.f32.gmra.mrb[28].mxu1 %vm1402_vm0, %v12589_v22  ;;  %1618 = vmatprep.mubr.f32.mxu0 %v19012_v55  ;;  %v1914_v22 = vceil.f32 %v1850_v26  ;;  %v1858_v26 = vmul.f32 0.0625, %v19038_v31 }
 0x28d   :  { %1779 = vmatprep.mubr.f32.mxu1 %v19012_v55 }
 0x28e   :  { %v10399_v5 = vtrunc.f32 %v1914_v22  ;;  %v1886_v22 = vfloor.f32 %v1854_v14  ;;  %v12912_v14 = vtrunc.f32 %v1887_v10  ;;  %v1922_v59 = vceil.f32 %v1858_v26 }
 0x28f   :  { %7788 = vmatmul.mubr.msk.f32.gmra.mrb[30].mxu0 %vm1402_vm0, %v12593_v29 }
 0x290   :  { %7806 = vmatmul.mubr.msk.f32.gmra.mrb[30].mxu1 %vm1402_vm0, %v12593_v29  ;;  %v10403_v29 = vtrunc.f32 %v1916_v13  ;;  %v10400_v36 = vcvt.f32.s32 %v10399_v5  ;;  %v18691_v13 = vcvt.f32.s32 %v12880_v60  ;;  %v12907_v5 = vtrunc.f32 %v1883_v57 }
 0x291   :  { %v1925_v57 = vceil.f32 %v1861_v35 }
 0x292   :  { %v10404_v47 = vcvt.f32.s32 %v10403_v29  ;;  %vm12888_vm4 = vcmp.lt.s32.totalorder %v10400_v36, 13  ;;  %v12928_v50 = vsub.s32 %v1953_v38, %v18691_v13  ;;  %v1888_v38 = vfloor.f32 %v1856_v41 }
 0x293   :  { %v1947_v29 = vsel %vm12888_vm4, %v10400_v36, 13  ;;  %v12918_v36 = vtrunc.f32 %v1886_v22  ;;  %v10417_v22 = vtrunc.f32 %v1923_v17  ;;  %v10421_v13 = vtrunc.f32 %v1925_v57 }
 0x294   :  { %vm12884_vm3 = vcmp.lt.s32.totalorder %v10404_v47, 13  ;;  %v12924_v46 = vsub.s32 %v1947_v29, %v18690_v19  ;;  %v1860_v29 = vmul.f32 0.0625, %v19040_v21  ;;  %v1890_v17 = vfloor.f32 %v1858_v26 }
 0x295   :  { %v1951_v63 = vsel %vm12884_vm3, %v10404_v47, 13  ;;  %v19041_v18 = vcvt.f32.s32 %v12907_v5  ;;  %v1863_v41 = vmul.f32 0.0625, %v19042_v8  ;;  %v19043_v57 = vcvt.f32.s32 %v12912_v14 }
 0x296   :  { %v12916_v47 = vsub.s32 %v1951_v63, %v18689_v30  ;;  %v10411_v63 = vtrunc.f32 %v1920_v3  ;;  %v10415_v30 = vtrunc.f32 %v1922_v59  ;;  %v1891_v3 = vfloor.f32 %v12897_v1 }
 0x297   :  { %v10418_v59 = vcvt.f32.s32 %v10417_v22  ;;  %v12943_v21 = vsub.s32 %v1949_v51, %v19041_v18  ;;  %v1924_v44 = vceil.f32 %v1860_v29  ;;  %v12948_v28 = vsub.s32 %v1957_v2, %v19043_v57 }
 0x298   :  { %v10412_v45 = vcvt.f32.s32 %v10411_v63  ;;  %v10416_v19 = vcvt.f32.s32 %v10415_v30  ;;  %v12951_v1 = vtrunc.f32 %v1888_v38  ;;  %v10422_v26 = vcvt.f32.s32 %v10421_v13 }
 0x299   :  { %v19044_v24 = vcvt.f32.s32 %v12918_v36  ;;  %v12957_v18 = vtrunc.f32 %v1891_v3  ;;  %v12959_v30 = vtrunc.f32 %v1890_v17  ;;  %vm1964_vm11 = vcmp.lt.s32.totalorder %v10418_v59, 13  ;;  %v19045_v3 = vld [vmem:[#allocation144_spill] sm:$0xff] }
 0x29a   :  { %vm1958_vm10 = vcmp.lt.s32.totalorder %v10412_v45, 13  ;;  %v1892_v63 = vfloor.f32 %v1860_v29  ;;  %vm1962_vm12 = vcmp.lt.s32.totalorder %v10416_v19, 13  ;;  %v10419_v13 = vtrunc.f32 %v1924_v44 }
 0x29b   :  { %v12955_v35 = vsub.s32 %v1955_v16, %v19044_v24  ;;  %v1895_v38 = vfloor.f32 %v1863_v41  ;;  %v1927_v2 = vceil.f32 %v1863_v41  ;;  %v1961_v16 = vsel %vm1960_vm9, %v10414_v6, 13 }
 0x29c   :  { %vm1968_vm13 = vcmp.lt.s32.totalorder %v10422_v26, 13  ;;  %v1862_v17 = vmul.f32 0.0625, %v19045_v3  ;;  %v1959_v24 = vsel %vm1958_vm10, %v10412_v45, 13  ;;  %v18694_v58 = vcvt.f32.s32 %v12957_v18 }
 0x29d   :  { %v1965_v8 = vsel %vm1964_vm11, %v10418_v59, 13  ;;  %v1963_v62 = vsel %vm1962_vm12, %v10416_v19, 13  ;;  %v12972_v56 = vtrunc.f32 %v1892_v63  ;;  %v1865_v44 = vmul.f32 0.0625, %v12294_v4 }
 0x29e   :  { %v1969_v41 = vsel %vm1968_vm13, %v10422_v26, 13  ;;  %v10420_v6 = vcvt.f32.s32 %v10419_v13  ;;  %v12975_v9 = vtrunc.f32 %v1895_v38  ;;  %v12977_v57 = vtrunc.f32 %v1927_v2 }
 0x29f   :  { %v19046_v45 = vcvt.f32.s32 %v12936_v11  ;;  %v19047_v19 = vcvt.f32.s32 %v12951_v1  ;;  %v1926_v63 = vceil.f32 %v1862_v17  ;;  %v19048_v26 = vcvt.f32.s32 %v12907_v5 }
 0x2a0   :  { %v12997_v2 = vsub.s32 %v1965_v8, %v18694_v58  ;;  %v19051_v5 = vcvt.f32.s32 %v12963_v15  ;;  %vm13012_vm14 = vcmp.lt.s32.totalorder %v10420_v6, 13 }
 0x2a1   :  { %v12983_v59 = vsub.s32 %v1961_v16, %v19046_v45  ;;  %v12987_v61 = vsub.s32 %v1959_v24, %v19047_v19  ;;  %v2171_v13 = vmul.u32 14, %v19048_v26  ;;  %v19049_v16 = vcvt.f32.s32 %v12959_v30 }
 0x2a2   :  { %v19050_v24 = vcvt.f32.s32 %v12878_v37  ;;  %v13009_v26 = vsub.s32 %v1969_v41, %v19051_v5  ;;  %v1929_v37 = vceil.f32 %v1865_v44  ;;  %v10423_v58 = vtrunc.f32 %v1926_v63 }
 0x2a3   :  { %v13001_v45 = vsub.s32 %v1963_v62, %v19049_v16  ;;  %v10426_v16 = vcvt.f32.s32 %v12977_v57  ;;  %v19054_v5 = vcvt.f32.s32 %v12880_v60  ;;  %v19055_v62 = vcvt.f32.s32 %v12871_v12 }
 0x2a4   :  { %v2170_v19 = vmul.u32 14, %v19050_v24  ;;  %v1897_v63 = vfloor.f32 %v1865_v44  ;;  %v13033_v60 = vtrunc.f32 %v1929_v37 }
 0x2a5   :  { %v12860_v34 = vpop.permute.xlu1 %2110  ;;  %v2172_v27 = vmul.u32 14, %v19055_v62  ;;  %vm13048_vm3 = vcmp.lt.s32.totalorder %v10426_v16, 13 }
 0x2a6   :  { %v12862_v49 = vpop.permute.xlu0 %2106  ;;  %v2140_v57 = vmul.u32 %v12860_v34, %v12916_v47  ;;  %v19074_v47 = vcvt.f32.s32 %v12959_v30 }
 0x2a7   :  { %v2138_v4 = vmul.u32 %v12862_v49, %v12924_v46  ;;  %v13019_v49 = vmul.f32 0.0625, %v12287_v53 }
 0x2a8   :  { %vm2156_vm2 = vcmp.gt.s32.totalorder %v2140_v57, 0 }
 0x2a9   :  { %v12865_v23 = vpop.permute.xlu1 %2112  ;;  %vm2154_vm0 = vcmp.gt.s32.totalorder %v2138_v4, 0  ;;  %v1928_v12 = vceil.f32 %v13019_v49  ;;  %v19056_v4 = vcvt.f32.s32 %v12912_v14 }
 0x2aa   :  { %v12867_v39 = vpop.permute.xlu0 %2108 }
 0x2ab   :  { %v2139_v38 = vmul.u32 %v12867_v39, %v12943_v21  ;;  %v1894_v21 = vfloor.f32 %v1862_v17  ;;  %v2173_v39 = vmul.u32 14, %v19054_v5 }
 0x2ac   :  { %v2141_v17 = vmul.u32 %v12865_v23, %v12928_v50  ;;  %v10424_v50 = vcvt.f32.s32 %v10423_v58  ;;  %v2175_v34 = vmul.u32 14, %v19056_v4  ;;  %v19071_v4 = vcvt.f32.s32 %v12957_v18 }
 0x2ad   :  { %v12873_v43 = vpop.permute.xlu1 %2116  ;;  %vm2155_vm15 = vcmp.gt.s32.totalorder %v2139_v38, 0 }
 0x2ae   :  { %vm13038_vm1 = vcmp.gt.s32.totalorder %v2141_v17, 0  ;;  %v2143_v44 = vmul.u32 %v12873_v43, %v12948_v28  ;;  %v13058_v28 = vtrunc.f32 %v1897_v63  ;;  %vm13061_vm4 = vcmp.lt.s32.totalorder %v10424_v50, 13 }
 0x2af   :  { %v12875_v7 = vpop.permute.xlu0 %2114 }
 0x2b0   :  { %v2142_v58 = vmul.u32 %v12875_v7, %v12955_v35  ;;  %v10427_v7 = vtrunc.f32 %v1928_v12  ;;  %vm13067_vm5 = vcmp.gt.s32.totalorder %v2143_v44, 0  ;;  %v1973_v12 = vsel %vm13048_vm3, %v10426_v16, 13 }
 0x2b1   :  { %v12882_v25 = vpop.permute.xlu1 %2120  ;;  %v2178_v44 = vmul.u32 14, %v19074_v47 }
 0x2b2   :  { %v2145_v57 = vmul.u32 %v12882_v25, %v12983_v59  ;;  %vm2158_vm6 = vcmp.gt.s32.totalorder %v2142_v58, 0  ;;  %v1971_v25 = vsel %vm13061_vm4, %v10424_v50, 13 }
 0x2b3   :  { %v12893_v54 = vpop.permute.xlu0 %2118 }
 0x2b4   :  { %vm13091_vm8 = vcmp.gt.s32.totalorder %v2145_v57, 0 }
 0x2b6   :  { %v12909_v40 = vpop.permute.xlu1 %2124 }
 0x2ba   :  { %v12920_v42 = vpop.permute.xlu0 %2122 }
 0x2bb   :  { %v12932_v31 = vpop.permute.xlu1 %2128 }
 0x2be   :  { %v12938_v10 = vpop.permute.xlu0 %2126 }
 0x2c3   :  { %v12961_v51 = vpop.permute.xlu1 %2132 }
 0x2c4   :  { %v12965_v22 = vpop.permute.xlu0 %2130 }
 0x2c8   :  { %v12979_v3 = vpop.permute.xlu1 %2136 }
 0x2c9   :  { %v12989_v29 = vpop.permute.xlu0 %2134 }
 0x2cc   :  { %v2189_v24 = vpop.permute.xlu1 %2188 }
 0x2cd   :  { %v2219_v46 = vadd.s32 %v2189_v24, %v2171_v13  ;;  %v2187_v41 = vpop.permute.xlu0 %2186  ;;  %v1967_v13 = vsel %vm13012_vm14, %v10420_v6, 13  ;;  %v13031_v24 = vtrunc.f32 %v1894_v21  ;;  %v19062_v21 = vcvt.f32.s32 %v12972_v56 }
 0x2ce   :  { %v2218_v33 = vadd.s32 %v2187_v41, %v2170_v19 }
 0x2cf   :  { %v2235_v53 = vsel %vm2155_vm15, %v2219_v46, 4294967295  ;;  %v13056_v8 = vsub.s32 %v1967_v13, %v19062_v21  ;;  %v19065_v46 = vcvt.f32.s32 %v12936_v11  ;;  %v19068_v13 = vcvt.f32.s32 %v12951_v1 }
 0x2d0   :  { %v2193_v5 = vpop.permute.xlu1 %2192  ;;  %2255 = vperm.xlu1 %10827, %v2235_v53   ;;  %v2234_v23 = vsel %vm2154_vm0, %v2218_v33, 4294967295  ;;  %v19059_v53 = vcvt.f32.s32 %v12918_v36 }
 0x2d1   :  { %v2221_v38 = vadd.s32 %v2193_v5, %v2173_v39  ;;  %v2191_v19 = vpop.permute.xlu0 %2190  ;;  %2252 = vperm.xlu0 %10826, %v2234_v23   ;;  %v2177_v41 = vmul.u32 14, %v19065_v46  ;;  %v2144_v5 = vmul.u32 %v12893_v54, %v12987_v61  ;;  %v1896_v23 = vfloor.f32 %v13019_v49 }
 0x2d2   :  { %v2220_v6 = vadd.s32 %v2191_v19, %v2172_v27  ;;  %v2174_v33 = vmul.u32 14, %v19059_v53  ;;  %v10430_v27 = vcvt.f32.s32 %v13033_v60  ;;  %v2176_v60 = vmul.u32 14, %v19068_v13 }
 0x2d3   :  { %v2237_v14 = vsel %vm13038_vm1, %v2221_v38, 4294967295  ;;  %v10392_v38 = vcvt.f32.s32 %v13031_v24  ;;  %v10428_v54 = vcvt.f32.s32 %v10427_v7  ;;  %v2147_v24 = vmul.u32 %v12909_v40, %v12997_v2 }
 0x2d4   :  { %v2197_v43 = vpop.permute.xlu1 %2196  ;;  %v2236_v36 = vsel %vm2156_vm2, %v2220_v6, 4294967295  ;;  %vm13085_vm7 = vcmp.lt.s32.totalorder %v10430_v27, 13  ;;  %vm2160_vm9 = vcmp.gt.s32.totalorder %v2144_v5, 0  ;;  %v2146_v6 = vmul.u32 %v12920_v42, %v13001_v45 }
 0x2d5   :  { %v2223_v35 = vadd.s32 %v2197_v43, %v2175_v34  ;;  %v2195_v37 = vpop.permute.xlu0 %2194  ;;  %2258 = vperm.xlu1 %10827, %v2236_v36   ;;  %2261 = vperm.xlu0 %10826, %v2237_v14   ;;  %v2179_v34 = vmul.u32 14, %v19071_v4  ;;  %v10395_v53 = vtrunc.f32 %v1896_v23  ;;  %v2086_v39 = vsub.s32 %v1971_v25, %v10392_v38 }
 0x2d6   :  { %v2222_v63 = vadd.s32 %v2195_v37, %v2174_v33  ;;  %v19075_v33 = vcvt.f32.s32 %v12975_v9  ;;  %v10398_v14 = vcvt.f32.s32 %v13058_v28  ;;  %v1977_v30 = vsel %vm13085_vm7, %v10430_v27, 13 }
 0x2d7   :  { %v2239_v11 = vsel %vm13067_vm5, %v2223_v35, 4294967295  ;;  %vm1974_vm10 = vcmp.lt.s32.totalorder %v10428_v54, 13  ;;  %v19076_v42 = vcvt.f32.s32 %v12963_v15  ;;  %vm2163_vm11 = vcmp.gt.s32.totalorder %v2147_v24, 0 }
 0x2d8   :  { %v2201_v59 = vpop.permute.xlu1 %2200  ;;  %v2238_v1 = vsel %vm2158_vm6, %v2222_v63, 4294967295  ;;  %v2087_v58 = vsub.s32 %v1973_v12, %v19075_v33  ;;  %v2149_v36 = vmul.u32 %v12932_v31, %v13009_v26  ;;  %v19077_v28 = vcvt.f32.s32 %v12972_v56 }
 0x2d9   :  { %v2225_v61 = vadd.s32 %v2201_v59, %v2177_v41  ;;  %v2199_v49 = vpop.permute.xlu0 %2198  ;;  %2264 = vperm.xlu1 %10827, %v2238_v1   ;;  %2267 = vperm.xlu0 %10826, %v2239_v11   ;;  %v2181_v45 = vmul.u32 14, %v19076_v42  ;;  %vm2162_vm12 = vcmp.gt.s32.totalorder %v2146_v6, 0  ;;  %v2148_v27 = vmul.u32 %v12938_v10, %v13056_v8 }
 0x2da   :  { %v2224_v50 = vadd.s32 %v2199_v49, %v2176_v60  ;;  %v2180_v7 = vmul.u32 14, %v19077_v28  ;;  %v10396_v35 = vcvt.f32.s32 %v10395_v53  ;;  %v1975_v46 = vsel %vm1974_vm10, %v10428_v54, 13 }
 0x2db   :  { %v2241_v18 = vsel %vm13091_vm8, %v2225_v61, 4294967295  ;;  %v2089_v57 = vsub.s32 %v1977_v30, %v10398_v14  ;;  %v19078_v31 = vmov %v19075_v33  ;;  %vm2165_vm13 = vcmp.gt.s32.totalorder %v2149_v36, 0 }
 0x2dc   :  { %v2205_v21 = vpop.permute.xlu1 %2204  ;;  %v2240_v40 = vsel %vm2160_vm9, %v2224_v50, 4294967295  ;;  %v2183_v26 = vmul.u32 14, %v19078_v31  ;;  %v2151_v56 = vmul.u32 %v12961_v51, %v2087_v58  ;;  %vm2164_vm14 = vcmp.gt.s32.totalorder %v2148_v27, 0 }
 0x2dd   :  { %v2227_v2 = vadd.s32 %v2205_v21, %v2179_v34  ;;  %v2203_v43 = vpop.permute.xlu0 %2202  ;;  %2270 = vperm.xlu1 %10827, %v2240_v40   ;;  %2273 = vperm.xlu0 %10826, %v2241_v18   ;;  %v2182_v60 = vmul.u32 14, %v10392_v38  ;;  %v2150_v10 = vmul.u32 %v12965_v22, %v2086_v39  ;;  %v2088_v8 = vsub.s32 %v1975_v46, %v10396_v35 }
 0x2de   :  { %v2226_v62 = vadd.s32 %v2203_v43, %v2178_v44  ;;  %v2185_v59 = vmul.u32 14, %v10398_v14  ;;  %vm2167_vm15 = vcmp.gt.s32.totalorder %v2151_v56, 0  ;;  %v2153_v9 = vmul.u32 %v12979_v3, %v2089_v57 }
 0x2df   :  { %v2243_v37 = vsel %vm2163_vm11, %v2227_v2, 4294967295  ;;  %v2184_v19 = vmul.u32 14, %v10396_v35  ;;  %vm2166_vm0 = vcmp.gt.s32.totalorder %v2150_v10, 0  ;;  %v2152_v51 = vmul.u32 %v12989_v29, %v2088_v8 }
 0x2e0   :  { %v2209_v41 = vpop.permute.xlu1 %2208  ;;  %v2242_v17 = vsel %vm2162_vm12, %v2226_v62, 4294967295  ;;  %vm2169_vm1 = vcmp.gt.s32.totalorder %v2153_v9, 0 }
 0x2e1   :  { %v2229_v15 = vadd.s32 %v2209_v41, %v2181_v45  ;;  %v2207_v63 = vpop.permute.xlu0 %2206  ;;  %2276 = vperm.xlu1 %10827, %v2242_v17   ;;  %2279 = vperm.xlu0 %10826, %v2243_v37   ;;  %vm2168_vm2 = vcmp.gt.s32.totalorder %v2152_v51, 0 }
 0x2e2   :  { %v2228_v13 = vadd.s32 %v2207_v63, %v2180_v7 }
 0x2e3   :  { %v2245_v5 = vsel %vm2165_vm13, %v2229_v15, 4294967295 }
 0x2e4   :  { %v2213_v23 = vpop.permute.xlu1 %2212  ;;  %v2244_v11 = vsel %vm2164_vm14, %v2228_v13, 4294967295 }
 0x2e5   :  { %v2231_v12 = vadd.s32 %v2213_v23, %v2183_v26  ;;  %v2211_v25 = vpop.permute.xlu0 %2210  ;;  %2282 = vperm.xlu1 %10827, %v2244_v11   ;;  %2285 = vperm.xlu0 %10826, %v2245_v5   ;;  %v13240_v5 = vadd.s32 128, %v12529_v20 }
 0x2e6   :  { %v2230_v1 = vadd.s32 %v2211_v25, %v2182_v60 }
 0x2e7   :  { %v2247_v38 = vsel %vm2167_vm15, %v2231_v12, 4294967295  ;;  %19079 = vst [vmem:[#allocation148_spill] sm:$0xff] %v13240_v5 }
 0x2e8   :  { %v2217_v54 = vpop.permute.xlu1 %2216  ;;  %v2246_v22 = vsel %vm2166_vm0, %v2230_v1, 4294967295 }
 0x2e9   :  { %v2233_v61 = vadd.s32 %v2217_v54, %v2185_v59  ;;  %v2215_v49 = vpop.permute.xlu0 %2214  ;;  %2288 = vperm.xlu1 %10827, %v2246_v22   ;;  %2291 = vperm.xlu0 %10826, %v2247_v38  }
 0x2ea   :  { %v2232_v4 = vadd.s32 %v2215_v49, %v2184_v19 }
 0x2eb   :  { %v2249_v34 = vsel %vm2169_vm1, %v2233_v61, 4294967295 }
 0x2ec   :  { %v2248_v16 = vsel %vm2168_vm2, %v2232_v4, 4294967295 }
 0x2ed   :  { %2294 = vperm.xlu1 %10827, %v2248_v16   ;;  %2297 = vperm.xlu0 %10826, %v2249_v34  }
 0x326   :  { %v1530_v3 = vpop.f32.mrb[0].mxu0  ;;  %v1691_v29 = vpop.f32.mrb[0].mxu1 }
 0x327   :  { %1786 = vst [vmem:[%s18559_s9] sm:$0xff] %v1530_v3  ;;  %v1532_v24 = vpop.f32.mrb[1].mxu0  ;;  %1788 = vst [vmem:[%s18559_s9 + $0x10] sm:$0xff] %v1691_v29  ;;  %v1693_v50 = vpop.f32.mrb[1].mxu1 }
 0x328   :  { %1787 = vst [vmem:[%s18559_s9 + $0x8] sm:$0xff] %v1532_v24  ;;  %1789 = vst [vmem:[%s18559_s9 + $0x18] sm:$0xff] %v1693_v50 }
 0x32a   :  { %v1536_v47 = vpop.f32.mrb[2].mxu0 }
 0x32b   :  { %1790 = vst [vmem:[%s18559_s9 + $0x20] sm:$0xff] %v1536_v47  ;;  %v1697_v44 = vpop.f32.mrb[2].mxu1  ;;  %v1538_v6 = vpop.f32.mrb[3].mxu0 }
 0x32c   :  { %1792 = vst [vmem:[%s18559_s9 + $0x30] sm:$0xff] %v1697_v44  ;;  %1791 = vst [vmem:[%s18559_s9 + $0x28] sm:$0xff] %v1538_v6  ;;  %v1699_v53 = vpop.f32.mrb[3].mxu1 }
 0x32d   :  { %1793 = vst [vmem:[%s18559_s9 + $0x38] sm:$0xff] %v1699_v53 }
 0x32e   :  { %v1542_v18 = vpop.f32.mrb[4].mxu0 }
 0x32f   :  { %1794 = vst [vmem:[%s18559_s9 + $0x40] sm:$0xff] %v1542_v18  ;;  %v1703_v33 = vpop.f32.mrb[4].mxu1  ;;  %v1544_v58 = vpop.f32.mrb[5].mxu0 }
 0x330   :  { %1796 = vst [vmem:[%s18559_s9 + $0x50] sm:$0xff] %v1703_v33  ;;  %1795 = vst [vmem:[%s18559_s9 + $0x48] sm:$0xff] %v1544_v58  ;;  %v1705_v39 = vpop.f32.mrb[5].mxu1 }
 0x331   :  { %1797 = vst [vmem:[%s18559_s9 + $0x58] sm:$0xff] %v1705_v39 }
 0x332   :  { %v1548_v14 = vpop.f32.mrb[6].mxu0 }
 0x333   :  { %1798 = vst [vmem:[%s18559_s9 + $0x60] sm:$0xff] %v1548_v14  ;;  %v1709_v21 = vpop.f32.mrb[6].mxu1  ;;  %v1550_v40 = vpop.f32.mrb[7].mxu0 }
 0x334   :  { %1800 = vst [vmem:[%s18559_s9 + $0x70] sm:$0xff] %v1709_v21  ;;  %1799 = vst [vmem:[%s18559_s9 + $0x68] sm:$0xff] %v1550_v40  ;;  %v1711_v30 = vpop.f32.mrb[7].mxu1 }
 0x335   :  { %1801 = vst [vmem:[%s18559_s9 + $0x78] sm:$0xff] %v1711_v30 }
 0x336   :  { %v1554_v2 = vpop.f32.mrb[8].mxu0 }
 0x337   :  { %1802 = vst [vmem:[%s18559_s9 + $0x80] sm:$0xff] %v1554_v2  ;;  %v1715_v43 = vpop.f32.mrb[8].mxu1  ;;  %v1556_v42 = vpop.f32.mrb[9].mxu0 }
 0x338   :  { %1804 = vst [vmem:[%s18559_s9 + $0x90] sm:$0xff] %v1715_v43  ;;  %1803 = vst [vmem:[%s18559_s9 + $0x88] sm:$0xff] %v1556_v42  ;;  %v1717_v45 = vpop.f32.mrb[9].mxu1 }
 0x339   :  { %1805 = vst [vmem:[%s18559_s9 + $0x98] sm:$0xff] %v1717_v45 }
 0x33a   :  { %v1560_v36 = vpop.f32.mrb[10].mxu0 }
 0x33b   :  { %1806 = vst [vmem:[%s18559_s9 + $0xa0] sm:$0xff] %v1560_v36  ;;  %v1721_v62 = vpop.f32.mrb[10].mxu1  ;;  %v1562_v28 = vpop.f32.mrb[11].mxu0 }
 0x33c   :  { %1808 = vst [vmem:[%s18559_s9 + $0xb0] sm:$0xff] %v1721_v62  ;;  %1807 = vst [vmem:[%s18559_s9 + $0xa8] sm:$0xff] %v1562_v28  ;;  %v1723_v7 = vpop.f32.mrb[11].mxu1 }
 0x33d   :  { %1809 = vst [vmem:[%s18559_s9 + $0xb8] sm:$0xff] %v1723_v7 }
 0x33e   :  { %v1566_v27 = vpop.f32.mrb[12].mxu0 }
 0x33f   :  { %1810 = vst [vmem:[%s18559_s9 + $0xc0] sm:$0xff] %v1566_v27  ;;  %v1727_v35 = vpop.f32.mrb[12].mxu1  ;;  %v1568_v37 = vpop.f32.mrb[13].mxu0 }
 0x340   :  { %1812 = vst [vmem:[%s18559_s9 + $0xd0] sm:$0xff] %v1727_v35  ;;  %1811 = vst [vmem:[%s18559_s9 + $0xc8] sm:$0xff] %v1568_v37  ;;  %v1729_v46 = vpop.f32.mrb[13].mxu1 }
 0x341   :  { %1813 = vst [vmem:[%s18559_s9 + $0xd8] sm:$0xff] %v1729_v46 }
 0x342   :  { %v1572_v41 = vpop.f32.mrb[14].mxu0 }
 0x343   :  { %1814 = vst [vmem:[%s18559_s9 + $0xe0] sm:$0xff] %v1572_v41  ;;  %v1733_v17 = vpop.f32.mrb[14].mxu1  ;;  %v1574_v57 = vpop.f32.mrb[15].mxu0 }
 0x344   :  { %1816 = vst [vmem:[%s18559_s9 + $0xf0] sm:$0xff] %v1733_v17  ;;  %1815 = vst [vmem:[%s18559_s9 + $0xe8] sm:$0xff] %v1574_v57  ;;  %v1735_v15 = vpop.f32.mrb[15].mxu1 }
 0x345   :  { %1817 = vst [vmem:[%s18559_s9 + $0xf8] sm:$0xff] %v1735_v15 }
 0x346   :  { %v1578_v63 = vpop.f32.mrb[16].mxu0 }
 0x347   :  { %1818 = vst [vmem:[%s18559_s9 + $0x100] sm:$0xff] %v1578_v63  ;;  %v1739_v31 = vpop.f32.mrb[16].mxu1  ;;  %v1580_v26 = vpop.f32.mrb[17].mxu0 }
 0x348   :  { %1820 = vst [vmem:[%s18559_s9 + $0x110] sm:$0xff] %v1739_v31  ;;  %1819 = vst [vmem:[%s18559_s9 + $0x108] sm:$0xff] %v1580_v26  ;;  %v1741_v56 = vpop.f32.mrb[17].mxu1 }
 0x349   :  { %1821 = vst [vmem:[%s18559_s9 + $0x118] sm:$0xff] %v1741_v56 }
 0x34a   :  { %v1584_v13 = vpop.f32.mrb[18].mxu0 }
 0x34b   :  { %1822 = vst [vmem:[%s18559_s9 + $0x120] sm:$0xff] %v1584_v13  ;;  %v1745_v60 = vpop.f32.mrb[18].mxu1  ;;  %v1586_v10 = vpop.f32.mrb[19].mxu0 }
 0x34c   :  { %1824 = vst [vmem:[%s18559_s9 + $0x130] sm:$0xff] %v1745_v60  ;;  %1823 = vst [vmem:[%s18559_s9 + $0x128] sm:$0xff] %v1586_v10  ;;  %v1747_v8 = vpop.f32.mrb[19].mxu1 }
 0x34d   :  { %1825 = vst [vmem:[%s18559_s9 + $0x138] sm:$0xff] %v1747_v8 }
 0x34e   :  { %v1590_v23 = vpop.f32.mrb[20].mxu0 }
 0x34f   :  { %1826 = vst [vmem:[%s18559_s9 + $0x140] sm:$0xff] %v1590_v23  ;;  %v1751_v11 = vpop.f32.mrb[20].mxu1  ;;  %v1592_v12 = vpop.f32.mrb[21].mxu0 }
 0x350   :  { %v13248_v25 = vpop.permute.xlu1 %2255  ;;  %1828 = vst [vmem:[%s18559_s9 + $0x150] sm:$0xff] %v1751_v11  ;;  %1827 = vst [vmem:[%s18559_s9 + $0x148] sm:$0xff] %v1592_v12  ;;  %v1753_v59 = vpop.f32.mrb[21].mxu1 }
 0x351   :  { %vm2301_vm3 = vcmp.eq.s32.totalorder %v12529_v20, %v13248_v25  ;;  %vm2302_vm4 = vcmp.eq.s32.totalorder %v13240_v5, %v13248_v25  ;;  %v13260_v9 = vpop.permute.xlu0 %2252  ;;  %1829 = vst [vmem:[%s18559_s9 + $0x158] sm:$0xff] %v1753_v59 }
 0x352   :  { %v13266_v1 = vsel %vm2302_vm4, 1.0, %v19012_v55  ;;  %vm2299_vm5 = vcmp.eq.s32.totalorder %v12529_v20, %v13260_v9  ;;  %vm2300_vm6 = vcmp.eq.s32.totalorder %v13240_v5, %v13260_v9  ;;  %v1596_v19 = vpop.f32.mrb[22].mxu0 }
 0x353   :  { %v13273_v51 = vsel %vm2300_vm6, 1.0, %v19012_v55  ;;  %1830 = vst [vmem:[%s18559_s9 + $0x160] sm:$0xff] %v1596_v19  ;;  %v1757_v38 = vpop.f32.mrb[22].mxu1  ;;  %v1598_v54 = vpop.f32.mrb[23].mxu0 }
 0x354   :  { %1832 = vst [vmem:[%s18559_s9 + $0x170] sm:$0xff] %v1757_v38  ;;  %1831 = vst [vmem:[%s18559_s9 + $0x168] sm:$0xff] %v1598_v54  ;;  %v1759_v22 = vpop.f32.mrb[23].mxu1  ;;  %v13284_v61 = vpop.permute.xlu1 %2258 }
 0x355   :  { %v13286_v49 = vpop.permute.xlu0 %2261  ;;  %1833 = vst [vmem:[%s18559_s9 + $0x178] sm:$0xff] %v1759_v22  ;;  %vm2303_vm7 = vcmp.eq.s32.totalorder %v12529_v20, %v13284_v61  ;;  %vm2304_vm8 = vcmp.eq.s32.totalorder %v13240_v5, %v13284_v61 }
 0x356   :  { %vm2305_vm9 = vcmp.eq.s32.totalorder %v12529_v20, %v13286_v49  ;;  %vm2306_vm10 = vcmp.eq.s32.totalorder %v13240_v5, %v13286_v49  ;;  %v1602_v4 = vpop.f32.mrb[24].mxu0  ;;  %v13300_v34 = vsel %vm2304_vm8, 1.0, %v19012_v55 }
 0x357   :  { %v13303_v16 = vsel %vm2306_vm10, 1.0, %v19012_v55  ;;  %1834 = vst [vmem:[%s18559_s9 + $0x180] sm:$0xff] %v1602_v4  ;;  %v1763_v3 = vpop.f32.mrb[24].mxu1  ;;  %v1604_v29 = vpop.f32.mrb[25].mxu0 }
 0x358   :  { %1836 = vst [vmem:[%s18559_s9 + $0x190] sm:$0xff] %v1763_v3  ;;  %1835 = vst [vmem:[%s18559_s9 + $0x188] sm:$0xff] %v1604_v29  ;;  %v1765_v24 = vpop.f32.mrb[25].mxu1  ;;  %v13314_v50 = vpop.permute.xlu1 %2264 }
 0x359   :  { %v13316_v47 = vpop.permute.xlu0 %2267  ;;  %1837 = vst [vmem:[%s18559_s9 + $0x198] sm:$0xff] %v1765_v24  ;;  %vm2307_vm11 = vcmp.eq.s32.totalorder %v12529_v20, %v13314_v50  ;;  %vm2308_vm12 = vcmp.eq.s32.totalorder %v13240_v5, %v13314_v50 }
 0x35a   :  { %vm2309_vm13 = vcmp.eq.s32.totalorder %v12529_v20, %v13316_v47  ;;  %vm2310_vm14 = vcmp.eq.s32.totalorder %v13240_v5, %v13316_v47  ;;  %v1608_v44 = vpop.f32.mrb[26].mxu0  ;;  %v13330_v6 = vsel %vm2308_vm12, 1.0, %v19012_v55 }
 0x35b   :  { %v13333_v53 = vsel %vm2310_vm14, 1.0, %v19012_v55  ;;  %1838 = vst [vmem:[%s18559_s9 + $0x1a0] sm:$0xff] %v1608_v44  ;;  %v1769_v18 = vpop.f32.mrb[26].mxu1  ;;  %v1610_v33 = vpop.f32.mrb[27].mxu0 }
 0x35c   :  { %1840 = vst [vmem:[%s18559_s9 + $0x1b0] sm:$0xff] %v1769_v18  ;;  %1839 = vst [vmem:[%s18559_s9 + $0x1a8] sm:$0xff] %v1610_v33  ;;  %v1771_v58 = vpop.f32.mrb[27].mxu1  ;;  %v13344_v39 = vpop.permute.xlu1 %2270 }
 0x35d   :  { %v13346_v14 = vpop.permute.xlu0 %2273  ;;  %1841 = vst [vmem:[%s18559_s9 + $0x1b8] sm:$0xff] %v1771_v58  ;;  %vm2311_vm15 = vcmp.eq.s32.totalorder %v12529_v20, %v13344_v39  ;;  %vm2312_vm0 = vcmp.eq.s32.totalorder %v13240_v5, %v13344_v39 }
 0x35e   :  { %vm2313_vm1 = vcmp.eq.s32.totalorder %v12529_v20, %v13346_v14  ;;  %vm2314_vm2 = vcmp.eq.s32.totalorder %v13240_v5, %v13346_v14  ;;  %v1614_v21 = vpop.f32.mrb[28].mxu0  ;;  %v13360_v40 = vsel %vm2312_vm0, 1.0, %v19012_v55 }
 0x35f   :  { %v13363_v30 = vsel %vm2314_vm2, 1.0, %v19012_v55  ;;  %1842 = vst [vmem:[%s18559_s9 + $0x1c0] sm:$0xff] %v1614_v21  ;;  %v1775_v2 = vpop.f32.mrb[28].mxu1  ;;  %v1616_v43 = vpop.f32.mrb[29].mxu0 }
 0x360   :  { %1844 = vst [vmem:[%s18559_s9 + $0x1d0] sm:$0xff] %v1775_v2  ;;  %1843 = vst [vmem:[%s18559_s9 + $0x1c8] sm:$0xff] %v1616_v43  ;;  %v1777_v42 = vpop.f32.mrb[29].mxu1  ;;  %v13374_v45 = vpop.permute.xlu1 %2276 }
 0x361   :  { %v13376_v36 = vpop.permute.xlu0 %2279  ;;  %1845 = vst [vmem:[%s18559_s9 + $0x1d8] sm:$0xff] %v1777_v42  ;;  %vm2315_vm4 = vcmp.eq.s32.totalorder %v12529_v20, %v13374_v45  ;;  %vm2316_vm6 = vcmp.eq.s32.totalorder %v13240_v5, %v13374_v45 }
 0x362   :  { %vm2317_vm8 = vcmp.eq.s32.totalorder %v12529_v20, %v13376_v36  ;;  %vm2318_vm10 = vcmp.eq.s32.totalorder %v13240_v5, %v13376_v36  ;;  %v1620_v62 = vpop.f32.mrb[30].mxu0  ;;  %v13390_v28 = vsel %vm2316_vm6, 1.0, %v19012_v55 }
 0x363   :  { %v13393_v7 = vsel %vm2318_vm10, 1.0, %v19012_v55  ;;  %1846 = vst [vmem:[%s18559_s9 + $0x1e0] sm:$0xff] %v1620_v62  ;;  %v1781_v27 = vpop.f32.mrb[30].mxu1  ;;  %v1622_v35 = vpop.f32.mrb[31].mxu0 }
 0x364   :  { %1848 = vst [vmem:[%s18559_s9 + $0x1f0] sm:$0xff] %v1781_v27  ;;  %1847 = vst [vmem:[%s18559_s9 + $0x1e8] sm:$0xff] %v1622_v35  ;;  %v1783_v37 = vpop.f32.mrb[31].mxu1  ;;  %v13404_v46 = vpop.permute.xlu1 %2282 }
 0x365   :  { %v13406_v41 = vpop.permute.xlu0 %2285  ;;  %1849 = vst [vmem:[%s18559_s9 + $0x1f8] sm:$0xff] %v1783_v37  ;;  %vm2319_vm12 = vcmp.eq.s32.totalorder %v12529_v20, %v13404_v46  ;;  %vm2320_vm14 = vcmp.eq.s32.totalorder %v13240_v5, %v13404_v46 }
 0x366   :  { %vm2322_vm2 = vcmp.eq.s32.totalorder %v13240_v5, %v13406_v41  ;;  %v13420_v17 = vsel %vm2320_vm14, 1.0, %v19012_v55 }
 0x367   :  { %v13423_v57 = vsel %vm2322_vm2, 1.0, %v19012_v55 }
 0x368   :  { %v13425_v15 = vpop.permute.xlu1 %2288 }
 0x369   :  { %19080 = vst [vmem:[#allocation146_spill] sm:$0xff] %v13425_v15  ;;  %v13427_v63 = vpop.permute.xlu0 %2291  ;;  %vm2324_vm10 = vcmp.eq.s32.totalorder %v13240_v5, %v13425_v15 }
 0x36a   :  { %19081 = vst [vmem:[#allocation149_spill] sm:$0xff] %v13427_v63  ;;  %vm2326_vm14 = vcmp.eq.s32.totalorder %v13240_v5, %v13427_v63  ;;  %v13438_v31 = vsel %vm2324_vm10, 1.0, %v19012_v55 }
 0x36b   :  { %19082 = vst [vmem:[#allocation147_spill] sm:$0xff] %v13438_v31  ;;  %v13441_v26 = vsel %vm2326_vm14, 1.0, %v19012_v55 }
 0x36c   :  { %19083 = vst [vmem:[#allocation151_spill] sm:$0xff] %v13441_v26  ;;  %v13443_v56 = vpop.permute.xlu1 %2294 }
 0x36d   :  { %19084 = vst [vmem:[#allocation150_spill] sm:$0xff] %v13443_v56  ;;  %v13445_v13 = vpop.permute.xlu0 %2297  ;;  %vm2327_vm2 = vcmp.eq.s32.totalorder %v12529_v20, %v13443_v56  ;;  %vm2328_vm6 = vcmp.eq.s32.totalorder %v13240_v5, %v13443_v56 }
 0x36e   :  { %19085 = vst [vmem:[#allocation152_spill] sm:$0xff] %v13445_v13  ;;  %vm2329_vm0 = vcmp.eq.s32.totalorder %v12529_v20, %v13445_v13  ;;  %vm2330_vm10 = vcmp.eq.s32.totalorder %v13240_v5, %v13445_v13  ;;  %v13456_v60 = vsel %vm2328_vm6, 1.0, %v19012_v55 }
 0x36f   :  { %19086 = vst [vmem:[#allocation155_spill] sm:$0xff] %v13456_v60  ;;  %v13459_v10 = vsel %vm2330_vm10, 1.0, %v19012_v55 }
 0x370   :  { %19087 = vst [vmem:[#allocation156_spill] sm:$0xff] %v13459_v10 }
 0x371   :  { %10856 = dma.done.wait [#allocation6 + $0x2], 6400 }
 0x372   :  { %10857 = vsyncadd [#allocation6 + $0x2], 4294960896  ;;  %v2684_v8 = vmul.f32 0.125, %v18993_v52  ;;  %v2682_v23 = vmul.f32 0.125, %v18994_v0  ;;  %v2685_v11 = vmul.f32 0.125, %v18995_v48  ;;  %v2683_v12 = vmul.f32 0.125, %v18996_v32 }
 0x373   :  { %v19088_v59 = vmov 1   ;;  %v19089_v19 = vld [vmem:[#allocation121_spill] sm:$0xff]  ;;  %v19090_v54 = vld [vmem:[#allocation120_spill] sm:$0xff]  ;;  %v19091_v4 = vld [vmem:[#allocation123_spill] sm:$0xff] }
 0x374   :  { %10829 = vset.pattern.permute.xlu1 %v19088_v59  ;;  %10828 = vset.pattern.permute.xlu0 %v19088_v59  ;;  %v13468_v38 = vmul.f32 0.125, %v19089_v19  ;;  %v13471_v22 = vmul.f32 0.125, %v19090_v54  ;;  %v13474_v3 = vmul.f32 0.125, %v19091_v4  ;;  %v19092_v29 = vld [vmem:[#allocation122_spill] sm:$0xff]  ;;  %v2796_v44 = vfloor.f32 %v2684_v8  ;;  %v2368_v48 = vld [vmem:[#allocation4 + $0x8] sm:$0xff]  ;;  %v2371_v52 = vld [vmem:[#allocation4 + $0x20] sm:$0xff] }
 0x375   :  { %v13477_v24 = vmul.f32 0.125, %v19092_v29  ;;  %v2828_v18 = vceil.f32 %v2684_v8  ;;  %v2794_v33 = vfloor.f32 %v2682_v23  ;;  %v2826_v58 = vceil.f32 %v2682_v23  ;;  %v2373_v55 = vld [vmem:[#allocation4 + $0x30] sm:$0xff]  ;;  %v2376_v5 = vld [vmem:[#allocation4 + $0x48] sm:$0xff]  ;;  %v2375_v13 = vld [vmem:[#allocation4 + $0x40] sm:$0xff] }
 0x376   :  { %v2797_v21 = vfloor.f32 %v2685_v11  ;;  %v2829_v2 = vceil.f32 %v2685_v11  ;;  %v2795_v43 = vfloor.f32 %v2683_v12  ;;  %v2827_v42 = vceil.f32 %v2683_v12  ;;  %v2370_v12 = vld [vmem:[#allocation4 + $0x18] sm:$0xff]  ;;  %v2377_v10 = vld [vmem:[#allocation4 + $0x50] sm:$0xff]  ;;  %v19137_v36 = vld [vmem:[#allocation132_spill] sm:$0xff] }
 0x377   :  { %v13479_v62 = vtrunc.f32 %v2796_v44  ;;  %v10595_v27 = vtrunc.f32 %v2828_v18  ;;  %v13481_v35 = vtrunc.f32 %v2794_v33  ;;  %v10591_v37 = vtrunc.f32 %v2826_v58  ;;  %v2367_v44 = vld [vmem:[#allocation4] sm:$0xff]  ;;  %v2378_v18 = vld [vmem:[#allocation4 + $0x58] sm:$0xff]  ;;  %v19108_v15 = vld [vmem:[#allocation130_spill] sm:$0xff] }
 0x378   :  { %v13483_v54 = vtrunc.f32 %v2797_v21  ;;  %v10597_v4 = vtrunc.f32 %v2829_v2  ;;  %v13485_v19 = vtrunc.f32 %v2795_v43  ;;  %v10593_v29 = vtrunc.f32 %v2827_v42  ;;  %v2369_v2 = vld [vmem:[#allocation4 + $0x10] sm:$0xff]  ;;  %v2372_v43 = vld [vmem:[#allocation4 + $0x28] sm:$0xff]  ;;  %v2374_v42 = vld [vmem:[#allocation4 + $0x38] sm:$0xff] }
 0x379   :  { %v10596_v32 = vcvt.f32.s32 %v10595_v27  ;;  %v10592_v11 = vcvt.f32.s32 %v10591_v37  ;;  %v9691_v59 = vpack.c.bf16 %v2370_v12, %v2368_v48  ;;  %v2799_v27 = vfloor.f32 %v13468_v38  ;;  %v19127_v50 = vld [vmem:[#allocation146_spill] sm:$0xff]  ;;  %v19129_v47 = vld [vmem:[#allocation151_spill] sm:$0xff]  ;;  %v19134_v14 = vld [vmem:[#allocation156_spill] sm:$0xff] }
 0x37a   :  { %v10598_v33 = vcvt.f32.s32 %v10597_v4  ;;  %v10594_v21 = vcvt.f32.s32 %v10593_v29  ;;  %v9693_v8 = vpack.c.bf16 %v2369_v2, %v2367_v44  ;;  %v9695_v0 = vpack.c.bf16 %v2374_v42, %v2372_v43  ;;  %v2380_v2 = vld [vmem:[#allocation4 + $0x68] sm:$0xff]  ;;  %v2382_v43 = vld [vmem:[#allocation4 + $0x78] sm:$0xff]  ;;  %v13496_v42 = vld [vmem:[#allocation4 + $0x60] sm:$0xff] }
 0x37b   :  { %vm2862_vm6 = vcmp.lt.s32.totalorder %v10596_v32, 27  ;;  %vm2858_vm14 = vcmp.lt.s32.totalorder %v10592_v11, 27  ;;  %9692 = vmatprep.subr.bf16.mxu0 %v9691_v59  ;;  %v19093_v4 = vcvt.f32.s32 %v13479_v62  ;;  %v19094_v48 = vcvt.f32.s32 %v13481_v35 }
 0x37c   :  { %v2863_v23 = vsel %vm2862_vm6, %v10596_v32, 27  ;;  %v2859_v37 = vsel %vm2858_vm14, %v10592_v11, 27  ;;  %v9697_v12 = vpack.c.bf16 %v2373_v55, %v2371_v52  ;;  %vm2864_vm10 = vcmp.lt.s32.totalorder %v10598_v33, 27  ;;  %9694 = vmatpush1.bf16.msra.mxu0 %v9693_v8 }
 0x37d   :  { %v2908_v58 = vsub.s32 %v2863_v23, %v19093_v4  ;;  %v2906_v29 = vsub.s32 %v2859_v37, %v19094_v48  ;;  %v2865_v44 = vsel %vm2864_vm10, %v10598_v33, 27  ;;  %vm2860_vm6 = vcmp.lt.s32.totalorder %v10594_v21, 27  ;;  %v2381_v33 = vld [vmem:[#allocation4 + $0x70] sm:$0xff]  ;;  %9696 = vmatprep.subr.bf16.mxu0 %v9695_v0  ;;  %v2384_v37 = vld [vmem:[#allocation4 + $0x88] sm:$0xff]  ;;  %v2386_v4 = vld [vmem:[#allocation4 + $0x98] sm:$0xff] }
 0x37e   :  { %v9699_v32 = vpack.c.bf16 %v2378_v18, %v2376_v5  ;;  %v9701_v11 = vpack.c.bf16 %v2377_v10, %v2375_v13  ;;  %v19095_v59 = vcvt.f32.s32 %v13483_v54  ;;  %v2861_v55 = vsel %vm2860_vm6, %v10594_v21, 27 }
 0x37f   :  { %2926 = vrot.lane.b32.xlu1 %v2908_v58, %s10864_s4  ;;  %2922 = vrot.lane.b32.xlu0 %v2906_v29, %s10864_s4  ;;  %v13502_v23 = vtrunc.f32 %v2799_v27  ;;  %v2831_v8 = vceil.f32 %v13468_v38  ;;  %v19096_v5 = vcvt.f32.s32 %v13485_v19  ;;  %v2798_v10 = vfloor.f32 %v13471_v22 }
 0x380   :  { %v2909_v52 = vsub.s32 %v2865_v44, %v19095_v59  ;;  %v2830_v18 = vceil.f32 %v13471_v22  ;;  %v9703_v58 = vpack.c.bf16 %v2382_v43, %v2380_v2  ;;  %v9705_v21 = vpack.c.bf16 %v2381_v33, %v13496_v42  ;;  %9698 = vmatpush1.bf16.msra.mxu0 %v9697_v12  ;;  %v13518_v22 = vld [vmem:[#allocation4 + $0x90] sm:$0xff] }
 0x381   :  { %v2907_v13 = vsub.s32 %v2861_v55, %v19096_v5  ;;  %v18708_v48 = vcvt.f32.s32 %v13502_v23  ;;  %v10601_v29 = vtrunc.f32 %v2831_v8  ;;  %v2801_v27 = vfloor.f32 %v13474_v3  ;;  %v13516_v55 = vld [vmem:[#allocation4 + $0x80] sm:$0xff]  ;;  %9700 = vmatprep.subr.bf16.mxu0 %v9699_v32 }
 0x382   :  { %v13512_v38 = vtrunc.f32 %v2798_v10  ;;  %v10599_v0 = vtrunc.f32 %v2830_v18  ;;  %v2833_v44 = vceil.f32 %v13474_v3  ;;  %v2800_v59 = vfloor.f32 %v13477_v24  ;;  %v2389_v10 = vld [vmem:[#allocation4 + $0xb0] sm:$0xff] }
 0x383   :  { %2928 = vrot.lane.b32.xlu1 %v2909_v52, %s10864_s4  ;;  %2924 = vrot.lane.b32.xlu0 %v2907_v13, %s10864_s4  ;;  %v10602_v2 = vcvt.f32.s32 %v10601_v29  ;;  %v13522_v43 = vtrunc.f32 %v2801_v27  ;;  %v2832_v12 = vceil.f32 %v13477_v24  ;;  %v9707_v42 = vpack.c.bf16 %v2386_v4, %v2384_v37  ;;  %v2388_v13 = vld [vmem:[#allocation4 + $0xa8] sm:$0xff]  ;;  %v2390_v29 = vld [vmem:[#allocation4 + $0xb8] sm:$0xff] }
 0x384   :  { %v18707_v8 = vcvt.f32.s32 %v13512_v38  ;;  %v10600_v3 = vcvt.f32.s32 %v10599_v0  ;;  %v10605_v33 = vtrunc.f32 %v2833_v44  ;;  %v13526_v5 = vtrunc.f32 %v2800_v59  ;;  %9702 = vmatpush1.bf16.msra.mxu0 %v9701_v11  ;;  %v19097_v44 = vld [vmem:[#allocation125_spill] sm:$0xff] }
 0x385   :  { %vm2868_vm14 = vcmp.lt.s32.totalorder %v10602_v2, 27  ;;  %v10603_v18 = vtrunc.f32 %v2832_v12  ;;  %v9709_v52 = vpack.c.bf16 %v13518_v22, %v13516_v55  ;;  %9704 = vmatprep.subr.bf16.mxu0 %v9703_v58  ;;  %v2691_v59 = vmul.f32 0.125, %v19097_v44  ;;  %v19098_v55 = vld [vmem:[#allocation124_spill] sm:$0xff] }
 0x386   :  { %v2869_v27 = vsel %vm2868_vm14, %v10602_v2, 27  ;;  %vm2866_vm10 = vcmp.lt.s32.totalorder %v10600_v3, 27  ;;  %v10606_v24 = vcvt.f32.s32 %v10605_v33  ;;  %v2690_v22 = vmul.f32 0.125, %v19098_v55  ;;  %v2387_v2 = vld [vmem:[#allocation4 + $0xa0] sm:$0xff]  ;;  %v2394_v55 = vld [vmem:[#allocation4 + $0xd8] sm:$0xff] }
 0x387   :  { %v2911_v37 = vsub.s32 %v2869_v27, %v18708_v48  ;;  %v2867_v4 = vsel %vm2866_vm10, %v10600_v3, 27  ;;  %v10604_v0 = vcvt.f32.s32 %v10603_v18  ;;  %v9711_v11 = vpack.c.bf16 %v2390_v29, %v2388_v13  ;;  %v2392_v3 = vld [vmem:[#allocation4 + $0xc8] sm:$0xff]  ;;  %v13542_v13 = vld [vmem:[#allocation4 + $0xc0] sm:$0xff]  ;;  %v13544_v29 = vld [vmem:[#allocation4 + $0xd0] sm:$0xff] }
 0x388   :  { %v2910_v12 = vsub.s32 %v2867_v4, %v18707_v8  ;;  %vm2872_vm6 = vcmp.lt.s32.totalorder %v10606_v24, 27  ;;  %v2803_v32 = vfloor.f32 %v2691_v59  ;;  %v2835_v27 = vceil.f32 %v2691_v59  ;;  %9706 = vmatpush1.bf16.msra.mxu0 %v9705_v21 }
 0x389   :  { %2932 = vrot.lane.b32.xlu1 %v2911_v37, %s10864_s4  ;;  %v2873_v33 = vsel %vm2872_vm6, %v10606_v24, 27  ;;  %vm2870_vm14 = vcmp.lt.s32.totalorder %v10604_v0, 27  ;;  %v19099_v58 = vcvt.f32.s32 %v13522_v43  ;;  %v2802_v8 = vfloor.f32 %v2690_v22  ;;  %9708 = vmatprep.subr.bf16.mxu0 %v9707_v42 }
 0x38a   :  { %2930 = vrot.lane.b32.xlu0 %v2910_v12, %s10864_s4  ;;  %v2871_v4 = vsel %vm2870_vm14, %v10604_v0, 27  ;;  %v2834_v48 = vceil.f32 %v2690_v22  ;;  %v19100_v24 = vcvt.f32.s32 %v13526_v5  ;;  %v13548_v59 = vtrunc.f32 %v2803_v32 }
 0x38b   :  { %v2913_v18 = vsub.s32 %v2873_v33, %v19099_v58  ;;  %v10609_v44 = vtrunc.f32 %v2835_v27  ;;  %v9713_v12 = vpack.c.bf16 %v2389_v10, %v2387_v2  ;;  %v13550_v21 = vtrunc.f32 %v2802_v8  ;;  %v19101_v33 = vld [vmem:[#allocation127_spill] sm:$0xff]  ;;  %v19102_v58 = vld [vmem:[#allocation126_spill] sm:$0xff] }
 0x38c   :  { %v2912_v37 = vsub.s32 %v2871_v4, %v19100_v24  ;;  %v10607_v56 = vtrunc.f32 %v2834_v48  ;;  %v2693_v0 = vmul.f32 0.125, %v19101_v33  ;;  %v2692_v22 = vmul.f32 0.125, %v19102_v58  ;;  %9710 = vmatpush1.bf16.msra.mxu0 %v9709_v52  ;;  %v2399_v33 = vld [vmem:[#allocation4 + $0x100] sm:$0xff] }
 0x38d   :  { %2936 = vrot.lane.b32.xlu1 %v2913_v18, %s10864_s4  ;;  %v18711_v60 = vcvt.f32.s32 %v13548_v59  ;;  %v10610_v63 = vcvt.f32.s32 %v10609_v44  ;;  %v9715_v26 = vpack.c.bf16 %v2394_v55, %v2392_v3  ;;  %v9717_v42 = vpack.c.bf16 %v13544_v29, %v13542_v13  ;;  %9712 = vmatprep.subr.bf16.mxu0 %v9711_v11  ;;  %v19103_v18 = vld [vmem:[#allocation129_spill] sm:$0xff]  ;;  %v2397_v11 = vld [vmem:[#allocation4 + $0xf0] sm:$0xff] }
 0x38e   :  { %2934 = vrot.lane.b32.xlu0 %v2912_v37, %s10864_s4  ;;  %v18712_v8 = vcvt.f32.s32 %v13550_v21  ;;  %v10608_v10 = vcvt.f32.s32 %v10607_v56  ;;  %v2805_v48 = vfloor.f32 %v2693_v0  ;;  %v2837_v32 = vceil.f32 %v2693_v0  ;;  %v2396_v3 = vld [vmem:[#allocation4 + $0xe8] sm:$0xff]  ;;  %v2398_v37 = vld [vmem:[#allocation4 + $0xf8] sm:$0xff]  ;;  %v2395_v0 = vld [vmem:[#allocation4 + $0xe0] sm:$0xff] }
 0x38f   :  { %vm2876_vm10 = vcmp.lt.s32.totalorder %v10610_v63, 27  ;;  %v2804_v2 = vfloor.f32 %v2692_v22  ;;  %v2836_v27 = vceil.f32 %v2692_v22  ;;  %v2695_v4 = vmul.f32 0.125, %v19103_v18 }
 0x390   :  { %v2877_v24 = vsel %vm2876_vm10, %v10610_v63, 27  ;;  %vm2874_vm6 = vcmp.lt.s32.totalorder %v10608_v10, 27  ;;  %v13561_v44 = vtrunc.f32 %v2805_v48  ;;  %v10613_v55 = vtrunc.f32 %v2837_v32  ;;  %9714 = vmatpush1.bf16.msra.mxu0 %v9713_v12  ;;  %v2401_v32 = vld [vmem:[#allocation4 + $0x110] sm:$0xff] }
 0x391   :  { %v2915_v52 = vsub.s32 %v2877_v24, %v18711_v60  ;;  %v2875_v13 = vsel %vm2874_vm6, %v10608_v10, 27  ;;  %v13565_v29 = vtrunc.f32 %v2804_v2  ;;  %v10611_v56 = vtrunc.f32 %v2836_v27  ;;  %9716 = vmatprep.subr.bf16.mxu0 %v9715_v26  ;;  %v19104_v2 = vld [vmem:[#allocation128_spill] sm:$0xff] }
 0x392   :  { %v2914_v22 = vsub.s32 %v2875_v13, %v18712_v8  ;;  %v10614_v48 = vcvt.f32.s32 %v10613_v55  ;;  %v2807_v18 = vfloor.f32 %v2695_v4  ;;  %v2839_v10 = vceil.f32 %v2695_v4  ;;  %v2400_v8 = vld [vmem:[#allocation4 + $0x108] sm:$0xff] }
 0x393   :  { %2940 = vrot.lane.b32.xlu1 %v2915_v52, %s10864_s4  ;;  %v10612_v24 = vcvt.f32.s32 %v10611_v56  ;;  %v2694_v27 = vmul.f32 0.125, %v19104_v2  ;;  %v9719_v13 = vpack.c.bf16 %v2398_v37, %v2396_v3  ;;  %v9721_v12 = vpack.c.bf16 %v2397_v11, %v2395_v0  ;;  %v2402_v52 = vld [vmem:[#allocation4 + $0x118] sm:$0xff] }
 0x394   :  { %2938 = vrot.lane.b32.xlu0 %v2914_v22, %s10864_s4  ;;  %vm2880_vm14 = vcmp.lt.s32.totalorder %v10614_v48, 27  ;;  %v13574_v60 = vtrunc.f32 %v2807_v18  ;;  %v10617_v55 = vtrunc.f32 %v2839_v10  ;;  %v19105_v26 = vcvt.f32.s32 %v13561_v44  ;;  %9718 = vmatpush1.bf16.msra.mxu0 %v9717_v42  ;;  %v19107_v11 = vld [vmem:[#allocation131_spill] sm:$0xff]  ;;  %v2404_v42 = vld [vmem:[#allocation4 + $0x128] sm:$0xff] }
 0x395   :  { %v2881_v63 = vsel %vm2880_vm14, %v10614_v48, 27  ;;  %vm2878_vm10 = vcmp.lt.s32.totalorder %v10612_v24, 27  ;;  %v2806_v58 = vfloor.f32 %v2694_v27  ;;  %v2838_v2 = vceil.f32 %v2694_v27  ;;  %9720 = vmatprep.subr.bf16.mxu0 %v9719_v13 }
 0x396   :  { %v2917_v4 = vsub.s32 %v2881_v63, %v19105_v26  ;;  %v2879_v56 = vsel %vm2878_vm10, %v10612_v24, 27  ;;  %v19106_v18 = vcvt.f32.s32 %v13565_v29  ;;  %v10618_v37 = vcvt.f32.s32 %v10617_v55  ;;  %v2406_v26 = vld [vmem:[#allocation4 + $0x138] sm:$0xff] }
 0x397   :  { %v13581_v0 = vtrunc.f32 %v2806_v58  ;;  %v2697_v48 = vmul.f32 0.125, %v19107_v11  ;;  %v10615_v10 = vtrunc.f32 %v2838_v2  ;;  %v2696_v31 = vmul.f32 0.125, %v19108_v15 }
 0x398   :  { %v2916_v3 = vsub.s32 %v2879_v56, %v19106_v18  ;;  %2944 = vrot.lane.b32.xlu1 %v2917_v4, %s10864_s4  ;;  %v9723_v63 = vpack.c.bf16 %v2402_v52, %v2400_v8  ;;  %v9725_v24 = vpack.c.bf16 %v2401_v32, %v2399_v33  ;;  %vm2884_vm6 = vcmp.lt.s32.totalorder %v10618_v37, 27  ;;  %9722 = vmatpush1.bf16.msra.mxu0 %v9721_v12  ;;  %v2403_v32 = vld [vmem:[#allocation4 + $0x120] sm:$0xff]  ;;  %v2405_v52 = vld [vmem:[#allocation4 + $0x130] sm:$0xff] }
 0x399   :  { %v2809_v55 = vfloor.f32 %v2697_v48  ;;  %v2841_v58 = vceil.f32 %v2697_v48  ;;  %v2885_v56 = vsel %vm2884_vm6, %v10618_v37, 27  ;;  %v10616_v13 = vcvt.f32.s32 %v10615_v10  ;;  %v2408_v48 = vld [vmem:[#allocation4 + $0x148] sm:$0xff]  ;;  %v2410_v37 = vld [vmem:[#allocation4 + $0x158] sm:$0xff] }
 0x39a   :  { %2942 = vrot.lane.b32.xlu0 %v2916_v3, %s10864_s4  ;;  %v2808_v18 = vfloor.f32 %v2696_v31  ;;  %v2840_v22 = vceil.f32 %v2696_v31  ;;  %v19109_v2 = vcvt.f32.s32 %v13574_v60  ;;  %9724 = vmatprep.subr.bf16.mxu0 %v9723_v63  ;;  %v9727_v8 = vpack.c.bf16 %v2406_v26, %v2404_v42 }
 0x39b   :  { %v13590_v15 = vtrunc.f32 %v2809_v55  ;;  %v10621_v33 = vtrunc.f32 %v2841_v58  ;;  %vm2882_vm14 = vcmp.lt.s32.totalorder %v10616_v13, 27  ;;  %v19110_v55 = vcvt.f32.s32 %v13581_v0 }
 0x39c   :  { %v2919_v4 = vsub.s32 %v2885_v56, %v19109_v2  ;;  %v13592_v3 = vtrunc.f32 %v2808_v18  ;;  %v10619_v27 = vtrunc.f32 %v2840_v22  ;;  %v2883_v12 = vsel %vm2882_vm14, %v10616_v13, 27  ;;  %9726 = vmatpush1.bf16.msra.mxu0 %v9725_v24  ;;  %v2407_v22 = vld [vmem:[#allocation4 + $0x140] sm:$0xff]  ;;  %v2409_v18 = vld [vmem:[#allocation4 + $0x150] sm:$0xff]  ;;  %v2412_v13 = vld [vmem:[#allocation4 + $0x168] sm:$0xff] }
 0x39d   :  { %v10590_v31 = vcvt.f32.s32 %v13590_v15  ;;  %v10622_v10 = vcvt.f32.s32 %v10621_v33  ;;  %v2918_v56 = vsub.s32 %v2883_v12, %v19110_v55  ;;  %v9729_v26 = vpack.c.bf16 %v2405_v52, %v2403_v32  ;;  %9728 = vmatprep.subr.bf16.mxu0 %v9727_v8  ;;  %v2411_v32 = vld [vmem:[#allocation4 + $0x160] sm:$0xff]  ;;  %v2413_v52 = vld [vmem:[#allocation4 + $0x170] sm:$0xff] }
 0x39e   :  { %2948 = vrot.lane.b32.xlu1 %v2919_v4, %s10864_s4  ;;  %v10588_v63 = vcvt.f32.s32 %v13592_v3  ;;  %v10620_v42 = vcvt.f32.s32 %v10619_v27  ;;  %v9731_v58 = vpack.c.bf16 %v2410_v37, %v2408_v48  ;;  %v2414_v4 = vld [vmem:[#allocation4 + $0x178] sm:$0xff]  ;;  %vm2417_vm14 = vcmask 556032   ;;  %v19139_v15 = vld [vmem:[#allocation134_spill] sm:$0xff] }
 0x39f   :  { %vm2888_vm10 = vcmp.lt.s32.totalorder %v10622_v10, 27  ;;  %2946 = vrot.lane.b32.xlu0 %v2918_v56, %s10864_s4  ;;  %7809 = vmatprep.mubr.msk.f32.mxu0 %vm2417_vm14, %v13273_v51  ;;  %v9733_v27 = vpack.c.bf16 %v2409_v18, %v2407_v22  ;;  %v9735_v8 = vpack.c.bf16 %v2414_v4, %v2412_v13  ;;  %v9737_v48 = vpack.c.bf16 %v2413_v52, %v2411_v32  ;;  %v2415_v56 = vld [vmem:[#allocation4 + $0x180] sm:$0xf]  ;;  %v19142_v32 = vld [vmem:[#allocation139_spill] sm:$0xff] }
 0x3a0   :  { %v2889_v2 = vsel %vm2888_vm10, %v10622_v10, 27  ;;  %vm2886_vm6 = vcmp.lt.s32.totalorder %v10620_v42, 27  ;;  %9730 = vmatpush1.bf16.msra.mxu0 %v9729_v26  ;;  %v19111_v37 = vcvt.f32.s32 %v13485_v19  ;;  %v19112_v51 = vcvt.f32.s32 %v13481_v35  ;;  %v2416_v10 = vld [vmem:[#allocation4 + $0x188] sm:$0xf] }
 0x3a1   :  { %v2921_v33 = vsub.s32 %v2889_v2, %v10590_v31  ;;  %v2887_v12 = vsel %vm2886_vm6, %v10620_v42, 27  ;;  %9732 = vmatprep.subr.bf16.mxu0 %v9731_v58  ;;  %vm2466_vm10 = vcmask 1043456   ;;  %v19113_v55 = vcvt.f32.s32 %v13483_v54 }
 0x3a2   :  { %v2920_v24 = vsub.s32 %v2887_v12, %v10588_v63  ;;  %v19114_v42 = vcvt.f32.s32 %v13479_v62  ;;  %v19115_v19 = vcvt.f32.s32 %v13502_v23  ;;  %v18714_v35 = vmov 1.0   ;;  %v19141_v12 = vld [vmem:[#allocation136_spill] sm:$0xff] }
 0x3a3   :  { %2952 = vrot.lane.b32.xlu1 %v2921_v33, %s10864_s4  ;;  %v19116_v54 = vcvt.f32.s32 %v13512_v38  ;;  %v19117_v62 = vcvt.f32.s32 %v13522_v43  ;;  %v19118_v9 = vcvt.f32.s32 %v13526_v5  ;;  %v19119_v23 = vcvt.f32.s32 %v13548_v59  ;;  %v19140_v59 = vld [vmem:[#allocation137_spill] sm:$0xff] }
 0x3a4   :  { %2950 = vrot.lane.b32.xlu0 %v2920_v24, %s10864_s4  ;;  %9734 = vmatpush1.bf16.msra.mxu0 %v9733_v27  ;;  %v19120_v25 = vcvt.f32.s32 %v13550_v21  ;;  %v19122_v61 = vcvt.f32.s32 %v13565_v29  ;;  %v19124_v49 = vcvt.f32.s32 %v13581_v0  ;;  %v2671_v21 = vmul.f32 0.125, %v19140_v59 }
 0x3a5   :  { %9736 = vmatprep.subr.bf16.mxu0 %v9735_v8  ;;  %v2670_v24 = vmul.f32 0.125, %v19141_v12  ;;  %v2673_v52 = vmul.f32 0.125, %v19142_v32 }
 0x3a6   :  { %v2735_v58 = vceil.f32 %v2671_v21 }
 0x3a7   :  { %3004 = vrot.lane.b32.xlu1 %v19111_v37, %s10864_s4 }
 0x3a8   :  { %3002 = vrot.lane.b32.xlu0 %v19112_v51, %s10864_s4  ;;  %9738 = vmatpush1.bf16.msra.mxu0 %v9737_v48  ;;  %v10537_v51 = vtrunc.f32 %v2735_v58 }
 0x3a9   :  { %7807 = vmatprep.subr.msk.mxu0 %vm2466_vm10, %v2416_v10 }
 0x3ab   :  { %3008 = vrot.lane.b32.xlu1 %v19113_v55, %s10864_s4 }
 0x3ac   :  { %3006 = vrot.lane.b32.xlu0 %v19114_v42, %s10864_s4  ;;  %7808 = vmatpush1.msk.msra.mxu0 %vm2466_vm10, %v2415_v56  ;;  %v19143_v42 = vld [vmem:[#allocation138_spill] sm:$0xff] }
 0x3ad   :  { %7810 = vmatmul.mubr.msk.f32.vlgmr.msra.gmra.mrb[32].mxu0 %vm2299_vm5, %v18714_v35  ;;  %vm19128_vm5 = vcmp.eq.s32.totalorder %v12529_v20, %v19127_v50 }
 0x3ae   :  { %7811 = vmatprep.mubr.msk.f32.mxu0 %vm2417_vm14, %v13266_v1  ;;  %v19121_v1 = vcvt.f32.s32 %v13561_v44 }
 0x3af   :  { %3012 = vrot.lane.b32.xlu1 %v19115_v19, %s10864_s4  ;;  %v2672_v19 = vmul.f32 0.125, %v19143_v42 }
 0x3b0   :  { %3010 = vrot.lane.b32.xlu0 %v19116_v54, %s10864_s4  ;;  %v2703_v54 = vfloor.f32 %v2671_v21 }
 0x3b1   :  { %7812 = vmatmul.mubr.msk.f32.gmra.mrb[34].mxu0 %vm2301_vm3, %v18714_v35  ;;  %vm19125_vm3 = vcmp.eq.s32.totalorder %v12529_v20, %v13406_v41 }
 0x3b2   :  { %7813 = vmatprep.mubr.msk.f32.mxu0 %vm2417_vm14, %v13300_v34  ;;  %v19123_v34 = vcvt.f32.s32 %v13574_v60  ;;  %v2667_v60 = vmul.f32 0.125, %v19139_v15 }
 0x3b3   :  { %3016 = vrot.lane.b32.xlu1 %v19117_v62, %s10864_s4  ;;  %v2734_v62 = vceil.f32 %v2670_v24 }
 0x3b4   :  { %3014 = vrot.lane.b32.xlu0 %v19118_v9, %s10864_s4  ;;  %v2731_v0 = vceil.f32 %v2667_v60  ;;  %v2699_v8 = vfloor.f32 %v2667_v60 }
 0x3b5   :  { %7814 = vmatmul.mubr.msk.f32.gmra.mrb[36].mxu0 %vm2303_vm7, %v18714_v35 }
 0x3b6   :  { %7815 = vmatprep.mubr.msk.f32.mxu0 %vm2417_vm14, %v13303_v16  ;;  %v19126_v16 = vld [vmem:[#allocation147_spill] sm:$0xff]  ;;  %v10529_v2 = vtrunc.f32 %v2731_v0 }
 0x3b7   :  { %3020 = vrot.lane.b32.xlu1 %v19119_v23, %s10864_s4  ;;  %v19144_v23 = vld [vmem:[#allocation141_spill] sm:$0xff] }
 0x3b8   :  { %3018 = vrot.lane.b32.xlu0 %v19120_v25, %s10864_s4  ;;  %v10530_v55 = vcvt.f32.s32 %v10529_v2  ;;  %v2675_v25 = vmul.f32 0.125, %v19144_v23 }
 0x3b9   :  { %7816 = vmatmul.mubr.msk.f32.gmra.mrb[38].mxu0 %vm2305_vm9, %v18714_v35 }
 0x3ba   :  { %7817 = vmatprep.mubr.msk.f32.mxu0 %vm2417_vm14, %v13330_v6  ;;  %v19130_v6 = vld [vmem:[#allocation149_spill] sm:$0xff]  ;;  %v2739_v60 = vceil.f32 %v2675_v25 }
 0x3bb   :  { %3024 = vrot.lane.b32.xlu1 %v19121_v1, %s10864_s4  ;;  %vm19131_vm7 = vcmp.eq.s32.totalorder %v12529_v20, %v19130_v6 }
 0x3bc   :  { %3022 = vrot.lane.b32.xlu0 %v19122_v61, %s10864_s4  ;;  %v13782_v61 = vtrunc.f32 %v2699_v8 }
 0x3bd   :  { %7818 = vmatmul.mubr.msk.f32.gmra.mrb[40].mxu0 %vm2307_vm11, %v18714_v35 }
 0x3be   :  { %7819 = vmatprep.mubr.msk.f32.mxu0 %vm2417_vm14, %v13333_v53  ;;  %v19132_v53 = vld [vmem:[#allocation155_spill] sm:$0xff]  ;;  %v18720_v21 = vcvt.f32.s32 %v13782_v61 }
 0x3bf   :  { %3028 = vrot.lane.b32.xlu1 %v19123_v34, %s10864_s4  ;;  %v2737_v34 = vceil.f32 %v2673_v52 }
 0x3c0   :  { %3026 = vrot.lane.b32.xlu0 %v19124_v49, %s10864_s4  ;;  %v19145_v49 = vld [vmem:[#allocation140_spill] sm:$0xff] }
 0x3c1   :  { %7820 = vmatmul.mubr.msk.f32.gmra.mrb[42].mxu0 %vm2309_vm13, %v18714_v35 }
 0x3c2   :  { %7821 = vmatprep.mubr.msk.f32.mxu0 %vm2417_vm14, %v13360_v40  ;;  %v2736_v40 = vceil.f32 %v2672_v19 }
 0x3c3   :  { %3032 = vrot.lane.b32.xlu1 %v10590_v31, %s10864_s4 }
 0x3c4   :  { %3030 = vrot.lane.b32.xlu0 %v10588_v63, %s10864_s4 }
 0x3c5   :  { %7822 = vmatmul.mubr.msk.f32.gmra.mrb[44].mxu0 %vm2311_vm15, %v18714_v35  ;;  %vm2764_vm15 = vcmp.lt.s32.totalorder %v10530_v55, 27 }
 0x3c6   :  { %7823 = vmatprep.mubr.msk.f32.mxu0 %vm2417_vm14, %v13363_v30  ;;  %v19136_v30 = vld [vmem:[#allocation133_spill] sm:$0xff] }
 0x3c7   :  { %v2668_v45 = vmul.f32 0.125, %v19136_v30 }
 0x3c9   :  { %7824 = vmatmul.mubr.msk.f32.gmra.mrb[46].mxu0 %vm2313_vm1, %v18714_v35  ;;  %v2732_v41 = vceil.f32 %v2668_v45  ;;  %v2700_v31 = vfloor.f32 %v2668_v45  ;;  %v19148_v45 = vld [vmem:[#allocation143_spill] sm:$0xff] }
 0x3ca   :  { %7825 = vmatprep.mubr.msk.f32.mxu0 %vm2417_vm14, %v13390_v28  ;;  %v2666_v28 = vmul.f32 0.125, %v19137_v36 }
 0x3cb   :  { %v10531_v44 = vtrunc.f32 %v2732_v41  ;;  %v13768_v27 = vtrunc.f32 %v2700_v31  ;;  %v13792_v41 = vtrunc.f32 %v2703_v54  ;;  %v2702_v31 = vfloor.f32 %v2670_v24 }
 0x3cc   :  { %v2730_v38 = vceil.f32 %v2666_v28  ;;  %v2698_v63 = vfloor.f32 %v2666_v28  ;;  %v2677_v28 = vmul.f32 0.125, %v19148_v45  ;;  %v10545_v54 = vtrunc.f32 %v2739_v60 }
 0x3cd   :  { %7826 = vmatmul.mubr.msk.f32.gmra.mrb[48].mxu0 %vm2315_vm4, %v18714_v35  ;;  %v10532_v22 = vcvt.f32.s32 %v10531_v44  ;;  %v18716_v1 = vcvt.f32.s32 %v13768_v27  ;;  %v10541_v44 = vtrunc.f32 %v2737_v34 }
 0x3ce   :  { %7827 = vmatprep.mubr.msk.f32.mxu0 %vm2417_vm14, %v13393_v7  ;;  %v10527_v3 = vtrunc.f32 %v2730_v38  ;;  %v13771_v48 = vtrunc.f32 %v2698_v63  ;;  %v2705_v63 = vfloor.f32 %v2673_v52  ;;  %v2741_v2 = vceil.f32 %v2677_v28 }
 0x3cf   :  { %vm2766_vm9 = vcmp.lt.s32.totalorder %v10532_v22, 27  ;;  %v10542_v34 = vcvt.f32.s32 %v10541_v44  ;;  %v13815_v52 = vtrunc.f32 %v2702_v31 }
 0x3d0   :  { %v10528_v4 = vcvt.f32.s32 %v10527_v3  ;;  %v2767_v50 = vsel %vm2766_vm9, %v10532_v22, 27  ;;  %v2765_v22 = vsel %vm2764_vm15, %v10530_v55, 27  ;;  %v2707_v55 = vfloor.f32 %v2675_v25 }
 0x3d1   :  { %7828 = vmatmul.mubr.msk.f32.gmra.mrb[50].mxu0 %vm2317_vm8, %v18714_v35  ;;  %v13796_v38 = vsub.s32 %v2767_v50, %v18716_v1  ;;  %vm2776_vm8 = vcmp.lt.s32.totalorder %v10542_v34, 27 }
 0x3d2   :  { %7829 = vmatprep.mubr.msk.f32.mxu0 %vm2417_vm14, %v13420_v17  ;;  %v19138_v17 = vld [vmem:[#allocation135_spill] sm:$0xff]  ;;  %vm2762_vm11 = vcmp.lt.s32.totalorder %v10528_v4, 27 }
 0x3d3   :  { %v2763_v39 = vsel %vm2762_vm11, %v10528_v4, 27  ;;  %v18717_v4 = vcvt.f32.s32 %v13792_v41 }
 0x3d5   :  { %7830 = vmatmul.mubr.msk.f32.gmra.mrb[52].mxu0 %vm2319_vm12, %v18714_v35 }
 0x3d6   :  { %7831 = vmatprep.mubr.msk.f32.mxu0 %vm2417_vm14, %v13423_v57  ;;  %v2669_v57 = vmul.f32 0.125, %v19138_v17 }
 0x3d8   :  { %v2733_v29 = vceil.f32 %v2669_v57  ;;  %v2701_v26 = vfloor.f32 %v2669_v57  ;;  %v10535_v57 = vtrunc.f32 %v2734_v62 }
 0x3d9   :  { %7832 = vmatmul.mubr.msk.f32.gmra.mrb[54].mxu0 %vm19125_vm3, %v18714_v35 }
 0x3da   :  { %7833 = vmatprep.mubr.msk.f32.mxu0 %vm2417_vm14, %v19126_v16  ;;  %v10533_v18 = vtrunc.f32 %v2733_v29  ;;  %v13773_v37 = vtrunc.f32 %v2701_v26  ;;  %v2674_v16 = vmul.f32 0.125, %v19145_v49  ;;  %v10536_v8 = vcvt.f32.s32 %v10535_v57 }
 0x3db   :  { %v10549_v57 = vtrunc.f32 %v2741_v2  ;;  %v19150_v2 = vld [vmem:[#allocation145_spill] sm:$0xff] }
 0x3dc   :  { %v10534_v10 = vcvt.f32.s32 %v10533_v18  ;;  %v18718_v6 = vcvt.f32.s32 %v13773_v37  ;;  %v2738_v0 = vceil.f32 %v2674_v16  ;;  %v10539_v18 = vtrunc.f32 %v2736_v40 }
 0x3dd   :  { %7834 = vmatmul.mubr.msk.f32.gmra.mrb[56].mxu0 %vm19128_vm5, %v18714_v35  ;;  %v2706_v40 = vfloor.f32 %v2674_v16  ;;  %vm2770_vm4 = vcmp.lt.s32.totalorder %v10536_v8, 27  ;;  %v13835_v16 = vtrunc.f32 %v2707_v55  ;;  %v2679_v1 = vmul.f32 0.125, %v19150_v2 }
 0x3de   :  { %7835 = vmatprep.mubr.msk.f32.mxu0 %vm2417_vm14, %v19129_v47  ;;  %v18719_v47 = vcvt.f32.s32 %v13771_v48  ;;  %vm13787_vm13 = vcmp.lt.s32.totalorder %v10534_v10, 27  ;;  %v10543_v50 = vtrunc.f32 %v2738_v0  ;;  %v10546_v0 = vcvt.f32.s32 %v10545_v54 }
 0x3df   :  { %v2769_v58 = vsel %vm13787_vm13, %v10534_v10, 27  ;;  %v13817_v10 = vtrunc.f32 %v2705_v63  ;;  %v2709_v63 = vfloor.f32 %v2677_v28  ;;  %v2711_v28 = vfloor.f32 %v2679_v1 }
 0x3e0   :  { %v13803_v3 = vsub.s32 %v2763_v39, %v18719_v47  ;;  %v19149_v39 = vld [vmem:[#allocation142_spill] sm:$0xff]  ;;  %v13813_v24 = vsub.s32 %v2769_v58, %v18718_v6  ;;  %v10544_v25 = vcvt.f32.s32 %v10543_v50  ;;  %v2777_v6 = vsel %vm2776_vm8, %v10542_v34, 27 }
 0x3e1   :  { %7836 = vmatmul.mubr.msk.f32.gmra.mrb[58].mxu0 %vm19131_vm7, %v18714_v35  ;;  %v13842_v47 = vtrunc.f32 %v2709_v63 }
 0x3e2   :  { %7837 = vmatprep.mubr.msk.f32.mxu0 %vm2417_vm14, %v19132_v53  ;;  %v10538_v53 = vcvt.f32.s32 %v10537_v51  ;;  %v2704_v51 = vfloor.f32 %v2672_v19  ;;  %v13823_v19 = vsub.s32 %v2765_v22, %v18720_v21  ;;  %v18721_v22 = vcvt.f32.s32 %v13815_v52 }
 0x3e4   :  { %vm2772_vm1 = vcmp.lt.s32.totalorder %v10538_v53, 27  ;;  %v13829_v44 = vtrunc.f32 %v2704_v51  ;;  %v10550_v51 = vcvt.f32.s32 %v10549_v57 }
 0x3e5   :  { %7838 = vmatmul.mubr.msk.f32.gmra.mrb[60].mxu0 %vm2327_vm2, %v18714_v35  ;;  %v2773_v62 = vsel %vm2772_vm1, %v10538_v53, 27  ;;  %v10540_v53 = vcvt.f32.s32 %v10539_v18  ;;  %vm2778_vm2 = vcmp.lt.s32.totalorder %v10544_v25, 27  ;;  %v19151_v18 = vld [vmem:[#allocation144_spill] sm:$0xff] }
 0x3e6   :  { %7839 = vmatprep.mubr.msk.f32.mxu0 %vm2417_vm14, %v19134_v14  ;;  %v13827_v60 = vsub.s32 %v2773_v62, %v18717_v4  ;;  %v2771_v62 = vsel %vm2770_vm4, %v10536_v8, 27  ;;  %v13838_v4 = vtrunc.f32 %v2706_v40  ;;  %v2678_v55 = vmul.f32 0.125, %v19151_v18 }
 0x3e7   :  { %vm2774_vm12 = vcmp.lt.s32.totalorder %v10540_v53, 27  ;;  %v13847_v2 = vsub.s32 %v2771_v62, %v18721_v22  ;;  %vm2784_vm6 = vcmp.lt.s32.totalorder %v10550_v51, 27  ;;  %v2779_v18 = vsel %vm2778_vm2, %v10544_v25, 27 }
 0x3e8   :  { %v2775_v40 = vsel %vm2774_vm12, %v10540_v53, 27  ;;  %v13860_v62 = vtrunc.f32 %v2711_v28  ;;  %v2743_v22 = vceil.f32 %v2679_v1  ;;  %v2710_v57 = vfloor.f32 %v2678_v55 }
 0x3e9   :  { %7840 = vmatmul.mubr.msk.f32.gmra.mrb[62].mxu0 %vm2329_vm0, %v18714_v35  ;;  %v2676_v35 = vmul.f32 0.125, %v19149_v39  ;;  %vm2780_vm0 = vcmp.lt.s32.totalorder %v10546_v0, 27  ;;  %v2742_v49 = vceil.f32 %v2678_v55  ;;  %v19156_v28 = vcvt.f32.s32 %v13835_v16 }
 0x3ea   :  { %v2781_v63 = vsel %vm2780_vm0, %v10546_v0, 27  ;;  %v2785_v0 = vsel %vm2784_vm6, %v10550_v51, 27  ;;  %v19157_v53 = vcvt.f32.s32 %v13838_v4  ;;  %v19158_v51 = vcvt.f32.s32 %v13771_v48 }
 0x3eb   :  { %v2740_v58 = vceil.f32 %v2676_v35  ;;  %v2708_v50 = vfloor.f32 %v2676_v35  ;;  %v19152_v35 = vcvt.f32.s32 %v13817_v10  ;;  %v13880_v55 = vsub.s32 %v2781_v63, %v19156_v28 }
 0x3ec   :  { %v10553_v32 = vtrunc.f32 %v2743_v22  ;;  %v10551_v48 = vtrunc.f32 %v2742_v49  ;;  %v19163_v22 = vcvt.f32.s32 %v13773_v37 }
 0x3ed   :  { %v10547_v21 = vtrunc.f32 %v2740_v58  ;;  %v13855_v34 = vsub.s32 %v2777_v6, %v19152_v35  ;;  %v13858_v45 = vtrunc.f32 %v2708_v50  ;;  %v19153_v6 = vcvt.f32.s32 %v13829_v44  ;;  %v19154_v58 = vld [vmem:[#allocation154_spill] sm:$0xff] }
 0x3ee   :  { %v13870_v42 = vmul.f32 0.125, %v19154_v58  ;;  %v19155_v50 = vcvt.f32.s32 %v13782_v61  ;;  %v2989_v61 = vmul.u32 28, %v19163_v22  ;;  %v10554_v59 = vcvt.f32.s32 %v10553_v32 }
 0x3ef   :  { %v10548_v8 = vcvt.f32.s32 %v10547_v21  ;;  %v13867_v35 = vsub.s32 %v2775_v40, %v19153_v6  ;;  %v13884_v40 = vsub.s32 %v2779_v18, %v19157_v53  ;;  %v2986_v6 = vmul.u32 28, %v19158_v51 }
 0x3f0   :  { %v2987_v1 = vmul.u32 28, %v19155_v50  ;;  %v13900_v18 = vtrunc.f32 %v2710_v57  ;;  %v2745_v28 = vceil.f32 %v13870_v42  ;;  %v19164_v57 = vcvt.f32.s32 %v13768_v27 }
 0x3f1   :  { %v13752_v7 = vpop.permute.xlu1 %2926  ;;  %v13754_v46 = vpop.permute.xlu0 %2922  ;;  %vm13896_vm14 = vcmp.lt.s32.totalorder %v10548_v8, 27  ;;  %vm13937_vm9 = vcmp.lt.s32.totalorder %v10554_v59, 27 }
 0x3f2   :  { %v2954_v58 = vmul.u32 %v13754_v46, %v13803_v3  ;;  %v19162_v46 = vld [vmem:[#allocation153_spill] sm:$0xff]  ;;  %v2988_v12 = vmul.u32 28, %v19164_v57  ;;  %v10520_v37 = vcvt.f32.s32 %v13900_v18 }
 0x3f3   :  { %v13904_v3 = vmul.f32 0.125, %v19162_v46  ;;  %v2956_v49 = vmul.u32 %v13752_v7, %v13796_v38  ;;  %v19165_v7 = vcvt.f32.s32 %v13792_v41 }
 0x3f4   :  { %vm2970_vm3 = vcmp.gt.s32.totalorder %v2954_v58, 0 }
 0x3f5   :  { %v13758_v43 = vpop.permute.xlu1 %2928  ;;  %v13760_v5 = vpop.permute.xlu0 %2924  ;;  %v2991_v38 = vmul.u32 28, %v19165_v7  ;;  %vm2972_vm7 = vcmp.gt.s32.totalorder %v2956_v49, 0 }
 0x3f6   :  { %v2955_v21 = vmul.u32 %v13760_v5, %v13823_v19  ;;  %v19159_v5 = vcvt.f32.s32 %v13842_v47 }
 0x3f8   :  { %v13894_v19 = vsub.s32 %v2785_v0, %v19159_v5  ;;  %v2957_v0 = vmul.u32 %v13758_v43, %v13813_v24  ;;  %vm2971_vm10 = vcmp.gt.s32.totalorder %v2955_v21, 0  ;;  %v10557_v24 = vtrunc.f32 %v2745_v28 }
 0x3f9   :  { %v2744_v21 = vceil.f32 %v13904_v3  ;;  %v19169_v28 = vcvt.f32.s32 %v13858_v45 }
 0x3fa   :  { %vm13920_vm5 = vcmp.gt.s32.totalorder %v2957_v0, 0  ;;  %v19174_v0 = vcvt.f32.s32 %v13817_v10 }
 0x3fb   :  { %v13763_v13 = vpop.permute.xlu1 %2932 }
 0x3fc   :  { %v13765_v33 = vpop.permute.xlu0 %2930 }
 0x3ff   :  { %v13775_v56 = vpop.permute.xlu1 %2936 }
 0x400   :  { %v13778_v9 = vpop.permute.xlu0 %2934  ;;  %v2961_v49 = vmul.u32 %v13775_v56, %v13855_v34 }
 0x402   :  { %vm13970_vm4 = vcmp.gt.s32.totalorder %v2961_v49, 0 }
 0x405   :  { %v13799_v29 = vpop.permute.xlu1 %2940 }
 0x406   :  { %v13805_v26 = vpop.permute.xlu0 %2938 }
 0x40a   :  { %v13819_v14 = vpop.permute.xlu1 %2944 }
 0x40c   :  { %v13831_v31 = vpop.permute.xlu0 %2942 }
 0x410   :  { %v13840_v54 = vpop.permute.xlu1 %2948 }
 0x411   :  { %v13851_v39 = vpop.permute.xlu0 %2946 }
 0x415   :  { %v13863_v23 = vpop.permute.xlu1 %2952 }
 0x416   :  { %v13872_v25 = vpop.permute.xlu0 %2950 }
 0x419   :  { %v3005_v53 = vpop.permute.xlu1 %3004 }
 0x41a   :  { %v3035_v51 = vadd.s32 %v3005_v53, %v2987_v1  ;;  %v3003_v50 = vpop.permute.xlu0 %3002  ;;  %v2783_v1 = vsel %vm13896_vm14, %v10548_v8, 27  ;;  %v10552_v53 = vcvt.f32.s32 %v10551_v48  ;;  %v2959_v8 = vmul.u32 %v13763_v13, %v13827_v60 }
 0x41b   :  { %v3034_v5 = vadd.s32 %v3003_v50, %v2986_v6  ;;  %v19168_v50 = vcvt.f32.s32 %v13815_v52  ;;  %v2713_v48 = vfloor.f32 %v13870_v42  ;;  %v10555_v60 = vtrunc.f32 %v2744_v21 }
 0x41c   :  { %v3051_v46 = vsel %vm2971_vm10, %v3035_v51, 4294967295  ;;  %vm13941_vm11 = vcmp.lt.s32.totalorder %v10552_v53, 27  ;;  %vm13947_vm13 = vcmp.gt.s32.totalorder %v2959_v8, 0  ;;  %v2712_v21 = vfloor.f32 %v13904_v3 }
 0x41d   :  { %v3009_v22 = vpop.permute.xlu1 %3008  ;;  %3075 = vperm.xlu1 %10829, %v3051_v46   ;;  %v3050_v43 = vsel %vm2970_vm3, %v3034_v5, 4294967295  ;;  %v2990_v63 = vmul.u32 28, %v19168_v50  ;;  %v13935_v46 = vsub.s32 %v2783_v1, %v19169_v28  ;;  %v2993_v5 = vmul.u32 28, %v19174_v0 }
 0x41e   :  { %v3037_v27 = vadd.s32 %v3009_v22, %v2989_v61  ;;  %v3007_v6 = vpop.permute.xlu0 %3006  ;;  %3072 = vperm.xlu0 %10828, %v3050_v43   ;;  %v2958_v61 = vmul.u32 %v13765_v33, %v13847_v2  ;;  %v10558_v33 = vcvt.f32.s32 %v10557_v24  ;;  %v19177_v22 = vcvt.f32.s32 %v13829_v44 }
 0x41f   :  { %v3036_v58 = vadd.s32 %v3007_v6, %v2988_v12  ;;  %v2960_v24 = vmul.u32 %v13778_v9, %v13867_v35  ;;  %v2787_v6 = vsel %vm13941_vm11, %v10552_v53, 27  ;;  %v10525_v56 = vtrunc.f32 %v2713_v48 }
 0x420   :  { %v3053_v41 = vsel %vm13920_vm5, %v3037_v27, 4294967295  ;;  %v2992_v43 = vmul.u32 28, %v19177_v22  ;;  %vm2974_vm15 = vcmp.gt.s32.totalorder %v2958_v61, 0  ;;  %v2789_v27 = vsel %vm13937_vm9, %v10554_v59, 27 }
 0x421   :  { %v3013_v12 = vpop.permute.xlu1 %3012  ;;  %v3052_v52 = vsel %vm2972_vm7, %v3036_v58, 4294967295  ;;  %vm13964_vm1 = vcmp.lt.s32.totalorder %v10558_v33, 27  ;;  %v19180_v3 = vcvt.f32.s32 %v13835_v16  ;;  %v2963_v53 = vmul.u32 %v13799_v29, %v13880_v55 }
 0x422   :  { %v3039_v42 = vadd.s32 %v3013_v12, %v2991_v38  ;;  %v3011_v2 = vpop.permute.xlu0 %3010  ;;  %3078 = vperm.xlu1 %10829, %v3052_v52   ;;  %3081 = vperm.xlu0 %10828, %v3053_v41   ;;  %v10556_v38 = vcvt.f32.s32 %v10555_v60  ;;  %v19183_v58 = vcvt.f32.s32 %v13838_v4  ;;  %vm2976_vm8 = vcmp.gt.s32.totalorder %v2960_v24, 0 }
 0x423   :  { %v3038_v1 = vadd.s32 %v3011_v2, %v2990_v63  ;;  %v2995_v32 = vmul.u32 28, %v19180_v3  ;;  %v2962_v63 = vmul.u32 %v13805_v26, %v13884_v40  ;;  %v10523_v61 = vtrunc.f32 %v2712_v21 }
 0x424   :  { %v3055_v10 = vsel %vm13947_vm13, %v3039_v42, 4294967295  ;;  %v2994_v50 = vmul.u32 28, %v19183_v58  ;;  %v19184_v48 = vcvt.f32.s32 %v13860_v62  ;;  %v2902_v28 = vsub.s32 %v2787_v6, %v10520_v37 }
 0x425   :  { %v3017_v34 = vpop.permute.xlu1 %3016  ;;  %v3054_v7 = vsel %vm2974_vm15, %v3038_v1, 4294967295  ;;  %v10526_v51 = vcvt.f32.s32 %v10525_v56  ;;  %v2793_v4 = vsel %vm13964_vm1, %v10558_v33, 27  ;;  %vm2790_vm12 = vcmp.lt.s32.totalorder %v10556_v38, 27 }
 0x426   :  { %v3041_v9 = vadd.s32 %v3017_v34, %v2993_v5  ;;  %v3015_v35 = vpop.permute.xlu0 %3014  ;;  %3084 = vperm.xlu1 %10829, %v3054_v7   ;;  %3087 = vperm.xlu0 %10828, %v3055_v10   ;;  %v2903_v41 = vsub.s32 %v2789_v27, %v19184_v48  ;;  %v19185_v26 = vcvt.f32.s32 %v13842_v47  ;;  %vm2979_vm0 = vcmp.gt.s32.totalorder %v2963_v53, 0 }
 0x427   :  { %v3040_v8 = vadd.s32 %v3015_v35, %v2992_v43  ;;  %v2965_v52 = vmul.u32 %v13819_v14, %v13894_v19  ;;  %v19186_v42 = vcvt.f32.s32 %v13858_v45  ;;  %vm2978_vm2 = vcmp.gt.s32.totalorder %v2962_v63, 0 }
 0x428   :  { %v3057_v16 = vsel %vm13970_vm4, %v3041_v9, 4294967295  ;;  %v2997_v40 = vmul.u32 28, %v19185_v26  ;;  %v2964_v33 = vmul.u32 %v13831_v31, %v13935_v46  ;;  %v10524_v0 = vcvt.f32.s32 %v10523_v61 }
 0x429   :  { %v3021_v29 = vpop.permute.xlu1 %3020  ;;  %v3056_v55 = vsel %vm2976_vm8, %v3040_v8, 4294967295  ;;  %v2996_v2 = vmul.u32 28, %v19186_v42  ;;  %v2791_v57 = vsel %vm2790_vm12, %v10556_v38, 27  ;;  %v2905_v22 = vsub.s32 %v2793_v4, %v10526_v51 }
 0x42a   :  { %v3043_v13 = vadd.s32 %v3021_v29, %v2995_v32  ;;  %v3019_v12 = vpop.permute.xlu0 %3018  ;;  %3090 = vperm.xlu1 %10829, %v3056_v55   ;;  %3093 = vperm.xlu0 %10828, %v3057_v16   ;;  %v19187_v14 = vmov %v19184_v48  ;;  %vm2981_vm6 = vcmp.gt.s32.totalorder %v2965_v52, 0  ;;  %v2967_v45 = vmul.u32 %v13840_v54, %v2903_v41  ;;  %v19193_v52 = vld [vmem:[#allocation148_spill] sm:$0xff] }
 0x42b   :  { %v3042_v60 = vadd.s32 %v3019_v12, %v2994_v50  ;;  %v2999_v19 = vmul.u32 28, %v19187_v14  ;;  %v2998_v31 = vmul.u32 28, %v10520_v37  ;;  %vm2980_vm14 = vcmp.gt.s32.totalorder %v2964_v33, 0 }
 0x42c   :  { %v3059_v5 = vsel %vm2979_vm0, %v3043_v13, 4294967295  ;;  %v2966_v46 = vmul.u32 %v13851_v39, %v2902_v28  ;;  %v2904_v21 = vsub.s32 %v2791_v57, %v10524_v0  ;;  %v3001_v62 = vmul.u32 28, %v10526_v51 }
 0x42d   :  { %v3025_v49 = vpop.permute.xlu1 %3024  ;;  %v3058_v1 = vsel %vm2978_vm2, %v3042_v60, 4294967295  ;;  %vm2983_vm10 = vcmp.gt.s32.totalorder %v2967_v45, 0  ;;  %v2969_v7 = vmul.u32 %v13863_v23, %v2905_v22  ;;  %v3000_v44 = vmul.u32 28, %v10524_v0 }
 0x42e   :  { %v3045_v47 = vadd.s32 %v3025_v49, %v2997_v40  ;;  %v3023_v43 = vpop.permute.xlu0 %3022  ;;  %3096 = vperm.xlu1 %10829, %v3058_v1   ;;  %3099 = vperm.xlu0 %10828, %v3059_v5   ;;  %vm2982_vm3 = vcmp.gt.s32.totalorder %v2966_v46, 0  ;;  %v2968_v18 = vmul.u32 %v13872_v25, %v2904_v21  ;;  %v14041_v51 = vadd.s32 256, %v12529_v20 }
 0x42f   :  { %v3044_v24 = vadd.s32 %v3023_v43, %v2996_v2  ;;  %vm2985_vm5 = vcmp.gt.s32.totalorder %v2969_v7, 0  ;;  %v14044_v29 = vadd.s32 384, %v12529_v20  ;;  %v14047_v55 = vadd.s32 512, %v12529_v20 }
 0x430   :  { %v3061_v10 = vsel %vm2981_vm6, %v3045_v47, 4294967295  ;;  %vm2984_vm7 = vcmp.gt.s32.totalorder %v2968_v18, 0  ;;  %v14050_v4 = vadd.s32 640, %v12529_v20  ;;  %v14053_v13 = vadd.s32 768, %v12529_v20 }
 0x431   :  { %v3029_v27 = vpop.permute.xlu1 %3028  ;;  %v3060_v6 = vsel %vm2980_vm14, %v3044_v24, 4294967295  ;;  %19188 = vst [vmem:[#allocation147_spill] sm:$0xff] %v14044_v29  ;;  %19189 = vst [vmem:[#allocation146_spill] sm:$0xff] %v14047_v55  ;;  %v19194_v2 = vmov 0.0  }
 0x432   :  { %v3047_v56 = vadd.s32 %v3029_v27, %v2999_v19  ;;  %v3027_v34 = vpop.permute.xlu0 %3026  ;;  %3102 = vperm.xlu1 %10829, %v3060_v6   ;;  %3105 = vperm.xlu0 %10828, %v3061_v10   ;;  %19190 = vst [vmem:[#allocation151_spill] sm:$0xff] %v14050_v4  ;;  %19191 = vst [vmem:[#allocation149_spill] sm:$0xff] %v14053_v13 }
 0x433   :  { %v3046_v54 = vadd.s32 %v3027_v34, %v2998_v31 }
 0x434   :  { %v3063_v37 = vsel %vm2983_vm10, %v3047_v56, 4294967295 }
 0x435   :  { %v3033_v38 = vpop.permute.xlu1 %3032  ;;  %v3062_v39 = vsel %vm2982_vm3, %v3046_v54, 4294967295 }
 0x436   :  { %v3049_v9 = vadd.s32 %v3033_v38, %v3001_v62  ;;  %v3031_v35 = vpop.permute.xlu0 %3030  ;;  %3108 = vperm.xlu1 %10829, %v3062_v39   ;;  %3111 = vperm.xlu0 %10828, %v3063_v37  }
 0x437   :  { %v3048_v3 = vadd.s32 %v3031_v35, %v3000_v44 }
 0x438   :  { %v3065_v32 = vsel %vm2985_vm5, %v3049_v9, 4294967295 }
 0x439   :  { %v3064_v59 = vsel %vm2984_vm7, %v3048_v3, 4294967295 }
 0x43a   :  { %3114 = vperm.xlu1 %10829, %v3064_v59   ;;  %3117 = vperm.xlu0 %10828, %v3065_v32  }
 0x480   :  { %v2539_v23 = vpop.f32.mrb[32].mxu0 }
 0x481   :  { %2634 = vst [vmem:[%s18558_s8] sm:$0xff] %v2539_v23  ;;  %v2541_v25 = vpop.f32.mrb[33].mxu0 }
 0x482   :  { %2635 = vst [vmem:[%s18558_s8 + $0x8] sm:$0xff] %v2541_v25 }
 0x484   :  { %v2545_v53 = vpop.f32.mrb[34].mxu0 }
 0x485   :  { %2636 = vst [vmem:[%s18558_s8 + $0x10] sm:$0xff] %v2545_v53  ;;  %v2547_v8 = vpop.f32.mrb[35].mxu0 }
 0x486   :  { %2637 = vst [vmem:[%s18558_s8 + $0x18] sm:$0xff] %v2547_v8 }
 0x488   :  { %v2551_v58 = vpop.f32.mrb[36].mxu0 }
 0x489   :  { %2638 = vst [vmem:[%s18558_s8 + $0x20] sm:$0xff] %v2551_v58  ;;  %v2553_v50 = vpop.f32.mrb[37].mxu0 }
 0x48a   :  { %2639 = vst [vmem:[%s18558_s8 + $0x28] sm:$0xff] %v2553_v50 }
 0x48c   :  { %v2557_v63 = vpop.f32.mrb[38].mxu0 }
 0x48d   :  { %2640 = vst [vmem:[%s18558_s8 + $0x30] sm:$0xff] %v2557_v63  ;;  %v2559_v61 = vpop.f32.mrb[39].mxu0 }
 0x48e   :  { %2641 = vst [vmem:[%s18558_s8 + $0x38] sm:$0xff] %v2559_v61 }
 0x490   :  { %v2563_v16 = vpop.f32.mrb[40].mxu0 }
 0x491   :  { %2642 = vst [vmem:[%s18558_s8 + $0x40] sm:$0xff] %v2563_v16  ;;  %v2565_v48 = vpop.f32.mrb[41].mxu0 }
 0x492   :  { %2643 = vst [vmem:[%s18558_s8 + $0x48] sm:$0xff] %v2565_v48 }
 0x494   :  { %v2569_v41 = vpop.f32.mrb[42].mxu0 }
 0x495   :  { %2644 = vst [vmem:[%s18558_s8 + $0x50] sm:$0xff] %v2569_v41  ;;  %v2571_v28 = vpop.f32.mrb[43].mxu0 }
 0x496   :  { %2645 = vst [vmem:[%s18558_s8 + $0x58] sm:$0xff] %v2571_v28 }
 0x498   :  { %v2575_v12 = vpop.f32.mrb[44].mxu0 }
 0x499   :  { %2646 = vst [vmem:[%s18558_s8 + $0x60] sm:$0xff] %v2575_v12  ;;  %v2577_v26 = vpop.f32.mrb[45].mxu0 }
 0x49a   :  { %2647 = vst [vmem:[%s18558_s8 + $0x68] sm:$0xff] %v2577_v26  ;;  %v19225_v26 = vld [vmem:[#allocation34_spill] sm:$0xff] }
 0x49c   :  { %v14058_v40 = vpop.permute.xlu1 %3075  ;;  %v2581_v42 = vpop.f32.mrb[46].mxu0 }
 0x49d   :  { %19192 = vst [vmem:[#allocation155_spill] sm:$0xff] %v14058_v40  ;;  %vm3126_vm9 = vcmp.eq.s32.totalorder %v12529_v20, %v14058_v40  ;;  %vm3127_vm11 = vcmp.eq.s32.totalorder %v19193_v52, %v14058_v40  ;;  %vm3128_vm13 = vcmp.eq.s32.totalorder %v14041_v51, %v14058_v40  ;;  %vm3129_vm15 = vcmp.eq.s32.totalorder %v14044_v29, %v14058_v40  ;;  %v14071_v60 = vpop.permute.xlu0 %3072  ;;  %v2583_v0 = vpop.f32.mrb[47].mxu0 }
 0x49e   :  { %vm3132_vm8 = vcmp.eq.s32.totalorder %v14053_v13, %v14058_v40  ;;  %vm3119_vm12 = vcmp.eq.s32.totalorder %v12529_v20, %v14071_v60  ;;  %vm3120_vm0 = vcmp.eq.s32.totalorder %v19193_v52, %v14071_v60  ;;  %vm3121_vm2 = vcmp.eq.s32.totalorder %v14041_v51, %v14071_v60  ;;  %2648 = vst [vmem:[%s18558_s8 + $0x70] sm:$0xff] %v2581_v42  ;;  %v19226_v42 = vld [vmem:[#allocation35_spill] sm:$0xff] }
 0x49f   :  { %v14082_v33 = vsel %vm3132_vm8, 1.0, %v19194_v2  ;;  %vm3122_vm6 = vcmp.eq.s32.totalorder %v14044_v29, %v14071_v60  ;;  %vm3125_vm3 = vcmp.eq.s32.totalorder %v14053_v13, %v14071_v60  ;;  %2649 = vst [vmem:[%s18558_s8 + $0x78] sm:$0xff] %v2583_v0  ;;  %v9739_v0 = vpack.c.bf16 %v19226_v42, %v19225_v26 }
 0x4a0   :  { %19195 = vst [vmem:[#allocation150_spill] sm:$0xff] %v14082_v33  ;;  %v14103_v5 = vsel %vm3125_vm3, 1.0, %v19194_v2  ;;  %v2587_v1 = vpop.f32.mrb[48].mxu0 }
 0x4a1   :  { %19196 = vst [vmem:[#allocation156_spill] sm:$0xff] %v14103_v5  ;;  %v14105_v57 = vpop.permute.xlu1 %3078  ;;  %v14107_v49 = vpop.permute.xlu0 %3081  ;;  %2650 = vst [vmem:[%s18558_s8 + $0x80] sm:$0xff] %v2587_v1  ;;  %v19227_v1 = vld [vmem:[#allocation66_spill] sm:$0xff] }
 0x4a2   :  { %19197 = vst [vmem:[#allocation152_spill] sm:$0xff] %v14105_v57  ;;  %19198 = vst [vmem:[#allocation157_spill] sm:$0xff] %v14107_v49  ;;  %vm3134_vm7 = vcmp.eq.s32.totalorder %v19193_v52, %v14105_v57  ;;  %vm3139_vm14 = vcmp.eq.s32.totalorder %v14053_v13, %v14105_v57  ;;  %v2589_v22 = vpop.f32.mrb[49].mxu0  ;;  %vm3146_vm5 = vcmp.eq.s32.totalorder %v14053_v13, %v14107_v49 }
 0x4a3   :  { %v14129_v47 = vsel %vm3139_vm14, 1.0, %v19194_v2  ;;  %2651 = vst [vmem:[%s18558_s8 + $0x88] sm:$0xff] %v2589_v22  ;;  %v14151_v19 = vsel %vm3146_vm5, 1.0, %v19194_v2  ;;  %v19228_v22 = vld [vmem:[#allocation67_spill] sm:$0xff] }
 0x4a4   :  { %19199 = vst [vmem:[#allocation158_spill] sm:$0xff] %v14129_v47  ;;  %19202 = vst [vmem:[#allocation161_spill] sm:$0xff] %v14151_v19  ;;  %v2593_v45 = vpop.f32.mrb[50].mxu0 }
 0x4a5   :  { %v14146_v43 = vpop.permute.xlu1 %3084  ;;  %v14148_v14 = vpop.permute.xlu0 %3087  ;;  %2652 = vst [vmem:[%s18558_s8 + $0x90] sm:$0xff] %v2593_v45  ;;  %v9771_v45 = vpack.c.bf16 %v19228_v22, %v19227_v1 }
 0x4a6   :  { %19200 = vst [vmem:[#allocation159_spill] sm:$0xff] %v14146_v43  ;;  %19201 = vst [vmem:[#allocation160_spill] sm:$0xff] %v14148_v14  ;;  %vm3153_vm1 = vcmp.eq.s32.totalorder %v14053_v13, %v14146_v43  ;;  %v2595_v24 = vpop.f32.mrb[51].mxu0  ;;  %vm3160_vm10 = vcmp.eq.s32.totalorder %v14053_v13, %v14148_v14 }
 0x4a7   :  { %v14171_v31 = vsel %vm3153_vm1, 1.0, %v19194_v2  ;;  %2653 = vst [vmem:[%s18558_s8 + $0x98] sm:$0xff] %v2595_v24  ;;  %v14195_v10 = vsel %vm3160_vm10, 1.0, %v19194_v2  ;;  %v19229_v24 = vld [vmem:[#allocation18_spill] sm:$0xff] }
 0x4a8   :  { %19203 = vst [vmem:[#allocation162_spill] sm:$0xff] %v14171_v31  ;;  %19206 = vst [vmem:[#allocation165_spill] sm:$0xff] %v14195_v10  ;;  %v2599_v27 = vpop.f32.mrb[52].mxu0 }
 0x4a9   :  { %v14190_v46 = vpop.permute.xlu1 %3090  ;;  %v14192_v21 = vpop.permute.xlu0 %3093  ;;  %2654 = vst [vmem:[%s18558_s8 + $0xa0] sm:$0xff] %v2599_v27  ;;  %v19230_v27 = vld [vmem:[#allocation19_spill] sm:$0xff] }
 0x4aa   :  { %19204 = vst [vmem:[#allocation163_spill] sm:$0xff] %v14190_v46  ;;  %19205 = vst [vmem:[#allocation164_spill] sm:$0xff] %v14192_v21  ;;  %vm3167_vm8 = vcmp.eq.s32.totalorder %v14053_v13, %v14190_v46  ;;  %v2601_v6 = vpop.f32.mrb[53].mxu0  ;;  %vm3174_vm1 = vcmp.eq.s32.totalorder %v14053_v13, %v14192_v21 }
 0x4ab   :  { %v14215_v56 = vsel %vm3167_vm8, 1.0, %v19194_v2  ;;  %2655 = vst [vmem:[%s18558_s8 + $0xa8] sm:$0xff] %v2601_v6  ;;  %v14239_v7 = vsel %vm3174_vm1, 1.0, %v19194_v2  ;;  %v9741_v6 = vpack.c.bf16 %v19230_v27, %v19229_v24 }
 0x4ac   :  { %19207 = vst [vmem:[#allocation166_spill] sm:$0xff] %v14215_v56  ;;  %19210 = vst [vmem:[#allocation169_spill] sm:$0xff] %v14239_v7  ;;  %v2605_v54 = vpop.f32.mrb[54].mxu0 }
 0x4ad   :  { %v14234_v34 = vpop.permute.xlu1 %3096  ;;  %v14236_v62 = vpop.permute.xlu0 %3099  ;;  %2656 = vst [vmem:[%s18558_s8 + $0xb0] sm:$0xff] %v2605_v54  ;;  %v19231_v54 = vld [vmem:[#allocation50_spill] sm:$0xff] }
 0x4ae   :  { %19208 = vst [vmem:[#allocation167_spill] sm:$0xff] %v14234_v34  ;;  %19209 = vst [vmem:[#allocation168_spill] sm:$0xff] %v14236_v62  ;;  %vm3181_vm4 = vcmp.eq.s32.totalorder %v14053_v13, %v14234_v34  ;;  %v2607_v44 = vpop.f32.mrb[55].mxu0  ;;  %vm3188_vm8 = vcmp.eq.s32.totalorder %v14053_v13, %v14236_v62 }
 0x4af   :  { %v14259_v18 = vsel %vm3181_vm4, 1.0, %v19194_v2  ;;  %2657 = vst [vmem:[%s18558_s8 + $0xb8] sm:$0xff] %v2607_v44  ;;  %v14283_v39 = vsel %vm3188_vm8, 1.0, %v19194_v2  ;;  %v19232_v44 = vld [vmem:[#allocation51_spill] sm:$0xff] }
 0x4b0   :  { %19211 = vst [vmem:[#allocation170_spill] sm:$0xff] %v14259_v18  ;;  %19214 = vst [vmem:[#allocation173_spill] sm:$0xff] %v14283_v39  ;;  %v2611_v9 = vpop.f32.mrb[56].mxu0 }
 0x4b1   :  { %v14278_v37 = vpop.permute.xlu1 %3102  ;;  %v14280_v38 = vpop.permute.xlu0 %3105  ;;  %2658 = vst [vmem:[%s18558_s8 + $0xc0] sm:$0xff] %v2611_v9  ;;  %v9773_v9 = vpack.c.bf16 %v19232_v44, %v19231_v54 }
 0x4b2   :  { %19212 = vst [vmem:[#allocation171_spill] sm:$0xff] %v14278_v37  ;;  %19213 = vst [vmem:[#allocation172_spill] sm:$0xff] %v14280_v38  ;;  %vm3195_vm5 = vcmp.eq.s32.totalorder %v14053_v13, %v14278_v37  ;;  %v2613_v35 = vpop.f32.mrb[57].mxu0  ;;  %vm3202_vm4 = vcmp.eq.s32.totalorder %v14053_v13, %v14280_v38 }
 0x4b3   :  { %v14303_v3 = vsel %vm3195_vm5, 1.0, %v19194_v2  ;;  %2659 = vst [vmem:[%s18558_s8 + $0xc8] sm:$0xff] %v2613_v35  ;;  %v14327_v23 = vsel %vm3202_vm4, 1.0, %v19194_v2  ;;  %v19233_v35 = vmov 1.0  }
 0x4b4   :  { %19215 = vst [vmem:[#allocation174_spill] sm:$0xff] %v14303_v3  ;;  %19218 = vst [vmem:[#allocation177_spill] sm:$0xff] %v14327_v23  ;;  %v2617_v25 = vpop.f32.mrb[58].mxu0  ;;  %7841 = vmatprep.mubr.msk.f32.mxu1 %vm3120_vm0, %v19233_v35 }
 0x4b5   :  { %v14322_v32 = vpop.permute.xlu1 %3108  ;;  %v14324_v59 = vpop.permute.xlu0 %3111  ;;  %2660 = vst [vmem:[%s18558_s8 + $0xd0] sm:$0xff] %v2617_v25 }
 0x4b6   :  { %19216 = vst [vmem:[#allocation175_spill] sm:$0xff] %v14322_v32  ;;  %19217 = vst [vmem:[#allocation176_spill] sm:$0xff] %v14324_v59  ;;  %vm3209_vm10 = vcmp.eq.s32.totalorder %v14053_v13, %v14322_v32  ;;  %v2619_v53 = vpop.f32.mrb[59].mxu0  ;;  %vm3216_vm5 = vcmp.eq.s32.totalorder %v14053_v13, %v14324_v59 }
 0x4b7   :  { %v14347_v8 = vsel %vm3209_vm10, 1.0, %v19194_v2  ;;  %2661 = vst [vmem:[%s18558_s8 + $0xd8] sm:$0xff] %v2619_v53  ;;  %v14371_v63 = vsel %vm3216_vm5, 1.0, %v19194_v2 }
 0x4b8   :  { %19219 = vst [vmem:[#allocation178_spill] sm:$0xff] %v14347_v8  ;;  %19222 = vst [vmem:[#allocation181_spill] sm:$0xff] %v14371_v63  ;;  %v2623_v61 = vpop.f32.mrb[60].mxu0 }
 0x4b9   :  { %v14366_v58 = vpop.permute.xlu1 %3114  ;;  %v14368_v50 = vpop.permute.xlu0 %3117  ;;  %2662 = vst [vmem:[%s18558_s8 + $0xe0] sm:$0xff] %v2623_v61 }
 0x4ba   :  { %19220 = vst [vmem:[#allocation179_spill] sm:$0xff] %v14366_v58  ;;  %19221 = vst [vmem:[#allocation180_spill] sm:$0xff] %v14368_v50  ;;  %vm3218_vm8 = vcmp.eq.s32.totalorder %v19193_v52, %v14366_v58  ;;  %vm3223_vm1 = vcmp.eq.s32.totalorder %v14053_v13, %v14366_v58  ;;  %v2625_v16 = vpop.f32.mrb[61].mxu0  ;;  %vm3225_vm3 = vcmp.eq.s32.totalorder %v19193_v52, %v14368_v50 }
 0x4bb   :  { %v14391_v48 = vsel %vm3223_vm1, 1.0, %v19194_v2  ;;  %vm3226_vm5 = vcmp.eq.s32.totalorder %v14041_v51, %v14368_v50  ;;  %2663 = vst [vmem:[%s18558_s8 + $0xe8] sm:$0xff] %v2625_v16  ;;  %vm3227_vm4 = vcmp.eq.s32.totalorder %v14044_v29, %v14368_v50  ;;  %vm3228_vm1 = vcmp.eq.s32.totalorder %v14047_v55, %v14368_v50 }
 0x4bc   :  { %19223 = vst [vmem:[#allocation182_spill] sm:$0xff] %v14391_v48  ;;  %vm3229_vm14 = vcmp.eq.s32.totalorder %v14050_v4, %v14368_v50  ;;  %vm3230_vm10 = vcmp.eq.s32.totalorder %v14053_v13, %v14368_v50  ;;  %v2629_v28 = vpop.f32.mrb[62].mxu0 }
 0x4bd   :  { %v14411_v41 = vsel %vm3230_vm10, 1.0, %v19194_v2  ;;  %2664 = vst [vmem:[%s18558_s8 + $0xf0] sm:$0xff] %v2629_v28  ;;  %v2631_v12 = vpop.f32.mrb[63].mxu0 }
 0x4be   :  { %19224 = vst [vmem:[#allocation183_spill] sm:$0xff] %v14411_v41  ;;  %2665 = vst [vmem:[%s18558_s8 + $0xf8] sm:$0xff] %v2631_v12 }
 0x4bf   :  { %10858 = dma.done.wait [#allocation6 + $0x1], 12544 }
 0x4c0   :  { %10859 = vsyncadd [#allocation6 + $0x1], 4294954752  ;;  %v19234_v25 = vld [vmem:[#allocation36_spill] sm:$0xff]  ;;  %v19235_v53 = vld [vmem:[#allocation37_spill] sm:$0xff]  ;;  %7873 = vmatprep.mubr.msk.f32.mxu0 %vm3122_vm6, %v19233_v35  ;;  %9740 = vmatprep.subr.bf16.mxu1 %v9739_v0  ;;  %v19268_v39 = vmov 1  }
 0x4c1   :  { %v9743_v61 = vpack.c.bf16 %v19235_v53, %v19234_v25  ;;  %v19236_v16 = vld [vmem:[#allocation68_spill] sm:$0xff]  ;;  %v19237_v28 = vld [vmem:[#allocation69_spill] sm:$0xff]  ;;  %9772 = vmatprep.subr.bf16.mxu0 %v9771_v45  ;;  %v19242_v54 = vld [vmem:[#allocation38_spill] sm:$0xff]  ;;  %9742 = vmatpush3.bf16.msra.mxu1 %v9741_v6 }
 0x4c2   :  { %v9775_v12 = vpack.c.bf16 %v19237_v28, %v19236_v16  ;;  %v19238_v26 = vld [vmem:[#allocation20_spill] sm:$0xff]  ;;  %v19239_v42 = vld [vmem:[#allocation21_spill] sm:$0xff]  ;;  %v19243_v44 = vld [vmem:[#allocation39_spill] sm:$0xff]  ;;  %9774 = vmatpush3.bf16.msra.mxu0 %v9773_v9  ;;  %10831 = vset.pattern.permute.xlu1 %v19268_v39 }
 0x4c3   :  { %v9745_v1 = vpack.c.bf16 %v19239_v42, %v19238_v26  ;;  %v19240_v22 = vld [vmem:[#allocation52_spill] sm:$0xff]  ;;  %v19241_v24 = vld [vmem:[#allocation53_spill] sm:$0xff]  ;;  %v9747_v2 = vpack.c.bf16 %v19243_v44, %v19242_v54  ;;  %v19244_v25 = vld [vmem:[#allocation70_spill] sm:$0xff]  ;;  %9744 = vmatprep.subr.bf16.mxu1 %v9743_v61  ;;  %10830 = vset.pattern.permute.xlu0 %v19268_v39 }
 0x4c4   :  { %v9777_v27 = vpack.c.bf16 %v19241_v24, %v19240_v22  ;;  %v19245_v53 = vld [vmem:[#allocation71_spill] sm:$0xff]  ;;  %v19246_v16 = vld [vmem:[#allocation22_spill] sm:$0xff]  ;;  %v19248_v26 = vld [vmem:[#allocation117_spill] sm:$0xff]  ;;  %9776 = vmatprep.subr.bf16.mxu0 %v9775_v12 }
 0x4c5   :  { %v9779_v13 = vpack.c.bf16 %v19245_v53, %v19244_v25  ;;  %v19247_v28 = vld [vmem:[#allocation23_spill] sm:$0xff]  ;;  %v4107_v42 = vmul.f32 0.25, %v19248_v26  ;;  %v19249_v22 = vld [vmem:[#allocation54_spill] sm:$0xff]  ;;  %v19251_v36 = vld [vmem:[#allocation40_spill] sm:$0xff]  ;;  %9746 = vmatpush3.bf16.msra.mxu1 %v9745_v1 }
 0x4c6   :  { %v9749_v15 = vpack.c.bf16 %v19247_v28, %v19246_v16  ;;  %v19250_v24 = vld [vmem:[#allocation55_spill] sm:$0xff]  ;;  %v19252_v30 = vld [vmem:[#allocation41_spill] sm:$0xff]  ;;  %v19253_v45 = vld [vmem:[#allocation72_spill] sm:$0xff]  ;;  %9778 = vmatpush3.bf16.msra.mxu0 %v9777_v27  ;;  %9748 = vmatprep.subr.bf16.mxu1 %v9747_v2 }
 0x4c7   :  { %v9781_v17 = vpack.c.bf16 %v19250_v24, %v19249_v22  ;;  %v9751_v0 = vpack.c.bf16 %v19252_v30, %v19251_v36  ;;  %v19254_v41 = vld [vmem:[#allocation73_spill] sm:$0xff]  ;;  %v19255_v54 = vld [vmem:[#allocation24_spill] sm:$0xff]  ;;  %v4219_v26 = vfloor.f32 %v4107_v42  ;;  %v19260_v63 = vld [vmem:[#allocation42_spill] sm:$0xff]  ;;  %9780 = vmatprep.subr.bf16.mxu0 %v9779_v13 }
 0x4c8   :  { %v9783_v48 = vpack.c.bf16 %v19254_v41, %v19253_v45  ;;  %v19256_v44 = vld [vmem:[#allocation25_spill] sm:$0xff]  ;;  %v19257_v53 = vld [vmem:[#allocation56_spill] sm:$0xff]  ;;  %v19261_v8 = vld [vmem:[#allocation43_spill] sm:$0xff]  ;;  %v4251_v41 = vceil.f32 %v4107_v42 }
 0x4c9   :  { %v9753_v25 = vpack.c.bf16 %v19256_v44, %v19255_v54  ;;  %v19258_v16 = vld [vmem:[#allocation57_spill] sm:$0xff]  ;;  %v19259_v6 = vld [vmem:[#allocation116_spill] sm:$0xff]  ;;  %v9755_v22 = vpack.c.bf16 %v19261_v8, %v19260_v63  ;;  %v19262_v24 = vld [vmem:[#allocation74_spill] sm:$0xff]  ;;  %9750 = vmatpush3.bf16.msra.mxu1 %v9749_v15 }
 0x4ca   :  { %v9785_v28 = vpack.c.bf16 %v19258_v16, %v19257_v53  ;;  %v4105_v9 = vmul.f32 0.25, %v19259_v6  ;;  %v19263_v23 = vld [vmem:[#allocation75_spill] sm:$0xff]  ;;  %v19264_v36 = vld [vmem:[#allocation26_spill] sm:$0xff]  ;;  %v19269_v54 = vld [vmem:[#allocation44_spill] sm:$0xff]  ;;  %v14485_v6 = vtrunc.f32 %v4219_v26  ;;  %9782 = vmatpush3.bf16.msra.mxu0 %v9781_v17  ;;  %9752 = vmatprep.subr.bf16.mxu1 %v9751_v0 }
 0x4cb   :  { %v9787_v30 = vpack.c.bf16 %v19263_v23, %v19262_v24  ;;  %v19265_v3 = vld [vmem:[#allocation27_spill] sm:$0xff]  ;;  %v19266_v61 = vld [vmem:[#allocation58_spill] sm:$0xff]  ;;  %v19270_v44 = vld [vmem:[#allocation45_spill] sm:$0xff]  ;;  %v10723_v23 = vtrunc.f32 %v4251_v41  ;;  %9784 = vmatprep.subr.bf16.mxu0 %v9783_v48 }
 0x4cc   :  { %v19267_v12 = vld [vmem:[#allocation59_spill] sm:$0xff]  ;;  %v19271_v16 = vld [vmem:[#allocation76_spill] sm:$0xff]  ;;  %v19272_v18 = vld [vmem:[#allocation77_spill] sm:$0xff]  ;;  %v4217_v46 = vfloor.f32 %v4105_v9  ;;  %v4249_v14 = vceil.f32 %v4105_v9 }
 0x4cd   :  { %v19273_v7 = vld [vmem:[#allocation28_spill] sm:$0xff]  ;;  %v19274_v56 = vld [vmem:[#allocation29_spill] sm:$0xff]  ;;  %v19277_v24 = vld [vmem:[#allocation46_spill] sm:$0xff]  ;;  %v10724_v2 = vcvt.f32.s32 %v10723_v23  ;;  %9754 = vmatpush3.bf16.msra.mxu1 %v9753_v25 }
 0x4ce   :  { %v19275_v63 = vld [vmem:[#allocation60_spill] sm:$0xff]  ;;  %v19276_v10 = vld [vmem:[#allocation61_spill] sm:$0xff]  ;;  %v19278_v45 = vld [vmem:[#allocation47_spill] sm:$0xff]  ;;  %v14507_v21 = vtrunc.f32 %v4217_v46  ;;  %v10719_v41 = vtrunc.f32 %v4249_v14  ;;  %9786 = vmatpush3.bf16.msra.mxu0 %v9785_v28  ;;  %9756 = vmatprep.subr.bf16.mxu1 %v9755_v22 }
 0x4cf   :  { %v19279_v31 = vld [vmem:[#allocation78_spill] sm:$0xff]  ;;  %v19280_v19 = vld [vmem:[#allocation79_spill] sm:$0xff]  ;;  %v19285_v4 = vld [vmem:[#allocation48_spill] sm:$0xff]  ;;  %vm4285_vm0 = vcmp.lt.s32.totalorder %v10724_v2, 55  ;;  %9788 = vmatprep.subr.bf16.mxu0 %v9787_v30 }
 0x4d0   :  { %v19281_v53 = vld [vmem:[#allocation30_spill] sm:$0xff]  ;;  %v19282_v33 = vld [vmem:[#allocation31_spill] sm:$0xff]  ;;  %v19286_v39 = vld [vmem:[#allocation49_spill] sm:$0xff]  ;;  %v10688_v42 = vcvt.f32.s32 %v14507_v21  ;;  %v19387_v21 = vcvt.f32.s32 %v14485_v6 }
 0x4d1   :  { %v19283_v8 = vld [vmem:[#allocation62_spill] sm:$0xff]  ;;  %v19284_v5 = vld [vmem:[#allocation63_spill] sm:$0xff]  ;;  %v19287_v27 = vld [vmem:[#allocation80_spill] sm:$0xff] }
 0x4d2   :  { %v19288_v50 = vld [vmem:[#allocation81_spill] sm:$0xff]  ;;  %v19289_v59 = vld [vmem:[#allocation32_spill] sm:$0xff]  ;;  %v19293_v26 = vld [vmem:[#allocation98_spill] sm:$0xff] }
 0x4d3   :  { %v19290_v32 = vld [vmem:[#allocation33_spill] sm:$0xff]  ;;  %v19291_v38 = vld [vmem:[#allocation64_spill] sm:$0xff]  ;;  %v19294_v62 = vld [vmem:[#allocation99_spill] sm:$0xff] }
 0x4d4   :  { %v19292_v37 = vld [vmem:[#allocation65_spill] sm:$0xff]  ;;  %v19295_v13 = vld [vmem:[#allocation82_spill] sm:$0xff]  ;;  %v19296_v34 = vld [vmem:[#allocation83_spill] sm:$0xff] }
 0x4d5   :  { %v19297_v1 = vld [vmem:[#allocation119_spill] sm:$0xff]  ;;  %v19298_v58 = vld [vmem:[#allocation118_spill] sm:$0xff]  ;;  %v19299_v49 = vld [vmem:[#allocation100_spill] sm:$0xff] }
 0x4d6   :  { %v4108_v43 = vmul.f32 0.25, %v19297_v1  ;;  %v4106_v47 = vmul.f32 0.25, %v19298_v58  ;;  %v19300_v11 = vld [vmem:[#allocation101_spill] sm:$0xff]  ;;  %v10720_v58 = vcvt.f32.s32 %v10719_v41 }
 0x4d7   :  { %v9807_v55 = vpack.c.bf16 %v19300_v11, %v19299_v49  ;;  %v19301_v57 = vld [vmem:[#allocation121_spill] sm:$0xff]  ;;  %v19338_v49 = vld [vmem:[#allocation128_spill] sm:$0xff] }
 0x4d8   :  { %v4110_v29 = vmul.f32 0.25, %v19301_v57  ;;  %v4220_v9 = vfloor.f32 %v4108_v43  ;;  %v4252_v40 = vceil.f32 %v4108_v43  ;;  %v4218_v1 = vfloor.f32 %v4106_v47 }
 0x4d9   :  { %v4250_v15 = vceil.f32 %v4106_v47  ;;  %v4286_v57 = vsel %vm4285_vm0, %v10724_v2, 55  ;;  %v19302_v43 = vcvt.f32.s32 %v14485_v6  ;;  %vm4281_vm6 = vcmp.lt.s32.totalorder %v10720_v58, 55  ;;  %v19303_v2 = vld [vmem:[#allocation120_spill] sm:$0xff] }
 0x4da   :  { %v4222_v17 = vfloor.f32 %v4110_v29  ;;  %v14510_v52 = vtrunc.f32 %v4220_v9  ;;  %v10725_v0 = vtrunc.f32 %v4252_v40  ;;  %v14512_v48 = vtrunc.f32 %v4218_v1  ;;  %v19392_v6 = vld [vmem:[#allocation168_spill] sm:$0xff] }
 0x4db   :  { %v10721_v46 = vtrunc.f32 %v4250_v15  ;;  %v4331_v14 = vsub.s32 %v4286_v57, %v19302_v43  ;;  %v4282_v41 = vsel %vm4281_vm6, %v10720_v58, 55  ;;  %v4254_v30 = vceil.f32 %v4110_v29  ;;  %v19306_v58 = vld [vmem:[#allocation123_spill] sm:$0xff] }
 0x4dc   :  { %v10694_v47 = vcvt.f32.s32 %v14510_v52  ;;  %v14517_v23 = vtrunc.f32 %v4222_v17  ;;  %v10726_v9 = vcvt.f32.s32 %v10725_v0  ;;  %v10690_v25 = vcvt.f32.s32 %v14512_v48  ;;  %v19307_v0 = vld [vmem:[#allocation122_spill] sm:$0xff]  ;;  %v19384_v48 = vld [vmem:[#allocation167_spill] sm:$0xff]  ;;  %v19395_v52 = vld [vmem:[#allocation112_spill] sm:$0xff] }
 0x4dd   :  { %v10722_v28 = vcvt.f32.s32 %v10721_v46  ;;  %4349 = vrot.lane.b32.xlu1 %v4331_v14, %s10864_s4  ;;  %v4329_v40 = vsub.s32 %v4282_v41, %v10688_v42  ;;  %v4109_v1 = vmul.f32 0.25, %v19303_v2  ;;  %v19304_v15 = vpack.c.bf16 %v19265_v3, %v19264_v36 }
 0x4de   :  { %v10698_v22 = vcvt.f32.s32 %v14517_v23  ;;  %v19305_v17 = vpack.c.bf16 %v19267_v12, %v19266_v61  ;;  %vm4287_vm10 = vcmp.lt.s32.totalorder %v10726_v9, 55  ;;  %v4112_v57 = vmul.f32 0.25, %v19306_v58  ;;  %v19399_v23 = vld [vmem:[#allocation171_spill] sm:$0xff] }
 0x4df   :  { %9758 = vmatpush3.bf16.msra.mxu1 %v19304_v15  ;;  %vm4283_vm0 = vcmp.lt.s32.totalorder %v10722_v28, 55  ;;  %v4111_v46 = vmul.f32 0.25, %v19307_v0  ;;  %v19308_v43 = vpack.c.bf16 %v19270_v44, %v19269_v54  ;;  %v19309_v29 = vpack.c.bf16 %v19272_v18, %v19271_v16  ;;  %4345 = vrot.lane.b32.xlu0 %v4329_v40, %s10864_s4  ;;  %v19313_v40 = vld [vmem:[#allocation85_spill] sm:$0xff] }
 0x4e0   :  { %9790 = vmatpush3.bf16.msra.mxu0 %v19305_v17  ;;  %v4288_v3 = vsel %vm4287_vm10, %v10726_v9, 55  ;;  %v4284_v36 = vsel %vm4283_vm0, %v10722_v28, 55  ;;  %v10729_v14 = vtrunc.f32 %v4254_v30  ;;  %v4221_v41 = vfloor.f32 %v4109_v1  ;;  %v19312_v28 = vld [vmem:[#allocation84_spill] sm:$0xff] }
 0x4e1   :  { %9760 = vmatprep.subr.bf16.mxu1 %v19308_v43  ;;  %9792 = vmatprep.subr.bf16.mxu0 %v19309_v29  ;;  %v4332_v61 = vsub.s32 %v4288_v3, %v10694_v47  ;;  %v4330_v12 = vsub.s32 %v4284_v36, %v10690_v25  ;;  %v4253_v2 = vceil.f32 %v4109_v1  ;;  %v4224_v15 = vfloor.f32 %v4112_v57 }
 0x4e2   :  { %v10730_v54 = vcvt.f32.s32 %v10729_v14  ;;  %v14544_v44 = vtrunc.f32 %v4221_v41  ;;  %v4256_v17 = vceil.f32 %v4112_v57  ;;  %v4223_v18 = vfloor.f32 %v4111_v46 }
 0x4e3   :  { %v19310_v16 = vpack.c.bf16 %v19274_v56, %v19273_v7  ;;  %v19311_v9 = vpack.c.bf16 %v19276_v10, %v19275_v63  ;;  %v9809_v30 = vpack.c.bf16 %v19313_v40, %v19312_v28  ;;  %v10727_v58 = vtrunc.f32 %v4253_v2  ;;  %v19316_v10 = vld [vmem:[#allocation102_spill] sm:$0xff]  ;;  %v19317_v63 = vld [vmem:[#allocation103_spill] sm:$0xff]  ;;  %4351 = vrot.lane.b32.xlu1 %v4332_v61, %s10864_s4  ;;  %4347 = vrot.lane.b32.xlu0 %v4330_v12, %s10864_s4  ;;  %v19320_v2 = vld [vmem:[#allocation125_spill] sm:$0xff] }
 0x4e4   :  { %v14554_v0 = vtrunc.f32 %v4224_v15  ;;  %v4255_v1 = vceil.f32 %v4111_v46  ;;  %v19314_v43 = vpack.c.bf16 %v19278_v45, %v19277_v24  ;;  %v19315_v57 = vpack.c.bf16 %v19280_v19, %v19279_v31  ;;  %v19341_v40 = vld [vmem:[#allocation131_spill] sm:$0xff] }
 0x4e5   :  { %9762 = vmatpush3.bf16.msra.mxu1 %v19310_v16  ;;  %9794 = vmatpush3.bf16.msra.mxu0 %v19311_v9  ;;  %vm4291_vm6 = vcmp.lt.s32.totalorder %v10730_v54, 55  ;;  %v10733_v56 = vtrunc.f32 %v4256_v17  ;;  %v14562_v7 = vtrunc.f32 %v4223_v18  ;;  %v9811_v29 = vpack.c.bf16 %v19317_v63, %v19316_v10  ;;  %v19344_v10 = vld [vmem:[#allocation88_spill] sm:$0xff]  ;;  %v19345_v63 = vld [vmem:[#allocation89_spill] sm:$0xff] }
 0x4e6   :  { %9764 = vmatprep.subr.bf16.mxu1 %v19314_v43  ;;  %9796 = vmatprep.subr.bf16.mxu0 %v19315_v57  ;;  %v4292_v46 = vsel %vm4291_vm6, %v10730_v54, 55  ;;  %v10696_v3 = vcvt.f32.s32 %v14544_v44  ;;  %v10728_v45 = vcvt.f32.s32 %v10727_v58  ;;  %v10731_v24 = vtrunc.f32 %v4255_v1  ;;  %v19321_v54 = vld [vmem:[#allocation124_spill] sm:$0xff]  ;;  %v19403_v44 = vld [vmem:[#allocation97_spill] sm:$0xff] }
 0x4e7   :  { %v4334_v19 = vsub.s32 %v4292_v46, %v10698_v22  ;;  %v10702_v31 = vcvt.f32.s32 %v14554_v0  ;;  %v10734_v36 = vcvt.f32.s32 %v10733_v56  ;;  %v10700_v14 = vcvt.f32.s32 %v14562_v7  ;;  %v19328_v46 = vld [vmem:[#allocation86_spill] sm:$0xff]  ;;  %v19406_v0 = vld [vmem:[#allocation172_spill] sm:$0xff]  ;;  %v19411_v7 = vld [vmem:[#allocation175_spill] sm:$0xff] }
 0x4e8   :  { %v19318_v41 = vpack.c.bf16 %v19282_v33, %v19281_v53  ;;  %v19319_v61 = vpack.c.bf16 %v19284_v5, %v19283_v8  ;;  %vm4289_vm10 = vcmp.lt.s32.totalorder %v10728_v45, 55  ;;  %v10732_v12 = vcvt.f32.s32 %v10731_v24  ;;  %v19324_v53 = vld [vmem:[#allocation127_spill] sm:$0xff]  ;;  %v19325_v5 = vld [vmem:[#allocation126_spill] sm:$0xff] }
 0x4e9   :  { %v4114_v15 = vmul.f32 0.25, %v19320_v2  ;;  %v4113_v17 = vmul.f32 0.25, %v19321_v54  ;;  %v19322_v18 = vpack.c.bf16 %v19286_v39, %v19285_v4  ;;  %v19323_v16 = vpack.c.bf16 %v19288_v50, %v19287_v27  ;;  %4355 = vrot.lane.b32.xlu1 %v4334_v19, %s10864_s4 }
 0x4ea   :  { %9766 = vmatpush3.bf16.msra.mxu1 %v19318_v41  ;;  %9798 = vmatpush3.bf16.msra.mxu0 %v19319_v61  ;;  %v4290_v33 = vsel %vm4289_vm10, %v10728_v45, 55  ;;  %vm4295_vm0 = vcmp.lt.s32.totalorder %v10734_v36, 55  ;;  %v4116_v9 = vmul.f32 0.25, %v19324_v53  ;;  %v4115_v8 = vmul.f32 0.25, %v19325_v5  ;;  %v19329_v45 = vld [vmem:[#allocation87_spill] sm:$0xff] }
 0x4eb   :  { %9768 = vmatprep.subr.bf16.mxu1 %v19322_v18  ;;  %9800 = vmatprep.subr.bf16.mxu0 %v19323_v16  ;;  %v4333_v58 = vsub.s32 %v4290_v33, %v10696_v3  ;;  %v4296_v1 = vsel %vm4295_vm0, %v10734_v36, 55  ;;  %vm4293_vm6 = vcmp.lt.s32.totalorder %v10732_v12, 55  ;;  %v4226_v43 = vfloor.f32 %v4114_v15  ;;  %v19332_v33 = vld [vmem:[#allocation148_spill] sm:$0xff]  ;;  %v19333_v53 = vld [vmem:[#allocation155_spill] sm:$0xff] }
 0x4ec   :  { %v4336_v4 = vsub.s32 %v4296_v1, %v10702_v31  ;;  %v4294_v39 = vsel %vm4293_vm6, %v10732_v12, 55  ;;  %v4258_v50 = vceil.f32 %v4114_v15  ;;  %v4225_v27 = vfloor.f32 %v4113_v17  ;;  %v19334_v1 = vld [vmem:[#allocation147_spill] sm:$0xff] }
 0x4ed   :  { %v19326_v57 = vpack.c.bf16 %v19290_v32, %v19289_v59  ;;  %v19327_v56 = vpack.c.bf16 %v19292_v37, %v19291_v38  ;;  %v9813_v24 = vpack.c.bf16 %v19329_v45, %v19328_v46  ;;  %v14602_v19 = vtrunc.f32 %v4226_v43  ;;  %4353 = vrot.lane.b32.xlu0 %v4333_v58, %s10864_s4  ;;  %v19335_v43 = vld [vmem:[#allocation104_spill] sm:$0xff] }
 0x4ee   :  { %v4257_v36 = vceil.f32 %v4113_v17  ;;  %v4228_v41 = vfloor.f32 %v4116_v9  ;;  %v19330_v61 = vpack.c.bf16 %v19294_v62, %v19293_v26  ;;  %v10737_v12 = vtrunc.f32 %v4258_v50  ;;  %4359 = vrot.lane.b32.xlu1 %v4336_v4, %s10864_s4  ;;  %v19336_v4 = vld [vmem:[#allocation105_spill] sm:$0xff] }
 0x4ef   :  { %9770 = vmatpush3.bf16.msra.mxu1 %v19326_v57  ;;  %9802 = vmatpush3.bf16.msra.mxu0 %v19327_v56  ;;  %v14608_v32 = vtrunc.f32 %v4225_v27  ;;  %v4260_v59 = vceil.f32 %v4116_v9  ;;  %v4227_v2 = vfloor.f32 %v4115_v8  ;;  %v4335_v37 = vsub.s32 %v4294_v39, %v10700_v14  ;;  %v19337_v57 = vld [vmem:[#allocation129_spill] sm:$0xff] }
 0x4f0   :  { %9804 = vmatprep.subr.bf16.mxu1 %v19330_v61  ;;  %v10735_v38 = vtrunc.f32 %v4257_v36  ;;  %v14613_v15 = vtrunc.f32 %v4228_v41  ;;  %v4259_v54 = vceil.f32 %v4115_v8  ;;  %v10706_v62 = vcvt.f32.s32 %v14602_v19  ;;  %v19339_v41 = vld [vmem:[#allocation152_spill] sm:$0xff] }
 0x4f1   :  { %v10738_v26 = vcvt.f32.s32 %v10737_v12  ;;  %v10741_v17 = vtrunc.f32 %v4260_v59  ;;  %v14624_v18 = vtrunc.f32 %v4227_v2  ;;  %v19331_v16 = vpack.c.bf16 %v19296_v34, %v19295_v13  ;;  %4357 = vrot.lane.b32.xlu0 %v4335_v37, %s10864_s4  ;;  %v19425_v19 = vld [vmem:[#allocation180_spill] sm:$0xff] }
 0x4f2   :  { %7842 = vmatmul.mubr.msk.f32.vlgmr.msra.gmra.mrb[32].mxu1 %vm3119_vm12, %v19233_v35  ;;  %7874 = vmatmul.mubr.msk.f32.vlgmr.msra.gmra.mrb[64].mxu0 %vm3121_vm2, %v19233_v35  ;;  %v10704_v9 = vcvt.f32.s32 %v14608_v32  ;;  %v10736_v5 = vcvt.f32.s32 %v10735_v38  ;;  %v10710_v8 = vcvt.f32.s32 %v14613_v15  ;;  %v10739_v58 = vtrunc.f32 %v4259_v54  ;;  %v19427_v32 = vld [vmem:[#allocation151_spill] sm:$0xff]  ;;  %v19429_v15 = vld [vmem:[#allocation156_spill] sm:$0xff] }
 0x4f3   :  { %9806 = vmatpush3.bf16.msra.mxu1 %v19331_v16  ;;  %7843 = vmatprep.mubr.msk.f32.mxu1 %vm3127_vm11, %v19233_v35  ;;  %vm4299_vm12 = vcmp.lt.s32.totalorder %v10738_v26, 55  ;;  %v10742_v34 = vcvt.f32.s32 %v10741_v17  ;;  %v10708_v13 = vcvt.f32.s32 %v14624_v18  ;;  %v9815_v39 = vpack.c.bf16 %v19336_v4, %v19335_v43  ;;  %v19347_v43 = vld [vmem:[#allocation157_spill] sm:$0xff]  ;;  %v19432_v18 = vld [vmem:[#allocation150_spill] sm:$0xff] }
 0x4f4   :  { %7875 = vmatprep.mubr.msk.f32.mxu0 %vm3129_vm15, %v19233_v35  ;;  %9808 = vmatprep.subr.bf16.mxu1 %v9807_v55  ;;  %v4300_v50 = vsel %vm4299_vm12, %v10738_v26, 55  ;;  %vm4297_vm11 = vcmp.lt.s32.totalorder %v10736_v5, 55  ;;  %v10740_v27 = vcvt.f32.s32 %v10739_v58  ;;  %v4118_v56 = vmul.f32 0.25, %v19337_v57  ;;  %v19346_v58 = vld [vmem:[#allocation130_spill] sm:$0xff] }
 0x4f5   :  { %v4338_v11 = vsub.s32 %v4300_v50, %v10706_v62  ;;  %v4298_v55 = vsel %vm4297_vm11, %v10736_v5, 55  ;;  %vm4303_vm15 = vcmp.lt.s32.totalorder %v10742_v34, 55  ;;  %v4117_v36 = vmul.f32 0.25, %v19338_v49  ;;  %v19350_v57 = vld [vmem:[#allocation106_spill] sm:$0xff] }
 0x4f6   :  { %7844 = vmatmul.mubr.msk.f32.gmra.mrb[34].mxu1 %vm3126_vm9, %v19233_v35  ;;  %7876 = vmatmul.mubr.msk.f32.gmra.mrb[66].mxu0 %vm3128_vm13, %v19233_v35  ;;  %vm19340_vm9 = vcmp.eq.s32.totalorder %v19334_v1, %v19339_v41  ;;  %v4337_v61 = vsub.s32 %v4298_v55, %v10704_v9  ;;  %v4304_v12 = vsel %vm4303_vm15, %v10742_v34, 55  ;;  %vm4301_vm13 = vcmp.lt.s32.totalorder %v10740_v27, 55 }
 0x4f7   :  { %7845 = vmatprep.mubr.msk.f32.mxu1 %vm3134_vm7, %v19233_v35  ;;  %7877 = vmatprep.mubr.msk.f32.mxu0 %vm19340_vm9, %v19233_v35  ;;  %v4230_v59 = vfloor.f32 %v4118_v56  ;;  %v4340_v2 = vsub.s32 %v4304_v12, %v10710_v8  ;;  %v4302_v37 = vsel %vm4301_vm13, %v10740_v27, 55  ;;  %v4262_v38 = vceil.f32 %v4118_v56  ;;  %v19351_v56 = vld [vmem:[#allocation107_spill] sm:$0xff] }
 0x4f8   :  { %9810 = vmatpush3.bf16.msra.mxu1 %v9809_v30  ;;  %4363 = vrot.lane.b32.xlu1 %v4338_v11, %s10864_s4  ;;  %v4229_v54 = vfloor.f32 %v4117_v36  ;;  %v4339_v26 = vsub.s32 %v4302_v37, %v10708_v13  ;;  %v4261_v28 = vceil.f32 %v4117_v36  ;;  %v4120_v30 = vmul.f32 0.25, %v19341_v40 }
 0x4f9   :  { %9812 = vmatprep.subr.bf16.mxu1 %v9811_v29  ;;  %4361 = vrot.lane.b32.xlu0 %v4337_v61, %s10864_s4  ;;  %v14680_v17 = vtrunc.f32 %v4230_v59  ;;  %vm19342_vm2 = vcmp.eq.s32.totalorder %v12529_v20, %v19339_v41  ;;  %vm19343_vm7 = vcmp.eq.s32.totalorder %v14041_v51, %v19339_v41  ;;  %v9817_v29 = vpack.c.bf16 %v19345_v63, %v19344_v10 }
 0x4fa   :  { %7846 = vmatmul.mubr.msk.f32.gmra.mrb[36].mxu1 %vm19342_vm2, %v19233_v35  ;;  %7878 = vmatmul.mubr.msk.f32.gmra.mrb[68].mxu0 %vm19343_vm7, %v19233_v35  ;;  %v10745_v16 = vtrunc.f32 %v4262_v38  ;;  %v14693_v5 = vtrunc.f32 %v4229_v54  ;;  %v4119_v34 = vmul.f32 0.25, %v19346_v58  ;;  %vm19348_vm10 = vcmp.eq.s32.totalorder %v19332_v33, %v19347_v43  ;;  %v19356_v54 = vld [vmem:[#allocation159_spill] sm:$0xff] }
 0x4fb   :  { %7847 = vmatprep.mubr.msk.f32.mxu1 %vm19348_vm10, %v19233_v35  ;;  %vm19349_vm0 = vcmp.eq.s32.totalorder %v19334_v1, %v19347_v43  ;;  %v10743_v4 = vtrunc.f32 %v4261_v28  ;;  %v4232_v50 = vfloor.f32 %v4120_v30  ;;  %v4264_v27 = vceil.f32 %v4120_v30 }
 0x4fc   :  { %7879 = vmatprep.mubr.msk.f32.mxu0 %vm19349_vm0, %v19233_v35  ;;  %v9819_v11 = vpack.c.bf16 %v19351_v56, %v19350_v57  ;;  %9814 = vmatpush3.bf16.msra.mxu1 %v9813_v24  ;;  %v10714_v55 = vcvt.f32.s32 %v14680_v17  ;;  %v10746_v49 = vcvt.f32.s32 %v10745_v16  ;;  %v4231_v36 = vfloor.f32 %v4119_v34  ;;  %v19354_v24 = vld [vmem:[#allocation114_spill] sm:$0xff]  ;;  %v19444_v17 = vld [vmem:[#allocation169_spill] sm:$0xff] }
 0x4fd   :  { %4367 = vrot.lane.b32.xlu1 %v4340_v2, %s10864_s4  ;;  %v4263_v61 = vceil.f32 %v4119_v34  ;;  %4365 = vrot.lane.b32.xlu0 %v4339_v26, %s10864_s4  ;;  %v10712_v12 = vcvt.f32.s32 %v14693_v5  ;;  %v10744_v59 = vcvt.f32.s32 %v10743_v4  ;;  %v14713_v37 = vtrunc.f32 %v4232_v50  ;;  %v19359_v34 = vld [vmem:[#allocation90_spill] sm:$0xff]  ;;  %v19360_v4 = vld [vmem:[#allocation91_spill] sm:$0xff]  ;;  %v19448_v5 = vld [vmem:[#allocation173_spill] sm:$0xff] }
 0x4fe   :  { %9816 = vmatprep.subr.bf16.mxu1 %v9815_v39  ;;  %v10749_v38 = vtrunc.f32 %v4264_v27  ;;  %vm19352_vm6 = vcmp.eq.s32.totalorder %v12529_v20, %v19347_v43  ;;  %vm19353_vm12 = vcmp.eq.s32.totalorder %v14041_v51, %v19347_v43  ;;  %vm4307_vm11 = vcmp.lt.s32.totalorder %v10746_v49, 55  ;;  %v19355_v39 = vld [vmem:[#allocation115_spill] sm:$0xff]  ;;  %v19363_v27 = vld [vmem:[#allocation160_spill] sm:$0xff] }
 0x4ff   :  { %7848 = vmatmul.mubr.msk.f32.gmra.mrb[38].mxu1 %vm19352_vm6, %v19233_v35  ;;  %7880 = vmatmul.mubr.msk.f32.gmra.mrb[70].mxu0 %vm19353_vm12, %v19233_v35  ;;  %v14723_v46 = vtrunc.f32 %v4231_v36  ;;  %v10747_v45 = vtrunc.f32 %v4263_v61  ;;  %v9835_v2 = vpack.c.bf16 %v19355_v39, %v19354_v24  ;;  %vm19357_vm15 = vcmp.eq.s32.totalorder %v19332_v33, %v19356_v54  ;;  %v19367_v36 = vld [vmem:[#allocation109_spill] sm:$0xff]  ;;  %v19377_v39 = vld [vmem:[#allocation164_spill] sm:$0xff] }
 0x500   :  { %7849 = vmatprep.mubr.msk.f32.mxu1 %vm19357_vm15, %v19233_v35  ;;  %vm19358_vm9 = vcmp.eq.s32.totalorder %v19334_v1, %v19356_v54  ;;  %v4308_v26 = vsel %vm4307_vm11, %v10746_v49, 55  ;;  %vm4305_vm13 = vcmp.lt.s32.totalorder %v10744_v59, 55  ;;  %v10718_v28 = vcvt.f32.s32 %v14713_v37  ;;  %9818 = vmatpush3.bf16.msra.mxu1 %v9817_v29  ;;  %v19366_v49 = vld [vmem:[#allocation108_spill] sm:$0xff]  ;;  %v19456_v37 = vld [vmem:[#allocation181_spill] sm:$0xff] }
 0x501   :  { %7881 = vmatprep.mubr.msk.f32.mxu0 %vm19358_vm9, %v19233_v35  ;;  %v10750_v40 = vcvt.f32.s32 %v10749_v38  ;;  %v4342_v30 = vsub.s32 %v4308_v26, %v10714_v55  ;;  %v4306_v10 = vsel %vm4305_vm13, %v10744_v59, 55  ;;  %v10716_v63 = vcvt.f32.s32 %v14723_v46  ;;  %9836 = vmatprep.subr.bf16.mxu0 %v9835_v2  ;;  %v19370_v59 = vld [vmem:[#allocation163_spill] sm:$0xff]  ;;  %v19373_v38 = vld [vmem:[#allocation92_spill] sm:$0xff]  ;;  %v19458_v46 = vld [vmem:[#allocation182_spill] sm:$0xff] }
 0x502   :  { %v10748_v16 = vcvt.f32.s32 %v10747_v45  ;;  %v4341_v58 = vsub.s32 %v4306_v10, %v10712_v12  ;;  %9820 = vmatprep.subr.bf16.mxu1 %v9819_v11  ;;  %v9821_v50 = vpack.c.bf16 %v19360_v4, %v19359_v34  ;;  %9838 = vmatpush3.bf16.msra.mxu0 %v9835_v2  ;;  %vm19361_vm7 = vcmp.eq.s32.totalorder %v12529_v20, %v19356_v54  ;;  %v19374_v45 = vld [vmem:[#allocation93_spill] sm:$0xff]  ;;  %v19380_v2 = vld [vmem:[#allocation110_spill] sm:$0xff]  ;;  %v19381_v26 = vld [vmem:[#allocation111_spill] sm:$0xff] }
 0x503   :  { %vm4311_vm2 = vcmp.lt.s32.totalorder %v10750_v40, 55  ;;  %7850 = vmatmul.mubr.msk.f32.gmra.mrb[40].mxu1 %vm19361_vm7, %v19233_v35  ;;  %vm19362_vm10 = vcmp.eq.s32.totalorder %v14041_v51, %v19356_v54  ;;  %vm19364_vm6 = vcmp.eq.s32.totalorder %v19332_v33, %v19363_v27  ;;  %vm19365_vm12 = vcmp.eq.s32.totalorder %v19334_v1, %v19363_v27  ;;  %4371 = vrot.lane.b32.xlu1 %v4342_v30, %s10864_s4  ;;  %v19466_v4 = vld [vmem:[#allocation135_spill] sm:$0xff] }
 0x504   :  { %7882 = vmatmul.mubr.msk.f32.gmra.mrb[72].mxu0 %vm19362_vm10, %v19233_v35  ;;  %v4312_v29 = vsel %vm4311_vm2, %v10750_v40, 55  ;;  %vm4309_vm0 = vcmp.lt.s32.totalorder %v10748_v16, 55  ;;  %7851 = vmatprep.mubr.msk.f32.mxu1 %vm19364_vm6, %v19233_v35  ;;  %v9823_v61 = vpack.c.bf16 %v19367_v36, %v19366_v49  ;;  %vm19368_vm11 = vcmp.eq.s32.totalorder %v12529_v20, %v19363_v27 }
 0x505   :  { %7883 = vmatprep.mubr.msk.f32.mxu0 %vm19365_vm12, %v19233_v35  ;;  %v4310_v57 = vsel %vm4309_vm0, %v10748_v16, 55  ;;  %4369 = vrot.lane.b32.xlu0 %v4341_v58, %s10864_s4  ;;  %v4344_v56 = vsub.s32 %v4312_v29, %v10718_v28  ;;  %vm19369_vm15 = vcmp.eq.s32.totalorder %v14041_v51, %v19363_v27  ;;  %vm19371_vm9 = vcmp.eq.s32.totalorder %v19332_v33, %v19370_v59  ;;  %v19465_v16 = vld [vmem:[#allocation132_spill] sm:$0xff] }
 0x506   :  { %v4343_v11 = vsub.s32 %v4310_v57, %v10716_v63  ;;  %9822 = vmatpush3.bf16.msra.mxu1 %v9821_v50  ;;  %vm19372_vm13 = vcmp.eq.s32.totalorder %v19334_v1, %v19370_v59  ;;  %v9825_v24 = vpack.c.bf16 %v19374_v45, %v19373_v38  ;;  %vm19375_vm2 = vcmp.eq.s32.totalorder %v12529_v20, %v19370_v59  ;;  %v19472_v45 = vld [vmem:[#allocation137_spill] sm:$0xff] }
 0x507   :  { %7852 = vmatmul.mubr.msk.f32.gmra.mrb[42].mxu1 %vm19368_vm11, %v19233_v35  ;;  %4375 = vrot.lane.b32.xlu1 %v4344_v56, %s10864_s4  ;;  %vm19376_vm7 = vcmp.eq.s32.totalorder %v14041_v51, %v19370_v59  ;;  %vm19378_vm10 = vcmp.eq.s32.totalorder %v19332_v33, %v19377_v39  ;;  %vm19379_vm0 = vcmp.eq.s32.totalorder %v19334_v1, %v19377_v39  ;;  %v4089_v58 = vmul.f32 0.25, %v19465_v16 }
 0x508   :  { %7884 = vmatmul.mubr.msk.f32.gmra.mrb[74].mxu0 %vm19369_vm15, %v19233_v35  ;;  %7853 = vmatprep.mubr.msk.f32.mxu1 %vm19371_vm9, %v19233_v35  ;;  %v9827_v40 = vpack.c.bf16 %v19381_v26, %v19380_v2  ;;  %vm19382_vm6 = vcmp.eq.s32.totalorder %v12529_v20, %v19377_v39  ;;  %vm19383_vm12 = vcmp.eq.s32.totalorder %v14041_v51, %v19377_v39  ;;  %v4092_v50 = vmul.f32 0.25, %v19466_v4 }
 0x509   :  { %7885 = vmatprep.mubr.msk.f32.mxu0 %vm19372_vm13, %v19233_v35  ;;  %4373 = vrot.lane.b32.xlu0 %v4343_v11, %s10864_s4  ;;  %vm19385_vm11 = vcmp.eq.s32.totalorder %v19332_v33, %v19384_v48  ;;  %vm19386_vm15 = vcmp.eq.s32.totalorder %v19334_v1, %v19384_v48  ;;  %vm19390_vm9 = vcmp.eq.s32.totalorder %v12529_v20, %v19384_v48  ;;  %v4153_v11 = vceil.f32 %v4089_v58 }
 0x50a   :  { %9824 = vmatprep.subr.bf16.mxu1 %v9823_v61  ;;  %vm19391_vm13 = vcmp.eq.s32.totalorder %v14041_v51, %v19384_v48  ;;  %v4156_v49 = vceil.f32 %v4092_v50 }
 0x50b   :  { %7854 = vmatmul.mubr.msk.f32.gmra.mrb[44].mxu1 %vm19375_vm2, %v19233_v35  ;;  %4427 = vrot.lane.b32.xlu1 %v10690_v25, %s10864_s4  ;;  %v19389_v25 = vld [vmem:[#allocation95_spill] sm:$0xff]  ;;  %vm19393_vm2 = vcmp.eq.s32.totalorder %v19332_v33, %v19392_v6  ;;  %v10655_v2 = vtrunc.f32 %v4153_v11 }
 0x50c   :  { %7886 = vmatmul.mubr.msk.f32.gmra.mrb[76].mxu0 %vm19376_vm7, %v19233_v35  ;;  %7855 = vmatprep.mubr.msk.f32.mxu1 %vm19378_vm10, %v19233_v35  ;;  %vm19394_vm7 = vcmp.eq.s32.totalorder %v19334_v1, %v19392_v6  ;;  %vm19397_vm10 = vcmp.eq.s32.totalorder %v12529_v20, %v19392_v6 }
 0x50d   :  { %7887 = vmatprep.mubr.msk.f32.mxu0 %vm19379_vm0, %v19233_v35  ;;  %4425 = vrot.lane.b32.xlu0 %v10688_v42, %s10864_s4  ;;  %v19388_v42 = vld [vmem:[#allocation94_spill] sm:$0xff]  ;;  %vm19398_vm0 = vcmp.eq.s32.totalorder %v14041_v51, %v19392_v6 }
 0x50e   :  { %9826 = vmatpush3.bf16.msra.mxu1 %v9825_v24  ;;  %v9829_v30 = vpack.c.bf16 %v19389_v25, %v19388_v42  ;;  %v4094_v24 = vmul.f32 0.25, %v19472_v45 }
 0x50f   :  { %7856 = vmatmul.mubr.msk.f32.gmra.mrb[46].mxu1 %vm19382_vm6, %v19233_v35  ;;  %4431 = vrot.lane.b32.xlu1 %v10694_v47, %s10864_s4  ;;  %v19396_v47 = vld [vmem:[#allocation113_spill] sm:$0xff]  ;;  %vm19400_vm6 = vcmp.eq.s32.totalorder %v19332_v33, %v19399_v23 }
 0x510   :  { %7888 = vmatmul.mubr.msk.f32.gmra.mrb[78].mxu0 %vm19383_vm12, %v19233_v35  ;;  %7857 = vmatprep.mubr.msk.f32.mxu1 %vm19385_vm11, %v19233_v35  ;;  %v9831_v10 = vpack.c.bf16 %v19396_v47, %v19395_v52  ;;  %vm19401_vm12 = vcmp.eq.s32.totalorder %v19334_v1, %v19399_v23  ;;  %vm19404_vm11 = vcmp.eq.s32.totalorder %v12529_v20, %v19399_v23  ;;  %v4158_v52 = vceil.f32 %v4094_v24  ;;  %v19475_v47 = vld [vmem:[#allocation136_spill] sm:$0xff] }
 0x511   :  { %7889 = vmatprep.mubr.msk.f32.mxu0 %vm19386_vm15, %v19233_v35  ;;  %4429 = vrot.lane.b32.xlu0 %v19387_v21, %s10864_s4  ;;  %vm19405_vm15 = vcmp.eq.s32.totalorder %v14041_v51, %v19399_v23  ;;  %v4126_v16 = vfloor.f32 %v4094_v24 }
 0x512   :  { %9828 = vmatprep.subr.bf16.mxu1 %v9827_v40  ;;  %v4124_v40 = vfloor.f32 %v4092_v50  ;;  %v19485_v50 = vld [vmem:[#allocation143_spill] sm:$0xff] }
 0x513   :  { %7858 = vmatmul.mubr.msk.f32.gmra.mrb[48].mxu1 %vm19390_vm9, %v19233_v35  ;;  %4435 = vrot.lane.b32.xlu1 %v10698_v22, %s10864_s4  ;;  %v19402_v22 = vld [vmem:[#allocation96_spill] sm:$0xff]  ;;  %vm19407_vm9 = vcmp.eq.s32.totalorder %v19332_v33, %v19406_v0 }
 0x514   :  { %7890 = vmatmul.mubr.msk.f32.gmra.mrb[80].mxu0 %vm19391_vm13, %v19233_v35  ;;  %7859 = vmatprep.mubr.msk.f32.mxu1 %vm19393_vm2, %v19233_v35  ;;  %vm19408_vm13 = vcmp.eq.s32.totalorder %v19334_v1, %v19406_v0  ;;  %vm19409_vm2 = vcmp.eq.s32.totalorder %v12529_v20, %v19406_v0 }
 0x515   :  { %7891 = vmatprep.mubr.msk.f32.mxu0 %vm19394_vm7, %v19233_v35  ;;  %4433 = vrot.lane.b32.xlu0 %v10696_v3, %s10864_s4  ;;  %v9833_v3 = vpack.c.bf16 %v19403_v44, %v19402_v22  ;;  %vm19410_vm7 = vcmp.eq.s32.totalorder %v14041_v51, %v19406_v0 }
 0x516   :  { %9830 = vmatpush3.bf16.msra.mxu1 %v9829_v30 }
 0x517   :  { %7860 = vmatmul.mubr.msk.f32.gmra.mrb[50].mxu1 %vm19397_vm10, %v19233_v35  ;;  %4439 = vrot.lane.b32.xlu1 %v10702_v31, %s10864_s4  ;;  %vm19412_vm10 = vcmp.eq.s32.totalorder %v19332_v33, %v19411_v7  ;;  %v19416_v31 = vld [vmem:[#allocation176_spill] sm:$0xff] }
 0x518   :  { %7892 = vmatmul.mubr.msk.f32.gmra.mrb[82].mxu0 %vm19398_vm0, %v19233_v35  ;;  %7861 = vmatprep.mubr.msk.f32.mxu1 %vm19400_vm6, %v19233_v35  ;;  %vm19413_vm0 = vcmp.eq.s32.totalorder %v19334_v1, %v19411_v7  ;;  %vm19414_vm6 = vcmp.eq.s32.totalorder %v12529_v20, %v19411_v7 }
 0x519   :  { %7893 = vmatprep.mubr.msk.f32.mxu0 %vm19401_vm12, %v19233_v35  ;;  %4437 = vrot.lane.b32.xlu0 %v10700_v14, %s10864_s4  ;;  %vm19415_vm12 = vcmp.eq.s32.totalorder %v14041_v51, %v19411_v7  ;;  %v19421_v14 = vld [vmem:[#allocation179_spill] sm:$0xff] }
 0x51a   :  { %9832 = vmatprep.subr.bf16.mxu1 %v9831_v10  ;;  %v4093_v10 = vmul.f32 0.25, %v19475_v47 }
 0x51b   :  { %7862 = vmatmul.mubr.msk.f32.gmra.mrb[52].mxu1 %vm19404_vm11, %v19233_v35  ;;  %4443 = vrot.lane.b32.xlu1 %v10706_v62, %s10864_s4  ;;  %vm19417_vm11 = vcmp.eq.s32.totalorder %v19332_v33, %v19416_v31  ;;  %v19430_v62 = vld [vmem:[#allocation146_spill] sm:$0xff] }
 0x51c   :  { %7894 = vmatmul.mubr.msk.f32.gmra.mrb[84].mxu0 %vm19405_vm15, %v19233_v35  ;;  %7863 = vmatprep.mubr.msk.f32.mxu1 %vm19407_vm9, %v19233_v35  ;;  %vm19418_vm15 = vcmp.eq.s32.totalorder %v19334_v1, %v19416_v31  ;;  %vm19419_vm9 = vcmp.eq.s32.totalorder %v12529_v20, %v19416_v31 }
 0x51d   :  { %7895 = vmatprep.mubr.msk.f32.mxu0 %vm19408_vm13, %v19233_v35  ;;  %4441 = vrot.lane.b32.xlu0 %v10704_v9, %s10864_s4  ;;  %vm19420_vm13 = vcmp.eq.s32.totalorder %v14041_v51, %v19416_v31  ;;  %v19434_v9 = vld [vmem:[#allocation158_spill] sm:$0xff] }
 0x51e   :  { %9834 = vmatpush3.bf16.msra.mxu1 %v9833_v3  ;;  %v10656_v3 = vcvt.f32.s32 %v10655_v2  ;;  %v15197_v2 = vtrunc.f32 %v4126_v16 }
 0x51f   :  { %7864 = vmatmul.mubr.msk.f32.gmra.mrb[54].mxu1 %vm19409_vm2, %v19233_v35  ;;  %4447 = vrot.lane.b32.xlu1 %v10710_v8, %s10864_s4  ;;  %vm19422_vm2 = vcmp.eq.s32.totalorder %v19334_v1, %v19421_v14  ;;  %v19436_v8 = vld [vmem:[#allocation161_spill] sm:$0xff] }
 0x520   :  { %7896 = vmatmul.mubr.msk.f32.gmra.mrb[86].mxu0 %vm19410_vm7, %v19233_v35  ;;  %7865 = vmatprep.mubr.msk.f32.mxu1 %vm19412_vm10, %v19233_v35  ;;  %vm19423_vm7 = vcmp.eq.s32.totalorder %v12529_v20, %v19421_v14  ;;  %vm3444_vm10 = vcmask 130048  }
 0x521   :  { %7897 = vmatprep.mubr.msk.f32.mxu0 %vm19413_vm0, %v19233_v35  ;;  %4445 = vrot.lane.b32.xlu0 %v10708_v13, %s10864_s4  ;;  %vm19426_vm0 = vcmp.eq.s32.totalorder %v12529_v20, %v19425_v19  ;;  %v19440_v13 = vld [vmem:[#allocation165_spill] sm:$0xff] }
 0x523   :  { %7866 = vmatmul.mubr.msk.f32.gmra.mrb[56].mxu1 %vm19414_vm6, %v19233_v35  ;;  %4451 = vrot.lane.b32.xlu1 %v10714_v55, %s10864_s4  ;;  %vm19435_vm6 = vcmp.eq.s32.totalorder %v19430_v62, %v19333_v53  ;;  %v19452_v55 = vld [vmem:[#allocation177_spill] sm:$0xff] }
 0x524   :  { %7898 = vmatmul.mubr.msk.f32.gmra.mrb[88].mxu0 %vm19415_vm12, %v19233_v35  ;;  %7867 = vmatprep.mubr.msk.f32.mxu1 %vm19417_vm11, %v19233_v35  ;;  %vm19437_vm12 = vcmp.eq.s32.totalorder %v19427_v32, %v19339_v41  ;;  %vm19439_vm11 = vcmp.eq.s32.totalorder %v19430_v62, %v19339_v41  ;;  %v19446_v41 = vld [vmem:[#allocation170_spill] sm:$0xff] }
 0x525   :  { %7899 = vmatprep.mubr.msk.f32.mxu0 %vm19418_vm15, %v19233_v35  ;;  %4449 = vrot.lane.b32.xlu0 %v10712_v12, %s10864_s4  ;;  %vm19441_vm15 = vcmp.eq.s32.totalorder %v19427_v32, %v19347_v43  ;;  %v19454_v12 = vld [vmem:[#allocation178_spill] sm:$0xff] }
 0x527   :  { %7868 = vmatmul.mubr.msk.f32.gmra.mrb[58].mxu1 %vm19419_vm9, %v19233_v35  ;;  %4455 = vrot.lane.b32.xlu1 %v10718_v28, %s10864_s4  ;;  %vm19443_vm9 = vcmp.eq.s32.totalorder %v19430_v62, %v19347_v43  ;;  %v19450_v43 = vld [vmem:[#allocation174_spill] sm:$0xff]  ;;  %v19463_v28 = vld [vmem:[#allocation133_spill] sm:$0xff] }
 0x528   :  { %7900 = vmatmul.mubr.msk.f32.gmra.mrb[90].mxu0 %vm19420_vm13, %v19233_v35  ;;  %7869 = vmatprep.mubr.msk.f32.mxu1 %vm3218_vm8, %v19233_v35  ;;  %vm19424_vm8 = vcmp.eq.s32.totalorder %v14041_v51, %v19421_v14  ;;  %vm19445_vm13 = vcmp.eq.s32.totalorder %v19427_v32, %v19356_v54 }
 0x529   :  { %7901 = vmatprep.mubr.msk.f32.mxu0 %vm19422_vm2, %v19233_v35  ;;  %4453 = vrot.lane.b32.xlu0 %v10716_v63, %s10864_s4  ;;  %vm19447_vm2 = vcmp.eq.s32.totalorder %v19430_v62, %v19356_v54  ;;  %v19460_v54 = vld [vmem:[#allocation183_spill] sm:$0xff]  ;;  %v4091_v63 = vmul.f32 0.25, %v19463_v28 }
 0x52b   :  { %7870 = vmatmul.mubr.msk.f32.gmra.mrb[60].mxu1 %vm19423_vm7, %v19233_v35  ;;  %vm19449_vm7 = vcmp.eq.s32.totalorder %v19427_v32, %v19363_v27  ;;  %v4155_v29 = vceil.f32 %v4091_v63 }
 0x52c   :  { %7902 = vmatmul.mubr.msk.f32.gmra.mrb[92].mxu0 %vm19424_vm8, %v19233_v35  ;;  %7871 = vmatprep.mubr.msk.f32.mxu1 %vm3225_vm3, %v19233_v35  ;;  %vm19428_vm3 = vcmp.eq.s32.totalorder %v19427_v32, %v14071_v60  ;;  %vm19451_vm8 = vcmp.eq.s32.totalorder %v19430_v62, %v19363_v27  ;;  %v19468_v27 = vld [vmem:[#allocation134_spill] sm:$0xff] }
 0x52d   :  { %7903 = vmatprep.mubr.msk.f32.mxu0 %vm3227_vm4, %v19233_v35  ;;  %vm19431_vm4 = vcmp.eq.s32.totalorder %v19430_v62, %v14071_v60  ;;  %v19438_v60 = vld [vmem:[#allocation162_spill] sm:$0xff]  ;;  %v4090_v57 = vmul.f32 0.25, %v19468_v27  ;;  %v10659_v36 = vtrunc.f32 %v4155_v29  ;;  %v15181_v29 = vmul.f32 0.25, %v19485_v50 }
 0x52f   :  { %7872 = vmatmul.mubr.msk.f32.gmra.mrb[62].mxu1 %vm19426_vm0, %v19233_v35  ;;  %vm19453_vm0 = vcmp.eq.s32.totalorder %v19427_v32, %v19370_v59  ;;  %v4154_v61 = vceil.f32 %v4090_v57  ;;  %v10660_v21 = vcvt.f32.s32 %v10659_v36  ;;  %v4122_v42 = vfloor.f32 %v4090_v57 }
 0x530   :  { %7904 = vmatmul.mubr.msk.f32.gmra.mrb[94].mxu0 %vm3226_vm5, %v19233_v35  ;;  %7905 = vmatprep.mubr.msk.f32.mxu1 %vm19428_vm3, %v19233_v35  ;;  %vm19433_vm5 = vcmp.eq.s32.totalorder %v19427_v32, %v19333_v53  ;;  %v19442_v53 = vld [vmem:[#allocation166_spill] sm:$0xff]  ;;  %vm19455_vm3 = vcmp.eq.s32.totalorder %v19430_v62, %v19370_v59  ;;  %v4123_v59 = vfloor.f32 %v4091_v63  ;;  %v4132_v19 = vfloor.f32 %v15181_v29 }
 0x531   :  { %9603 = vmatprep.mubr.msk.f32.mxu0 %vm3444_vm10, %v19429_v15  ;;  %v10657_v25 = vtrunc.f32 %v4154_v61 }
 0x532   :  { %v15140_v30 = vtrunc.f32 %v4123_v59 }
 0x533   :  { %7906 = vmatmul.mubr.msk.f32.vlgmr.msra.gmra.mrb[64].mxu1 %vm19431_vm4, %v19233_v35  ;;  %vm19457_vm4 = vcmp.eq.s32.totalorder %v19427_v32, %v19377_v39 }
 0x534   :  { %9604 = vmatmul.mubr.msk.f32.vlgmr.msra.gmra.mrb[96].mxu0 %vm3444_vm10, %v19432_v18  ;;  %7907 = vmatprep.mubr.msk.f32.mxu1 %vm19433_vm5, %v19233_v35  ;;  %vm19459_vm5 = vcmp.eq.s32.totalorder %v19430_v62, %v19377_v39  ;;  %v4121_v39 = vfloor.f32 %v4089_v58  ;;  %v15154_v18 = vtrunc.f32 %v4122_v42  ;;  %v4125_v58 = vfloor.f32 %v4093_v10 }
 0x535   :  { %9606 = vmatprep.mubr.msk.f32.mxu0 %vm3444_vm10, %v19434_v9  ;;  %v10658_v9 = vcvt.f32.s32 %v10657_v25 }
 0x536   :  { %v15146_v44 = vtrunc.f32 %v4121_v39  ;;  %v18768_v61 = vcvt.f32.s32 %v15154_v18 }
 0x537   :  { %7908 = vmatmul.mubr.msk.f32.gmra.mrb[66].mxu1 %vm19435_vm6, %v19233_v35  ;;  %vm19461_vm6 = vcmp.eq.s32.totalorder %v19427_v32, %v19384_v48 }
 0x538   :  { %9607 = vmatmul.mubr.msk.f32.gmra.mrb[98].mxu0 %vm3444_vm10, %v19436_v8  ;;  %7909 = vmatprep.mubr.msk.f32.mxu1 %vm19437_vm12, %v19233_v35  ;;  %vm19462_vm12 = vcmp.eq.s32.totalorder %v19430_v62, %v19384_v48  ;;  %v10661_v48 = vtrunc.f32 %v4156_v49 }
 0x539   :  { %9609 = vmatprep.mubr.msk.f32.mxu0 %vm3444_vm10, %v19438_v60  ;;  %v19478_v60 = vld [vmem:[#allocation138_spill] sm:$0xff] }
 0x53a   :  { %v10662_v15 = vcvt.f32.s32 %v10661_v48 }
 0x53b   :  { %7910 = vmatmul.mubr.msk.f32.gmra.mrb[68].mxu1 %vm19439_vm11, %v19233_v35  ;;  %vm19464_vm11 = vcmp.eq.s32.totalorder %v19427_v32, %v19392_v6 }
 0x53c   :  { %9610 = vmatmul.mubr.msk.f32.gmra.mrb[100].mxu0 %vm3444_vm10, %v19440_v13  ;;  %7911 = vmatprep.mubr.msk.f32.mxu1 %vm19441_vm15, %v19233_v35  ;;  %vm19469_vm15 = vcmp.eq.s32.totalorder %v19427_v32, %v19399_v23  ;;  %v4095_v13 = vmul.f32 0.25, %v19478_v60  ;;  %v18764_v60 = vcvt.f32.s32 %v15197_v2 }
 0x53d   :  { %9612 = vmatprep.mubr.msk.f32.mxu0 %vm3444_vm10, %v19442_v53  ;;  %v18766_v53 = vcvt.f32.s32 %v15140_v30 }
 0x53e   :  { %v4159_v4 = vceil.f32 %v4095_v13 }
 0x53f   :  { %7912 = vmatmul.mubr.msk.f32.gmra.mrb[70].mxu1 %vm19443_vm9, %v19233_v35  ;;  %vm19470_vm9 = vcmp.eq.s32.totalorder %v19430_v62, %v19399_v23  ;;  %v19476_v23 = vld [vmem:[#allocation139_spill] sm:$0xff] }
 0x540   :  { %9613 = vmatmul.mubr.msk.f32.gmra.mrb[102].mxu0 %vm3444_vm10, %v19444_v17  ;;  %7913 = vmatprep.mubr.msk.f32.mxu1 %vm19445_vm13, %v19233_v35  ;;  %vm19471_vm13 = vcmp.eq.s32.totalorder %v19427_v32, %v19406_v0  ;;  %v4096_v22 = vmul.f32 0.25, %v19476_v23  ;;  %v10665_v17 = vtrunc.f32 %v4158_v52  ;;  %v10667_v42 = vtrunc.f32 %v4159_v4 }
 0x541   :  { %9615 = vmatprep.mubr.msk.f32.mxu0 %vm3444_vm10, %v19446_v41  ;;  %v4157_v41 = vceil.f32 %v4093_v10  ;;  %v4164_v52 = vceil.f32 %v15181_v29  ;;  %v4127_v23 = vfloor.f32 %v4095_v13 }
 0x542   :  { %v10666_v57 = vcvt.f32.s32 %v10665_v17 }
 0x543   :  { %7914 = vmatmul.mubr.msk.f32.gmra.mrb[72].mxu1 %vm19447_vm2, %v19233_v35  ;;  %vm19473_vm2 = vcmp.eq.s32.totalorder %v19430_v62, %v19406_v0  ;;  %v15148_v0 = vtrunc.f32 %v4124_v40  ;;  %v10663_v11 = vtrunc.f32 %v4157_v41  ;;  %v4128_v40 = vfloor.f32 %v4096_v22 }
 0x544   :  { %9616 = vmatmul.mubr.msk.f32.gmra.mrb[104].mxu0 %vm3444_vm10, %v19448_v5  ;;  %7915 = vmatprep.mubr.msk.f32.mxu1 %vm19449_vm7, %v19233_v35  ;;  %vm19474_vm7 = vcmp.eq.s32.totalorder %v19427_v32, %v19411_v7  ;;  %v4160_v5 = vceil.f32 %v4096_v22  ;;  %v10677_v63 = vtrunc.f32 %v4164_v52 }
 0x545   :  { %9618 = vmatprep.mubr.msk.f32.mxu0 %vm3444_vm10, %v19450_v43  ;;  %v18765_v28 = vcvt.f32.s32 %v15148_v0  ;;  %v10664_v47 = vcvt.f32.s32 %v10663_v11  ;;  %v15227_v17 = vtrunc.f32 %v4128_v40  ;;  %v19491_v11 = vld [vmem:[#allocation145_spill] sm:$0xff] }
 0x546   :  { %v10669_v49 = vtrunc.f32 %v4160_v5  ;;  %v19488_v5 = vld [vmem:[#allocation142_spill] sm:$0xff] }
 0x547   :  { %7916 = vmatmul.mubr.msk.f32.gmra.mrb[74].mxu1 %vm19451_vm8, %v19233_v35  ;;  %vm19477_vm8 = vcmp.eq.s32.totalorder %v19430_v62, %v19411_v7  ;;  %v18767_v7 = vcvt.f32.s32 %v15146_v44 }
 0x548   :  { %9619 = vmatmul.mubr.msk.f32.gmra.mrb[106].mxu0 %vm3444_vm10, %v19452_v55  ;;  %7917 = vmatprep.mubr.msk.f32.mxu1 %vm19453_vm0, %v19233_v35  ;;  %vm4189_vm0 = vcmp.lt.s32.totalorder %v10660_v21, 55  ;;  %v19480_v55 = vld [vmem:[#allocation141_spill] sm:$0xff]  ;;  %v10670_v10 = vcvt.f32.s32 %v10669_v49 }
 0x549   :  { %9621 = vmatprep.mubr.msk.f32.mxu0 %vm3444_vm10, %v19454_v12  ;;  %v4098_v12 = vmul.f32 0.25, %v19480_v55  ;;  %v4099_v55 = vmul.f32 0.25, %v19488_v5 }
 0x54b   :  { %7918 = vmatmul.mubr.msk.f32.gmra.mrb[76].mxu1 %vm19455_vm3, %v19233_v35  ;;  %vm19479_vm3 = vcmp.eq.s32.totalorder %v19427_v32, %v19416_v31  ;;  %v4162_v59 = vceil.f32 %v4098_v12  ;;  %v4130_v41 = vfloor.f32 %v4098_v12  ;;  %v15240_v12 = vtrunc.f32 %v4127_v23 }
 0x54c   :  { %9622 = vmatmul.mubr.msk.f32.gmra.mrb[108].mxu0 %vm3444_vm10, %v19456_v37  ;;  %7919 = vmatprep.mubr.msk.f32.mxu1 %vm19457_vm4, %v19233_v35  ;;  %vm4185_vm4 = vcmp.lt.s32.totalorder %v10656_v3, 55  ;;  %v19481_v37 = vld [vmem:[#allocation140_spill] sm:$0xff]  ;;  %v4131_v23 = vfloor.f32 %v4099_v55 }
 0x54d   :  { %9624 = vmatprep.mubr.msk.f32.mxu0 %vm3444_vm10, %v19458_v46  ;;  %v15169_v46 = vmul.f32 0.25, %v19481_v37  ;;  %v4186_v27 = vsel %vm4185_vm4, %v10656_v3, 55  ;;  %v10668_v37 = vcvt.f32.s32 %v10667_v42  ;;  %v10678_v42 = vcvt.f32.s32 %v10677_v63 }
 0x54e   :  { %v15201_v48 = vsub.s32 %v4186_v27, %v18767_v7  ;;  %v18771_v52 = vcvt.f32.s32 %v15240_v12 }
 0x54f   :  { %7920 = vmatmul.mubr.msk.f32.gmra.mrb[78].mxu1 %vm19459_vm5, %v19233_v35  ;;  %v15105_v34 = vpop.permute.xlu1 %4349  ;;  %vm15172_vm5 = vcmp.lt.s32.totalorder %v10662_v15, 55  ;;  %v4161_v45 = vceil.f32 %v15169_v46 }
 0x550   :  { %9625 = vmatmul.mubr.msk.f32.gmra.mrb[110].mxu0 %vm3444_vm10, %v19460_v54  ;;  %7921 = vmatprep.mubr.msk.f32.mxu1 %vm19461_vm6, %v19233_v35  ;;  %vm19467_vm10 = vcmp.eq.s32.totalorder %v19430_v62, %v19392_v6  ;;  %v4190_v54 = vsel %vm4189_vm0, %v10660_v21, 55  ;;  %vm19484_vm6 = vcmp.eq.s32.totalorder %v19430_v62, %v19416_v31  ;;  %v4192_v24 = vsel %vm15172_vm5, %v10662_v15, 55 }
 0x551   :  { %v15117_v56 = vpop.permute.xlu0 %4345  ;;  %v15191_v31 = vsub.s32 %v4190_v54, %v18766_v53  ;;  %v15207_v21 = vtrunc.f32 %v4125_v58  ;;  %v10673_v15 = vtrunc.f32 %v4162_v59  ;;  %v4129_v54 = vfloor.f32 %v15169_v46 }
 0x552   :  { %v4102_v46 = vmul.f32 0.25, %v19491_v11  ;;  %v18763_v59 = vcvt.f32.s32 %v15227_v17 }
 0x553   :  { %7922 = vmatmul.mubr.msk.f32.gmra.mrb[80].mxu1 %vm19462_vm12, %v19233_v35  ;;  %vm4187_vm12 = vcmp.lt.s32.totalorder %v10658_v9, 55  ;;  %v18762_v16 = vcvt.f32.s32 %v15207_v21  ;;  %v10674_v4 = vcvt.f32.s32 %v10673_v15  ;;  %v15255_v40 = vtrunc.f32 %v4129_v54  ;;  %v19492_v54 = vld [vmem:[#allocation144_spill] sm:$0xff] }
 0x554   :  { %7923 = vmatprep.mubr.msk.f32.mxu1 %vm19464_vm11, %v19233_v35  ;;  %vm19486_vm11 = vcmp.eq.s32.totalorder %v19427_v32, %v19421_v14  ;;  %v4188_v39 = vsel %vm4187_vm12, %v10658_v9, 55  ;;  %v10671_v9 = vtrunc.f32 %v4161_v45  ;;  %v15253_v45 = vtrunc.f32 %v4130_v41 }
 0x555   :  { %v15127_v38 = vpop.permute.xlu1 %4351  ;;  %v15130_v26 = vpop.permute.xlu0 %4347  ;;  %v15224_v3 = vsub.s32 %v4188_v39, %v18768_v61  ;;  %v4134_v15 = vfloor.f32 %v4102_v46  ;;  %v4166_v5 = vceil.f32 %v4102_v46  ;;  %v4101_v63 = vmul.f32 0.25, %v19492_v54  ;;  %v19494_v61 = vld [vmem:[#allocation153_spill] sm:$0xff] }
 0x556   :  { %v10672_v50 = vcvt.f32.s32 %v10671_v9  ;;  %v15260_v9 = vtrunc.f32 %v4132_v19  ;;  %v18769_v58 = vcvt.f32.s32 %v15255_v40 }
 0x557   :  { %7924 = vmatmul.mubr.msk.f32.gmra.mrb[82].mxu1 %vm19467_vm10, %v19233_v35  ;;  %vm19487_vm10 = vcmp.eq.s32.totalorder %v19430_v62, %v19421_v14  ;;  %v15220_v14 = vsub.s32 %v4192_v24, %v18765_v28  ;;  %v4163_v24 = vceil.f32 %v4099_v55  ;;  %v18770_v55 = vcvt.f32.s32 %v15253_v45 }
 0x558   :  { %7925 = vmatprep.mubr.msk.f32.mxu1 %vm19469_vm15, %v19233_v35  ;;  %vm4195_vm15 = vcmp.lt.s32.totalorder %v10666_v57, 55  ;;  %v10681_v54 = vtrunc.f32 %v4166_v5  ;;  %v4165_v7 = vceil.f32 %v4101_v63 }
 0x559   :  { %v4196_v13 = vsel %vm4195_vm15, %v10666_v57, 55 }
 0x55a   :  { %v15250_v49 = vsub.s32 %v4196_v13, %v18764_v60  ;;  %v10675_v13 = vtrunc.f32 %v4163_v24 }
 0x55b   :  { %7926 = vmatmul.mubr.msk.f32.gmra.mrb[84].mxu1 %vm19470_vm9, %v19233_v35  ;;  %v15142_v6 = vpop.permute.xlu1 %4355  ;;  %vm15236_vm9 = vcmp.lt.s32.totalorder %v10670_v10, 55 }
 0x55c   :  { %7927 = vmatprep.mubr.msk.f32.mxu1 %vm19471_vm13, %v19233_v35  ;;  %v4200_v29 = vsel %vm15236_vm9, %v10670_v10, 55  ;;  %vm4203_vm13 = vcmp.lt.s32.totalorder %v10674_v4, 55  ;;  %v10676_v53 = vcvt.f32.s32 %v10675_v13 }
 0x55d   :  { %v15269_v10 = vsub.s32 %v4200_v29, %v18763_v59  ;;  %v4204_v46 = vsel %vm4203_vm13, %v10674_v4, 55  ;;  %v18772_v29 = vcvt.f32.s32 %v15260_v9  ;;  %v19493_v59 = vld [vmem:[#allocation154_spill] sm:$0xff]  ;;  %v15290_v4 = vmul.f32 0.25, %v19494_v61 }
 0x55e   :  { %v15287_v60 = vmul.f32 0.25, %v19493_v59 }
 0x55f   :  { %7928 = vmatmul.mubr.msk.f32.gmra.mrb[86].mxu1 %vm19473_vm2, %v19233_v35  ;;  %v15156_v8 = vpop.permute.xlu0 %4353  ;;  %vm4201_vm2 = vcmp.lt.s32.totalorder %v10672_v50, 55 }
 0x560   :  { %7929 = vmatprep.mubr.msk.f32.mxu1 %vm19474_vm7, %v19233_v35  ;;  %v15165_v43 = vpop.permute.xlu1 %4359  ;;  %vm4207_vm7 = vcmp.lt.s32.totalorder %v10678_v42, 55 }
 0x561   :  { %v4208_v28 = vsel %vm4207_vm7, %v10678_v42, 55 }
 0x562   :  { %v15316_v13 = vsub.s32 %v4208_v28, %v18772_v29  ;;  %v4380_v28 = vmul.u32 %v15127_v38, %v15220_v14 }
 0x563   :  { %7930 = vmatmul.mubr.msk.f32.gmra.mrb[88].mxu1 %vm19477_vm8, %v19233_v35  ;;  %v15187_v36 = vpop.permute.xlu0 %4357  ;;  %vm4205_vm8 = vcmp.lt.s32.totalorder %v10676_v53, 55 }
 0x564   :  { %7931 = vmatprep.mubr.msk.f32.mxu1 %vm19479_vm3, %v19233_v35 }
 0x567   :  { %7932 = vmatmul.mubr.msk.f32.gmra.mrb[90].mxu1 %vm19484_vm6, %v19233_v35  ;;  %vm15351_vm6 = vcmp.gt.s32.totalorder %v4380_v28, 0  ;;  %v19510_v28 = vcvt.f32.s32 %v15207_v21 }
 0x568   :  { %7933 = vmatprep.mubr.msk.f32.mxu1 %vm19486_vm11, %v19233_v35 }
 0x56a   :  { %v15209_v25 = vpop.permute.xlu1 %4363 }
 0x56b   :  { %7934 = vmatmul.mubr.msk.f32.gmra.mrb[92].mxu1 %vm19487_vm10, %v19233_v35  ;;  %v15216_v22 = vpop.permute.xlu0 %4361 }
 0x56c   :  { %7935 = vmatprep.mubr.msk.f32.mxu1 %vm3229_vm14, %v19233_v35  ;;  %vm4193_vm14 = vcmp.lt.s32.totalorder %v10664_v47, 55 }
 0x56d   :  { %v4194_v39 = vsel %vm4193_vm14, %v10664_v47, 55 }
 0x56e   :  { %v15264_v41 = vsub.s32 %v4194_v39, %v18762_v16  ;;  %v4202_v39 = vsel %vm4201_vm2, %v10672_v50, 55  ;;  %v15277_v16 = vtrunc.f32 %v4131_v23  ;;  %v4377_v50 = vmul.u32 %v15117_v56, %v15201_v48 }
 0x56f   :  { %7936 = vmatmul.mubr.msk.f32.gmra.mrb[94].mxu1 %vm3228_vm1, %v19233_v35  ;;  %v15242_v27 = vpop.permute.xlu1 %4367  ;;  %v15245_v57 = vpop.permute.xlu0 %4365  ;;  %vm4197_vm1 = vcmp.lt.s32.totalorder %v10668_v37, 55  ;;  %v4378_v23 = vmul.u32 %v15130_v26, %v15224_v3  ;;  %v15302_v59 = vsub.s32 %v4202_v39, %v18769_v58  ;;  %v19495_v56 = vcvt.f32.s32 %v15154_v18 }
 0x570   :  { %v4198_v47 = vsel %vm4197_vm1, %v10668_v37, 55  ;;  %v15279_v37 = vtrunc.f32 %v4134_v15  ;;  %v15298_v15 = vsub.s32 %v4204_v46, %v18770_v55  ;;  %v19496_v26 = vcvt.f32.s32 %v15146_v44 }
 0x571   :  { %v15283_v24 = vsub.s32 %v4198_v47, %v18771_v52  ;;  %v4410_v48 = vmul.u32 56, %v19495_v56  ;;  %v10682_v46 = vcvt.f32.s32 %v10681_v54  ;;  %v4133_v39 = vfloor.f32 %v4101_v63 }
 0x572   :  { %v4409_v3 = vmul.u32 56, %v19496_v26  ;;  %v4168_v58 = vceil.f32 %v15287_v60  ;;  %v10679_v55 = vtrunc.f32 %v4165_v7  ;;  %v4136_v52 = vfloor.f32 %v15287_v60 }
 0x573   :  { %v4167_v47 = vceil.f32 %v15290_v4  ;;  %v4379_v18 = vmul.u32 %v15105_v34, %v15191_v31  ;;  %vm15323_vm0 = vcmp.gt.s32.totalorder %v4377_v50, 0  ;;  %vm15329_vm3 = vcmp.gt.s32.totalorder %v4378_v23, 0 }
 0x574   :  { %v19501_v26 = vcvt.f32.s32 %v15140_v30  ;;  %v19502_v34 = vcvt.f32.s32 %v15148_v0  ;;  %v4206_v50 = vsel %vm4205_vm8, %v10676_v53, 55  ;;  %vm15337_vm4 = vcmp.lt.s32.totalorder %v10682_v46, 55 }
 0x575   :  { %v15273_v19 = vpop.permute.xlu1 %4371  ;;  %v15341_v38 = vtrunc.f32 %v4133_v39  ;;  %v10685_v14 = vtrunc.f32 %v4168_v58  ;;  %v10680_v23 = vcvt.f32.s32 %v10679_v55  ;;  %v10683_v35 = vtrunc.f32 %v4167_v47 }
 0x576   :  { %v4411_v29 = vmul.u32 56, %v19501_v26  ;;  %v4412_v31 = vmul.u32 56, %v19502_v34  ;;  %vm15347_vm5 = vcmp.gt.s32.totalorder %v4379_v18, 0  ;;  %v19509_v18 = vcvt.f32.s32 %v15197_v2 }
 0x577   :  { %v15275_v11 = vpop.permute.xlu0 %4369  ;;  %v4382_v53 = vmul.u32 %v15142_v6, %v15250_v49  ;;  %v4381_v55 = vmul.u32 %v15156_v8, %v15264_v41  ;;  %v4212_v6 = vsel %vm15337_vm4, %v10682_v46, 55  ;;  %v10686_v8 = vcvt.f32.s32 %v10685_v14 }
 0x578   :  { %v4414_v63 = vmul.u32 56, %v19509_v18  ;;  %v4135_v49 = vfloor.f32 %v15290_v4  ;;  %vm15370_vm12 = vcmp.lt.s32.totalorder %v10680_v23, 55  ;;  %v4384_v4 = vmul.u32 %v15165_v43, %v15269_v10 }
 0x579   :  { %v15304_v42 = vpop.permute.xlu1 %4375  ;;  %vm15378_vm11 = vcmp.gt.s32.totalorder %v4382_v53, 0  ;;  %vm15382_vm10 = vcmp.gt.s32.totalorder %v4381_v55, 0  ;;  %v4210_v43 = vsel %vm15370_vm12, %v10680_v23, 55  ;;  %v15397_v10 = vtrunc.f32 %v4136_v52 }
 0x57a   :  { %vm15399_vm15 = vcmp.lt.s32.totalorder %v10686_v8, 55  ;;  %vm15413_vm9 = vcmp.gt.s32.totalorder %v4384_v4, 0  ;;  %v4386_v23 = vmul.u32 %v15209_v25, %v15298_v15  ;;  %v4385_v53 = vmul.u32 %v15216_v22, %v15302_v59 }
 0x57b   :  { %v15306_v5 = vpop.permute.xlu0 %4373  ;;  %v10654_v25 = vcvt.f32.s32 %v15397_v10  ;;  %v4216_v22 = vsel %vm15399_vm15, %v10686_v8, 55  ;;  %v4388_v8 = vmul.u32 %v15242_v27, %v15316_v13  ;;  %v19535_v4 = vcvt.f32.s32 %v15260_v9 }
 0x57c   :  { %vm15441_vm13 = vcmp.gt.s32.totalorder %v4386_v23, 0  ;;  %vm15445_vm2 = vcmp.gt.s32.totalorder %v4385_v53, 0 }
 0x57d   :  { %v4428_v54 = vpop.permute.xlu1 %4427  ;;  %vm15461_vm7 = vcmp.gt.s32.totalorder %v4388_v8, 0  ;;  %v4424_v23 = vmul.u32 56, %v10654_v25 }
 0x57e   :  { %v4458_v56 = vadd.s32 %v4428_v54, %v4410_v48  ;;  %v4413_v54 = vmul.u32 56, %v19510_v28 }
 0x57f   :  { %v4426_v7 = vpop.permute.xlu0 %4425 }
 0x580   :  { %v4457_v60 = vadd.s32 %v4426_v7, %v4409_v3  ;;  %v4474_v48 = vsel %vm15329_vm3, %v4458_v56, 4294967295  ;;  %v19511_v7 = vcvt.f32.s32 %v15277_v16  ;;  %v10648_v3 = vcvt.f32.s32 %v15341_v38 }
 0x581   :  { %4511 = vperm.xlu1 %10831, %v4474_v48   ;;  %v4432_v47 = vpop.permute.xlu1 %4431  ;;  %v19519_v48 = vcvt.f32.s32 %v15240_v12 }
 0x582   :  { %v4473_v30 = vsel %vm15323_vm0, %v4457_v60, 4294967295  ;;  %v4460_v44 = vadd.s32 %v4432_v47, %v4412_v31  ;;  %v15365_v56 = vsub.s32 %v4206_v50, %v19511_v7  ;;  %v19518_v50 = vcvt.f32.s32 %v15227_v17 }
 0x583   :  { %v4430_v58 = vpop.permute.xlu0 %4429  ;;  %4508 = vperm.xlu0 %10830, %v4473_v30   ;;  %v4415_v30 = vmul.u32 56, %v19519_v48 }
 0x584   :  { %v4459_v39 = vadd.s32 %v4430_v58, %v4411_v29  ;;  %v10684_v29 = vcvt.f32.s32 %v10683_v35  ;;  %v4476_v21 = vsel %vm15351_vm6, %v4460_v44, 4294967295  ;;  %v4383_v35 = vmul.u32 %v15187_v36, %v15283_v24 }
 0x585   :  { %v4436_v46 = vpop.permute.xlu1 %4435  ;;  %v4416_v14 = vmul.u32 56, %v19518_v50  ;;  %v15403_v24 = vtrunc.f32 %v4135_v49  ;;  %v19528_v44 = vcvt.f32.s32 %v15253_v45  ;;  %v4325_v49 = vsub.s32 %v4210_v43, %v10648_v3 }
 0x586   :  { %v4475_v2 = vsel %vm15347_vm5, %v4459_v39, 4294967295  ;;  %v4462_v34 = vadd.s32 %v4436_v46, %v4414_v63  ;;  %vm15405_vm14 = vcmp.lt.s32.totalorder %v10684_v29, 55  ;;  %vm15417_vm1 = vcmp.gt.s32.totalorder %v4383_v35, 0 }
 0x587   :  { %4514 = vperm.xlu1 %10831, %v4475_v2   ;;  %v4434_v26 = vpop.permute.xlu0 %4433  ;;  %4517 = vperm.xlu0 %10830, %v4476_v21   ;;  %v4418_v18 = vmul.u32 56, %v19528_v44  ;;  %v19529_v63 = vcvt.f32.s32 %v15255_v40  ;;  %v10652_v15 = vcvt.f32.s32 %v15403_v24  ;;  %v4214_v59 = vsel %vm15405_vm14, %v10684_v29, 55 }
 0x588   :  { %v4461_v31 = vadd.s32 %v4434_v26, %v4413_v54  ;;  %v4478_v12 = vsel %vm15378_vm11, %v4462_v34, 4294967295  ;;  %v19530_v54 = vcvt.f32.s32 %v15279_v37  ;;  %v4387_v29 = vmul.u32 %v15245_v57, %v15365_v56 }
 0x589   :  { %v4440_v55 = vpop.permute.xlu1 %4439  ;;  %v4417_v28 = vmul.u32 56, %v19529_v63  ;;  %v4420_v35 = vmul.u32 56, %v19535_v4  ;;  %v19536_v46 = vcvt.f32.s32 %v15277_v16  ;;  %v4328_v34 = vsub.s32 %v4216_v22, %v10654_v25 }
 0x58a   :  { %v4477_v17 = vsel %vm15382_vm10, %v4461_v31, 4294967295  ;;  %v4464_v47 = vadd.s32 %v4440_v55, %v4416_v14  ;;  %v4326_v7 = vsub.s32 %v4212_v6, %v19530_v54  ;;  %v4327_v31 = vsub.s32 %v4214_v59, %v10652_v15 }
 0x58b   :  { %v4438_v58 = vpop.permute.xlu0 %4437  ;;  %4520 = vperm.xlu1 %10831, %v4477_v17   ;;  %4523 = vperm.xlu0 %10830, %v4478_v12   ;;  %v4419_v26 = vmul.u32 56, %v19536_v46  ;;  %vm15465_vm8 = vcmp.gt.s32.totalorder %v4387_v29, 0  ;;  %v4389_v16 = vmul.u32 %v15275_v11, %v4325_v49  ;;  %v19541_v43 = vmov %v19530_v54 }
 0x58c   :  { %v4463_v39 = vadd.s32 %v4438_v58, %v4415_v30  ;;  %v4480_v40 = vsel %vm15413_vm9, %v4464_v47, 4294967295  ;;  %v4390_v9 = vmul.u32 %v15273_v19, %v4326_v7  ;;  %v4422_v10 = vmul.u32 56, %v19541_v43 }
 0x58d   :  { %v4444_v2 = vpop.permute.xlu1 %4443  ;;  %v4421_v36 = vmul.u32 56, %v10648_v3  ;;  %vm15481_vm3 = vcmp.gt.s32.totalorder %v4389_v16, 0  ;;  %v4392_v17 = vmul.u32 %v15304_v42, %v4328_v34 }
 0x58e   :  { %v4479_v45 = vsel %vm15417_vm1, %v4463_v39, 4294967295  ;;  %v4466_v60 = vadd.s32 %v4444_v2, %v4418_v18  ;;  %vm15477_vm0 = vcmp.gt.s32.totalorder %v4390_v9, 0  ;;  %v4391_v37 = vmul.u32 %v15306_v5, %v4327_v31 }
 0x58f   :  { %v4442_v21 = vpop.permute.xlu0 %4441  ;;  %4526 = vperm.xlu1 %10831, %v4479_v45   ;;  %4529 = vperm.xlu0 %10830, %v4480_v40   ;;  %v4423_v53 = vmul.u32 56, %v10652_v15  ;;  %vm4408_vm4 = vcmp.gt.s32.totalorder %v4392_v17, 0 }
 0x590   :  { %v4465_v61 = vadd.s32 %v4442_v21, %v4417_v28  ;;  %v4482_v57 = vsel %vm15441_vm13, %v4466_v60, 4294967295  ;;  %vm4407_vm5 = vcmp.gt.s32.totalorder %v4391_v37, 0 }
 0x591   :  { %v4448_v50 = vpop.permute.xlu1 %4447 }
 0x592   :  { %v4481_v27 = vsel %vm15445_vm2, %v4465_v61, 4294967295  ;;  %v4468_v48 = vadd.s32 %v4448_v50, %v4420_v35 }
 0x593   :  { %v4446_v14 = vpop.permute.xlu0 %4445  ;;  %4532 = vperm.xlu1 %10831, %v4481_v27   ;;  %4535 = vperm.xlu0 %10830, %v4482_v57  }
 0x594   :  { %v4467_v30 = vadd.s32 %v4446_v14, %v4419_v26  ;;  %v4484_v0 = vsel %vm15461_vm7, %v4468_v48, 4294967295 }
 0x595   :  { %v4452_v12 = vpop.permute.xlu1 %4451 }
 0x596   :  { %v4483_v24 = vsel %vm15465_vm8, %v4467_v30, 4294967295  ;;  %v4470_v38 = vadd.s32 %v4452_v12, %v4422_v10 }
 0x597   :  { %v4450_v3 = vpop.permute.xlu0 %4449  ;;  %4538 = vperm.xlu1 %10831, %v4483_v24   ;;  %4541 = vperm.xlu0 %10830, %v4484_v0  }
 0x598   :  { %v4469_v52 = vadd.s32 %v4450_v3, %v4421_v36  ;;  %v4486_v58 = vsel %vm15477_vm0, %v4470_v38, 4294967295 }
 0x599   :  { %v4456_v47 = vpop.permute.xlu1 %4455 }
 0x59a   :  { %v4485_v55 = vsel %vm15481_vm3, %v4469_v52, 4294967295  ;;  %v4472_v5 = vadd.s32 %v4456_v47, %v4424_v23 }
 0x59b   :  { %v4454_v42 = vpop.permute.xlu0 %4453  ;;  %4544 = vperm.xlu1 %10831, %v4485_v55   ;;  %4547 = vperm.xlu0 %10830, %v4486_v58  }
 0x59c   :  { %v4471_v39 = vadd.s32 %v4454_v42, %v4423_v53  ;;  %v4488_v18 = vsel %vm4408_vm4, %v4472_v5, 4294967295 }
 0x59e   :  { %v4487_v44 = vsel %vm4407_vm5, %v4471_v39, 4294967295 }
 0x59f   :  { %4550 = vperm.xlu1 %10831, %v4487_v44   ;;  %4553 = vperm.xlu0 %10830, %v4488_v18  }
 0x5c5   :  { %v8389_v63 = vpop.f32.mrb[32].mxu1  ;;  %v8469_v28 = vpop.f32.mrb[64].mxu0 }
 0x5c6   :  { %v8390_v54 = vpop.f32.mrb[33].mxu1  ;;  %v8470_v7 = vpop.f32.mrb[65].mxu0 }
 0x5c7   :  { %v8391_v49 = vadd.f32 %v8390_v54, %v8389_v63  ;;  %v8471_v25 = vadd.f32 %v8470_v7, %v8469_v28 }
 0x5c9   :  { %v15491_v22 = vadd.f32 %v8471_v25, %v8391_v49  ;;  %v8392_v15 = vpop.f32.mrb[34].mxu1  ;;  %v8472_v59 = vpop.f32.mrb[66].mxu0 }
 0x5ca   :  { %v8393_v45 = vpop.f32.mrb[35].mxu1  ;;  %v8473_v40 = vpop.f32.mrb[67].mxu0 }
 0x5cb   :  { %v8394_v41 = vadd.f32 %v8393_v45, %v8392_v15  ;;  %v8474_v6 = vadd.f32 %v8473_v40, %v8472_v59 }
 0x5cd   :  { %v15493_v8 = vadd.f32 %v8474_v6, %v8394_v41  ;;  %v8395_v29 = vpop.f32.mrb[36].mxu1  ;;  %v8475_v2 = vpop.f32.mrb[68].mxu0 }
 0x5ce   :  { %v8396_v21 = vpop.f32.mrb[37].mxu1  ;;  %v8476_v60 = vpop.f32.mrb[69].mxu0 }
 0x5cf   :  { %v8397_v61 = vadd.f32 %v8396_v21, %v8395_v29  ;;  %v8477_v4 = vadd.f32 %v8476_v60, %v8475_v2 }
 0x5d1   :  { %v15495_v35 = vadd.f32 %v8477_v4, %v8397_v61 }
 0x5d2   :  { %v8398_v46 = vpop.f32.mrb[38].mxu1  ;;  %v8478_v26 = vpop.f32.mrb[70].mxu0 }
 0x5d3   :  { %v8399_v34 = vpop.f32.mrb[39].mxu1  ;;  %v8479_v31 = vpop.f32.mrb[71].mxu0 }
 0x5d4   :  { %v8400_v27 = vadd.f32 %v8399_v34, %v8398_v46  ;;  %v8480_v57 = vadd.f32 %v8479_v31, %v8478_v26 }
 0x5d6   :  { %v15497_v13 = vadd.f32 %v8480_v57, %v8400_v27  ;;  %v8401_v56 = vpop.f32.mrb[40].mxu1 }
 0x5d7   :  { %v8481_v9 = vpop.f32.mrb[72].mxu0  ;;  %v8402_v16 = vpop.f32.mrb[41].mxu1 }
 0x5d8   :  { %v8482_v50 = vpop.f32.mrb[73].mxu0  ;;  %v8403_v14 = vadd.f32 %v8402_v16, %v8401_v56 }
 0x5d9   :  { %v8483_v48 = vadd.f32 %v8482_v50, %v8481_v9 }
 0x5da   :  { %v8404_v43 = vpop.f32.mrb[42].mxu1 }
 0x5db   :  { %v15499_v30 = vadd.f32 %v8483_v48, %v8403_v14  ;;  %v8484_v10 = vpop.f32.mrb[74].mxu0  ;;  %v8405_v36 = vpop.f32.mrb[43].mxu1 }
 0x5dc   :  { %v8485_v24 = vpop.f32.mrb[75].mxu0  ;;  %v8406_v0 = vadd.f32 %v8405_v36, %v8404_v43 }
 0x5dd   :  { %v8486_v19 = vadd.f32 %v8485_v24, %v8484_v10 }
 0x5de   :  { %v8407_v17 = vpop.f32.mrb[44].mxu1 }
 0x5df   :  { %v15501_v11 = vadd.f32 %v8486_v19, %v8406_v0  ;;  %v8487_v37 = vpop.f32.mrb[76].mxu0  ;;  %v8408_v12 = vpop.f32.mrb[45].mxu1 }
 0x5e0   :  { %v8488_v3 = vpop.f32.mrb[77].mxu0  ;;  %v8409_v38 = vadd.f32 %v8408_v12, %v8407_v17 }
 0x5e1   :  { %v8489_v52 = vadd.f32 %v8488_v3, %v8487_v37 }
 0x5e2   :  { %v8410_v53 = vpop.f32.mrb[46].mxu1 }
 0x5e3   :  { %v15503_v23 = vadd.f32 %v8489_v52, %v8409_v38  ;;  %v8490_v55 = vpop.f32.mrb[78].mxu0  ;;  %v8411_v58 = vpop.f32.mrb[47].mxu1 }
 0x5e4   :  { %v8491_v47 = vpop.f32.mrb[79].mxu0  ;;  %v8412_v42 = vadd.f32 %v8411_v58, %v8410_v53  ;;  %v15520_v58 = vadd.s32 896, %v12529_v20 }
 0x5e5   :  { %v8492_v5 = vadd.f32 %v8491_v47, %v8490_v55  ;;  %v15523_v47 = vadd.s32 1024, %v12529_v20 }
 0x5e6   :  { %v8413_v44 = vpop.f32.mrb[48].mxu1 }
 0x5e7   :  { %v15505_v39 = vadd.f32 %v8492_v5, %v8412_v42  ;;  %v8493_v18 = vpop.f32.mrb[80].mxu0  ;;  %v8414_v63 = vpop.f32.mrb[49].mxu1  ;;  %v15526_v42 = vadd.s32 1152, %v12529_v20 }
 0x5e8   :  { %v8494_v28 = vpop.f32.mrb[81].mxu0  ;;  %v8415_v54 = vadd.f32 %v8414_v63, %v8413_v44  ;;  %v15532_v63 = vadd.s32 1408, %v12529_v20 }
 0x5e9   :  { %v8495_v7 = vadd.f32 %v8494_v28, %v8493_v18  ;;  %v15529_v18 = vadd.s32 1280, %v12529_v20  ;;  %v15535_v28 = vadd.s32 1536, %v12529_v20 }
 0x5ea   :  { %v8416_v25 = vpop.f32.mrb[50].mxu1 }
 0x5eb   :  { %v15507_v49 = vadd.f32 %v8495_v7, %v8415_v54  ;;  %v8496_v15 = vpop.f32.mrb[82].mxu0  ;;  %v8417_v59 = vpop.f32.mrb[51].mxu1  ;;  %v15538_v54 = vadd.s32 1664, %v12529_v20  ;;  %v15541_v7 = vadd.s32 1792, %v12529_v20 }
 0x5ec   :  { %v8497_v45 = vpop.f32.mrb[83].mxu0  ;;  %v8418_v40 = vadd.f32 %v8417_v59, %v8416_v25  ;;  %v15544_v25 = vadd.s32 1920, %v12529_v20 }
 0x5ed   :  { %v8498_v41 = vadd.f32 %v8497_v45, %v8496_v15 }
 0x5ee   :  { %v8419_v29 = vpop.f32.mrb[52].mxu1 }
 0x5ef   :  { %v15509_v6 = vadd.f32 %v8498_v41, %v8418_v40  ;;  %v8499_v2 = vpop.f32.mrb[84].mxu0  ;;  %v8420_v21 = vpop.f32.mrb[53].mxu1  ;;  %v15549_v40 = vadd.s32 2048, %v12529_v20  ;;  %v15552_v41 = vadd.s32 2176, %v12529_v20 }
 0x5f0   :  { %v8500_v60 = vpop.f32.mrb[85].mxu0  ;;  %v8421_v61 = vadd.f32 %v8420_v21, %v8419_v29  ;;  %v15555_v29 = vadd.s32 2304, %v12529_v20 }
 0x5f1   :  { %v8501_v4 = vadd.f32 %v8500_v60, %v8499_v2  ;;  %v15558_v60 = vadd.s32 2432, %v12529_v20 }
 0x5f2   :  { %v8422_v26 = vpop.f32.mrb[54].mxu1 }
 0x5f3   :  { %v15511_v46 = vadd.f32 %v8501_v4, %v8421_v61  ;;  %v8502_v34 = vpop.f32.mrb[86].mxu0  ;;  %v8423_v31 = vpop.f32.mrb[55].mxu1  ;;  %v15561_v61 = vadd.s32 2560, %v12529_v20  ;;  %v15564_v4 = vadd.s32 2688, %v12529_v20 }
 0x5f4   :  { %v8503_v27 = vpop.f32.mrb[87].mxu0  ;;  %v8424_v57 = vadd.f32 %v8423_v31, %v8422_v26  ;;  %v15567_v26 = vadd.s32 2816, %v12529_v20 }
 0x5f5   :  { %v8504_v56 = vadd.f32 %v8503_v27, %v8502_v34  ;;  %v15570_v27 = vadd.s32 2944, %v12529_v20 }
 0x5f6   :  { %v8425_v16 = vpop.f32.mrb[56].mxu1 }
 0x5f7   :  { %v15513_v9 = vadd.f32 %v8504_v56, %v8424_v57  ;;  %v8505_v50 = vpop.f32.mrb[88].mxu0  ;;  %v8426_v14 = vpop.f32.mrb[57].mxu1  ;;  %v15573_v57 = vadd.s32 3072, %v12529_v20 }
 0x5f8   :  { %v8506_v48 = vpop.f32.mrb[89].mxu0  ;;  %v8427_v43 = vadd.f32 %v8426_v14, %v8425_v16  ;;  %v19550_v14 = vld [vmem:[#allocation149_spill] sm:$0xff] }
 0x5f9   :  { %v8507_v10 = vadd.f32 %v8506_v48, %v8505_v50 }
 0x5fa   :  { %v8428_v24 = vpop.f32.mrb[58].mxu1 }
 0x5fb   :  { %v15515_v36 = vadd.f32 %v8507_v10, %v8427_v43  ;;  %v8508_v0 = vpop.f32.mrb[90].mxu0  ;;  %v8429_v19 = vpop.f32.mrb[59].mxu1 }
 0x5fc   :  { %v8509_v17 = vpop.f32.mrb[91].mxu0  ;;  %v8430_v37 = vadd.f32 %v8429_v19, %v8428_v24 }
 0x5fd   :  { %19546 = vst [vmem:[#allocation34_spill] sm:$0xff] %v15515_v36  ;;  %v8510_v12 = vadd.f32 %v8509_v17, %v8508_v0 }
 0x5fe   :  { %v8431_v38 = vpop.f32.mrb[60].mxu1 }
 0x5ff   :  { %v15517_v3 = vadd.f32 %v8510_v12, %v8430_v37  ;;  %v8511_v52 = vpop.f32.mrb[92].mxu0  ;;  %v8432_v53 = vpop.f32.mrb[61].mxu1 }
 0x600   :  { %v8512_v55 = vpop.f32.mrb[93].mxu0  ;;  %v8433_v5 = vadd.f32 %v8432_v53, %v8431_v38  ;;  %v15575_v56 = vpop.permute.xlu1 %4511 }
 0x601   :  { %v8513_v44 = vadd.f32 %v8512_v55, %v8511_v52  ;;  %19548 = vst [vmem:[#allocation66_spill] sm:$0xff] %v15575_v56  ;;  %vm4580_vm6 = vcmp.eq.s32.totalorder %v12529_v20, %v15575_v56  ;;  %vm4581_vm12 = vcmp.eq.s32.totalorder %v19332_v33, %v15575_v56  ;;  %vm4582_vm11 = vcmp.eq.s32.totalorder %v14041_v51, %v15575_v56 }
 0x602   :  { %v8434_v59 = vpop.f32.mrb[62].mxu1  ;;  %vm4583_vm10 = vcmp.eq.s32.totalorder %v19334_v1, %v15575_v56  ;;  %vm4604_vm0 = vcmp.eq.s32.totalorder %v15573_v57, %v15575_v56  ;;  %v19552_v52 = vmov 0.0  }
 0x603   :  { %v15546_v15 = vadd.f32 %v8513_v44, %v8433_v5  ;;  %v8514_v45 = vpop.f32.mrb[94].mxu0  ;;  %v8435_v2 = vpop.f32.mrb[63].mxu1  ;;  %v15637_v53 = vsel %vm4604_vm0, 1.0, %v19552_v52 }
 0x604   :  { %v8515_v21 = vpop.f32.mrb[95].mxu0  ;;  %v8436_v34 = vadd.f32 %v8435_v2, %v8434_v59  ;;  %19553 = vst [vmem:[#allocation19_spill] sm:$0xff] %v15637_v53 }
 0x605   :  { %19547 = vst [vmem:[#allocation35_spill] sm:$0xff] %v15546_v15  ;;  %v8516_v31 = vadd.f32 %v8515_v21, %v8514_v45 }
 0x606   :  { %v8549_v50 = vpop.f32.mrb[64].mxu1  ;;  %v15615_v0 = vpop.permute.xlu1 %4514 }
 0x607   :  { %v15585_v16 = vadd.f32 %v8516_v31, %v8436_v34  ;;  %v9605_v48 = vpop.f32.mrb[96].mxu0  ;;  %v8550_v43 = vpop.f32.mrb[65].mxu1  ;;  %19551 = vst [vmem:[#allocation18_spill] sm:$0xff] %v15615_v0  ;;  %vm4606_vm7 = vcmp.eq.s32.totalorder %v19332_v33, %v15615_v0  ;;  %vm4629_vm8 = vcmp.eq.s32.totalorder %v15573_v57, %v15615_v0 }
 0x608   :  { %v3994_v10 = vpop.f32.mrb[97].mxu0  ;;  %v8551_v24 = vadd.f32 %v8550_v43, %v8549_v50  ;;  %v15715_v43 = vsel %vm4629_vm8, 1.0, %v19552_v52 }
 0x609   :  { %19549 = vst [vmem:[#allocation67_spill] sm:$0xff] %v15585_v16  ;;  %19555 = vst [vmem:[#allocation51_spill] sm:$0xff] %v15715_v43 }
 0x60a   :  { %v8552_v19 = vpop.f32.mrb[66].mxu1  ;;  %v3850_v12 = vadd.f32 %v8551_v24, %v15491_v22  ;;  %v15649_v22 = vpop.permute.xlu0 %4508 }
 0x60b   :  { %v15625_v17 = vpop.f32.mrb[98].mxu0  ;;  %v8553_v37 = vpop.f32.mrb[67].mxu1  ;;  %19554 = vst [vmem:[#allocation50_spill] sm:$0xff] %v15649_v22  ;;  %vm4555_vm2 = vcmp.eq.s32.totalorder %v12529_v20, %v15649_v22  ;;  %vm4556_vm3 = vcmp.eq.s32.totalorder %v19332_v33, %v15649_v22  ;;  %vm4557_vm0 = vcmp.eq.s32.totalorder %v14041_v51, %v15649_v22  ;;  %vm4558_vm1 = vcmp.eq.s32.totalorder %v19334_v1, %v15649_v22 }
 0x60c   :  { %v15634_v38 = vpop.f32.mrb[99].mxu0  ;;  %v8554_v55 = vadd.f32 %v8553_v37, %v8552_v19  ;;  %v3995_v5 = vadd.f32 %v3994_v10, %v3850_v12  ;;  %vm4579_vm14 = vcmp.eq.s32.totalorder %v15573_v57, %v15649_v22  ;;  %v15812_v43 = vpop.permute.xlu1 %4520 }
 0x60d   :  { %19561 = vst [vmem:[#allocation21_spill] sm:$0xff] %v15812_v43  ;;  %vm4679_vm5 = vcmp.eq.s32.totalorder %v15573_v57, %v15812_v43 }
 0x60e   :  { %v3855_v44 = vadd.f32 %v8554_v55, %v15493_v8  ;;  %v8555_v59 = vpop.f32.mrb[68].mxu1  ;;  %4073 = vst [vmem:[%s18557_s7] sm:$0xff] %v3995_v5  ;;  %v15731_v10 = vpop.permute.xlu0 %4517  ;;  %v15774_v55 = vsel %vm4579_vm14, 1.0, %v19552_v52 }
 0x60f   :  { %v15658_v45 = vpop.f32.mrb[100].mxu0  ;;  %v8556_v8 = vpop.f32.mrb[69].mxu1  ;;  %19556 = vst [vmem:[#allocation36_spill] sm:$0xff] %v15731_v10  ;;  %19558 = vst [vmem:[#allocation68_spill] sm:$0xff] %v15774_v55  ;;  %vm4654_vm13 = vcmp.eq.s32.totalorder %v15573_v57, %v15731_v10 }
 0x610   :  { %v15671_v2 = vpop.f32.mrb[101].mxu0  ;;  %v4000_v21 = vadd.f32 %v9605_v48, %v3855_v44  ;;  %v8557_v5 = vadd.f32 %v8556_v8, %v8555_v59  ;;  %v15847_v16 = vsel %vm4654_vm13, 1.0, %v19552_v52 }
 0x611   :  { %19564 = vst [vmem:[#allocation38_spill] sm:$0xff] %v15847_v16 }
 0x612   :  { %4074 = vst [vmem:[%s18557_s7 + $0x8] sm:$0xff] %v4000_v21  ;;  %v15698_v34 = vpop.f32.mrb[70].mxu1 }
 0x613   :  { %v15700_v31 = vpop.f32.mrb[102].mxu0  ;;  %v15710_v50 = vpop.f32.mrb[71].mxu1 }
 0x614   :  { %v15712_v48 = vpop.f32.mrb[103].mxu0  ;;  %v8560_v22 = vadd.f32 %v15710_v50, %v15698_v34 }
 0x616   :  { %v15741_v24 = vpop.f32.mrb[72].mxu1 }
 0x617   :  { %v15743_v19 = vpop.f32.mrb[104].mxu0  ;;  %v15753_v37 = vpop.f32.mrb[73].mxu1 }
 0x618   :  { %19557 = vst [vmem:[#allocation37_spill] sm:$0xff] %v15743_v19  ;;  %v15755_v12 = vpop.f32.mrb[105].mxu0  ;;  %v8563_v10 = vadd.f32 %v15753_v37, %v15741_v24 }
 0x61a   :  { %v15780_v44 = vpop.f32.mrb[74].mxu1  ;;  %v3870_v19 = vadd.f32 %v8563_v10, %v15499_v30 }
 0x61b   :  { %v15782_v21 = vpop.f32.mrb[106].mxu0  ;;  %v15792_v59 = vpop.f32.mrb[75].mxu1 }
 0x61c   :  { %19559 = vst [vmem:[#allocation69_spill] sm:$0xff] %v15782_v21  ;;  %v15794_v8 = vpop.f32.mrb[107].mxu0 }
 0x61d   :  { %19560 = vst [vmem:[#allocation20_spill] sm:$0xff] %v15794_v8  ;;  %v8566_v8 = vadd.f32 %v15792_v59, %v15780_v44  ;;  %v4015_v44 = vadd.f32 %v15671_v2, %v3870_v19 }
 0x61e   :  { %v15822_v53 = vpop.f32.mrb[76].mxu1 }
 0x61f   :  { %v15824_v55 = vpop.f32.mrb[108].mxu0  ;;  %v15834_v0 = vpop.f32.mrb[77].mxu1  ;;  %4077 = vst [vmem:[%s18557_s7 + $0x20] sm:$0xff] %v4015_v44 }
 0x620   :  { %19562 = vst [vmem:[#allocation52_spill] sm:$0xff] %v15824_v55  ;;  %v15836_v56 = vpop.f32.mrb[109].mxu0  ;;  %v3860_v55 = vadd.f32 %v8557_v5, %v15495_v35 }
 0x621   :  { %19563 = vst [vmem:[#allocation53_spill] sm:$0xff] %v15836_v56  ;;  %v3865_v56 = vadd.f32 %v8560_v22, %v15497_v13 }
 0x622   :  { %v15861_v34 = vpop.f32.mrb[78].mxu1  ;;  %v4005_v50 = vadd.f32 %v15634_v38, %v3860_v55  ;;  %v15928_v55 = vsel %vm4679_vm5, 1.0, %v19552_v52 }
 0x623   :  { %v15863_v35 = vpop.f32.mrb[110].mxu0  ;;  %v15872_v13 = vpop.f32.mrb[79].mxu1  ;;  %v4010_v5 = vadd.f32 %v15625_v17, %v3865_v56  ;;  %19568 = vst [vmem:[#allocation22_spill] sm:$0xff] %v15928_v55 }
 0x624   :  { %19565 = vst [vmem:[#allocation39_spill] sm:$0xff] %v15863_v35  ;;  %v15874_v22 = vpop.f32.mrb[111].mxu0  ;;  %4075 = vst [vmem:[%s18557_s7 + $0x10] sm:$0xff] %v4005_v50  ;;  %v15894_v56 = vpop.permute.xlu0 %4523 }
 0x625   :  { %19566 = vst [vmem:[#allocation70_spill] sm:$0xff] %v15874_v22  ;;  %19567 = vst [vmem:[#allocation71_spill] sm:$0xff] %v15894_v56  ;;  %v15964_v55 = vpop.permute.xlu1 %4526  ;;  %vm4704_vm14 = vcmp.eq.s32.totalorder %v15573_v57, %v15894_v56 }
 0x626   :  { %4076 = vst [vmem:[%s18557_s7 + $0x18] sm:$0xff] %v4010_v5  ;;  %v15907_v17 = vpop.f32.mrb[80].mxu1  ;;  %19569 = vst [vmem:[#allocation23_spill] sm:$0xff] %v15964_v55  ;;  %v15985_v43 = vsel %vm4704_vm14, 1.0, %v19552_v52  ;;  %vm4729_vm5 = vcmp.eq.s32.totalorder %v15573_v57, %v15964_v55 }
 0x627   :  { %v15917_v38 = vpop.f32.mrb[81].mxu1  ;;  %19570 = vst [vmem:[#allocation117_spill] sm:$0xff] %v15985_v43  ;;  %v16050_v56 = vsel %vm4729_vm5, 1.0, %v19552_v52 }
 0x628   :  { %v16019_v24 = vpop.permute.xlu0 %4529  ;;  %19572 = vst [vmem:[#allocation55_spill] sm:$0xff] %v16050_v56 }
 0x629   :  { %19571 = vst [vmem:[#allocation54_spill] sm:$0xff] %v16019_v24  ;;  %v16086_v55 = vpop.permute.xlu1 %4532  ;;  %vm4754_vm5 = vcmp.eq.s32.totalorder %v15573_v57, %v16019_v24  ;;  %v3875_v24 = vadd.f32 %v8566_v8, %v15501_v11 }
 0x62a   :  { %v15944_v50 = vpop.f32.mrb[82].mxu1  ;;  %v16116_v36 = vsel %vm4754_vm5, 1.0, %v19552_v52  ;;  %vm4779_vm8 = vcmp.eq.s32.totalorder %v15573_v57, %v16086_v55 }
 0x62b   :  { %v15954_v5 = vpop.f32.mrb[83].mxu1  ;;  %19573 = vst [vmem:[#allocation40_spill] sm:$0xff] %v16116_v36  ;;  %v4020_v2 = vadd.f32 %v15658_v45, %v3875_v24  ;;  %v16186_v59 = vsel %vm4779_vm8, 1.0, %v19552_v52  ;;  %v8569_v24 = vadd.f32 %v15834_v0, %v15822_v53 }
 0x62c   :  { %v16160_v45 = vpop.permute.xlu0 %4535  ;;  %19574 = vst [vmem:[#allocation41_spill] sm:$0xff] %v16186_v59 }
 0x62d   :  { %4078 = vst [vmem:[%s18557_s7 + $0x28] sm:$0xff] %v4020_v2  ;;  %v16218_v8 = vpop.permute.xlu1 %4538  ;;  %vm4804_vm9 = vcmp.eq.s32.totalorder %v15573_v57, %v16160_v45  ;;  %v3880_v59 = vadd.f32 %v8569_v24, %v15503_v23 }
 0x62e   :  { %v15982_v16 = vpop.f32.mrb[84].mxu1  ;;  %v16245_v44 = vsel %vm4804_vm9, 1.0, %v19552_v52  ;;  %vm4829_vm15 = vcmp.eq.s32.totalorder %v15573_v57, %v16218_v8 }
 0x62f   :  { %v15993_v35 = vpop.f32.mrb[85].mxu1  ;;  %19575 = vst [vmem:[#allocation72_spill] sm:$0xff] %v16245_v44  ;;  %v16304_v53 = vsel %vm4829_vm15, 1.0, %v19552_v52 }
 0x630   :  { %v16277_v0 = vpop.permute.xlu0 %4541  ;;  %19576 = vst [vmem:[#allocation73_spill] sm:$0xff] %v16304_v53  ;;  %v8572_v53 = vadd.f32 %v15872_v13, %v15861_v34  ;;  %v4025_v34 = vadd.f32 %v15712_v48, %v3880_v59  ;;  %v8575_v13 = vadd.f32 %v15917_v38, %v15907_v17  ;;  %v8578_v59 = vadd.f32 %v15954_v5, %v15944_v50 }
 0x631   :  { %v16336_v2 = vpop.permute.xlu1 %4544  ;;  %vm4854_vm4 = vcmp.eq.s32.totalorder %v15573_v57, %v16277_v0 }
 0x632   :  { %v16021_v37 = vpop.f32.mrb[86].mxu1  ;;  %v16355_v44 = vsel %vm4854_vm4, 1.0, %v19552_v52  ;;  %v3885_v36 = vadd.f32 %v8572_v53, %v15505_v39  ;;  %4079 = vst [vmem:[%s18557_s7 + $0x30] sm:$0xff] %v4025_v34  ;;  %vm4879_vm13 = vcmp.eq.s32.totalorder %v15573_v57, %v16336_v2  ;;  %v3890_v24 = vadd.f32 %v8575_v13, %v15507_v49 }
 0x633   :  { %v16031_v43 = vpop.f32.mrb[87].mxu1  ;;  %19577 = vst [vmem:[#allocation24_spill] sm:$0xff] %v16355_v44  ;;  %v8581_v53 = vadd.f32 %v15993_v35, %v15982_v16 }
 0x634   :  { %v4030_v23 = vadd.f32 %v15700_v31, %v3885_v36  ;;  %v16394_v39 = vpop.permute.xlu0 %4547  ;;  %v16424_v36 = vsel %vm4879_vm13, 1.0, %v19552_v52  ;;  %v4035_v50 = vadd.f32 %v15755_v12, %v3890_v24  ;;  %v19585_v12 = vld [vmem:[#allocation35_spill] sm:$0xff] }
 0x635   :  { %19578 = vst [vmem:[#allocation25_spill] sm:$0xff] %v16424_v36  ;;  %v16456_v31 = vpop.permute.xlu1 %4550  ;;  %vm4904_vm4 = vcmp.eq.s32.totalorder %v15573_v57, %v16394_v39  ;;  %v3900_v49 = vadd.f32 %v8581_v53, %v15511_v46 }
 0x636   :  { %v16058_v22 = vpop.f32.mrb[88].mxu1  ;;  %4080 = vst [vmem:[%s18557_s7 + $0x38] sm:$0xff] %v4030_v23  ;;  %v16475_v48 = vsel %vm4904_vm4, 1.0, %v19552_v52  ;;  %vm4929_vm15 = vcmp.eq.s32.totalorder %v15573_v57, %v16456_v31  ;;  %v8584_v23 = vadd.f32 %v16031_v43, %v16021_v37  ;;  %v19582_v43 = vld [vmem:[#allocation34_spill] sm:$0xff]  ;;  %4081 = vst [vmem:[%s18557_s7 + $0x40] sm:$0xff] %v4035_v50  ;;  %v19586_v37 = vld [vmem:[#allocation69_spill] sm:$0xff] }
 0x637   :  { %v16068_v56 = vpop.f32.mrb[89].mxu1  ;;  %19579 = vst [vmem:[#allocation56_spill] sm:$0xff] %v16475_v48  ;;  %v16534_v38 = vsel %vm4929_vm15, 1.0, %v19552_v52  ;;  %v3895_v48 = vadd.f32 %v8578_v59, %v15509_v6  ;;  %v19584_v6 = vld [vmem:[#allocation20_spill] sm:$0xff] }
 0x638   :  { %v16507_v17 = vpop.permute.xlu0 %4553  ;;  %19580 = vst [vmem:[#allocation57_spill] sm:$0xff] %v16534_v38  ;;  %v8587_v38 = vadd.f32 %v16068_v56, %v16058_v22  ;;  %v19583_v56 = vld [vmem:[#allocation37_spill] sm:$0xff]  ;;  %v4045_v46 = vadd.f32 %v19584_v6, %v3900_v49 }
 0x639   :  { %vm4948_vm8 = vcmp.eq.s32.totalorder %v15555_v29, %v16507_v17  ;;  %vm4949_vm5 = vcmp.eq.s32.totalorder %v15558_v60, %v16507_v17  ;;  %vm4950_vm4 = vcmp.eq.s32.totalorder %v15561_v61, %v16507_v17  ;;  %vm4951_vm15 = vcmp.eq.s32.totalorder %v15564_v4, %v16507_v17 }
 0x63a   :  { %v16096_v21 = vpop.f32.mrb[90].mxu1  ;;  %vm4952_vm14 = vcmp.eq.s32.totalorder %v15567_v26, %v16507_v17  ;;  %vm4953_vm13 = vcmp.eq.s32.totalorder %v15570_v27, %v16507_v17  ;;  %vm4954_vm9 = vcmp.eq.s32.totalorder %v15573_v57, %v16507_v17  ;;  %v3910_v5 = vadd.f32 %v8587_v38, %v19582_v43  ;;  %v19589_v38 = vld [vmem:[#allocation67_spill] sm:$0xff]  ;;  %4083 = vst [vmem:[%s18557_s7 + $0x50] sm:$0xff] %v4045_v46 }
 0x63b   :  { %v16106_v15 = vpop.f32.mrb[91].mxu1  ;;  %v16590_v34 = vsel %vm4954_vm9, 1.0, %v19552_v52  ;;  %v3905_v52 = vadd.f32 %v8584_v23, %v15513_v9  ;;  %v19587_v9 = vld [vmem:[#allocation52_spill] sm:$0xff] }
 0x63c   :  { %19581 = vst [vmem:[#allocation116_spill] sm:$0xff] %v16590_v34  ;;  %v8590_v57 = vadd.f32 %v16106_v15, %v16096_v21  ;;  %v4040_v15 = vadd.f32 %v19583_v56, %v3895_v48  ;;  %v19591_v48 = vld [vmem:[#allocation39_spill] sm:$0xff] }
 0x63e   :  { %v16130_v30 = vpop.f32.mrb[92].mxu1  ;;  %v3915_v35 = vadd.f32 %v8590_v57, %v15517_v3  ;;  %v19588_v3 = vld [vmem:[#allocation53_spill] sm:$0xff]  ;;  %4082 = vst [vmem:[%s18557_s7 + $0x48] sm:$0xff] %v4040_v15 }
 0x63f   :  { %v16140_v11 = vpop.f32.mrb[93].mxu1  ;;  %v4055_v13 = vadd.f32 %v19588_v3, %v3910_v5 }
 0x640   :  { %v8593_v16 = vadd.f32 %v16140_v11, %v16130_v30  ;;  %v4050_v30 = vadd.f32 %v19586_v37, %v3905_v52  ;;  %v4060_v11 = vadd.f32 %v19587_v9, %v3915_v35 }
 0x641   :  { %4085 = vst [vmem:[%s18557_s7 + $0x60] sm:$0xff] %v4055_v13 }
 0x642   :  { %v16173_v10 = vpop.f32.mrb[94].mxu1  ;;  %v3920_v21 = vadd.f32 %v8593_v16, %v19585_v12  ;;  %4084 = vst [vmem:[%s18557_s7 + $0x58] sm:$0xff] %v4050_v30  ;;  %4086 = vst [vmem:[%s18557_s7 + $0x68] sm:$0xff] %v4060_v11 }
 0x643   :  { %v16183_v19 = vpop.f32.mrb[95].mxu1 }
 0x644   :  { %v8596_v22 = vadd.f32 %v16183_v19, %v16173_v10  ;;  %v19590_v10 = vld [vmem:[#allocation70_spill] sm:$0xff] }
 0x645   :  { %v4065_v19 = vadd.f32 %v19590_v10, %v3920_v21 }
 0x646   :  { %v3925_v59 = vadd.f32 %v8596_v22, %v19589_v38 }
 0x647   :  { %4087 = vst [vmem:[%s18557_s7 + $0x70] sm:$0xff] %v4065_v19 }
 0x648   :  { %v4070_v24 = vadd.f32 %v19591_v48, %v3925_v59 }
 0x64a   :  { %4088 = vst [vmem:[%s18557_s7 + $0x78] sm:$0xff] %v4070_v24 }
 0x64b   :  { %10860 = dma.done.wait [#allocation6], 50176 }
 0x64c   :  { %10861 = vsyncadd [#allocation6], 4294917120  ;;  %v19592_v53 = vmov 1.0   ;;  %v19593_v23 = vld [vmem:[#allocation50_spill] sm:$0xff]  ;;  %v5374_v57 = vld [vmem:[#allocation2 + $0x80] sm:$0xff] }
 0x64d   :  { %7953 = vmatprep.mubr.msk.f32.mxu1 %vm4556_vm3, %v19592_v53  ;;  %7985 = vmatprep.mubr.msk.f32.mxu0 %vm4558_vm1, %v19592_v53  ;;  %v5375_v50 = vld [vmem:[#allocation2 + $0x88] sm:$0xff]  ;;  %v5406_v49 = vld [vmem:[#allocation2 + $0x180] sm:$0xff]  ;;  %v5376_v6 = vld [vmem:[#allocation2 + $0x90] sm:$0xff] }
 0x64e   :  { %v9839_v16 = vpack.c.bf16 %v5375_v50, %v5374_v57  ;;  %v5407_v52 = vld [vmem:[#allocation2 + $0x188] sm:$0xff]  ;;  %v5358_v35 = vld [vmem:[#allocation2] sm:$0xff]  ;;  %v5377_v12 = vld [vmem:[#allocation2 + $0x98] sm:$0xff] }
 0x64f   :  { %v5359_v43 = vld [vmem:[#allocation2 + $0x8] sm:$0xff]  ;;  %v9871_v5 = vpack.c.bf16 %v5407_v52, %v5406_v49  ;;  %v5390_v56 = vld [vmem:[#allocation2 + $0x100] sm:$0xff]  ;;  %v5408_v21 = vld [vmem:[#allocation2 + $0x190] sm:$0xff]  ;;  %v9843_v30 = vpack.c.bf16 %v5377_v12, %v5376_v6 }
 0x650   :  { %v9841_v22 = vpack.c.bf16 %v5359_v43, %v5358_v35  ;;  %v5391_v15 = vld [vmem:[#allocation2 + $0x108] sm:$0xff]  ;;  %9840 = vmatprep.subr.bf16.mxu1 %v9839_v16  ;;  %v5409_v37 = vld [vmem:[#allocation2 + $0x198] sm:$0xff]  ;;  %v5360_v11 = vld [vmem:[#allocation2 + $0x10] sm:$0xff] }
 0x651   :  { %v9873_v46 = vpack.c.bf16 %v5391_v15, %v5390_v56  ;;  %9872 = vmatprep.subr.bf16.mxu0 %v9871_v5  ;;  %v9875_v9 = vpack.c.bf16 %v5409_v37, %v5408_v21  ;;  %v5361_v3 = vld [vmem:[#allocation2 + $0x18] sm:$0xff]  ;;  %v5392_v13 = vld [vmem:[#allocation2 + $0x110] sm:$0xff]  ;;  %v5378_v10 = vld [vmem:[#allocation2 + $0xa0] sm:$0xff] }
 0x652   :  { %9842 = vmatpush3.bf16.msra.mxu1 %v9841_v22  ;;  %v9845_v38 = vpack.c.bf16 %v5361_v3, %v5360_v11  ;;  %v5393_v59 = vld [vmem:[#allocation2 + $0x118] sm:$0xff]  ;;  %v5379_v19 = vld [vmem:[#allocation2 + $0xa8] sm:$0xff]  ;;  %v5410_v57 = vld [vmem:[#allocation2 + $0x1a0] sm:$0xff] }
 0x653   :  { %9874 = vmatpush3.bf16.msra.mxu0 %v9873_v46  ;;  %9844 = vmatprep.subr.bf16.mxu1 %v9843_v30  ;;  %v9877_v48 = vpack.c.bf16 %v5393_v59, %v5392_v13  ;;  %v9847_v24 = vpack.c.bf16 %v5379_v19, %v5378_v10  ;;  %v5411_v50 = vld [vmem:[#allocation2 + $0x1a8] sm:$0xff]  ;;  %v5362_v49 = vld [vmem:[#allocation2 + $0x20] sm:$0xff]  ;;  %v5380_v22 = vld [vmem:[#allocation2 + $0xb0] sm:$0xff] }
 0x654   :  { %9876 = vmatprep.subr.bf16.mxu0 %v9875_v9  ;;  %v9879_v16 = vpack.c.bf16 %v5411_v50, %v5410_v57  ;;  %v5363_v52 = vld [vmem:[#allocation2 + $0x28] sm:$0xff]  ;;  %v5394_v35 = vld [vmem:[#allocation2 + $0x120] sm:$0xff]  ;;  %v5381_v56 = vld [vmem:[#allocation2 + $0xb8] sm:$0xff] }
 0x655   :  { %v5395_v43 = vld [vmem:[#allocation2 + $0x128] sm:$0xff]  ;;  %v9849_v5 = vpack.c.bf16 %v5363_v52, %v5362_v49  ;;  %v5412_v15 = vld [vmem:[#allocation2 + $0x1b0] sm:$0xff]  ;;  %v9851_v46 = vpack.c.bf16 %v5381_v56, %v5380_v22  ;;  %v5413_v12 = vld [vmem:[#allocation2 + $0x1b8] sm:$0xff] }
 0x656   :  { %9846 = vmatpush3.bf16.msra.mxu1 %v9845_v38  ;;  %v9881_v6 = vpack.c.bf16 %v5395_v43, %v5394_v35  ;;  %v5364_v21 = vld [vmem:[#allocation2 + $0x30] sm:$0xff]  ;;  %v5365_v37 = vld [vmem:[#allocation2 + $0x38] sm:$0xff]  ;;  %v9883_v30 = vpack.c.bf16 %v5413_v12, %v5412_v15  ;;  %v5382_v3 = vld [vmem:[#allocation2 + $0xc0] sm:$0xff] }
 0x657   :  { %9878 = vmatpush3.bf16.msra.mxu0 %v9877_v48  ;;  %9848 = vmatprep.subr.bf16.mxu1 %v9847_v24  ;;  %v5396_v9 = vld [vmem:[#allocation2 + $0x130] sm:$0xff]  ;;  %v5397_v11 = vld [vmem:[#allocation2 + $0x138] sm:$0xff]  ;;  %v5383_v13 = vld [vmem:[#allocation2 + $0xc8] sm:$0xff]  ;;  %v9853_v38 = vpack.c.bf16 %v5365_v37, %v5364_v21 }
 0x658   :  { %9880 = vmatprep.subr.bf16.mxu0 %v9879_v16  ;;  %v5414_v59 = vld [vmem:[#allocation2 + $0x1c0] sm:$0xff]  ;;  %v5415_v10 = vld [vmem:[#allocation2 + $0x1c8] sm:$0xff]  ;;  %v9885_v19 = vpack.c.bf16 %v5397_v11, %v5396_v9  ;;  %v9855_v48 = vpack.c.bf16 %v5383_v13, %v5382_v3  ;;  %v5384_v16 = vld [vmem:[#allocation2 + $0xd0] sm:$0xff] }
 0x659   :  { %v5366_v24 = vld [vmem:[#allocation2 + $0x40] sm:$0xff]  ;;  %v5367_v57 = vld [vmem:[#allocation2 + $0x48] sm:$0xff]  ;;  %v9887_v49 = vpack.c.bf16 %v5415_v10, %v5414_v59  ;;  %v5385_v35 = vld [vmem:[#allocation2 + $0xd8] sm:$0xff] }
 0x65a   :  { %9850 = vmatpush3.bf16.msra.mxu1 %v9849_v5  ;;  %v5398_v50 = vld [vmem:[#allocation2 + $0x140] sm:$0xff]  ;;  %v5399_v52 = vld [vmem:[#allocation2 + $0x148] sm:$0xff]  ;;  %v5416_v43 = vld [vmem:[#allocation2 + $0x1d0] sm:$0xff]  ;;  %v9857_v56 = vpack.c.bf16 %v5367_v57, %v5366_v24  ;;  %v9859_v15 = vpack.c.bf16 %v5385_v35, %v5384_v16 }
 0x65b   :  { %9882 = vmatpush3.bf16.msra.mxu0 %v9881_v6  ;;  %9852 = vmatprep.subr.bf16.mxu1 %v9851_v46  ;;  %v5417_v22 = vld [vmem:[#allocation2 + $0x1d8] sm:$0xff]  ;;  %v9889_v5 = vpack.c.bf16 %v5399_v52, %v5398_v50  ;;  %v5368_v6 = vld [vmem:[#allocation2 + $0x50] sm:$0xff]  ;;  %v5386_v9 = vld [vmem:[#allocation2 + $0xe0] sm:$0xff] }
 0x65c   :  { %9884 = vmatprep.subr.bf16.mxu0 %v9883_v30  ;;  %v5369_v46 = vld [vmem:[#allocation2 + $0x58] sm:$0xff]  ;;  %v5400_v12 = vld [vmem:[#allocation2 + $0x150] sm:$0xff]  ;;  %v9891_v21 = vpack.c.bf16 %v5417_v22, %v5416_v43  ;;  %v5387_v30 = vld [vmem:[#allocation2 + $0xe8] sm:$0xff] }
 0x65d   :  { %v5401_v37 = vld [vmem:[#allocation2 + $0x158] sm:$0xff]  ;;  %v5418_v11 = vld [vmem:[#allocation2 + $0x1e0] sm:$0xff]  ;;  %v5419_v3 = vld [vmem:[#allocation2 + $0x1e8] sm:$0xff]  ;;  %v9861_v13 = vpack.c.bf16 %v5369_v46, %v5368_v6  ;;  %v9863_v10 = vpack.c.bf16 %v5387_v30, %v5386_v9 }
 0x65e   :  { %9854 = vmatpush3.bf16.msra.mxu1 %v9853_v38  ;;  %v9893_v59 = vpack.c.bf16 %v5401_v37, %v5400_v12  ;;  %v5370_v38 = vld [vmem:[#allocation2 + $0x60] sm:$0xff]  ;;  %v9895_v24 = vpack.c.bf16 %v5419_v3, %v5418_v11  ;;  %v5403_v57 = vld [vmem:[#allocation2 + $0x168] sm:$0xff]  ;;  %v5388_v50 = vld [vmem:[#allocation2 + $0xf0] sm:$0xff] }
 0x65f   :  { %9886 = vmatpush3.bf16.msra.mxu0 %v9885_v19  ;;  %9856 = vmatprep.subr.bf16.mxu1 %v9855_v48  ;;  %v5371_v19 = vld [vmem:[#allocation2 + $0x68] sm:$0xff]  ;;  %v5402_v48 = vld [vmem:[#allocation2 + $0x160] sm:$0xff]  ;;  %v5420_v52 = vld [vmem:[#allocation2 + $0x1f0] sm:$0xff] }
 0x660   :  { %9888 = vmatprep.subr.bf16.mxu0 %v9887_v49  ;;  %v5389_v49 = vld [vmem:[#allocation2 + $0xf8] sm:$0xff]  ;;  %v9865_v35 = vpack.c.bf16 %v5371_v19, %v5370_v38  ;;  %v9897_v43 = vpack.c.bf16 %v5403_v57, %v5402_v48  ;;  %v5438_v12 = vld [vmem:[#allocation2 + $0x280] sm:$0xff]  ;;  %v5471_v9 = vld [vmem:[#allocation2 + $0x388] sm:$0xff] }
 0x661   :  { %v5421_v16 = vld [vmem:[#allocation2 + $0x1f8] sm:$0xff]  ;;  %v9867_v22 = vpack.c.bf16 %v5389_v49, %v5388_v50  ;;  %v5470_v37 = vld [vmem:[#allocation2 + $0x380] sm:$0xff]  ;;  %v5472_v50 = vld [vmem:[#allocation2 + $0x390] sm:$0xff] }
 0x662   :  { %9858 = vmatpush3.bf16.msra.mxu1 %v9857_v56  ;;  %v5372_v56 = vld [vmem:[#allocation2 + $0x70] sm:$0xff]  ;;  %v9899_v6 = vpack.c.bf16 %v5421_v16, %v5420_v52  ;;  %v5405_v46 = vld [vmem:[#allocation2 + $0x178] sm:$0xff]  ;;  %v9935_v38 = vpack.c.bf16 %v5471_v9, %v5470_v37  ;;  %v5454_v48 = vld [vmem:[#allocation2 + $0x300] sm:$0xff] }
 0x663   :  { %9890 = vmatpush3.bf16.msra.mxu0 %v9889_v5  ;;  %9860 = vmatprep.subr.bf16.mxu1 %v9859_v15  ;;  %v5373_v5 = vld [vmem:[#allocation2 + $0x78] sm:$0xff]  ;;  %v5404_v15 = vld [vmem:[#allocation2 + $0x170] sm:$0xff]  ;;  %v5503_v34 = vld [vmem:[#allocation2 + $0x488] sm:$0xff] }
 0x664   :  { %9892 = vmatprep.subr.bf16.mxu0 %v9891_v21  ;;  %v5439_v21 = vld [vmem:[#allocation2 + $0x288] sm:$0xff]  ;;  %v9869_v30 = vpack.c.bf16 %v5373_v5, %v5372_v56  ;;  %v9901_v11 = vpack.c.bf16 %v5405_v46, %v5404_v15  ;;  %v5441_v19 = vld [vmem:[#allocation2 + $0x298] sm:$0xff]  ;;  %v5424_v16 = vld [vmem:[#allocation2 + $0x210] sm:$0xff] }
 0x665   :  { %v9903_v3 = vpack.c.bf16 %v5439_v21, %v5438_v12  ;;  %v5473_v49 = vld [vmem:[#allocation2 + $0x398] sm:$0xff]  ;;  %v5443_v56 = vld [vmem:[#allocation2 + $0x2a8] sm:$0xff]  ;;  %v5456_v15 = vld [vmem:[#allocation2 + $0x310] sm:$0xff] }
 0x666   :  { %9862 = vmatpush3.bf16.msra.mxu1 %v9861_v13  ;;  %v5422_v13 = vld [vmem:[#allocation2 + $0x200] sm:$0xff]  ;;  %v9939_v5 = vpack.c.bf16 %v5473_v49, %v5472_v50  ;;  %v5475_v12 = vld [vmem:[#allocation2 + $0x3a8] sm:$0xff]  ;;  %v19594_v21 = vld [vmem:[#allocation66_spill] sm:$0xff] }
 0x667   :  { %9894 = vmatpush3.bf16.msra.mxu0 %v9893_v59  ;;  %9864 = vmatprep.subr.bf16.mxu1 %v9863_v10  ;;  %v5423_v59 = vld [vmem:[#allocation2 + $0x208] sm:$0xff]  ;;  %v5440_v10 = vld [vmem:[#allocation2 + $0x290] sm:$0xff]  ;;  %v5474_v46 = vld [vmem:[#allocation2 + $0x3a0] sm:$0xff] }
 0x668   :  { %9896 = vmatprep.subr.bf16.mxu0 %v9895_v24  ;;  %v5455_v24 = vld [vmem:[#allocation2 + $0x308] sm:$0xff]  ;;  %v9905_v57 = vpack.c.bf16 %v5423_v59, %v5422_v13  ;;  %v9907_v52 = vpack.c.bf16 %v5441_v19, %v5440_v10  ;;  %v5445_v59 = vld [vmem:[#allocation2 + $0x2b8] sm:$0xff]  ;;  %v9943_v10 = vpack.c.bf16 %v5475_v12, %v5474_v46  ;;  %v5478_v46 = vld [vmem:[#allocation2 + $0x3c0] sm:$0xff] }
 0x669   :  { %v5459_v19 = vld [vmem:[#allocation2 + $0x328] sm:$0xff] }
 0x66a   :  { %9866 = vmatpush3.bf16.msra.mxu1 %v9865_v35  ;;  %v5425_v35 = vld [vmem:[#allocation2 + $0x218] sm:$0xff]  ;;  %v5479_v12 = vld [vmem:[#allocation2 + $0x3c8] sm:$0xff] }
 0x66b   :  { %9898 = vmatpush3.bf16.msra.mxu0 %v9897_v43  ;;  %9868 = vmatprep.subr.bf16.mxu1 %v9867_v22  ;;  %v5442_v43 = vld [vmem:[#allocation2 + $0x2a0] sm:$0xff]  ;;  %v9937_v22 = vpack.c.bf16 %v5455_v24, %v5454_v48  ;;  %v9909_v37 = vpack.c.bf16 %v5425_v35, %v5424_v16  ;;  %v19595_v48 = vld [vmem:[#allocation18_spill] sm:$0xff]  ;;  %v5429_v16 = vld [vmem:[#allocation2 + $0x238] sm:$0xff] }
 0x66c   :  { %9900 = vmatprep.subr.bf16.mxu0 %v9899_v6  ;;  %v5457_v6 = vld [vmem:[#allocation2 + $0x318] sm:$0xff]  ;;  %v9911_v9 = vpack.c.bf16 %v5443_v56, %v5442_v43  ;;  %v5476_v24 = vld [vmem:[#allocation2 + $0x3b0] sm:$0xff]  ;;  %v5446_v35 = vld [vmem:[#allocation2 + $0x2c0] sm:$0xff] }
 0x66d   :  { %v9941_v13 = vpack.c.bf16 %v5457_v6, %v5456_v15  ;;  %v5461_v15 = vld [vmem:[#allocation2 + $0x338] sm:$0xff]  ;;  %v19599_v6 = vld [vmem:[#allocation36_spill] sm:$0xff] }
 0x66e   :  { %9870 = vmatpush3.bf16.msra.mxu1 %v9869_v30  ;;  %v5426_v30 = vld [vmem:[#allocation2 + $0x220] sm:$0xff]  ;;  %vm19601_vm1 = vcmp.eq.s32.totalorder %v19334_v1, %v19599_v6 }
 0x66f   :  { %9902 = vmatpush3.bf16.msra.mxu0 %v9901_v11  ;;  %9904 = vmatprep.subr.bf16.mxu1 %v9903_v3  ;;  %v5427_v11 = vld [vmem:[#allocation2 + $0x228] sm:$0xff]  ;;  %v5444_v3 = vld [vmem:[#allocation2 + $0x2b0] sm:$0xff] }
 0x670   :  { %9936 = vmatprep.subr.bf16.mxu0 %v9935_v38  ;;  %v5458_v38 = vld [vmem:[#allocation2 + $0x320] sm:$0xff]  ;;  %v9913_v50 = vpack.c.bf16 %v5427_v11, %v5426_v30  ;;  %v9915_v49 = vpack.c.bf16 %v5445_v59, %v5444_v3  ;;  %v5431_v11 = vld [vmem:[#allocation2 + $0x248] sm:$0xff]  ;;  %v5448_v3 = vld [vmem:[#allocation2 + $0x2d0] sm:$0xff] }
 0x671   :  { %7954 = vmatmul.mubr.msk.f32.vlgmr.msra.gmra.mrb[96].mxu1 %vm4555_vm2, %v19592_v53  ;;  %v9945_v43 = vpack.c.bf16 %v5459_v19, %v5458_v38  ;;  %v5430_v30 = vld [vmem:[#allocation2 + $0x240] sm:$0xff]  ;;  %vm19602_vm2 = vcmp.eq.s32.totalorder %v12529_v20, %v19599_v6  ;;  %v5449_v59 = vld [vmem:[#allocation2 + $0x2d8] sm:$0xff]  ;;  %v5463_v19 = vld [vmem:[#allocation2 + $0x348] sm:$0xff] }
 0x672   :  { %7986 = vmatmul.mubr.msk.f32.vlgmr.msra.gmra.mrb[112].mxu0 %vm4557_vm0, %v19592_v53  ;;  %9906 = vmatpush3.bf16.msra.mxu1 %v9905_v57  ;;  %v5477_v57 = vld [vmem:[#allocation2 + $0x3b8] sm:$0xff]  ;;  %v5462_v38 = vld [vmem:[#allocation2 + $0x340] sm:$0xff] }
 0x673   :  { %7955 = vmatprep.mubr.msk.f32.mxu1 %vm4581_vm12, %v19592_v53  ;;  %7987 = vmatprep.mubr.msk.f32.mxu0 %vm4583_vm10, %v19592_v53  ;;  %vm19597_vm12 = vcmp.eq.s32.totalorder %v12529_v20, %v19595_v48  ;;  %v9947_v56 = vpack.c.bf16 %v5477_v57, %v5476_v24  ;;  %vm19600_vm10 = vcmp.eq.s32.totalorder %v19332_v33, %v19599_v6  ;;  %v19604_v24 = vld [vmem:[#allocation21_spill] sm:$0xff]  ;;  %v5480_v57 = vld [vmem:[#allocation2 + $0x3d0] sm:$0xff] }
 0x674   :  { %9908 = vmatprep.subr.bf16.mxu1 %v9907_v52  ;;  %9938 = vmatpush3.bf16.msra.mxu0 %v9937_v22  ;;  %v5428_v52 = vld [vmem:[#allocation2 + $0x230] sm:$0xff]  ;;  %v5447_v22 = vld [vmem:[#allocation2 + $0x2c8] sm:$0xff]  ;;  %vm19605_vm3 = vcmp.eq.s32.totalorder %v19332_v33, %v19604_v24  ;;  %vm19606_vm0 = vcmp.eq.s32.totalorder %v19334_v1, %v19604_v24  ;;  %vm19607_vm9 = vcmp.eq.s32.totalorder %v12529_v20, %v19604_v24 }
 0x675   :  { %7956 = vmatmul.mubr.msk.f32.gmra.mrb[98].mxu1 %vm4580_vm6, %v19592_v53  ;;  %9940 = vmatprep.subr.bf16.mxu0 %v9939_v5  ;;  %vm19596_vm6 = vcmp.eq.s32.totalorder %v19334_v1, %v19595_v48  ;;  %v5460_v5 = vld [vmem:[#allocation2 + $0x330] sm:$0xff] }
 0x676   :  { %7988 = vmatmul.mubr.msk.f32.gmra.mrb[114].mxu0 %vm4582_vm11, %v19592_v53  ;;  %7957 = vmatprep.mubr.msk.f32.mxu1 %vm4606_vm7, %v19592_v53  ;;  %vm19598_vm11 = vcmp.eq.s32.totalorder %v14041_v51, %v19595_v48  ;;  %vm19603_vm7 = vcmp.eq.s32.totalorder %v14041_v51, %v19599_v6 }
 0x677   :  { %7989 = vmatprep.mubr.msk.f32.mxu0 %vm19596_vm6, %v19592_v53  ;;  %9910 = vmatpush3.bf16.msra.mxu1 %v9909_v37  ;;  %v9917_v37 = vpack.c.bf16 %v5429_v16, %v5428_v52  ;;  %v9923_v52 = vpack.c.bf16 %v5449_v59, %v5448_v3  ;;  %v5432_v16 = vld [vmem:[#allocation2 + $0x250] sm:$0xff]  ;;  %vm19608_vm6 = vcmp.eq.s32.totalorder %v14041_v51, %v19604_v24  ;;  %v5434_v3 = vld [vmem:[#allocation2 + $0x260] sm:$0xff] }
 0x678   :  { %9912 = vmatprep.subr.bf16.mxu1 %v9911_v9  ;;  %9942 = vmatpush3.bf16.msra.mxu0 %v9941_v13  ;;  %v9919_v9 = vpack.c.bf16 %v5447_v22, %v5446_v35  ;;  %v9949_v13 = vpack.c.bf16 %v5461_v15, %v5460_v5  ;;  %v5433_v35 = vld [vmem:[#allocation2 + $0x258] sm:$0xff]  ;;  %v9953_v22 = vpack.c.bf16 %v5463_v19, %v5462_v38  ;;  %v5464_v15 = vld [vmem:[#allocation2 + $0x350] sm:$0xff] }
 0x679   :  { %7958 = vmatmul.mubr.msk.f32.gmra.mrb[100].mxu1 %vm19597_vm12, %v19592_v53  ;;  %9944 = vmatprep.subr.bf16.mxu0 %v9943_v10  ;;  %v9951_v10 = vpack.c.bf16 %v5479_v12, %v5478_v46  ;;  %v5465_v46 = vld [vmem:[#allocation2 + $0x358] sm:$0xff] }
 0x67a   :  { %7990 = vmatmul.mubr.msk.f32.gmra.mrb[116].mxu0 %vm19598_vm11, %v19592_v53  ;;  %7959 = vmatprep.mubr.msk.f32.mxu1 %vm19600_vm10, %v19592_v53  ;;  %v19609_v12 = vld [vmem:[#allocation71_spill] sm:$0xff]  ;;  %v9957_v59 = vpack.c.bf16 %v5465_v46, %v5464_v15  ;;  %v5468_v15 = vld [vmem:[#allocation2 + $0x370] sm:$0xff] }
 0x67b   :  { %7991 = vmatprep.mubr.msk.f32.mxu0 %vm19601_vm1, %v19592_v53  ;;  %9914 = vmatpush3.bf16.msra.mxu1 %v9913_v50  ;;  %v5481_v50 = vld [vmem:[#allocation2 + $0x3d8] sm:$0xff]  ;;  %vm19610_vm12 = vcmp.eq.s32.totalorder %v19332_v33, %v19609_v12  ;;  %vm19611_vm11 = vcmp.eq.s32.totalorder %v19334_v1, %v19609_v12  ;;  %vm19612_vm10 = vcmp.eq.s32.totalorder %v12529_v20, %v19609_v12 }
 0x67c   :  { %9916 = vmatprep.subr.bf16.mxu1 %v9915_v49  ;;  %9946 = vmatpush3.bf16.msra.mxu0 %v9945_v43  ;;  %v9921_v49 = vpack.c.bf16 %v5431_v11, %v5430_v30  ;;  %v5450_v43 = vld [vmem:[#allocation2 + $0x2e0] sm:$0xff]  ;;  %v9955_v5 = vpack.c.bf16 %v5481_v50, %v5480_v57  ;;  %v9925_v30 = vpack.c.bf16 %v5433_v35, %v5432_v16  ;;  %v5453_v38 = vld [vmem:[#allocation2 + $0x2f8] sm:$0xff]  ;;  %v5467_v50 = vld [vmem:[#allocation2 + $0x368] sm:$0xff] }
 0x67d   :  { %7960 = vmatmul.mubr.msk.f32.gmra.mrb[102].mxu1 %vm19602_vm2, %v19592_v53  ;;  %9948 = vmatprep.subr.bf16.mxu0 %v9947_v56  ;;  %v5451_v56 = vld [vmem:[#allocation2 + $0x2e8] sm:$0xff]  ;;  %v5466_v57 = vld [vmem:[#allocation2 + $0x360] sm:$0xff]  ;;  %vm19613_vm1 = vcmp.eq.s32.totalorder %v14041_v51, %v19609_v12  ;;  %v5485_v16 = vld [vmem:[#allocation2 + $0x3f8] sm:$0xff] }
 0x67e   :  { %7992 = vmatmul.mubr.msk.f32.gmra.mrb[118].mxu0 %vm19603_vm7, %v19592_v53  ;;  %7961 = vmatprep.mubr.msk.f32.mxu1 %vm19605_vm3, %v19592_v53  ;;  %v9927_v11 = vpack.c.bf16 %v5451_v56, %v5450_v43  ;;  %v5437_v56 = vld [vmem:[#allocation2 + $0x278] sm:$0xff] }
 0x67f   :  { %7993 = vmatprep.mubr.msk.f32.mxu0 %vm19606_vm0, %v19592_v53  ;;  %9918 = vmatpush3.bf16.msra.mxu1 %v9917_v37  ;;  %v5482_v37 = vld [vmem:[#allocation2 + $0x3e0] sm:$0xff] }
 0x680   :  { %9920 = vmatprep.subr.bf16.mxu1 %v9919_v9  ;;  %9950 = vmatpush3.bf16.msra.mxu0 %v9949_v13  ;;  %v5483_v9 = vld [vmem:[#allocation2 + $0x3e8] sm:$0xff] }
 0x681   :  { %7962 = vmatmul.mubr.msk.f32.gmra.mrb[104].mxu1 %vm19607_vm9, %v19592_v53  ;;  %9952 = vmatprep.subr.bf16.mxu0 %v9951_v10  ;;  %v5435_v13 = vld [vmem:[#allocation2 + $0x268] sm:$0xff]  ;;  %v5452_v10 = vld [vmem:[#allocation2 + $0x2f0] sm:$0xff]  ;;  %v9959_v19 = vpack.c.bf16 %v5483_v9, %v5482_v37  ;;  %v5469_v37 = vld [vmem:[#allocation2 + $0x378] sm:$0xff] }
 0x682   :  { %7994 = vmatmul.mubr.msk.f32.gmra.mrb[120].mxu0 %vm19608_vm6, %v19592_v53  ;;  %7963 = vmatprep.mubr.msk.f32.mxu1 %vm19610_vm12, %v19592_v53  ;;  %v9929_v35 = vpack.c.bf16 %v5435_v13, %v5434_v3  ;;  %v9931_v43 = vpack.c.bf16 %v5453_v38, %v5452_v10  ;;  %v5502_v9 = vld [vmem:[#allocation2 + $0x480] sm:$0xff]  ;;  %v5535_v3 = vld [vmem:[#allocation2 + $0x588] sm:$0xff] }
 0x683   :  { %7995 = vmatprep.mubr.msk.f32.mxu0 %vm19611_vm11, %v19592_v53  ;;  %9922 = vmatpush3.bf16.msra.mxu1 %v9921_v49  ;;  %v19614_v49 = vld [vmem:[#allocation23_spill] sm:$0xff]  ;;  %v9967_v10 = vpack.c.bf16 %v5503_v34, %v5502_v9  ;;  %v5486_v34 = vld [vmem:[#allocation2 + $0x400] sm:$0xff] }
 0x684   :  { %9924 = vmatprep.subr.bf16.mxu1 %v9923_v52  ;;  %9954 = vmatpush3.bf16.msra.mxu0 %v9953_v22  ;;  %vm19615_vm2 = vcmp.eq.s32.totalorder %v19332_v33, %v19614_v49  ;;  %v5484_v52 = vld [vmem:[#allocation2 + $0x3f0] sm:$0xff]  ;;  %vm19616_vm7 = vcmp.eq.s32.totalorder %v19334_v1, %v19614_v49  ;;  %vm19617_vm3 = vcmp.eq.s32.totalorder %v12529_v20, %v19614_v49  ;;  %v5538_v9 = vld [vmem:[#allocation2 + $0x5a0] sm:$0xff] }
 0x685   :  { %7964 = vmatmul.mubr.msk.f32.gmra.mrb[106].mxu1 %vm19612_vm10, %v19592_v53  ;;  %9956 = vmatprep.subr.bf16.mxu0 %v9955_v5  ;;  %v5436_v22 = vld [vmem:[#allocation2 + $0x270] sm:$0xff]  ;;  %v9961_v5 = vpack.c.bf16 %v5467_v50, %v5466_v57  ;;  %v9963_v46 = vpack.c.bf16 %v5485_v16, %v5484_v52  ;;  %vm19618_vm0 = vcmp.eq.s32.totalorder %v14041_v51, %v19614_v49  ;;  %v5505_v50 = vld [vmem:[#allocation2 + $0x498] sm:$0xff]  ;;  %v5518_v52 = vld [vmem:[#allocation2 + $0x500] sm:$0xff] }
 0x686   :  { %7996 = vmatmul.mubr.msk.f32.gmra.mrb[122].mxu0 %vm19613_vm1, %v19592_v53  ;;  %7965 = vmatprep.mubr.msk.f32.mxu1 %vm19615_vm2, %v19592_v53  ;;  %v9933_v13 = vpack.c.bf16 %v5437_v56, %v5436_v22  ;;  %vm19624_vm10 = vcmp.eq.s32.totalorder %v19332_v33, %v16086_v55  ;;  %vm19625_vm1 = vcmp.eq.s32.totalorder %v19334_v1, %v16086_v55  ;;  %v5504_v57 = vld [vmem:[#allocation2 + $0x490] sm:$0xff]  ;;  %v5519_v16 = vld [vmem:[#allocation2 + $0x508] sm:$0xff]  ;;  %v5489_v22 = vld [vmem:[#allocation2 + $0x418] sm:$0xff] }
 0x687   :  { %7997 = vmatprep.mubr.msk.f32.mxu0 %vm19616_vm7, %v19592_v53  ;;  %9926 = vmatpush3.bf16.msra.mxu1 %v9925_v30  ;;  %v19619_v30 = vld [vmem:[#allocation54_spill] sm:$0xff]  ;;  %vm19626_vm2 = vcmp.eq.s32.totalorder %v12529_v20, %v16086_v55  ;;  %vm19627_vm7 = vcmp.eq.s32.totalorder %v14041_v51, %v16086_v55  ;;  %v5506_v56 = vld [vmem:[#allocation2 + $0x4a0] sm:$0xff] }
 0x688   :  { %9928 = vmatprep.subr.bf16.mxu1 %v9927_v11  ;;  %9958 = vmatpush3.bf16.msra.mxu0 %v9957_v59  ;;  %vm19620_vm9 = vcmp.eq.s32.totalorder %v19332_v33, %v19619_v30  ;;  %v5534_v11 = vld [vmem:[#allocation2 + $0x580] sm:$0xff]  ;;  %vm19621_vm6 = vcmp.eq.s32.totalorder %v19334_v1, %v19619_v30  ;;  %v9965_v59 = vpack.c.bf16 %v5469_v37, %v5468_v15  ;;  %v5521_v37 = vld [vmem:[#allocation2 + $0x518] sm:$0xff] }
 0x689   :  { %7966 = vmatmul.mubr.msk.f32.gmra.mrb[108].mxu1 %vm19617_vm3, %v19592_v53  ;;  %9960 = vmatprep.subr.bf16.mxu0 %v9959_v19  ;;  %vm19622_vm12 = vcmp.eq.s32.totalorder %v12529_v20, %v19619_v30  ;;  %v9999_v38 = vpack.c.bf16 %v5535_v3, %v5534_v11  ;;  %vm19623_vm11 = vcmp.eq.s32.totalorder %v14041_v51, %v19619_v30  ;;  %v5487_v19 = vld [vmem:[#allocation2 + $0x408] sm:$0xff] }
 0x68a   :  { %7998 = vmatmul.mubr.msk.f32.gmra.mrb[124].mxu0 %vm19618_vm0, %v19592_v53  ;;  %7967 = vmatprep.mubr.msk.f32.mxu1 %vm19620_vm9, %v19592_v53  ;;  %vm19628_vm3 = vcmp.eq.s32.totalorder %v19332_v33, %v16160_v45  ;;  %vm19629_vm0 = vcmp.eq.s32.totalorder %v19334_v1, %v16160_v45  ;;  %vm19630_vm9 = vcmp.eq.s32.totalorder %v12529_v20, %v16160_v45  ;;  %v5539_v11 = vld [vmem:[#allocation2 + $0x5a8] sm:$0xff] }
 0x68b   :  { %7999 = vmatprep.mubr.msk.f32.mxu0 %vm19621_vm6, %v19592_v53  ;;  %9930 = vmatpush3.bf16.msra.mxu1 %v9929_v35  ;;  %vm19631_vm6 = vcmp.eq.s32.totalorder %v14041_v51, %v16160_v45  ;;  %v5537_v35 = vld [vmem:[#allocation2 + $0x598] sm:$0xff] }
 0x68c   :  { %9932 = vmatprep.subr.bf16.mxu1 %v9931_v43  ;;  %9962 = vmatpush3.bf16.msra.mxu0 %v9961_v5  ;;  %v5488_v43 = vld [vmem:[#allocation2 + $0x410] sm:$0xff]  ;;  %v10001_v5 = vpack.c.bf16 %v5519_v16, %v5518_v52  ;;  %v5523_v52 = vld [vmem:[#allocation2 + $0x528] sm:$0xff] }
 0x68d   :  { %7968 = vmatmul.mubr.msk.f32.gmra.mrb[110].mxu1 %vm19622_vm12, %v19592_v53  ;;  %9964 = vmatprep.subr.bf16.mxu0 %v9963_v46  ;;  %vm19632_vm12 = vcmp.eq.s32.totalorder %v19332_v33, %v16218_v8  ;;  %v5520_v46 = vld [vmem:[#allocation2 + $0x510] sm:$0xff]  ;;  %v9973_v3 = vpack.c.bf16 %v5489_v22, %v5488_v43  ;;  %v5493_v43 = vld [vmem:[#allocation2 + $0x438] sm:$0xff]  ;;  %v5510_v22 = vld [vmem:[#allocation2 + $0x4c0] sm:$0xff] }
 0x68e   :  { %8000 = vmatmul.mubr.msk.f32.gmra.mrb[126].mxu0 %vm19623_vm11, %v19592_v53  ;;  %7969 = vmatprep.mubr.msk.f32.mxu1 %vm19624_vm10, %v19592_v53  ;;  %vm19633_vm11 = vcmp.eq.s32.totalorder %v19334_v1, %v16218_v8  ;;  %vm19634_vm10 = vcmp.eq.s32.totalorder %v12529_v20, %v16218_v8  ;;  %v5540_v16 = vld [vmem:[#allocation2 + $0x5b0] sm:$0xff] }
 0x68f   :  { %8001 = vmatprep.mubr.msk.f32.mxu0 %vm19625_vm1, %v19592_v53  ;;  %9934 = vmatpush3.bf16.msra.mxu1 %v9933_v13  ;;  %vm19635_vm1 = vcmp.eq.s32.totalorder %v14041_v51, %v16218_v8 }
 0x690   :  { %9966 = vmatpush3.bf16.msra.mxu0 %v9965_v59  ;;  %9968 = vmatprep.subr.bf16.mxu1 %v9967_v10  ;;  %v5490_v59 = vld [vmem:[#allocation2 + $0x420] sm:$0xff]  ;;  %v5491_v10 = vld [vmem:[#allocation2 + $0x428] sm:$0xff] }
 0x691   :  { %7970 = vmatmul.mubr.msk.f32.gmra.mrb[112].mxu1 %vm19626_vm2, %v19592_v53  ;;  %10000 = vmatprep.subr.bf16.mxu0 %v9999_v38  ;;  %vm19636_vm2 = vcmp.eq.s32.totalorder %v19332_v33, %v16277_v0  ;;  %v5508_v38 = vld [vmem:[#allocation2 + $0x4b0] sm:$0xff] }
 0x692   :  { %8002 = vmatmul.mubr.msk.f32.gmra.mrb[128].mxu0 %vm19627_vm7, %v19592_v53  ;;  %7971 = vmatprep.mubr.msk.f32.mxu1 %vm19628_vm3, %v19592_v53  ;;  %vm19637_vm7 = vcmp.eq.s32.totalorder %v19334_v1, %v16277_v0  ;;  %vm19638_vm3 = vcmp.eq.s32.totalorder %v12529_v20, %v16277_v0 }
 0x693   :  { %8003 = vmatprep.mubr.msk.f32.mxu0 %vm19629_vm0, %v19592_v53  ;;  %vm19639_vm0 = vcmp.eq.s32.totalorder %v14041_v51, %v16277_v0 }
 0x695   :  { %7972 = vmatmul.mubr.msk.f32.gmra.mrb[114].mxu1 %vm19630_vm9, %v19592_v53  ;;  %vm19640_vm9 = vcmp.eq.s32.totalorder %v19332_v33, %v16336_v2 }
 0x696   :  { %8004 = vmatmul.mubr.msk.f32.gmra.mrb[130].mxu0 %vm19631_vm6, %v19592_v53  ;;  %7973 = vmatprep.mubr.msk.f32.mxu1 %vm19632_vm12, %v19592_v53  ;;  %vm19641_vm6 = vcmp.eq.s32.totalorder %v19334_v1, %v16336_v2  ;;  %vm19642_vm12 = vcmp.eq.s32.totalorder %v12529_v20, %v16336_v2 }
 0x697   :  { %8005 = vmatprep.mubr.msk.f32.mxu0 %vm19633_vm11, %v19592_v53  ;;  %vm19643_vm11 = vcmp.eq.s32.totalorder %v14041_v51, %v16336_v2 }
 0x699   :  { %7974 = vmatmul.mubr.msk.f32.gmra.mrb[116].mxu1 %vm19634_vm10, %v19592_v53  ;;  %vm19644_vm10 = vcmp.eq.s32.totalorder %v19332_v33, %v16394_v39 }
 0x69a   :  { %8006 = vmatmul.mubr.msk.f32.gmra.mrb[132].mxu0 %vm19635_vm1, %v19592_v53  ;;  %7975 = vmatprep.mubr.msk.f32.mxu1 %vm19636_vm2, %v19592_v53  ;;  %vm19645_vm1 = vcmp.eq.s32.totalorder %v19334_v1, %v16394_v39  ;;  %vm19646_vm2 = vcmp.eq.s32.totalorder %v12529_v20, %v16394_v39 }
 0x69b   :  { %8007 = vmatprep.mubr.msk.f32.mxu0 %vm19637_vm7, %v19592_v53  ;;  %vm19647_vm7 = vcmp.eq.s32.totalorder %v14041_v51, %v16394_v39 }
 0x69d   :  { %7976 = vmatmul.mubr.msk.f32.gmra.mrb[118].mxu1 %vm19638_vm3, %v19592_v53  ;;  %vm19648_vm3 = vcmp.eq.s32.totalorder %v19332_v33, %v16456_v31 }
 0x69e   :  { %8008 = vmatmul.mubr.msk.f32.gmra.mrb[134].mxu0 %vm19639_vm0, %v19592_v53  ;;  %7977 = vmatprep.mubr.msk.f32.mxu1 %vm19640_vm9, %v19592_v53  ;;  %vm19649_vm0 = vcmp.eq.s32.totalorder %v19334_v1, %v16456_v31  ;;  %vm19650_vm9 = vcmp.eq.s32.totalorder %v12529_v20, %v16456_v31 }
 0x69f   :  { %8009 = vmatprep.mubr.msk.f32.mxu0 %vm19641_vm6, %v19592_v53  ;;  %vm19651_vm6 = vcmp.eq.s32.totalorder %v14041_v51, %v16456_v31 }
 0x6a1   :  { %7978 = vmatmul.mubr.msk.f32.gmra.mrb[120].mxu1 %vm19642_vm12, %v19592_v53  ;;  %vm19652_vm12 = vcmp.eq.s32.totalorder %v19332_v33, %v16507_v17  ;;  %v9969_v33 = vpack.c.bf16 %v5487_v19, %v5486_v34  ;;  %v10005_v34 = vpack.c.bf16 %v5521_v37, %v5520_v46  ;;  %v5509_v19 = vld [vmem:[#allocation2 + $0x4b8] sm:$0xff]  ;;  %v5542_v37 = vld [vmem:[#allocation2 + $0x5c0] sm:$0xff] }
 0x6a2   :  { %8010 = vmatmul.mubr.msk.f32.gmra.mrb[136].mxu0 %vm19643_vm11, %v19592_v53  ;;  %7979 = vmatprep.mubr.msk.f32.mxu1 %vm19644_vm10, %v19592_v53  ;;  %vm19653_vm11 = vcmp.eq.s32.totalorder %v19334_v1, %v16507_v17  ;;  %vm19654_vm10 = vcmp.eq.s32.totalorder %v12529_v20, %v16507_v17  ;;  %v5536_v1 = vld [vmem:[#allocation2 + $0x590] sm:$0xff]  ;;  %v9971_v20 = vpack.c.bf16 %v5505_v50, %v5504_v57  ;;  %v5522_v50 = vld [vmem:[#allocation2 + $0x520] sm:$0xff]  ;;  %v5525_v46 = vld [vmem:[#allocation2 + $0x538] sm:$0xff] }
 0x6a3   :  { %8011 = vmatprep.mubr.msk.f32.mxu0 %vm19645_vm1, %v19592_v53  ;;  %vm19655_vm1 = vcmp.eq.s32.totalorder %v14041_v51, %v16507_v17  ;;  %v5507_v51 = vld [vmem:[#allocation2 + $0x4a8] sm:$0xff]  ;;  %v10003_v15 = vpack.c.bf16 %v5537_v35, %v5536_v1  ;;  %v10007_v57 = vpack.c.bf16 %v5539_v11, %v5538_v9  ;;  %v9977_v1 = vpack.c.bf16 %v5491_v10, %v5490_v59  ;;  %v5512_v10 = vld [vmem:[#allocation2 + $0x4d0] sm:$0xff] }
 0x6a4   :  { %v9975_v13 = vpack.c.bf16 %v5507_v51, %v5506_v56  ;;  %v9979_v35 = vpack.c.bf16 %v5509_v19, %v5508_v38  ;;  %v10009_v56 = vpack.c.bf16 %v5523_v52, %v5522_v50  ;;  %v5543_v9 = vld [vmem:[#allocation2 + $0x5c8] sm:$0xff]  ;;  %v5544_v52 = vld [vmem:[#allocation2 + $0x5d0] sm:$0xff] }
 0x6a5   :  { %7980 = vmatmul.mubr.msk.f32.gmra.mrb[122].mxu1 %vm19646_vm2, %v19592_v53  ;;  %vm19656_vm2 = vcmp.eq.s32.totalorder %v19427_v32, %v19593_v23  ;;  %v5495_v59 = vld [vmem:[#allocation2 + $0x448] sm:$0xff]  ;;  %v10015_v19 = vpack.c.bf16 %v5543_v9, %v5542_v37 }
 0x6a6   :  { %8012 = vmatmul.mubr.msk.f32.gmra.mrb[138].mxu0 %vm19647_vm7, %v19592_v53  ;;  %7981 = vmatprep.mubr.msk.f32.mxu1 %vm19648_vm3, %v19592_v53  ;;  %vm19657_vm7 = vcmp.eq.s32.totalorder %v15520_v58, %v19593_v23  ;;  %vm19658_vm3 = vcmp.eq.s32.totalorder %v19430_v62, %v19593_v23  ;;  %v5527_v50 = vld [vmem:[#allocation2 + $0x548] sm:$0xff] }
 0x6a7   :  { %8013 = vmatprep.mubr.msk.f32.mxu0 %vm19649_vm0, %v19592_v53  ;;  %vm19659_vm0 = vcmp.eq.s32.totalorder %v19550_v14, %v19593_v23  ;;  %v5547_v37 = vld [vmem:[#allocation2 + $0x5e8] sm:$0xff] }
 0x6a9   :  { %7982 = vmatmul.mubr.msk.f32.gmra.mrb[124].mxu1 %vm19650_vm9, %v19592_v53  ;;  %vm19660_vm9 = vcmp.eq.s32.totalorder %v19427_v32, %v19594_v21 }
 0x6aa   :  { %8014 = vmatmul.mubr.msk.f32.gmra.mrb[140].mxu0 %vm19651_vm6, %v19592_v53  ;;  %7983 = vmatprep.mubr.msk.f32.mxu1 %vm19652_vm12, %v19592_v53  ;;  %vm19661_vm6 = vcmp.eq.s32.totalorder %v15520_v58, %v19594_v21  ;;  %vm19662_vm12 = vcmp.eq.s32.totalorder %v19430_v62, %v19594_v21 }
 0x6ab   :  { %8015 = vmatprep.mubr.msk.f32.mxu0 %vm19653_vm11, %v19592_v53  ;;  %vm19663_vm11 = vcmp.eq.s32.totalorder %v19550_v14, %v19594_v21 }
 0x6ad   :  { %7984 = vmatmul.mubr.msk.f32.gmra.mrb[126].mxu1 %vm19654_vm10, %v19592_v53  ;;  %vm19664_vm10 = vcmp.eq.s32.totalorder %v19427_v32, %v19595_v48 }
 0x6ae   :  { %8016 = vmatmul.mubr.msk.f32.gmra.mrb[142].mxu0 %vm19655_vm1, %v19592_v53  ;;  %8017 = vmatprep.mubr.msk.f32.mxu1 %vm19656_vm2, %v19592_v53  ;;  %vm19665_vm1 = vcmp.eq.s32.totalorder %v15520_v58, %v19595_v48  ;;  %vm19666_vm2 = vcmp.eq.s32.totalorder %v19430_v62, %v19595_v48 }
 0x6af   :  { %8049 = vmatprep.mubr.msk.f32.mxu0 %vm19657_vm7, %v19592_v53  ;;  %vm19667_vm7 = vcmp.eq.s32.totalorder %v19550_v14, %v19595_v48 }
 0x6b1   :  { %8018 = vmatmul.mubr.msk.f32.vlgmr.msra.gmra.mrb[128].mxu1 %vm19658_vm3, %v19592_v53  ;;  %vm19668_vm3 = vcmp.eq.s32.totalorder %v19427_v32, %v19599_v6 }
 0x6b2   :  { %9970 = vmatpush3.bf16.msra.mxu1 %v9969_v33  ;;  %8050 = vmatmul.mubr.msk.f32.vlgmr.msra.gmra.mrb[144].mxu0 %vm19659_vm0, %v19592_v53  ;;  %v5541_v33 = vld [vmem:[#allocation2 + $0x5b8] sm:$0xff]  ;;  %vm19669_vm0 = vcmp.eq.s32.totalorder %v15520_v58, %v19599_v6 }
 0x6b3   :  { %8019 = vmatprep.mubr.msk.f32.mxu1 %vm19660_vm9, %v19592_v53  ;;  %8051 = vmatprep.mubr.msk.f32.mxu0 %vm19661_vm6, %v19592_v53  ;;  %v10011_v51 = vpack.c.bf16 %v5541_v33, %v5540_v16  ;;  %vm19670_vm9 = vcmp.eq.s32.totalorder %v19430_v62, %v19599_v6  ;;  %vm19671_vm6 = vcmp.eq.s32.totalorder %v19550_v14, %v19599_v6  ;;  %v5545_v16 = vld [vmem:[#allocation2 + $0x5d8] sm:$0xff] }
 0x6b4   :  { %9972 = vmatprep.subr.bf16.mxu1 %v9971_v20  ;;  %10002 = vmatpush3.bf16.msra.mxu0 %v10001_v5  ;;  %v5492_v20 = vld [vmem:[#allocation2 + $0x430] sm:$0xff]  ;;  %v5511_v5 = vld [vmem:[#allocation2 + $0x4c8] sm:$0xff] }
 0x6b5   :  { %8020 = vmatmul.mubr.msk.f32.gmra.mrb[130].mxu1 %vm19662_vm12, %v19592_v53  ;;  %10004 = vmatprep.subr.bf16.mxu0 %v10003_v15  ;;  %v5524_v15 = vld [vmem:[#allocation2 + $0x530] sm:$0xff]  ;;  %v9981_v11 = vpack.c.bf16 %v5493_v43, %v5492_v20  ;;  %vm19672_vm12 = vcmp.eq.s32.totalorder %v19427_v32, %v19604_v24  ;;  %v5497_v20 = vld [vmem:[#allocation2 + $0x458] sm:$0xff]  ;;  %v5514_v43 = vld [vmem:[#allocation2 + $0x4e0] sm:$0xff] }
 0x6b6   :  { %8052 = vmatmul.mubr.msk.f32.gmra.mrb[146].mxu0 %vm19663_vm11, %v19592_v53  ;;  %8021 = vmatprep.mubr.msk.f32.mxu1 %vm19664_vm10, %v19592_v53  ;;  %v10013_v38 = vpack.c.bf16 %v5525_v46, %v5524_v15  ;;  %vm19673_vm11 = vcmp.eq.s32.totalorder %v15520_v58, %v19604_v24  ;;  %vm19674_vm10 = vcmp.eq.s32.totalorder %v19430_v62, %v19604_v24  ;;  %v5529_v15 = vld [vmem:[#allocation2 + $0x558] sm:$0xff]  ;;  %v5546_v46 = vld [vmem:[#allocation2 + $0x5e0] sm:$0xff] }
 0x6b7   :  { %8053 = vmatprep.mubr.msk.f32.mxu0 %vm19665_vm1, %v19592_v53  ;;  %9974 = vmatpush3.bf16.msra.mxu1 %v9973_v3  ;;  %v9983_v3 = vpack.c.bf16 %v5511_v5, %v5510_v22  ;;  %v10019_v5 = vpack.c.bf16 %v5545_v16, %v5544_v52  ;;  %vm19675_vm1 = vcmp.eq.s32.totalorder %v19550_v14, %v19604_v24  ;;  %v5549_v52 = vld [vmem:[#allocation2 + $0x5f8] sm:$0xff] }
 0x6b8   :  { %9976 = vmatprep.subr.bf16.mxu1 %v9975_v13  ;;  %10006 = vmatpush3.bf16.msra.mxu0 %v10005_v34  ;;  %v5494_v13 = vld [vmem:[#allocation2 + $0x440] sm:$0xff]  ;;  %v5513_v34 = vld [vmem:[#allocation2 + $0x4d8] sm:$0xff] }
 0x6b9   :  { %8022 = vmatmul.mubr.msk.f32.gmra.mrb[132].mxu1 %vm19666_vm2, %v19592_v53  ;;  %10008 = vmatprep.subr.bf16.mxu0 %v10007_v57  ;;  %v5526_v57 = vld [vmem:[#allocation2 + $0x540] sm:$0xff]  ;;  %v9985_v33 = vpack.c.bf16 %v5495_v59, %v5494_v13  ;;  %vm19676_vm2 = vcmp.eq.s32.totalorder %v19427_v32, %v19609_v12  ;;  %v5499_v13 = vld [vmem:[#allocation2 + $0x468] sm:$0xff] }
 0x6ba   :  { %8054 = vmatmul.mubr.msk.f32.gmra.mrb[148].mxu0 %vm19667_vm7, %v19592_v53  ;;  %8023 = vmatprep.mubr.msk.f32.mxu1 %vm19668_vm3, %v19592_v53  ;;  %v10017_v22 = vpack.c.bf16 %v5527_v50, %v5526_v57  ;;  %vm19677_vm7 = vcmp.eq.s32.totalorder %v15520_v58, %v19609_v12  ;;  %vm19678_vm3 = vcmp.eq.s32.totalorder %v19430_v62, %v19609_v12  ;;  %v5531_v57 = vld [vmem:[#allocation2 + $0x568] sm:$0xff]  ;;  %v5548_v50 = vld [vmem:[#allocation2 + $0x5f0] sm:$0xff] }
 0x6bb   :  { %8055 = vmatprep.mubr.msk.f32.mxu0 %vm19669_vm0, %v19592_v53  ;;  %9978 = vmatpush3.bf16.msra.mxu1 %v9977_v1  ;;  %v9987_v1 = vpack.c.bf16 %v5513_v34, %v5512_v10  ;;  %v5516_v10 = vld [vmem:[#allocation2 + $0x4f0] sm:$0xff]  ;;  %v10023_v34 = vpack.c.bf16 %v5547_v37, %v5546_v46  ;;  %vm19679_vm0 = vcmp.eq.s32.totalorder %v19550_v14, %v19609_v12  ;;  %v5599_v46 = vld [vmem:[#allocation2 + $0x788] sm:$0xff] }
 0x6bc   :  { %9980 = vmatprep.subr.bf16.mxu1 %v9979_v35  ;;  %10010 = vmatpush3.bf16.msra.mxu0 %v10009_v56  ;;  %v5496_v35 = vld [vmem:[#allocation2 + $0x450] sm:$0xff]  ;;  %v5515_v56 = vld [vmem:[#allocation2 + $0x4e8] sm:$0xff] }
 0x6bd   :  { %8024 = vmatmul.mubr.msk.f32.gmra.mrb[134].mxu1 %vm19670_vm9, %v19592_v53  ;;  %10012 = vmatprep.subr.bf16.mxu0 %v10011_v51  ;;  %v5528_v51 = vld [vmem:[#allocation2 + $0x550] sm:$0xff]  ;;  %v9989_v9 = vpack.c.bf16 %v5497_v20, %v5496_v35  ;;  %vm19680_vm9 = vcmp.eq.s32.totalorder %v19427_v32, %v19614_v49  ;;  %v5501_v35 = vld [vmem:[#allocation2 + $0x478] sm:$0xff] }
 0x6be   :  { %8056 = vmatmul.mubr.msk.f32.gmra.mrb[150].mxu0 %vm19671_vm6, %v19592_v53  ;;  %8025 = vmatprep.mubr.msk.f32.mxu1 %vm19672_vm12, %v19592_v53  ;;  %v10021_v59 = vpack.c.bf16 %v5529_v15, %v5528_v51  ;;  %vm19681_vm6 = vcmp.eq.s32.totalorder %v15520_v58, %v19614_v49  ;;  %vm19682_vm12 = vcmp.eq.s32.totalorder %v19430_v62, %v19614_v49  ;;  %v5567_v51 = vld [vmem:[#allocation2 + $0x688] sm:$0xff]  ;;  %v5598_v15 = vld [vmem:[#allocation2 + $0x780] sm:$0xff] }
 0x6bf   :  { %8057 = vmatprep.mubr.msk.f32.mxu0 %vm19673_vm11, %v19592_v53  ;;  %9982 = vmatpush3.bf16.msra.mxu1 %v9981_v11  ;;  %v9991_v11 = vpack.c.bf16 %v5515_v56, %v5514_v43  ;;  %v5532_v43 = vld [vmem:[#allocation2 + $0x570] sm:$0xff]  ;;  %v5533_v56 = vld [vmem:[#allocation2 + $0x578] sm:$0xff]  ;;  %vm19683_vm11 = vcmp.eq.s32.totalorder %v19550_v14, %v19614_v49 }
 0x6c0   :  { %9984 = vmatprep.subr.bf16.mxu1 %v9983_v3  ;;  %10014 = vmatpush3.bf16.msra.mxu0 %v10013_v38  ;;  %v5498_v3 = vld [vmem:[#allocation2 + $0x460] sm:$0xff]  ;;  %v5517_v38 = vld [vmem:[#allocation2 + $0x4f8] sm:$0xff] }
 0x6c1   :  { %8026 = vmatmul.mubr.msk.f32.gmra.mrb[136].mxu1 %vm19674_vm10, %v19592_v53  ;;  %10016 = vmatprep.subr.bf16.mxu0 %v10015_v19  ;;  %v5530_v19 = vld [vmem:[#allocation2 + $0x560] sm:$0xff]  ;;  %v9993_v16 = vpack.c.bf16 %v5499_v13, %v5498_v3  ;;  %vm19684_vm10 = vcmp.eq.s32.totalorder %v19427_v32, %v19619_v30  ;;  %v10063_v3 = vpack.c.bf16 %v5599_v46, %v5598_v15  ;;  %v5555_v15 = vld [vmem:[#allocation2 + $0x628] sm:$0xff]  ;;  %v5572_v46 = vld [vmem:[#allocation2 + $0x6b0] sm:$0xff] }
 0x6c2   :  { %8058 = vmatmul.mubr.msk.f32.gmra.mrb[152].mxu0 %vm19675_vm1, %v19592_v53  ;;  %8027 = vmatprep.mubr.msk.f32.mxu1 %vm19676_vm2, %v19592_v53  ;;  %v10025_v20 = vpack.c.bf16 %v5531_v57, %v5530_v19  ;;  %vm19685_vm1 = vcmp.eq.s32.totalorder %v15520_v58, %v19619_v30  ;;  %vm19686_vm2 = vcmp.eq.s32.totalorder %v19430_v62, %v19619_v30  ;;  %v5550_v13 = vld [vmem:[#allocation2 + $0x600] sm:$0xff]  ;;  %v5583_v19 = vld [vmem:[#allocation2 + $0x708] sm:$0xff]  ;;  %v5601_v57 = vld [vmem:[#allocation2 + $0x798] sm:$0xff] }
 0x6c3   :  { %8059 = vmatprep.mubr.msk.f32.mxu0 %vm19677_vm7, %v19592_v53  ;;  %9986 = vmatpush3.bf16.msra.mxu1 %v9985_v33  ;;  %v9995_v33 = vpack.c.bf16 %v5517_v38, %v5516_v10  ;;  %vm19687_vm7 = vcmp.eq.s32.totalorder %v19550_v14, %v19619_v30  ;;  %v5568_v10 = vld [vmem:[#allocation2 + $0x690] sm:$0xff]  ;;  %v5569_v38 = vld [vmem:[#allocation2 + $0x698] sm:$0xff] }
 0x6c4   :  { %9988 = vmatprep.subr.bf16.mxu1 %v9987_v1  ;;  %10018 = vmatpush3.bf16.msra.mxu0 %v10017_v22  ;;  %v5500_v1 = vld [vmem:[#allocation2 + $0x470] sm:$0xff]  ;;  %v10027_v22 = vpack.c.bf16 %v5549_v52, %v5548_v50  ;;  %v5553_v52 = vld [vmem:[#allocation2 + $0x618] sm:$0xff] }
 0x6c5   :  { %8028 = vmatmul.mubr.msk.f32.gmra.mrb[138].mxu1 %vm19678_vm3, %v19592_v53  ;;  %10020 = vmatprep.subr.bf16.mxu0 %v10019_v5  ;;  %v5566_v5 = vld [vmem:[#allocation2 + $0x680] sm:$0xff]  ;;  %v9997_v37 = vpack.c.bf16 %v5501_v35, %v5500_v1  ;;  %vm19688_vm3 = vcmp.eq.s32.totalorder %v19427_v32, %v16086_v55  ;;  %v5552_v50 = vld [vmem:[#allocation2 + $0x610] sm:$0xff] }
 0x6c6   :  { %8060 = vmatmul.mubr.msk.f32.gmra.mrb[154].mxu0 %vm19679_vm0, %v19592_v53  ;;  %8029 = vmatprep.mubr.msk.f32.mxu1 %vm19680_vm9, %v19592_v53  ;;  %vm19689_vm0 = vcmp.eq.s32.totalorder %v15520_v58, %v16086_v55  ;;  %vm19690_vm9 = vcmp.eq.s32.totalorder %v19430_v62, %v16086_v55  ;;  %v5584_v35 = vld [vmem:[#allocation2 + $0x710] sm:$0xff] }
 0x6c7   :  { %8061 = vmatprep.mubr.msk.f32.mxu0 %vm19681_vm6, %v19592_v53  ;;  %9990 = vmatpush3.bf16.msra.mxu1 %v9989_v9  ;;  %v10029_v9 = vpack.c.bf16 %v5533_v56, %v5532_v43  ;;  %vm19691_vm6 = vcmp.eq.s32.totalorder %v19550_v14, %v16086_v55  ;;  %v5602_v43 = vld [vmem:[#allocation2 + $0x7a0] sm:$0xff]  ;;  %v10037_v56 = vpack.c.bf16 %v5553_v52, %v5552_v50  ;;  %v5588_v52 = vld [vmem:[#allocation2 + $0x730] sm:$0xff] }
 0x6c8   :  { %9992 = vmatprep.subr.bf16.mxu1 %v9991_v11  ;;  %10022 = vmatpush3.bf16.msra.mxu0 %v10021_v59  ;;  %v10031_v11 = vpack.c.bf16 %v5567_v51, %v5566_v5  ;;  %v5551_v59 = vld [vmem:[#allocation2 + $0x608] sm:$0xff]  ;;  %v5554_v51 = vld [vmem:[#allocation2 + $0x620] sm:$0xff] }
 0x6c9   :  { %8030 = vmatmul.mubr.msk.f32.gmra.mrb[140].mxu1 %vm19682_vm12, %v19592_v53  ;;  %10024 = vmatprep.subr.bf16.mxu0 %v10023_v34  ;;  %vm19692_vm12 = vcmp.eq.s32.totalorder %v19427_v32, %v16160_v45  ;;  %v5582_v34 = vld [vmem:[#allocation2 + $0x700] sm:$0xff] }
 0x6ca   :  { %8062 = vmatmul.mubr.msk.f32.gmra.mrb[156].mxu0 %vm19683_vm11, %v19592_v53  ;;  %8031 = vmatprep.mubr.msk.f32.mxu1 %vm19684_vm10, %v19592_v53  ;;  %vm19693_vm11 = vcmp.eq.s32.totalorder %v15520_v58, %v16160_v45  ;;  %vm19694_vm10 = vcmp.eq.s32.totalorder %v19430_v62, %v16160_v45 }
 0x6cb   :  { %8063 = vmatprep.mubr.msk.f32.mxu0 %vm19685_vm1, %v19592_v53  ;;  %9994 = vmatpush3.bf16.msra.mxu1 %v9993_v16  ;;  %vm19695_vm1 = vcmp.eq.s32.totalorder %v19550_v14, %v16160_v45  ;;  %v5570_v16 = vld [vmem:[#allocation2 + $0x6a0] sm:$0xff] }
 0x6cc   :  { %9996 = vmatprep.subr.bf16.mxu1 %v9995_v33  ;;  %10026 = vmatpush3.bf16.msra.mxu0 %v10025_v20  ;;  %v10065_v33 = vpack.c.bf16 %v5583_v19, %v5582_v34  ;;  %v5585_v20 = vld [vmem:[#allocation2 + $0x718] sm:$0xff]  ;;  %v5556_v19 = vld [vmem:[#allocation2 + $0x630] sm:$0xff] }
 0x6cd   :  { %8032 = vmatmul.mubr.msk.f32.gmra.mrb[142].mxu1 %vm19686_vm2, %v19592_v53  ;;  %10028 = vmatprep.subr.bf16.mxu0 %v10027_v22  ;;  %vm19696_vm2 = vcmp.eq.s32.totalorder %v19427_v32, %v16218_v8  ;;  %v5603_v22 = vld [vmem:[#allocation2 + $0x7a8] sm:$0xff] }
 0x6ce   :  { %8064 = vmatmul.mubr.msk.f32.gmra.mrb[158].mxu0 %vm19687_vm7, %v19592_v53  ;;  %8033 = vmatprep.mubr.msk.f32.mxu1 %vm19688_vm3, %v19592_v53  ;;  %vm19697_vm7 = vcmp.eq.s32.totalorder %v15520_v58, %v16218_v8  ;;  %vm19698_vm3 = vcmp.eq.s32.totalorder %v19430_v62, %v16218_v8 }
 0x6cf   :  { %8065 = vmatprep.mubr.msk.f32.mxu0 %vm19689_vm0, %v19592_v53  ;;  %9998 = vmatpush3.bf16.msra.mxu1 %v9997_v37  ;;  %vm19699_vm0 = vcmp.eq.s32.totalorder %v19550_v14, %v16218_v8  ;;  %v10069_v37 = vpack.c.bf16 %v5585_v20, %v5584_v35  ;;  %v5558_v20 = vld [vmem:[#allocation2 + $0x640] sm:$0xff] }
 0x6d0   :  { %10030 = vmatpush3.bf16.msra.mxu0 %v10029_v9  ;;  %10032 = vmatprep.subr.bf16.mxu1 %v10031_v11  ;;  %v5573_v9 = vld [vmem:[#allocation2 + $0x6b8] sm:$0xff]  ;;  %v10071_v11 = vpack.c.bf16 %v5603_v22, %v5602_v43  ;;  %v5559_v43 = vld [vmem:[#allocation2 + $0x648] sm:$0xff]  ;;  %v5576_v22 = vld [vmem:[#allocation2 + $0x6d0] sm:$0xff] }
 0x6d1   :  { %8034 = vmatmul.mubr.msk.f32.gmra.mrb[144].mxu1 %vm19690_vm9, %v19592_v53  ;;  %10064 = vmatprep.subr.bf16.mxu0 %v10063_v3  ;;  %vm19700_vm9 = vcmp.eq.s32.totalorder %v19427_v32, %v16277_v0  ;;  %v5586_v3 = vld [vmem:[#allocation2 + $0x720] sm:$0xff]  ;;  %v10043_v34 = vpack.c.bf16 %v5573_v9, %v5572_v46  ;;  %v5591_v46 = vld [vmem:[#allocation2 + $0x748] sm:$0xff]  ;;  %v5609_v9 = vld [vmem:[#allocation2 + $0x7d8] sm:$0xff] }
 0x6d2   :  { %8066 = vmatmul.mubr.msk.f32.gmra.mrb[160].mxu0 %vm19691_vm6, %v19592_v53  ;;  %8035 = vmatprep.mubr.msk.f32.mxu1 %vm19692_vm12, %v19592_v53  ;;  %vm19701_vm6 = vcmp.eq.s32.totalorder %v15520_v58, %v16277_v0  ;;  %vm19702_vm12 = vcmp.eq.s32.totalorder %v19430_v62, %v16277_v0 }
 0x6d3   :  { %8067 = vmatprep.mubr.msk.f32.mxu0 %vm19693_vm11, %v19592_v53  ;;  %vm19703_vm11 = vcmp.eq.s32.totalorder %v19550_v14, %v16277_v0 }
 0x6d5   :  { %8036 = vmatmul.mubr.msk.f32.gmra.mrb[146].mxu1 %vm19694_vm10, %v19592_v53  ;;  %vm19704_vm10 = vcmp.eq.s32.totalorder %v19427_v32, %v16336_v2 }
 0x6d6   :  { %8068 = vmatmul.mubr.msk.f32.gmra.mrb[162].mxu0 %vm19695_vm1, %v19592_v53  ;;  %8037 = vmatprep.mubr.msk.f32.mxu1 %vm19696_vm2, %v19592_v53  ;;  %vm19705_vm1 = vcmp.eq.s32.totalorder %v15520_v58, %v16336_v2  ;;  %vm19706_vm2 = vcmp.eq.s32.totalorder %v19430_v62, %v16336_v2 }
 0x6d7   :  { %8069 = vmatprep.mubr.msk.f32.mxu0 %vm19697_vm7, %v19592_v53  ;;  %vm19707_vm7 = vcmp.eq.s32.totalorder %v19550_v14, %v16336_v2 }
 0x6d9   :  { %8038 = vmatmul.mubr.msk.f32.gmra.mrb[148].mxu1 %vm19698_vm3, %v19592_v53  ;;  %vm19708_vm3 = vcmp.eq.s32.totalorder %v19427_v32, %v16394_v39 }
 0x6da   :  { %8070 = vmatmul.mubr.msk.f32.gmra.mrb[164].mxu0 %vm19699_vm0, %v19592_v53  ;;  %8039 = vmatprep.mubr.msk.f32.mxu1 %vm19700_vm9, %v19592_v53  ;;  %vm19709_vm0 = vcmp.eq.s32.totalorder %v15520_v58, %v16394_v39  ;;  %vm19710_vm9 = vcmp.eq.s32.totalorder %v19430_v62, %v16394_v39 }
 0x6db   :  { %8071 = vmatprep.mubr.msk.f32.mxu0 %vm19701_vm6, %v19592_v53  ;;  %vm19711_vm6 = vcmp.eq.s32.totalorder %v19550_v14, %v16394_v39 }
 0x6dd   :  { %8040 = vmatmul.mubr.msk.f32.gmra.mrb[150].mxu1 %vm19702_vm12, %v19592_v53  ;;  %vm19712_vm12 = vcmp.eq.s32.totalorder %v19427_v32, %v16456_v31 }
 0x6de   :  { %8072 = vmatmul.mubr.msk.f32.gmra.mrb[166].mxu0 %vm19703_vm11, %v19592_v53  ;;  %8041 = vmatprep.mubr.msk.f32.mxu1 %vm19704_vm10, %v19592_v53  ;;  %vm19713_vm11 = vcmp.eq.s32.totalorder %v15520_v58, %v16456_v31  ;;  %vm19714_vm10 = vcmp.eq.s32.totalorder %v19430_v62, %v16456_v31 }
 0x6df   :  { %8073 = vmatprep.mubr.msk.f32.mxu0 %vm19705_vm1, %v19592_v53  ;;  %vm19715_vm1 = vcmp.eq.s32.totalorder %v19550_v14, %v16456_v31 }
 0x6e1   :  { %8042 = vmatmul.mubr.msk.f32.gmra.mrb[152].mxu1 %vm19706_vm2, %v19592_v53  ;;  %vm19716_vm2 = vcmp.eq.s32.totalorder %v19427_v32, %v16507_v17  ;;  %v10033_v32 = vpack.c.bf16 %v5551_v59, %v5550_v13  ;;  %v5587_v13 = vld [vmem:[#allocation2 + $0x728] sm:$0xff]  ;;  %v5604_v59 = vld [vmem:[#allocation2 + $0x7b0] sm:$0xff] }
 0x6e2   :  { %8074 = vmatmul.mubr.msk.f32.gmra.mrb[168].mxu0 %vm19707_vm7, %v19592_v53  ;;  %8043 = vmatprep.mubr.msk.f32.mxu1 %vm19708_vm3, %v19592_v53  ;;  %vm19717_vm7 = vcmp.eq.s32.totalorder %v15520_v58, %v16507_v17  ;;  %vm19718_vm3 = vcmp.eq.s32.totalorder %v19430_v62, %v16507_v17  ;;  %v5600_v58 = vld [vmem:[#allocation2 + $0x790] sm:$0xff]  ;;  %v10035_v62 = vpack.c.bf16 %v5569_v38, %v5568_v10  ;;  %v5605_v10 = vld [vmem:[#allocation2 + $0x7b8] sm:$0xff] }
 0x6e3   :  { %8075 = vmatprep.mubr.msk.f32.mxu0 %vm19709_vm0, %v19592_v53  ;;  %vm19719_vm0 = vcmp.eq.s32.totalorder %v19550_v14, %v16507_v17  ;;  %v5571_v14 = vld [vmem:[#allocation2 + $0x6a8] sm:$0xff]  ;;  %v10067_v1 = vpack.c.bf16 %v5601_v57, %v5600_v58  ;;  %v10041_v38 = vpack.c.bf16 %v5555_v15, %v5554_v51  ;;  %v5574_v58 = vld [vmem:[#allocation2 + $0x6c0] sm:$0xff]  ;;  %v10073_v57 = vpack.c.bf16 %v5587_v13, %v5586_v3  ;;  %v5560_v13 = vld [vmem:[#allocation2 + $0x650] sm:$0xff] }
 0x6e4   :  { %v10039_v5 = vpack.c.bf16 %v5571_v14, %v5570_v16  ;;  %v10075_v50 = vpack.c.bf16 %v5605_v10, %v5604_v59  ;;  %v5589_v16 = vld [vmem:[#allocation2 + $0x738] sm:$0xff]  ;;  %v5607_v14 = vld [vmem:[#allocation2 + $0x7c8] sm:$0xff]  ;;  %v5590_v15 = vld [vmem:[#allocation2 + $0x740] sm:$0xff] }
 0x6e5   :  { %8044 = vmatmul.mubr.msk.f32.gmra.mrb[154].mxu1 %vm19710_vm9, %v19592_v53  ;;  %vm19720_vm9 = vcmp.eq.s32.totalorder %v15526_v42, %v19593_v23  ;;  %v5561_v59 = vld [vmem:[#allocation2 + $0x658] sm:$0xff]  ;;  %v5578_v10 = vld [vmem:[#allocation2 + $0x6e0] sm:$0xff] }
 0x6e6   :  { %8076 = vmatmul.mubr.msk.f32.gmra.mrb[170].mxu0 %vm19711_vm6, %v19592_v53  ;;  %8045 = vmatprep.mubr.msk.f32.mxu1 %vm19712_vm12, %v19592_v53  ;;  %vm19721_vm6 = vcmp.eq.s32.totalorder %v15532_v63, %v19593_v23  ;;  %vm19722_vm12 = vcmp.eq.s32.totalorder %v15523_v47, %v19593_v23 }
 0x6e7   :  { %8077 = vmatprep.mubr.msk.f32.mxu0 %vm19713_vm11, %v19592_v53  ;;  %vm19723_vm11 = vcmp.eq.s32.totalorder %v15529_v18, %v19593_v23 }
 0x6e9   :  { %8046 = vmatmul.mubr.msk.f32.gmra.mrb[156].mxu1 %vm19714_vm10, %v19592_v53  ;;  %vm19724_vm10 = vcmp.eq.s32.totalorder %v15526_v42, %v19594_v21 }
 0x6ea   :  { %8078 = vmatmul.mubr.msk.f32.gmra.mrb[172].mxu0 %vm19715_vm1, %v19592_v53  ;;  %8047 = vmatprep.mubr.msk.f32.mxu1 %vm19716_vm2, %v19592_v53  ;;  %vm19725_vm1 = vcmp.eq.s32.totalorder %v15532_v63, %v19594_v21  ;;  %vm19726_vm2 = vcmp.eq.s32.totalorder %v15523_v47, %v19594_v21 }
 0x6eb   :  { %8079 = vmatprep.mubr.msk.f32.mxu0 %vm19717_vm7, %v19592_v53  ;;  %vm19727_vm7 = vcmp.eq.s32.totalorder %v15529_v18, %v19594_v21 }
 0x6ed   :  { %8048 = vmatmul.mubr.msk.f32.gmra.mrb[158].mxu1 %vm19718_vm3, %v19592_v53  ;;  %vm19728_vm3 = vcmp.eq.s32.totalorder %v15526_v42, %v19595_v48 }
 0x6ee   :  { %8080 = vmatmul.mubr.msk.f32.gmra.mrb[174].mxu0 %vm19719_vm0, %v19592_v53  ;;  %8081 = vmatprep.mubr.msk.f32.mxu1 %vm19720_vm9, %v19592_v53  ;;  %vm19729_vm0 = vcmp.eq.s32.totalorder %v15532_v63, %v19595_v48  ;;  %vm19730_vm9 = vcmp.eq.s32.totalorder %v15523_v47, %v19595_v48 }
 0x6ef   :  { %8113 = vmatprep.mubr.msk.f32.mxu0 %vm19721_vm6, %v19592_v53  ;;  %vm19731_vm6 = vcmp.eq.s32.totalorder %v15529_v18, %v19595_v48 }
 0x6f1   :  { %8082 = vmatmul.mubr.msk.f32.vlgmr.msra.gmra.mrb[160].mxu1 %vm19722_vm12, %v19592_v53  ;;  %vm19732_vm12 = vcmp.eq.s32.totalorder %v15526_v42, %v19599_v6 }
 0x6f2   :  { %10034 = vmatpush3.bf16.msra.mxu1 %v10033_v32  ;;  %8114 = vmatmul.mubr.msk.f32.vlgmr.msra.gmra.mrb[176].mxu0 %vm19723_vm11, %v19592_v53  ;;  %v5557_v32 = vld [vmem:[#allocation2 + $0x638] sm:$0xff]  ;;  %vm19733_vm11 = vcmp.eq.s32.totalorder %v15532_v63, %v19599_v6 }
 0x6f3   :  { %8083 = vmatprep.mubr.msk.f32.mxu1 %vm19724_vm10, %v19592_v53  ;;  %8115 = vmatprep.mubr.msk.f32.mxu0 %vm19725_vm1, %v19592_v53  ;;  %vm19734_vm10 = vcmp.eq.s32.totalorder %v15523_v47, %v19599_v6  ;;  %vm19735_vm1 = vcmp.eq.s32.totalorder %v15529_v18, %v19599_v6 }
 0x6f4   :  { %10036 = vmatprep.subr.bf16.mxu1 %v10035_v62  ;;  %10066 = vmatpush3.bf16.msra.mxu0 %v10065_v33  ;;  %v5575_v62 = vld [vmem:[#allocation2 + $0x6c8] sm:$0xff]  ;;  %v5606_v33 = vld [vmem:[#allocation2 + $0x7c0] sm:$0xff] }
 0x6f5   :  { %8084 = vmatmul.mubr.msk.f32.gmra.mrb[162].mxu1 %vm19726_vm2, %v19592_v53  ;;  %10068 = vmatprep.subr.bf16.mxu0 %v10067_v1  ;;  %v10045_v1 = vpack.c.bf16 %v5557_v32, %v5556_v19  ;;  %v10047_v35 = vpack.c.bf16 %v5575_v62, %v5574_v58  ;;  %v10079_v51 = vpack.c.bf16 %v5607_v14, %v5606_v33  ;;  %v5592_v32 = vld [vmem:[#allocation2 + $0x750] sm:$0xff]  ;;  %v5593_v58 = vld [vmem:[#allocation2 + $0x758] sm:$0xff]  ;;  %v5611_v62 = vld [vmem:[#allocation2 + $0x7e8] sm:$0xff] }
 0x6f6   :  { %8116 = vmatmul.mubr.msk.f32.gmra.mrb[178].mxu0 %vm19727_vm7, %v19592_v53  ;;  %8085 = vmatprep.mubr.msk.f32.mxu1 %vm19728_vm3, %v19592_v53  ;;  %vm19736_vm2 = vcmp.eq.s32.totalorder %v15526_v42, %v19604_v24  ;;  %vm19737_vm7 = vcmp.eq.s32.totalorder %v15532_v63, %v19604_v24  ;;  %vm19738_vm3 = vcmp.eq.s32.totalorder %v15523_v47, %v19604_v24  ;;  %v5563_v33 = vld [vmem:[#allocation2 + $0x668] sm:$0xff] }
 0x6f7   :  { %8117 = vmatprep.mubr.msk.f32.mxu0 %vm19729_vm0, %v19592_v53  ;;  %10038 = vmatpush3.bf16.msra.mxu1 %v10037_v56  ;;  %v10077_v56 = vpack.c.bf16 %v5589_v16, %v5588_v52  ;;  %vm19739_vm0 = vcmp.eq.s32.totalorder %v15529_v18, %v19604_v24  ;;  %v5562_v16 = vld [vmem:[#allocation2 + $0x660] sm:$0xff]  ;;  %v10085_v14 = vpack.c.bf16 %v5593_v58, %v5592_v32 }
 0x6f8   :  { %10040 = vmatprep.subr.bf16.mxu1 %v10039_v5  ;;  %10070 = vmatpush3.bf16.msra.mxu0 %v10069_v37  ;;  %v5577_v5 = vld [vmem:[#allocation2 + $0x6d8] sm:$0xff]  ;;  %v5608_v37 = vld [vmem:[#allocation2 + $0x7d0] sm:$0xff] }
 0x6f9   :  { %8086 = vmatmul.mubr.msk.f32.gmra.mrb[164].mxu1 %vm19730_vm9, %v19592_v53  ;;  %10072 = vmatprep.subr.bf16.mxu0 %v10071_v11  ;;  %v10049_v11 = vpack.c.bf16 %v5559_v43, %v5558_v20  ;;  %v10051_v3 = vpack.c.bf16 %v5577_v5, %v5576_v22  ;;  %v10083_v19 = vpack.c.bf16 %v5609_v9, %v5608_v37  ;;  %v5594_v43 = vld [vmem:[#allocation2 + $0x760] sm:$0xff]  ;;  %v5595_v22 = vld [vmem:[#allocation2 + $0x768] sm:$0xff]  ;;  %v5613_v5 = vld [vmem:[#allocation2 + $0x7f8] sm:$0xff] }
 0x6fa   :  { %8118 = vmatmul.mubr.msk.f32.gmra.mrb[180].mxu0 %vm19731_vm6, %v19592_v53  ;;  %8087 = vmatprep.mubr.msk.f32.mxu1 %vm19732_vm12, %v19592_v53  ;;  %vm19740_vm9 = vcmp.eq.s32.totalorder %v15526_v42, %v19609_v12  ;;  %vm19741_vm6 = vcmp.eq.s32.totalorder %v15532_v63, %v19609_v12  ;;  %vm19742_vm12 = vcmp.eq.s32.totalorder %v15523_v47, %v19609_v12  ;;  %v5565_v37 = vld [vmem:[#allocation2 + $0x678] sm:$0xff] }
 0x6fb   :  { %8119 = vmatprep.mubr.msk.f32.mxu0 %vm19733_vm11, %v19592_v53  ;;  %10042 = vmatpush3.bf16.msra.mxu1 %v10041_v38  ;;  %v10081_v38 = vpack.c.bf16 %v5591_v46, %v5590_v15  ;;  %vm19743_vm11 = vcmp.eq.s32.totalorder %v15529_v18, %v19609_v12  ;;  %v5564_v46 = vld [vmem:[#allocation2 + $0x670] sm:$0xff]  ;;  %v10089_v9 = vpack.c.bf16 %v5595_v22, %v5594_v43  ;;  %v5634_v43 = vld [vmem:[#allocation2 + $0x8a0] sm:$0xff] }
 0x6fc   :  { %10044 = vmatprep.subr.bf16.mxu1 %v10043_v34  ;;  %10074 = vmatpush3.bf16.msra.mxu0 %v10073_v57  ;;  %v5579_v34 = vld [vmem:[#allocation2 + $0x6e8] sm:$0xff]  ;;  %v5610_v57 = vld [vmem:[#allocation2 + $0x7e0] sm:$0xff] }
 0x6fd   :  { %8088 = vmatmul.mubr.msk.f32.gmra.mrb[166].mxu1 %vm19734_vm10, %v19592_v53  ;;  %10076 = vmatprep.subr.bf16.mxu0 %v10075_v50  ;;  %v10053_v50 = vpack.c.bf16 %v5561_v59, %v5560_v13  ;;  %v10055_v52 = vpack.c.bf16 %v5579_v34, %v5578_v10  ;;  %v10087_v20 = vpack.c.bf16 %v5611_v62, %v5610_v57  ;;  %v5597_v13 = vld [vmem:[#allocation2 + $0x778] sm:$0xff]  ;;  %v5630_v59 = vld [vmem:[#allocation2 + $0x880] sm:$0xff]  ;;  %v5631_v10 = vld [vmem:[#allocation2 + $0x888] sm:$0xff] }
 0x6fe   :  { %8120 = vmatmul.mubr.msk.f32.gmra.mrb[182].mxu0 %vm19735_vm1, %v19592_v53  ;;  %8089 = vmatprep.mubr.msk.f32.mxu1 %vm19736_vm2, %v19592_v53  ;;  %vm19744_vm10 = vcmp.eq.s32.totalorder %v15526_v42, %v19614_v49  ;;  %vm19745_vm1 = vcmp.eq.s32.totalorder %v15532_v63, %v19614_v49  ;;  %vm19746_vm2 = vcmp.eq.s32.totalorder %v15523_v47, %v19614_v49  ;;  %v5663_v34 = vld [vmem:[#allocation2 + $0x988] sm:$0xff]  ;;  %v5614_v62 = vld [vmem:[#allocation2 + $0x800] sm:$0xff] }
 0x6ff   :  { %8121 = vmatprep.mubr.msk.f32.mxu0 %vm19737_vm7, %v19592_v53  ;;  %10046 = vmatpush3.bf16.msra.mxu1 %v10045_v1  ;;  %v5580_v1 = vld [vmem:[#allocation2 + $0x6f0] sm:$0xff]  ;;  %vm19747_vm7 = vcmp.eq.s32.totalorder %v15529_v18, %v19614_v49  ;;  %v10095_v58 = vpack.c.bf16 %v5631_v10, %v5630_v59  ;;  %v5637_v10 = vld [vmem:[#allocation2 + $0x8b8] sm:$0xff] }
 0x700   :  { %10048 = vmatprep.subr.bf16.mxu1 %v10047_v35  ;;  %10078 = vmatpush3.bf16.msra.mxu0 %v10077_v56  ;;  %v5581_v35 = vld [vmem:[#allocation2 + $0x6f8] sm:$0xff]  ;;  %v5612_v56 = vld [vmem:[#allocation2 + $0x7f0] sm:$0xff] }
 0x701   :  { %8090 = vmatmul.mubr.msk.f32.gmra.mrb[168].mxu1 %vm19738_vm3, %v19592_v53  ;;  %10080 = vmatprep.subr.bf16.mxu0 %v10079_v51  ;;  %v10057_v51 = vpack.c.bf16 %v5563_v33, %v5562_v16  ;;  %v10059_v15 = vpack.c.bf16 %v5581_v35, %v5580_v1  ;;  %vm19748_vm3 = vcmp.eq.s32.totalorder %v15526_v42, %v19619_v30  ;;  %v5633_v16 = vld [vmem:[#allocation2 + $0x898] sm:$0xff]  ;;  %v5646_v33 = vld [vmem:[#allocation2 + $0x900] sm:$0xff]  ;;  %v5616_v35 = vld [vmem:[#allocation2 + $0x810] sm:$0xff] }
 0x702   :  { %8122 = vmatmul.mubr.msk.f32.gmra.mrb[184].mxu0 %vm19739_vm0, %v19592_v53  ;;  %8091 = vmatprep.mubr.msk.f32.mxu1 %vm19740_vm9, %v19592_v53  ;;  %vm19749_vm0 = vcmp.eq.s32.totalorder %v15532_v63, %v19619_v30  ;;  %vm19750_vm9 = vcmp.eq.s32.totalorder %v15523_v47, %v19619_v30  ;;  %v5665_v1 = vld [vmem:[#allocation2 + $0x998] sm:$0xff] }
 0x703   :  { %8123 = vmatprep.mubr.msk.f32.mxu0 %vm19741_vm6, %v19592_v53  ;;  %10050 = vmatpush3.bf16.msra.mxu1 %v10049_v11  ;;  %v5596_v11 = vld [vmem:[#allocation2 + $0x770] sm:$0xff]  ;;  %vm19751_vm6 = vcmp.eq.s32.totalorder %v15529_v18, %v19619_v30 }
 0x704   :  { %10052 = vmatprep.subr.bf16.mxu1 %v10051_v3  ;;  %10082 = vmatpush3.bf16.msra.mxu0 %v10081_v38  ;;  %v10091_v3 = vpack.c.bf16 %v5613_v5, %v5612_v56  ;;  %v5662_v38 = vld [vmem:[#allocation2 + $0x980] sm:$0xff]  ;;  %v10093_v32 = vpack.c.bf16 %v5597_v13, %v5596_v11  ;;  %v5648_v5 = vld [vmem:[#allocation2 + $0x910] sm:$0xff] }
 0x705   :  { %8092 = vmatmul.mubr.msk.f32.gmra.mrb[170].mxu1 %vm19742_vm12, %v19592_v53  ;;  %10084 = vmatprep.subr.bf16.mxu0 %v10083_v19  ;;  %v10061_v19 = vpack.c.bf16 %v5565_v37, %v5564_v46  ;;  %v10127_v57 = vpack.c.bf16 %v5663_v34, %v5662_v38  ;;  %vm19752_vm12 = vcmp.eq.s32.totalorder %v15526_v42, %v16086_v55  ;;  %v5667_v46 = vld [vmem:[#allocation2 + $0x9a8] sm:$0xff]  ;;  %v5618_v11 = vld [vmem:[#allocation2 + $0x820] sm:$0xff]  ;;  %v5636_v13 = vld [vmem:[#allocation2 + $0x8b0] sm:$0xff] }
 0x706   :  { %8124 = vmatmul.mubr.msk.f32.gmra.mrb[186].mxu0 %vm19743_vm11, %v19592_v53  ;;  %8093 = vmatprep.mubr.msk.f32.mxu1 %vm19744_vm10, %v19592_v53  ;;  %vm19753_vm11 = vcmp.eq.s32.totalorder %v15532_v63, %v16086_v55  ;;  %vm19754_vm10 = vcmp.eq.s32.totalorder %v15523_v47, %v16086_v55  ;;  %v5650_v34 = vld [vmem:[#allocation2 + $0x920] sm:$0xff] }
 0x707   :  { %8125 = vmatprep.mubr.msk.f32.mxu0 %vm19745_vm1, %v19592_v53  ;;  %10054 = vmatpush3.bf16.msra.mxu1 %v10053_v50  ;;  %vm19755_vm1 = vcmp.eq.s32.totalorder %v15529_v18, %v16086_v55  ;;  %v5615_v50 = vld [vmem:[#allocation2 + $0x808] sm:$0xff] }
 0x708   :  { %10056 = vmatprep.subr.bf16.mxu1 %v10055_v52  ;;  %10086 = vmatpush3.bf16.msra.mxu0 %v10085_v14  ;;  %v5632_v52 = vld [vmem:[#allocation2 + $0x890] sm:$0xff]  ;;  %v5647_v14 = vld [vmem:[#allocation2 + $0x908] sm:$0xff] }
 0x709   :  { %8094 = vmatmul.mubr.msk.f32.gmra.mrb[172].mxu1 %vm19746_vm2, %v19592_v53  ;;  %10088 = vmatprep.subr.bf16.mxu0 %v10087_v20  ;;  %vm19756_vm2 = vcmp.eq.s32.totalorder %v15526_v42, %v16160_v45  ;;  %v5617_v20 = vld [vmem:[#allocation2 + $0x818] sm:$0xff]  ;;  %v10129_v22 = vpack.c.bf16 %v5647_v14, %v5646_v33  ;;  %v5639_v14 = vld [vmem:[#allocation2 + $0x8c8] sm:$0xff] }
 0x70a   :  { %8126 = vmatmul.mubr.msk.f32.gmra.mrb[188].mxu0 %vm19747_vm7, %v19592_v53  ;;  %8095 = vmatprep.mubr.msk.f32.mxu1 %vm19748_vm3, %v19592_v53  ;;  %vm19757_vm7 = vcmp.eq.s32.totalorder %v15532_v63, %v16160_v45  ;;  %vm19758_vm3 = vcmp.eq.s32.totalorder %v15523_v47, %v16160_v45  ;;  %v10101_v37 = vpack.c.bf16 %v5617_v20, %v5616_v35  ;;  %v5671_v35 = vld [vmem:[#allocation2 + $0x9c8] sm:$0xff] }
 0x70b   :  { %8127 = vmatprep.mubr.msk.f32.mxu0 %vm19749_vm0, %v19592_v53  ;;  %10058 = vmatpush3.bf16.msra.mxu1 %v10057_v51  ;;  %vm19759_vm0 = vcmp.eq.s32.totalorder %v15529_v18, %v16160_v45  ;;  %v5649_v51 = vld [vmem:[#allocation2 + $0x918] sm:$0xff] }
 0x70c   :  { %10060 = vmatprep.subr.bf16.mxu1 %v10059_v15  ;;  %10090 = vmatpush3.bf16.msra.mxu0 %v10089_v9  ;;  %v5666_v15 = vld [vmem:[#allocation2 + $0x9a0] sm:$0xff]  ;;  %v10133_v59 = vpack.c.bf16 %v5649_v51, %v5648_v5  ;;  %v5641_v51 = vld [vmem:[#allocation2 + $0x8d8] sm:$0xff] }
 0x70d   :  { %8096 = vmatmul.mubr.msk.f32.gmra.mrb[174].mxu1 %vm19750_vm9, %v19592_v53  ;;  %10092 = vmatprep.subr.bf16.mxu0 %v10091_v3  ;;  %vm19760_vm9 = vcmp.eq.s32.totalorder %v15526_v42, %v16218_v8  ;;  %v5619_v3 = vld [vmem:[#allocation2 + $0x828] sm:$0xff]  ;;  %v10135_v38 = vpack.c.bf16 %v5667_v46, %v5666_v15  ;;  %v5654_v46 = vld [vmem:[#allocation2 + $0x940] sm:$0xff] }
 0x70e   :  { %8128 = vmatmul.mubr.msk.f32.gmra.mrb[190].mxu0 %vm19751_vm6, %v19592_v53  ;;  %8097 = vmatprep.mubr.msk.f32.mxu1 %vm19752_vm12, %v19592_v53  ;;  %vm19761_vm6 = vcmp.eq.s32.totalorder %v15532_v63, %v16218_v8  ;;  %vm19762_vm12 = vcmp.eq.s32.totalorder %v15523_v47, %v16218_v8 }
 0x70f   :  { %8129 = vmatprep.mubr.msk.f32.mxu0 %vm19753_vm11, %v19592_v53  ;;  %10062 = vmatpush3.bf16.msra.mxu1 %v10061_v19  ;;  %vm19763_vm11 = vcmp.eq.s32.totalorder %v15529_v18, %v16218_v8  ;;  %v5651_v19 = vld [vmem:[#allocation2 + $0x928] sm:$0xff] }
 0x710   :  { %10094 = vmatpush3.bf16.msra.mxu0 %v10093_v32  ;;  %10096 = vmatprep.subr.bf16.mxu1 %v10095_v58  ;;  %v5668_v32 = vld [vmem:[#allocation2 + $0x9b0] sm:$0xff]  ;;  %v5669_v58 = vld [vmem:[#allocation2 + $0x9b8] sm:$0xff]  ;;  %v10137_v33 = vpack.c.bf16 %v5651_v19, %v5650_v34  ;;  %v5643_v19 = vld [vmem:[#allocation2 + $0x8e8] sm:$0xff] }
 0x711   :  { %8098 = vmatmul.mubr.msk.f32.gmra.mrb[176].mxu1 %vm19754_vm10, %v19592_v53  ;;  %10128 = vmatprep.subr.bf16.mxu0 %v10127_v57  ;;  %vm19764_vm10 = vcmp.eq.s32.totalorder %v15526_v42, %v16277_v0  ;;  %v10105_v57 = vpack.c.bf16 %v5619_v3, %v5618_v11  ;;  %v5673_v11 = vld [vmem:[#allocation2 + $0x9d8] sm:$0xff] }
 0x712   :  { %8130 = vmatmul.mubr.msk.f32.gmra.mrb[192].mxu0 %vm19755_vm1, %v19592_v53  ;;  %8099 = vmatprep.mubr.msk.f32.mxu1 %vm19756_vm2, %v19592_v53  ;;  %vm19765_vm1 = vcmp.eq.s32.totalorder %v15532_v63, %v16277_v0  ;;  %vm19766_vm2 = vcmp.eq.s32.totalorder %v15523_v47, %v16277_v0 }
 0x713   :  { %8131 = vmatprep.mubr.msk.f32.mxu0 %vm19757_vm7, %v19592_v53  ;;  %vm19767_vm7 = vcmp.eq.s32.totalorder %v15529_v18, %v16277_v0 }
 0x715   :  { %8100 = vmatmul.mubr.msk.f32.gmra.mrb[178].mxu1 %vm19758_vm3, %v19592_v53  ;;  %vm19768_vm3 = vcmp.eq.s32.totalorder %v15526_v42, %v16336_v2 }
 0x716   :  { %8132 = vmatmul.mubr.msk.f32.gmra.mrb[194].mxu0 %vm19759_vm0, %v19592_v53  ;;  %8101 = vmatprep.mubr.msk.f32.mxu1 %vm19760_vm9, %v19592_v53  ;;  %vm19769_vm0 = vcmp.eq.s32.totalorder %v15532_v63, %v16336_v2  ;;  %vm19770_vm9 = vcmp.eq.s32.totalorder %v15523_v47, %v16336_v2 }
 0x717   :  { %8133 = vmatprep.mubr.msk.f32.mxu0 %vm19761_vm6, %v19592_v53  ;;  %vm19771_vm6 = vcmp.eq.s32.totalorder %v15529_v18, %v16336_v2 }
 0x719   :  { %8102 = vmatmul.mubr.msk.f32.gmra.mrb[180].mxu1 %vm19762_vm12, %v19592_v53  ;;  %vm19772_vm12 = vcmp.eq.s32.totalorder %v15526_v42, %v16394_v39 }
 0x71a   :  { %8134 = vmatmul.mubr.msk.f32.gmra.mrb[196].mxu0 %vm19763_vm11, %v19592_v53  ;;  %8103 = vmatprep.mubr.msk.f32.mxu1 %vm19764_vm10, %v19592_v53  ;;  %vm19773_vm11 = vcmp.eq.s32.totalorder %v15532_v63, %v16394_v39  ;;  %vm19774_vm10 = vcmp.eq.s32.totalorder %v15523_v47, %v16394_v39 }
 0x71b   :  { %8135 = vmatprep.mubr.msk.f32.mxu0 %vm19765_vm1, %v19592_v53  ;;  %vm19775_vm1 = vcmp.eq.s32.totalorder %v15529_v18, %v16394_v39 }
 0x71d   :  { %8104 = vmatmul.mubr.msk.f32.gmra.mrb[182].mxu1 %vm19766_vm2, %v19592_v53  ;;  %vm19776_vm2 = vcmp.eq.s32.totalorder %v15526_v42, %v16456_v31 }
 0x71e   :  { %8136 = vmatmul.mubr.msk.f32.gmra.mrb[198].mxu0 %vm19767_vm7, %v19592_v53  ;;  %8105 = vmatprep.mubr.msk.f32.mxu1 %vm19768_vm3, %v19592_v53  ;;  %vm19777_vm7 = vcmp.eq.s32.totalorder %v15532_v63, %v16456_v31  ;;  %vm19778_vm3 = vcmp.eq.s32.totalorder %v15523_v47, %v16456_v31 }
 0x71f   :  { %8137 = vmatprep.mubr.msk.f32.mxu0 %vm19769_vm0, %v19592_v53  ;;  %vm19779_vm0 = vcmp.eq.s32.totalorder %v15529_v18, %v16456_v31 }
 0x721   :  { %8106 = vmatmul.mubr.msk.f32.gmra.mrb[184].mxu1 %vm19770_vm9, %v19592_v53  ;;  %vm19780_vm9 = vcmp.eq.s32.totalorder %v15526_v42, %v16507_v17  ;;  %v10097_v42 = vpack.c.bf16 %v5615_v50, %v5614_v62  ;;  %v10107_v62 = vpack.c.bf16 %v5637_v10, %v5636_v13  ;;  %v5620_v50 = vld [vmem:[#allocation2 + $0x830] sm:$0xff]  ;;  %v5625_v10 = vld [vmem:[#allocation2 + $0x858] sm:$0xff] }
 0x722   :  { %8138 = vmatmul.mubr.msk.f32.gmra.mrb[200].mxu0 %vm19771_vm6, %v19592_v53  ;;  %8107 = vmatprep.mubr.msk.f32.mxu1 %vm19772_vm12, %v19592_v53  ;;  %vm19781_vm6 = vcmp.eq.s32.totalorder %v15532_v63, %v16507_v17  ;;  %vm19782_vm12 = vcmp.eq.s32.totalorder %v15523_v47, %v16507_v17  ;;  %v5664_v63 = vld [vmem:[#allocation2 + $0x990] sm:$0xff]  ;;  %v10099_v47 = vpack.c.bf16 %v5633_v16, %v5632_v52  ;;  %v5621_v52 = vld [vmem:[#allocation2 + $0x838] sm:$0xff]  ;;  %v5638_v16 = vld [vmem:[#allocation2 + $0x8c0] sm:$0xff] }
 0x723   :  { %8139 = vmatprep.mubr.msk.f32.mxu0 %vm19773_vm11, %v19592_v53  ;;  %vm19783_vm11 = vcmp.eq.s32.totalorder %v15529_v18, %v16507_v17  ;;  %v5635_v18 = vld [vmem:[#allocation2 + $0x8a8] sm:$0xff]  ;;  %v10131_v56 = vpack.c.bf16 %v5665_v1, %v5664_v63  ;;  %v5652_v63 = vld [vmem:[#allocation2 + $0x930] sm:$0xff]  ;;  %v5653_v1 = vld [vmem:[#allocation2 + $0x938] sm:$0xff]  ;;  %v10109_v20 = vpack.c.bf16 %v5621_v52, %v5620_v50 }
 0x724   :  { %v10103_v9 = vpack.c.bf16 %v5635_v18, %v5634_v43  ;;  %v10111_v43 = vpack.c.bf16 %v5639_v14, %v5638_v16  ;;  %v5623_v18 = vld [vmem:[#allocation2 + $0x848] sm:$0xff]  ;;  %v10141_v5 = vpack.c.bf16 %v5653_v1, %v5652_v63  ;;  %v5626_v14 = vld [vmem:[#allocation2 + $0x860] sm:$0xff] }
 0x725   :  { %8108 = vmatmul.mubr.msk.f32.gmra.mrb[186].mxu1 %vm19774_vm10, %v19592_v53  ;;  %vm19784_vm10 = vcmp.eq.s32.totalorder %v15538_v54, %v19593_v23  ;;  %v5675_v50 = vld [vmem:[#allocation2 + $0x9e8] sm:$0xff]  ;;  %v5658_v1 = vld [vmem:[#allocation2 + $0x960] sm:$0xff] }
 0x726   :  { %8140 = vmatmul.mubr.msk.f32.gmra.mrb[202].mxu0 %vm19775_vm1, %v19592_v53  ;;  %8109 = vmatprep.mubr.msk.f32.mxu1 %vm19776_vm2, %v19592_v53  ;;  %vm19785_vm1 = vcmp.eq.s32.totalorder %v15544_v25, %v19593_v23  ;;  %vm19786_vm2 = vcmp.eq.s32.totalorder %v15535_v28, %v19593_v23 }
 0x727   :  { %8141 = vmatprep.mubr.msk.f32.mxu0 %vm19777_vm7, %v19592_v53  ;;  %vm19787_vm7 = vcmp.eq.s32.totalorder %v15541_v7, %v19593_v23 }
 0x729   :  { %8110 = vmatmul.mubr.msk.f32.gmra.mrb[188].mxu1 %vm19778_vm3, %v19592_v53  ;;  %vm19788_vm3 = vcmp.eq.s32.totalorder %v15538_v54, %v19594_v21 }
 0x72a   :  { %8142 = vmatmul.mubr.msk.f32.gmra.mrb[204].mxu0 %vm19779_vm0, %v19592_v53  ;;  %8111 = vmatprep.mubr.msk.f32.mxu1 %vm19780_vm9, %v19592_v53  ;;  %vm19789_vm0 = vcmp.eq.s32.totalorder %v15544_v25, %v19594_v21  ;;  %vm19790_vm9 = vcmp.eq.s32.totalorder %v15535_v28, %v19594_v21 }
 0x72b   :  { %8143 = vmatprep.mubr.msk.f32.mxu0 %vm19781_vm6, %v19592_v53  ;;  %vm19791_vm6 = vcmp.eq.s32.totalorder %v15541_v7, %v19594_v21 }
 0x72d   :  { %8112 = vmatmul.mubr.msk.f32.gmra.mrb[190].mxu1 %vm19782_vm12, %v19592_v53  ;;  %vm19792_vm12 = vcmp.eq.s32.totalorder %v15538_v54, %v19595_v48 }
 0x72e   :  { %8144 = vmatmul.mubr.msk.f32.gmra.mrb[206].mxu0 %vm19783_vm11, %v19592_v53  ;;  %8145 = vmatprep.mubr.msk.f32.mxu1 %vm19784_vm10, %v19592_v53  ;;  %vm19793_vm11 = vcmp.eq.s32.totalorder %v15544_v25, %v19595_v48  ;;  %vm19794_vm10 = vcmp.eq.s32.totalorder %v15535_v28, %v19595_v48 }
 0x72f   :  { %8177 = vmatprep.mubr.msk.f32.mxu0 %vm19785_vm1, %v19592_v53  ;;  %vm19795_vm1 = vcmp.eq.s32.totalorder %v15541_v7, %v19595_v48 }
 0x731   :  { %8146 = vmatmul.mubr.msk.f32.vlgmr.msra.gmra.mrb[192].mxu1 %vm19786_vm2, %v19592_v53  ;;  %vm19796_vm2 = vcmp.eq.s32.totalorder %v15538_v54, %v19599_v6 }
 0x732   :  { %10098 = vmatpush3.bf16.msra.mxu1 %v10097_v42  ;;  %8178 = vmatmul.mubr.msk.f32.vlgmr.msra.gmra.mrb[208].mxu0 %vm19787_vm7, %v19592_v53  ;;  %v10139_v42 = vpack.c.bf16 %v5669_v58, %v5668_v32  ;;  %vm19797_vm7 = vcmp.eq.s32.totalorder %v15544_v25, %v19599_v6  ;;  %v5656_v58 = vld [vmem:[#allocation2 + $0x950] sm:$0xff] }
 0x733   :  { %8147 = vmatprep.mubr.msk.f32.mxu1 %vm19788_vm3, %v19592_v53  ;;  %8179 = vmatprep.mubr.msk.f32.mxu0 %vm19789_vm0, %v19592_v53  ;;  %vm19798_vm3 = vcmp.eq.s32.totalorder %v15535_v28, %v19599_v6  ;;  %vm19799_vm0 = vcmp.eq.s32.totalorder %v15541_v7, %v19599_v6 }
 0x734   :  { %10100 = vmatprep.subr.bf16.mxu1 %v10099_v47  ;;  %10130 = vmatpush3.bf16.msra.mxu0 %v10129_v22  ;;  %v5670_v47 = vld [vmem:[#allocation2 + $0x9c0] sm:$0xff] }
 0x735   :  { %8148 = vmatmul.mubr.msk.f32.gmra.mrb[194].mxu1 %vm19790_vm9, %v19592_v53  ;;  %10132 = vmatprep.subr.bf16.mxu0 %v10131_v56  ;;  %v5622_v22 = vld [vmem:[#allocation2 + $0x840] sm:$0xff]  ;;  %v5640_v56 = vld [vmem:[#allocation2 + $0x8d0] sm:$0xff]  ;;  %v10143_v15 = vpack.c.bf16 %v5671_v35, %v5670_v47  ;;  %vm19800_vm9 = vcmp.eq.s32.totalorder %v15538_v54, %v19604_v24 }
 0x736   :  { %8180 = vmatmul.mubr.msk.f32.gmra.mrb[210].mxu0 %vm19791_vm6, %v19592_v53  ;;  %8149 = vmatprep.mubr.msk.f32.mxu1 %vm19792_vm12, %v19592_v53  ;;  %vm19801_vm6 = vcmp.eq.s32.totalorder %v15544_v25, %v19604_v24  ;;  %v10113_v3 = vpack.c.bf16 %v5623_v18, %v5622_v22  ;;  %v10115_v13 = vpack.c.bf16 %v5641_v51, %v5640_v56  ;;  %v5659_v18 = vld [vmem:[#allocation2 + $0x968] sm:$0xff]  ;;  %v5676_v51 = vld [vmem:[#allocation2 + $0x9f0] sm:$0xff] }
 0x737   :  { %8181 = vmatprep.mubr.msk.f32.mxu0 %vm19793_vm11, %v19592_v53  ;;  %10102 = vmatpush3.bf16.msra.mxu1 %v10101_v37  ;;  %v5655_v37 = vld [vmem:[#allocation2 + $0x948] sm:$0xff]  ;;  %vm19802_vm12 = vcmp.eq.s32.totalorder %v15535_v28, %v19604_v24  ;;  %vm19803_vm11 = vcmp.eq.s32.totalorder %v15541_v7, %v19604_v24 }
 0x738   :  { %10104 = vmatprep.subr.bf16.mxu1 %v10103_v9  ;;  %10134 = vmatpush3.bf16.msra.mxu0 %v10133_v59  ;;  %v5672_v9 = vld [vmem:[#allocation2 + $0x9d0] sm:$0xff]  ;;  %v10145_v34 = vpack.c.bf16 %v5655_v37, %v5654_v46 }
 0x739   :  { %8150 = vmatmul.mubr.msk.f32.gmra.mrb[196].mxu1 %vm19794_vm10, %v19592_v53  ;;  %10136 = vmatprep.subr.bf16.mxu0 %v10135_v38  ;;  %v5624_v59 = vld [vmem:[#allocation2 + $0x850] sm:$0xff]  ;;  %v5642_v38 = vld [vmem:[#allocation2 + $0x8e0] sm:$0xff]  ;;  %v10147_v32 = vpack.c.bf16 %v5673_v11, %v5672_v9  ;;  %vm19804_vm10 = vcmp.eq.s32.totalorder %v15538_v54, %v19609_v12 }
 0x73a   :  { %8182 = vmatmul.mubr.msk.f32.gmra.mrb[212].mxu0 %vm19795_vm1, %v19592_v53  ;;  %8151 = vmatprep.mubr.msk.f32.mxu1 %vm19796_vm2, %v19592_v53  ;;  %vm19805_vm1 = vcmp.eq.s32.totalorder %v15544_v25, %v19609_v12  ;;  %v10117_v52 = vpack.c.bf16 %v5625_v10, %v5624_v59  ;;  %vm19806_vm2 = vcmp.eq.s32.totalorder %v15535_v28, %v19609_v12  ;;  %v5660_v10 = vld [vmem:[#allocation2 + $0x970] sm:$0xff] }
 0x73b   :  { %8183 = vmatprep.mubr.msk.f32.mxu0 %vm19797_vm7, %v19592_v53  ;;  %10106 = vmatpush3.bf16.msra.mxu1 %v10105_v57  ;;  %v5657_v57 = vld [vmem:[#allocation2 + $0x958] sm:$0xff]  ;;  %vm19807_vm7 = vcmp.eq.s32.totalorder %v15541_v7, %v19609_v12  ;;  %v10153_v59 = vpack.c.bf16 %v5659_v18, %v5658_v1 }
 0x73c   :  { %10108 = vmatprep.subr.bf16.mxu1 %v10107_v62  ;;  %10138 = vmatpush3.bf16.msra.mxu0 %v10137_v33  ;;  %v5674_v62 = vld [vmem:[#allocation2 + $0x9e0] sm:$0xff]  ;;  %v10119_v33 = vpack.c.bf16 %v5643_v19, %v5642_v38  ;;  %v10149_v63 = vpack.c.bf16 %v5657_v57, %v5656_v58  ;;  %v5661_v58 = vld [vmem:[#allocation2 + $0x978] sm:$0xff] }
 0x73d   :  { %8152 = vmatmul.mubr.msk.f32.gmra.mrb[198].mxu1 %vm19798_vm3, %v19592_v53  ;;  %10140 = vmatprep.subr.bf16.mxu0 %v10139_v42  ;;  %v5627_v42 = vld [vmem:[#allocation2 + $0x868] sm:$0xff]  ;;  %v10151_v22 = vpack.c.bf16 %v5675_v50, %v5674_v62  ;;  %vm19808_vm3 = vcmp.eq.s32.totalorder %v15538_v54, %v19614_v49  ;;  %v5694_v57 = vld [vmem:[#allocation2 + $0xa80] sm:$0xff]  ;;  %v10157_v1 = vpack.c.bf16 %v5661_v58, %v5660_v10 }
 0x73e   :  { %8184 = vmatmul.mubr.msk.f32.gmra.mrb[214].mxu0 %vm19799_vm0, %v19592_v53  ;;  %8153 = vmatprep.mubr.msk.f32.mxu1 %vm19800_vm9, %v19592_v53  ;;  %vm19809_vm0 = vcmp.eq.s32.totalorder %v15544_v25, %v19614_v49  ;;  %v10121_v37 = vpack.c.bf16 %v5627_v42, %v5626_v14  ;;  %vm19810_vm9 = vcmp.eq.s32.totalorder %v15535_v28, %v19614_v49  ;;  %v5695_v62 = vld [vmem:[#allocation2 + $0xa88] sm:$0xff] }
 0x73f   :  { %8185 = vmatprep.mubr.msk.f32.mxu0 %vm19801_vm6, %v19592_v53  ;;  %10110 = vmatpush3.bf16.msra.mxu1 %v10109_v20  ;;  %v5644_v20 = vld [vmem:[#allocation2 + $0x8f0] sm:$0xff]  ;;  %vm19811_vm6 = vcmp.eq.s32.totalorder %v15541_v7, %v19614_v49 }
 0x740   :  { %10112 = vmatprep.subr.bf16.mxu1 %v10111_v43  ;;  %10142 = vmatpush3.bf16.msra.mxu0 %v10141_v5  ;;  %v5645_v43 = vld [vmem:[#allocation2 + $0x8f8] sm:$0xff] }
 0x741   :  { %8154 = vmatmul.mubr.msk.f32.gmra.mrb[200].mxu1 %vm19802_vm12, %v19592_v53  ;;  %10144 = vmatprep.subr.bf16.mxu0 %v10143_v15  ;;  %v5677_v15 = vld [vmem:[#allocation2 + $0x9f8] sm:$0xff]  ;;  %v10123_v11 = vpack.c.bf16 %v5645_v43, %v5644_v20  ;;  %vm19812_vm12 = vcmp.eq.s32.totalorder %v15538_v54, %v19619_v30 }
 0x742   :  { %8186 = vmatmul.mubr.msk.f32.gmra.mrb[216].mxu0 %vm19803_vm11, %v19592_v53  ;;  %8155 = vmatprep.mubr.msk.f32.mxu1 %vm19804_vm10, %v19592_v53  ;;  %vm19813_vm11 = vcmp.eq.s32.totalorder %v15544_v25, %v19619_v30  ;;  %vm19814_vm10 = vcmp.eq.s32.totalorder %v15535_v28, %v19619_v30 }
 0x743   :  { %8187 = vmatprep.mubr.msk.f32.mxu0 %vm19805_vm1, %v19592_v53  ;;  %10114 = vmatpush3.bf16.msra.mxu1 %v10113_v3  ;;  %v5628_v3 = vld [vmem:[#allocation2 + $0x870] sm:$0xff]  ;;  %vm19815_vm1 = vcmp.eq.s32.totalorder %v15541_v7, %v19619_v30 }
 0x744   :  { %v8647_v16 = vpop.f32.mrb[96].mxu1  ;;  %10116 = vmatprep.subr.bf16.mxu1 %v10115_v13  ;;  %10146 = vmatpush3.bf16.msra.mxu0 %v10145_v34  ;;  %v5629_v13 = vld [vmem:[#allocation2 + $0x878] sm:$0xff] }
 0x745   :  { %v8727_v47 = vpop.f32.mrb[112].mxu0  ;;  %v8648_v35 = vpop.f32.mrb[97].mxu1  ;;  %8156 = vmatmul.mubr.msk.f32.gmra.mrb[202].mxu1 %vm19806_vm2, %v19592_v53  ;;  %10148 = vmatprep.subr.bf16.mxu0 %v10147_v32  ;;  %v10155_v32 = vpack.c.bf16 %v5677_v15, %v5676_v51  ;;  %v10125_v42 = vpack.c.bf16 %v5629_v13, %v5628_v3  ;;  %vm19816_vm2 = vcmp.eq.s32.totalorder %v15538_v54, %v16086_v55 }
 0x746   :  { %v8649_v56 = vadd.f32 %v8648_v35, %v8647_v16  ;;  %v8728_v5 = vpop.f32.mrb[113].mxu0  ;;  %8188 = vmatmul.mubr.msk.f32.gmra.mrb[218].mxu0 %vm19807_vm7, %v19592_v53  ;;  %8157 = vmatprep.mubr.msk.f32.mxu1 %vm19808_vm3, %v19592_v53  ;;  %v5726_v16 = vld [vmem:[#allocation2 + $0xb80] sm:$0xff]  ;;  %vm19817_vm7 = vcmp.eq.s32.totalorder %v15544_v25, %v16086_v55  ;;  %vm19818_vm3 = vcmp.eq.s32.totalorder %v15535_v28, %v16086_v55 }
 0x747   :  { %v8729_v46 = vadd.f32 %v8728_v5, %v8727_v47  ;;  %8189 = vmatprep.mubr.msk.f32.mxu0 %vm19809_vm0, %v19592_v53  ;;  %10118 = vmatpush3.bf16.msra.mxu1 %v10117_v52  ;;  %v10159_v47 = vpack.c.bf16 %v5695_v62, %v5694_v57  ;;  %vm19819_vm0 = vcmp.eq.s32.totalorder %v15541_v7, %v16086_v55 }
 0x748   :  { %v8650_v9 = vpop.f32.mrb[98].mxu1  ;;  %10120 = vmatprep.subr.bf16.mxu1 %v10119_v33  ;;  %10150 = vmatpush3.bf16.msra.mxu0 %v10149_v63  ;;  %v5727_v33 = vld [vmem:[#allocation2 + $0xb88] sm:$0xff] }
 0x749   :  { %v17513_v38 = vadd.f32 %v8729_v46, %v8649_v56  ;;  %v8730_v34 = vpop.f32.mrb[114].mxu0  ;;  %v8651_v19 = vpop.f32.mrb[99].mxu1  ;;  %8158 = vmatmul.mubr.msk.f32.gmra.mrb[204].mxu1 %vm19810_vm9, %v19592_v53  ;;  %10152 = vmatprep.subr.bf16.mxu0 %v10151_v22  ;;  %v10191_v22 = vpack.c.bf16 %v5727_v33, %v5726_v16  ;;  %vm19820_vm9 = vcmp.eq.s32.totalorder %v15538_v54, %v16160_v45 }
 0x74a   :  { %v8652_v50 = vadd.f32 %v8651_v19, %v8650_v9  ;;  %v8731_v52 = vpop.f32.mrb[115].mxu0  ;;  %8190 = vmatmul.mubr.msk.f32.gmra.mrb[220].mxu0 %vm19811_vm6, %v19592_v53  ;;  %8159 = vmatprep.mubr.msk.f32.mxu1 %vm19812_vm12, %v19592_v53  ;;  %vm19821_vm6 = vcmp.eq.s32.totalorder %v15544_v25, %v16160_v45  ;;  %vm19822_vm12 = vcmp.eq.s32.totalorder %v15535_v28, %v16160_v45 }
 0x74b   :  { %v8732_v14 = vadd.f32 %v8731_v52, %v8730_v34  ;;  %8191 = vmatprep.mubr.msk.f32.mxu0 %vm19813_vm11, %v19592_v53  ;;  %10122 = vmatpush3.bf16.msra.mxu1 %v10121_v37  ;;  %vm19823_vm11 = vcmp.eq.s32.totalorder %v15541_v7, %v16160_v45 }
 0x74c   :  { %v8653_v63 = vpop.f32.mrb[100].mxu1  ;;  %10124 = vmatprep.subr.bf16.mxu1 %v10123_v11  ;;  %10154 = vmatpush3.bf16.msra.mxu0 %v10153_v59 }
 0x74d   :  { %v17531_v35 = vadd.f32 %v8732_v14, %v8652_v50  ;;  %v8733_v20 = vpop.f32.mrb[116].mxu0  ;;  %v8654_v43 = vpop.f32.mrb[101].mxu1  ;;  %8160 = vmatmul.mubr.msk.f32.gmra.mrb[206].mxu1 %vm19814_vm10, %v19592_v53  ;;  %10156 = vmatprep.subr.bf16.mxu0 %v10155_v32  ;;  %vm19824_vm10 = vcmp.eq.s32.totalorder %v15538_v54, %v16218_v8 }
 0x74e   :  { %v8655_v18 = vadd.f32 %v8654_v43, %v8653_v63  ;;  %v8734_v56 = vpop.f32.mrb[117].mxu0  ;;  %8192 = vmatmul.mubr.msk.f32.gmra.mrb[222].mxu0 %vm19815_vm1, %v19592_v53  ;;  %8161 = vmatprep.mubr.msk.f32.mxu1 %vm19816_vm2, %v19592_v53  ;;  %vm19825_vm1 = vcmp.eq.s32.totalorder %v15544_v25, %v16218_v8  ;;  %vm19826_vm2 = vcmp.eq.s32.totalorder %v15535_v28, %v16218_v8 }
 0x74f   :  { %v8735_v5 = vadd.f32 %v8734_v56, %v8733_v20  ;;  %8193 = vmatprep.mubr.msk.f32.mxu0 %vm19817_vm7, %v19592_v53  ;;  %10126 = vmatpush3.bf16.msra.mxu1 %v10125_v42  ;;  %vm19827_vm7 = vcmp.eq.s32.totalorder %v15541_v7, %v16218_v8 }
 0x750   :  { %v8656_v51 = vpop.f32.mrb[102].mxu1  ;;  %10158 = vmatpush3.bf16.msra.mxu0 %v10157_v1  ;;  %10160 = vmatprep.subr.bf16.mxu1 %v10159_v47 }
 0x751   :  { %v17549_v15 = vadd.f32 %v8735_v5, %v8655_v18  ;;  %v8736_v46 = vpop.f32.mrb[118].mxu0  ;;  %v8657_v37 = vpop.f32.mrb[103].mxu1  ;;  %8162 = vmatmul.mubr.msk.f32.gmra.mrb[208].mxu1 %vm19818_vm3, %v19592_v53  ;;  %10192 = vmatprep.subr.bf16.mxu0 %v10191_v22  ;;  %vm19828_vm3 = vcmp.eq.s32.totalorder %v15538_v54, %v16277_v0 }
 0x752   :  { %v8658_v9 = vadd.f32 %v8657_v37, %v8656_v51  ;;  %v8737_v11 = vpop.f32.mrb[119].mxu0  ;;  %8194 = vmatmul.mubr.msk.f32.gmra.mrb[224].mxu0 %vm19819_vm0, %v19592_v53  ;;  %8163 = vmatprep.mubr.msk.f32.mxu1 %vm19820_vm9, %v19592_v53  ;;  %vm19829_vm0 = vcmp.eq.s32.totalorder %v15544_v25, %v16277_v0  ;;  %vm19830_vm9 = vcmp.eq.s32.totalorder %v15535_v28, %v16277_v0 }
 0x753   :  { %v8738_v3 = vadd.f32 %v8737_v11, %v8736_v46  ;;  %8195 = vmatprep.mubr.msk.f32.mxu0 %vm19821_vm6, %v19592_v53  ;;  %vm19831_vm6 = vcmp.eq.s32.totalorder %v15541_v7, %v16277_v0 }
 0x754   :  { %v8659_v13 = vpop.f32.mrb[104].mxu1 }
 0x755   :  { %v17567_v59 = vadd.f32 %v8738_v3, %v8658_v9  ;;  %v8739_v10 = vpop.f32.mrb[120].mxu0  ;;  %v8660_v34 = vpop.f32.mrb[105].mxu1  ;;  %8164 = vmatmul.mubr.msk.f32.gmra.mrb[210].mxu1 %vm19822_vm12, %v19592_v53  ;;  %vm19832_vm12 = vcmp.eq.s32.totalorder %v15538_v54, %v16336_v2 }
 0x756   :  { %v8661_v19 = vadd.f32 %v8660_v34, %v8659_v13  ;;  %v8740_v32 = vpop.f32.mrb[121].mxu0  ;;  %8196 = vmatmul.mubr.msk.f32.gmra.mrb[226].mxu0 %vm19823_vm11, %v19592_v53  ;;  %8165 = vmatprep.mubr.msk.f32.mxu1 %vm19824_vm10, %v19592_v53  ;;  %vm19833_vm11 = vcmp.eq.s32.totalorder %v15544_v25, %v16336_v2  ;;  %vm19834_vm10 = vcmp.eq.s32.totalorder %v15535_v28, %v16336_v2 }
 0x757   :  { %v8741_v58 = vadd.f32 %v8740_v32, %v8739_v10  ;;  %8197 = vmatprep.mubr.msk.f32.mxu0 %vm19825_vm1, %v19592_v53  ;;  %vm19835_vm1 = vcmp.eq.s32.totalorder %v15541_v7, %v16336_v2 }
 0x758   :  { %v8662_v57 = vpop.f32.mrb[106].mxu1 }
 0x759   :  { %v17585_v62 = vadd.f32 %v8741_v58, %v8661_v19  ;;  %v8742_v50 = vpop.f32.mrb[122].mxu0  ;;  %v8663_v52 = vpop.f32.mrb[107].mxu1  ;;  %8166 = vmatmul.mubr.msk.f32.gmra.mrb[212].mxu1 %vm19826_vm2, %v19592_v53  ;;  %vm19836_vm2 = vcmp.eq.s32.totalorder %v15538_v54, %v16394_v39 }
 0x75a   :  { %v8664_v16 = vadd.f32 %v8663_v52, %v8662_v57  ;;  %v8743_v33 = vpop.f32.mrb[123].mxu0  ;;  %8198 = vmatmul.mubr.msk.f32.gmra.mrb[228].mxu0 %vm19827_vm7, %v19592_v53  ;;  %8167 = vmatprep.mubr.msk.f32.mxu1 %vm19828_vm3, %v19592_v53  ;;  %vm19837_vm7 = vcmp.eq.s32.totalorder %v15544_v25, %v16394_v39  ;;  %vm19838_vm3 = vcmp.eq.s32.totalorder %v15535_v28, %v16394_v39 }
 0x75b   :  { %v8744_v14 = vadd.f32 %v8743_v33, %v8742_v50  ;;  %8199 = vmatprep.mubr.msk.f32.mxu0 %vm19829_vm0, %v19592_v53  ;;  %vm19839_vm0 = vcmp.eq.s32.totalorder %v15541_v7, %v16394_v39 }
 0x75c   :  { %v8665_v42 = vpop.f32.mrb[108].mxu1 }
 0x75d   :  { %v17603_v63 = vadd.f32 %v8744_v14, %v8664_v16  ;;  %v8745_v1 = vpop.f32.mrb[124].mxu0  ;;  %v8666_v47 = vpop.f32.mrb[109].mxu1  ;;  %8168 = vmatmul.mubr.msk.f32.gmra.mrb[214].mxu1 %vm19830_vm9, %v19592_v53  ;;  %vm19840_vm9 = vcmp.eq.s32.totalorder %v15538_v54, %v16456_v31 }
 0x75e   :  { %v8667_v20 = vadd.f32 %v8666_v47, %v8665_v42  ;;  %v8746_v43 = vpop.f32.mrb[125].mxu0  ;;  %8200 = vmatmul.mubr.msk.f32.gmra.mrb[230].mxu0 %vm19831_vm6, %v19592_v53  ;;  %8169 = vmatprep.mubr.msk.f32.mxu1 %vm19832_vm12, %v19592_v53  ;;  %vm19841_vm6 = vcmp.eq.s32.totalorder %v15544_v25, %v16456_v31  ;;  %vm19842_vm12 = vcmp.eq.s32.totalorder %v15535_v28, %v16456_v31  ;;  %v5678_v42 = vld [vmem:[#allocation2 + $0xa00] sm:$0xff] }
 0x75f   :  { %v8747_v22 = vadd.f32 %v8746_v43, %v8745_v1  ;;  %8201 = vmatprep.mubr.msk.f32.mxu0 %vm19833_vm11, %v19592_v53  ;;  %vm19843_vm11 = vcmp.eq.s32.totalorder %v15541_v7, %v16456_v31  ;;  %v5679_v1 = vld [vmem:[#allocation2 + $0xa08] sm:$0xff] }
 0x760   :  { %v8668_v18 = vpop.f32.mrb[110].mxu1 }
 0x761   :  { %v17621_v56 = vadd.f32 %v8747_v22, %v8667_v20  ;;  %v8748_v5 = vpop.f32.mrb[126].mxu0  ;;  %v8669_v51 = vpop.f32.mrb[111].mxu1  ;;  %8170 = vmatmul.mubr.msk.f32.gmra.mrb[216].mxu1 %vm19834_vm10, %v19592_v53  ;;  %vm19844_vm10 = vcmp.eq.s32.totalorder %v15538_v54, %v16507_v17  ;;  %v5696_v20 = vld [vmem:[#allocation2 + $0xa90] sm:$0xff]  ;;  %v5697_v54 = vld [vmem:[#allocation2 + $0xa98] sm:$0xff] }
 0x762   :  { %v8670_v46 = vadd.f32 %v8669_v51, %v8668_v18  ;;  %v8749_v37 = vpop.f32.mrb[127].mxu0  ;;  %8202 = vmatmul.mubr.msk.f32.gmra.mrb[232].mxu0 %vm19835_vm1, %v19592_v53  ;;  %8171 = vmatprep.mubr.msk.f32.mxu1 %vm19836_vm2, %v19592_v53  ;;  %vm19845_vm1 = vcmp.eq.s32.totalorder %v15544_v25, %v16507_v17  ;;  %vm19846_vm2 = vcmp.eq.s32.totalorder %v15535_v28, %v16507_v17  ;;  %v5711_v51 = vld [vmem:[#allocation2 + $0xb08] sm:$0xff] }
 0x763   :  { %v8750_v9 = vadd.f32 %v8749_v37, %v8748_v5  ;;  %8203 = vmatprep.mubr.msk.f32.mxu0 %vm19837_vm7, %v19592_v53  ;;  %v5710_v5 = vld [vmem:[#allocation2 + $0xb00] sm:$0xff]  ;;  %vm19847_vm7 = vcmp.eq.s32.totalorder %v15541_v7, %v16507_v17  ;;  %v10161_v25 = vpack.c.bf16 %v5679_v1, %v5678_v42  ;;  %v5713_v42 = vld [vmem:[#allocation2 + $0xb18] sm:$0xff] }
 0x764   :  { %v8671_v11 = vpop.f32.mrb[112].mxu1  ;;  %v5698_v7 = vld [vmem:[#allocation2 + $0xaa0] sm:$0xff] }
 0x765   :  { %v17639_v3 = vadd.f32 %v8750_v9, %v8670_v46  ;;  %v8751_v13 = vpop.f32.mrb[128].mxu0  ;;  %v8672_v10 = vpop.f32.mrb[113].mxu1  ;;  %8172 = vmatmul.mubr.msk.f32.gmra.mrb[218].mxu1 %vm19838_vm3, %v19592_v53  ;;  %vm19848_vm3 = vcmp.eq.s32.totalorder %v15552_v41, %v19593_v23  ;;  %v5728_v9 = vld [vmem:[#allocation2 + $0xb90] sm:$0xff] }
 0x766   :  { %v8673_v34 = vadd.f32 %v8672_v10, %v8671_v11  ;;  %v8752_v19 = vpop.f32.mrb[129].mxu0  ;;  %8204 = vmatmul.mubr.msk.f32.gmra.mrb[234].mxu0 %vm19839_vm0, %v19592_v53  ;;  %8173 = vmatprep.mubr.msk.f32.mxu1 %vm19840_vm9, %v19592_v53  ;;  %v5729_v11 = vld [vmem:[#allocation2 + $0xb98] sm:$0xff]  ;;  %vm19849_vm0 = vcmp.eq.s32.totalorder %v15558_v60, %v19593_v23  ;;  %v10163_v10 = vpack.c.bf16 %v5697_v54, %v5696_v20  ;;  %v5730_v20 = vld [vmem:[#allocation2 + $0xba0] sm:$0xff] }
 0x767   :  { %v8753_v32 = vadd.f32 %v8752_v19, %v8751_v13  ;;  %8205 = vmatprep.mubr.msk.f32.mxu0 %vm19841_vm6, %v19592_v53  ;;  %v5681_v19 = vld [vmem:[#allocation2 + $0xa18] sm:$0xff]  ;;  %vm19850_vm9 = vcmp.eq.s32.totalorder %v15549_v40, %v19593_v23  ;;  %vm19851_vm6 = vcmp.eq.s32.totalorder %v15555_v29, %v19593_v23 }
 0x768   :  { %v8674_v58 = vpop.f32.mrb[114].mxu1 }
 0x769   :  { %v17657_v57 = vadd.f32 %v8753_v32, %v8673_v34  ;;  %v8754_v50 = vpop.f32.mrb[130].mxu0  ;;  %v8675_v52 = vpop.f32.mrb[115].mxu1  ;;  %8174 = vmatmul.mubr.msk.f32.gmra.mrb[220].mxu1 %vm19842_vm12, %v19592_v53  ;;  %v5680_v34 = vld [vmem:[#allocation2 + $0xa10] sm:$0xff]  ;;  %v10193_v32 = vpack.c.bf16 %v5711_v51, %v5710_v5  ;;  %vm19852_vm12 = vcmp.eq.s32.totalorder %v15552_v41, %v19594_v21 }
 0x76a   :  { %v8676_v16 = vadd.f32 %v8675_v52, %v8674_v58  ;;  %v8755_v33 = vpop.f32.mrb[131].mxu0  ;;  %8206 = vmatmul.mubr.msk.f32.gmra.mrb[236].mxu0 %vm19843_vm11, %v19592_v53  ;;  %8175 = vmatprep.mubr.msk.f32.mxu1 %vm19844_vm10, %v19592_v53  ;;  %vm19853_vm11 = vcmp.eq.s32.totalorder %v15558_v60, %v19594_v21  ;;  %v10165_v54 = vpack.c.bf16 %v5681_v19, %v5680_v34  ;;  %v5714_v19 = vld [vmem:[#allocation2 + $0xb20] sm:$0xff] }
 0x76b   :  { %v8756_v14 = vadd.f32 %v8755_v33, %v8754_v50  ;;  %8207 = vmatprep.mubr.msk.f32.mxu0 %vm19845_vm1, %v19592_v53  ;;  %v10195_v33 = vpack.c.bf16 %v5729_v11, %v5728_v9  ;;  %vm19854_vm10 = vcmp.eq.s32.totalorder %v15549_v40, %v19594_v21  ;;  %vm19855_vm1 = vcmp.eq.s32.totalorder %v15555_v29, %v19594_v21 }
 0x76c   :  { %v8677_v47 = vpop.f32.mrb[116].mxu1 }
 0x76d   :  { %v17675_v43 = vadd.f32 %v8756_v14, %v8676_v16  ;;  %v8757_v22 = vpop.f32.mrb[132].mxu0  ;;  %v8678_v18 = vpop.f32.mrb[117].mxu1  ;;  %8176 = vmatmul.mubr.msk.f32.gmra.mrb[222].mxu1 %vm19846_vm2, %v19592_v53  ;;  %v5699_v16 = vld [vmem:[#allocation2 + $0xaa8] sm:$0xff]  ;;  %v5712_v14 = vld [vmem:[#allocation2 + $0xb10] sm:$0xff]  ;;  %vm19856_vm2 = vcmp.eq.s32.totalorder %v15552_v41, %v19595_v48 }
 0x76e   :  { %v8679_v46 = vadd.f32 %v8678_v18, %v8677_v47  ;;  %v8758_v37 = vpop.f32.mrb[133].mxu0  ;;  %8208 = vmatmul.mubr.msk.f32.gmra.mrb[238].mxu0 %vm19847_vm7, %v19592_v53  ;;  %8209 = vmatprep.mubr.msk.f32.mxu1 %vm19848_vm3, %v19592_v53  ;;  %v10167_v51 = vpack.c.bf16 %v5699_v16, %v5698_v7  ;;  %v10197_v9 = vpack.c.bf16 %v5713_v42, %v5712_v14  ;;  %v5733_v16 = vld [vmem:[#allocation2 + $0xbb8] sm:$0xff] }
 0x76f   :  { %v8759_v28 = vadd.f32 %v8758_v37, %v8757_v22  ;;  %8241 = vmatprep.mubr.msk.f32.mxu0 %vm19849_vm0, %v19592_v53  ;;  %v5731_v22 = vld [vmem:[#allocation2 + $0xba8] sm:$0xff]  ;;  %vm19857_vm7 = vcmp.eq.s32.totalorder %v15558_v60, %v19595_v48  ;;  %vm19858_vm3 = vcmp.eq.s32.totalorder %v15549_v40, %v19595_v48  ;;  %vm19859_vm0 = vcmp.eq.s32.totalorder %v15555_v29, %v19595_v48 }
 0x770   :  { %v8680_v13 = vpop.f32.mrb[118].mxu1  ;;  %v5683_v37 = vld [vmem:[#allocation2 + $0xa28] sm:$0xff]  ;;  %v10199_v34 = vpack.c.bf16 %v5731_v22, %v5730_v20  ;;  %v5685_v20 = vld [vmem:[#allocation2 + $0xa38] sm:$0xff]  ;;  %v5702_v22 = vld [vmem:[#allocation2 + $0xac0] sm:$0xff] }
 0x771   :  { %v17693_v58 = vadd.f32 %v8759_v28, %v8679_v46  ;;  %v8760_v50 = vpop.f32.mrb[134].mxu0  ;;  %v8681_v52 = vpop.f32.mrb[119].mxu1  ;;  %8210 = vmatmul.mubr.msk.f32.vlgmr.msra.gmra.mrb[224].mxu1 %vm19850_vm9, %v19592_v53  ;;  %v5682_v46 = vld [vmem:[#allocation2 + $0xa20] sm:$0xff]  ;;  %vm19860_vm9 = vcmp.eq.s32.totalorder %v15552_v41, %v19599_v6 }
 0x772   :  { %v8682_v1 = vadd.f32 %v8681_v52, %v8680_v13  ;;  %v8761_v47 = vpop.f32.mrb[135].mxu0  ;;  %10162 = vmatpush3.bf16.msra.mxu1 %v10161_v25  ;;  %8242 = vmatmul.mubr.msk.f32.vlgmr.msra.gmra.mrb[240].mxu0 %vm19851_vm6, %v19592_v53  ;;  %v5700_v25 = vld [vmem:[#allocation2 + $0xab0] sm:$0xff]  ;;  %vm19861_vm6 = vcmp.eq.s32.totalorder %v15558_v60, %v19599_v6 }
 0x773   :  { %v8762_v18 = vadd.f32 %v8761_v47, %v8760_v50  ;;  %8211 = vmatprep.mubr.msk.f32.mxu1 %vm19852_vm12, %v19592_v53  ;;  %8243 = vmatprep.mubr.msk.f32.mxu0 %vm19853_vm11, %v19592_v53  ;;  %v5701_v50 = vld [vmem:[#allocation2 + $0xab8] sm:$0xff]  ;;  %v5684_v47 = vld [vmem:[#allocation2 + $0xa30] sm:$0xff]  ;;  %vm19863_vm12 = vcmp.eq.s32.totalorder %v15549_v40, %v19599_v6  ;;  %vm19864_vm11 = vcmp.eq.s32.totalorder %v15555_v29, %v19599_v6 }
 0x774   :  { %v8683_v5 = vpop.f32.mrb[120].mxu1  ;;  %10164 = vmatprep.subr.bf16.mxu1 %v10163_v10  ;;  %10194 = vmatpush3.bf16.msra.mxu0 %v10193_v32  ;;  %v5715_v10 = vld [vmem:[#allocation2 + $0xb28] sm:$0xff]  ;;  %v5732_v32 = vld [vmem:[#allocation2 + $0xbb0] sm:$0xff] }
 0x775   :  { %v17711_v11 = vadd.f32 %v8762_v18, %v8682_v1  ;;  %v8763_v28 = vpop.f32.mrb[136].mxu0  ;;  %v8684_v13 = vpop.f32.mrb[121].mxu1  ;;  %8212 = vmatmul.mubr.msk.f32.gmra.mrb[226].mxu1 %vm19854_vm10, %v19592_v53  ;;  %10196 = vmatprep.subr.bf16.mxu0 %v10195_v33  ;;  %v10169_v33 = vpack.c.bf16 %v5683_v37, %v5682_v46  ;;  %v10171_v1 = vpack.c.bf16 %v5701_v50, %v5700_v25  ;;  %v5716_v46 = vld [vmem:[#allocation2 + $0xb30] sm:$0xff]  ;;  %v5735_v50 = vld [vmem:[#allocation2 + $0xbc8] sm:$0xff] }
 0x776   :  { %v8685_v7 = vadd.f32 %v8684_v13, %v8683_v5  ;;  %v8764_v52 = vpop.f32.mrb[137].mxu0  ;;  %8244 = vmatmul.mubr.msk.f32.gmra.mrb[242].mxu0 %vm19855_vm1, %v19592_v53  ;;  %8213 = vmatprep.mubr.msk.f32.mxu1 %vm19856_vm2, %v19592_v53  ;;  %v10201_v18 = vpack.c.bf16 %v5715_v10, %v5714_v19  ;;  %vm19865_vm10 = vcmp.eq.s32.totalorder %v15552_v41, %v19604_v24 }
 0x777   :  { %v8765_v14 = vadd.f32 %v8764_v52, %v8763_v28  ;;  %8245 = vmatprep.mubr.msk.f32.mxu0 %vm19857_vm7, %v19592_v53  ;;  %10166 = vmatpush3.bf16.msra.mxu1 %v10165_v54  ;;  %v5703_v28 = vld [vmem:[#allocation2 + $0xac8] sm:$0xff]  ;;  %v10203_v54 = vpack.c.bf16 %v5733_v16, %v5732_v32  ;;  %v5704_v32 = vld [vmem:[#allocation2 + $0xad0] sm:$0xff]  ;;  %vm19866_vm1 = vcmp.eq.s32.totalorder %v15558_v60, %v19604_v24 }
 0x778   :  { %v8686_v42 = vpop.f32.mrb[122].mxu1  ;;  %10168 = vmatprep.subr.bf16.mxu1 %v10167_v51  ;;  %10198 = vmatpush3.bf16.msra.mxu0 %v10197_v9  ;;  %v5717_v51 = vld [vmem:[#allocation2 + $0xb38] sm:$0xff]  ;;  %v5734_v9 = vld [vmem:[#allocation2 + $0xbc0] sm:$0xff]  ;;  %v10175_v10 = vpack.c.bf16 %v5703_v28, %v5702_v22  ;;  %v5687_v52 = vld [vmem:[#allocation2 + $0xa48] sm:$0xff]  ;;  %vm19867_vm2 = vcmp.eq.s32.totalorder %v15549_v40, %v19604_v24  ;;  %vm19868_vm7 = vcmp.eq.s32.totalorder %v15555_v29, %v19604_v24 }
 0x779   :  { %v17729_v5 = vadd.f32 %v8765_v14, %v8685_v7  ;;  %v8766_v13 = vpop.f32.mrb[138].mxu0  ;;  %v8687_v36 = vpop.f32.mrb[123].mxu1  ;;  %8214 = vmatmul.mubr.msk.f32.gmra.mrb[228].mxu1 %vm19858_vm3, %v19592_v53  ;;  %10200 = vmatprep.subr.bf16.mxu0 %v10199_v34  ;;  %v5686_v7 = vld [vmem:[#allocation2 + $0xa40] sm:$0xff]  ;;  %v10205_v16 = vpack.c.bf16 %v5717_v51, %v5716_v46  ;;  %v5737_v28 = vld [vmem:[#allocation2 + $0xbd8] sm:$0xff]  ;;  %vm19869_vm3 = vcmp.eq.s32.totalorder %v15552_v41, %v19609_v12 }
 0x77a   :  { %v8688_v37 = vadd.f32 %v8687_v36, %v8686_v42  ;;  %v8767_v25 = vpop.f32.mrb[139].mxu0  ;;  %8246 = vmatmul.mubr.msk.f32.gmra.mrb[244].mxu0 %vm19859_vm0, %v19592_v53  ;;  %8215 = vmatprep.mubr.msk.f32.mxu1 %vm19860_vm9, %v19592_v53  ;;  %v10173_v36 = vpack.c.bf16 %v5685_v20, %v5684_v47  ;;  %v5718_v47 = vld [vmem:[#allocation2 + $0xb40] sm:$0xff]  ;;  %vm19870_vm0 = vcmp.eq.s32.totalorder %v15558_v60, %v19609_v12 }
 0x77b   :  { %v8768_v19 = vadd.f32 %v8767_v25, %v8766_v13  ;;  %8247 = vmatprep.mubr.msk.f32.mxu0 %vm19861_vm6, %v19592_v53  ;;  %10170 = vmatpush3.bf16.msra.mxu1 %v10169_v33  ;;  %v5705_v13 = vld [vmem:[#allocation2 + $0xad8] sm:$0xff]  ;;  %v10207_v33 = vpack.c.bf16 %v5735_v50, %v5734_v9  ;;  %v5706_v9 = vld [vmem:[#allocation2 + $0xae0] sm:$0xff]  ;;  %vm19872_vm9 = vcmp.eq.s32.totalorder %v15549_v40, %v19609_v12 }
 0x77c   :  { %v8689_v34 = vpop.f32.mrb[124].mxu1  ;;  %10172 = vmatprep.subr.bf16.mxu1 %v10171_v1  ;;  %10202 = vmatpush3.bf16.msra.mxu0 %v10201_v18  ;;  %v5719_v1 = vld [vmem:[#allocation2 + $0xb48] sm:$0xff]  ;;  %v5736_v18 = vld [vmem:[#allocation2 + $0xbd0] sm:$0xff]  ;;  %v10179_v51 = vpack.c.bf16 %v5705_v13, %v5704_v32  ;;  %v5689_v25 = vld [vmem:[#allocation2 + $0xa58] sm:$0xff]  ;;  %vm19873_vm6 = vcmp.eq.s32.totalorder %v15555_v29, %v19609_v12 }
 0x77d   :  { %v17747_v14 = vadd.f32 %v8768_v19, %v8688_v37  ;;  %v8769_v42 = vpop.f32.mrb[140].mxu0  ;;  %v8690_v44 = vpop.f32.mrb[125].mxu1  ;;  %8216 = vmatmul.mubr.msk.f32.gmra.mrb[230].mxu1 %vm19863_vm12, %v19592_v53  ;;  %10204 = vmatprep.subr.bf16.mxu0 %v10203_v54  ;;  %v5688_v37 = vld [vmem:[#allocation2 + $0xa50] sm:$0xff]  ;;  %v10209_v50 = vpack.c.bf16 %v5719_v1, %v5718_v47  ;;  %v5739_v13 = vld [vmem:[#allocation2 + $0xbe8] sm:$0xff]  ;;  %vm19874_vm12 = vcmp.eq.s32.totalorder %v15552_v41, %v19614_v49 }
 0x77e   :  { %v8691_v20 = vadd.f32 %v8690_v44, %v8689_v34  ;;  %v8770_v22 = vpop.f32.mrb[141].mxu0  ;;  %8248 = vmatmul.mubr.msk.f32.gmra.mrb[246].mxu0 %vm19864_vm11, %v19592_v53  ;;  %8217 = vmatprep.mubr.msk.f32.mxu1 %vm19865_vm10, %v19592_v53  ;;  %v10177_v44 = vpack.c.bf16 %v5687_v52, %v5686_v7  ;;  %v5720_v7 = vld [vmem:[#allocation2 + $0xb50] sm:$0xff]  ;;  %vm19875_vm11 = vcmp.eq.s32.totalorder %v15558_v60, %v19614_v49 }
 0x77f   :  { %19862 = vst [vmem:[#allocation42_spill] sm:$0xff] %v17747_v14  ;;  %v8771_v46 = vadd.f32 %v8770_v22, %v8769_v42  ;;  %8249 = vmatprep.mubr.msk.f32.mxu0 %vm19866_vm1, %v19592_v53  ;;  %10174 = vmatpush3.bf16.msra.mxu1 %v10173_v36  ;;  %v5707_v42 = vld [vmem:[#allocation2 + $0xae8] sm:$0xff]  ;;  %v10211_v36 = vpack.c.bf16 %v5737_v28, %v5736_v18  ;;  %v5722_v28 = vld [vmem:[#allocation2 + $0xb60] sm:$0xff] }
 0x780   :  { %v8692_v54 = vpop.f32.mrb[126].mxu1  ;;  %10176 = vmatprep.subr.bf16.mxu1 %v10175_v10  ;;  %10206 = vmatpush3.bf16.msra.mxu0 %v10205_v16  ;;  %v5721_v10 = vld [vmem:[#allocation2 + $0xb58] sm:$0xff]  ;;  %v5738_v16 = vld [vmem:[#allocation2 + $0xbe0] sm:$0xff]  ;;  %v10183_v1 = vpack.c.bf16 %v5707_v42, %v5706_v9  ;;  %v5691_v22 = vld [vmem:[#allocation2 + $0xa68] sm:$0xff]  ;;  %vm19876_vm10 = vcmp.eq.s32.totalorder %v15549_v40, %v19614_v49  ;;  %vm19877_vm1 = vcmp.eq.s32.totalorder %v15555_v29, %v19614_v49 }
 0x781   :  { %v17765_v19 = vadd.f32 %v8771_v46, %v8691_v20  ;;  %v8772_v34 = vpop.f32.mrb[142].mxu0  ;;  %v8693_v14 = vpop.f32.mrb[127].mxu1  ;;  %8218 = vmatmul.mubr.msk.f32.gmra.mrb[232].mxu1 %vm19867_vm2, %v19592_v53  ;;  %10208 = vmatprep.subr.bf16.mxu0 %v10207_v33  ;;  %v5690_v20 = vld [vmem:[#allocation2 + $0xa60] sm:$0xff]  ;;  %v10213_v18 = vpack.c.bf16 %v5721_v10, %v5720_v7  ;;  %v5741_v7 = vld [vmem:[#allocation2 + $0xbf8] sm:$0xff]  ;;  %vm19878_vm2 = vcmp.eq.s32.totalorder %v15552_v41, %v19619_v30 }
 0x782   :  { %v8694_v52 = vadd.f32 %v8693_v14, %v8692_v54  ;;  %v8773_v32 = vpop.f32.mrb[143].mxu0  ;;  %8250 = vmatmul.mubr.msk.f32.gmra.mrb[248].mxu0 %vm19868_vm7, %v19592_v53  ;;  %8219 = vmatprep.mubr.msk.f32.mxu1 %vm19869_vm3, %v19592_v53  ;;  %v10181_v14 = vpack.c.bf16 %v5689_v25, %v5688_v37  ;;  %v5709_v37 = vld [vmem:[#allocation2 + $0xaf8] sm:$0xff]  ;;  %v10215_v25 = vpack.c.bf16 %v5739_v13, %v5738_v16  ;;  %v5692_v13 = vld [vmem:[#allocation2 + $0xa70] sm:$0xff] }
 0x783   :  { %v8774_v47 = vadd.f32 %v8773_v32, %v8772_v34  ;;  %8251 = vmatprep.mubr.msk.f32.mxu0 %vm19870_vm0, %v19592_v53  ;;  %10178 = vmatpush3.bf16.msra.mxu1 %v10177_v44  ;;  %v5708_v44 = vld [vmem:[#allocation2 + $0xaf0] sm:$0xff]  ;;  %vm19879_vm7 = vcmp.eq.s32.totalorder %v15558_v60, %v19619_v30  ;;  %vm19880_vm3 = vcmp.eq.s32.totalorder %v15549_v40, %v19619_v30 }
 0x784   :  { %v8807_v33 = vpop.f32.mrb[128].mxu1  ;;  %10180 = vmatprep.subr.bf16.mxu1 %v10179_v51  ;;  %10210 = vmatpush3.bf16.msra.mxu0 %v10209_v50  ;;  %v5723_v51 = vld [vmem:[#allocation2 + $0xb68] sm:$0xff]  ;;  %v5740_v50 = vld [vmem:[#allocation2 + $0xbf0] sm:$0xff]  ;;  %v10187_v16 = vpack.c.bf16 %v5709_v37, %v5708_v44  ;;  %vm19881_vm0 = vcmp.eq.s32.totalorder %v15555_v29, %v19619_v30 }
 0x785   :  { %v17783_v46 = vadd.f32 %v8774_v47, %v8694_v52  ;;  %v8808_v54 = vpop.f32.mrb[129].mxu1  ;;  %8220 = vmatmul.mubr.msk.f32.gmra.mrb[234].mxu1 %vm19872_vm9, %v19592_v53  ;;  %v8887_v34 = vpop.f32.mrb[144].mxu0  ;;  %10212 = vmatprep.subr.bf16.mxu0 %v10211_v36  ;;  %v10185_v36 = vpack.c.bf16 %v5691_v22, %v5690_v20  ;;  %v5693_v47 = vld [vmem:[#allocation2 + $0xa78] sm:$0xff]  ;;  %v5742_v22 = vld [vmem:[#allocation2 + $0xc00] sm:$0xff]  ;;  %vm19882_vm9 = vcmp.eq.s32.totalorder %v15552_v41, %v16086_v55 }
 0x786   :  { %v8809_v9 = vadd.f32 %v8808_v54, %v8807_v33  ;;  %v8888_v42 = vpop.f32.mrb[145].mxu0  ;;  %8252 = vmatmul.mubr.msk.f32.gmra.mrb[250].mxu0 %vm19873_vm6, %v19592_v53  ;;  %8221 = vmatprep.mubr.msk.f32.mxu1 %vm19874_vm12, %v19592_v53  ;;  %v10217_v33 = vpack.c.bf16 %v5723_v51, %v5722_v28  ;;  %v5724_v54 = vld [vmem:[#allocation2 + $0xb70] sm:$0xff]  ;;  %v5725_v20 = vld [vmem:[#allocation2 + $0xb78] sm:$0xff]  ;;  %v10189_v44 = vpack.c.bf16 %v5693_v47, %v5692_v13 }
 0x787   :  { %19871 = vst [vmem:[#allocation43_spill] sm:$0xff] %v17783_v46  ;;  %v8889_v10 = vadd.f32 %v8888_v42, %v8887_v34  ;;  %8253 = vmatprep.mubr.msk.f32.mxu0 %vm19875_vm11, %v19592_v53  ;;  %10182 = vmatpush3.bf16.msra.mxu1 %v10181_v14  ;;  %v10219_v14 = vpack.c.bf16 %v5741_v7, %v5740_v50 }
 0x788   :  { %v6156_v52 = vadd.f32 %v8809_v9, %v17513_v38  ;;  %v8810_v32 = vpop.f32.mrb[130].mxu1  ;;  %10184 = vmatprep.subr.bf16.mxu1 %v10183_v1  ;;  %10214 = vmatpush3.bf16.msra.mxu0 %v10213_v18  ;;  %v5743_v38 = vld [vmem:[#allocation2 + $0xc08] sm:$0xff]  ;;  %vm19883_vm6 = vcmp.eq.s32.totalorder %v15558_v60, %v16086_v55  ;;  %vm19884_vm12 = vcmp.eq.s32.totalorder %v15549_v40, %v16086_v55 }
 0x789   :  { %v8811_v46 = vpop.f32.mrb[131].mxu1  ;;  %8222 = vmatmul.mubr.msk.f32.gmra.mrb[236].mxu1 %vm19876_vm10, %v19592_v53  ;;  %v8890_v34 = vpop.f32.mrb[146].mxu0  ;;  %10216 = vmatprep.subr.bf16.mxu0 %v10215_v25  ;;  %v10221_v25 = vpack.c.bf16 %v5725_v20, %v5724_v54  ;;  %v17821_v51 = vpack.c.bf16 %v5743_v38, %v5742_v22  ;;  %vm19885_vm11 = vcmp.eq.s32.totalorder %v15555_v29, %v16086_v55 }
 0x78a   :  { %v17806_v9 = vadd.f32 %v8889_v10, %v6156_v52  ;;  %v8812_v1 = vadd.f32 %v8811_v46, %v8810_v32  ;;  %v8891_v18 = vpop.f32.mrb[147].mxu0  ;;  %8254 = vmatmul.mubr.msk.f32.gmra.mrb[252].mxu0 %vm19877_vm1, %v19592_v53  ;;  %8223 = vmatprep.mubr.msk.f32.mxu1 %vm19878_vm2, %v19592_v53  ;;  %vm19886_vm10 = vcmp.eq.s32.totalorder %v15552_v41, %v16160_v45 }
 0x78b   :  { %v8892_v28 = vadd.f32 %v8891_v18, %v8890_v34  ;;  %8255 = vmatprep.mubr.msk.f32.mxu0 %vm19879_vm7, %v19592_v53  ;;  %10186 = vmatpush3.bf16.msra.mxu1 %v10185_v36  ;;  %vm19887_vm1 = vcmp.eq.s32.totalorder %v15558_v60, %v16160_v45  ;;  %vm19888_vm2 = vcmp.eq.s32.totalorder %v15549_v40, %v16160_v45 }
 0x78c   :  { %v6161_v46 = vadd.f32 %v8812_v1, %v17531_v35  ;;  %v8813_v37 = vpop.f32.mrb[132].mxu1  ;;  %10188 = vmatprep.subr.bf16.mxu1 %v10187_v16  ;;  %10218 = vmatpush3.bf16.msra.mxu0 %v10217_v33  ;;  %vm19889_vm7 = vcmp.eq.s32.totalorder %v15555_v29, %v16160_v45 }
 0x78d   :  { %v8814_v42 = vpop.f32.mrb[133].mxu1  ;;  %8224 = vmatmul.mubr.msk.f32.gmra.mrb[238].mxu1 %vm19880_vm3, %v19592_v53  ;;  %v8893_v50 = vpop.f32.mrb[148].mxu0  ;;  %10220 = vmatprep.subr.bf16.mxu0 %v10219_v14  ;;  %vm19890_vm3 = vcmp.eq.s32.totalorder %v15552_v41, %v16218_v8 }
 0x78e   :  { %v17827_v7 = vadd.f32 %v8892_v28, %v6161_v46  ;;  %v8815_v10 = vadd.f32 %v8814_v42, %v8813_v37  ;;  %v8894_v36 = vpop.f32.mrb[149].mxu0  ;;  %8256 = vmatmul.mubr.msk.f32.gmra.mrb[254].mxu0 %vm19881_vm0, %v19592_v53  ;;  %8225 = vmatprep.mubr.msk.f32.mxu1 %vm19882_vm9, %v19592_v53  ;;  %vm19891_vm0 = vcmp.eq.s32.totalorder %v15558_v60, %v16218_v8 }
 0x78f   :  { %v8895_v35 = vadd.f32 %v8894_v36, %v8893_v50  ;;  %8257 = vmatprep.mubr.msk.f32.mxu0 %vm19883_vm6, %v19592_v53  ;;  %10190 = vmatpush3.bf16.msra.mxu1 %v10189_v44  ;;  %vm19892_vm9 = vcmp.eq.s32.totalorder %v15549_v40, %v16218_v8  ;;  %vm19893_vm6 = vcmp.eq.s32.totalorder %v15555_v29, %v16218_v8 }
 0x790   :  { %v6166_v52 = vadd.f32 %v8815_v10, %v17549_v15  ;;  %v8816_v32 = vpop.f32.mrb[134].mxu1  ;;  %10222 = vmatpush3.bf16.msra.mxu0 %v10221_v25  ;;  %10224 = vmatprep.subr.bf16.mxu1 %v17821_v51 }
 0x791   :  { %v8817_v16 = vpop.f32.mrb[135].mxu1  ;;  %8226 = vmatmul.mubr.msk.f32.gmra.mrb[240].mxu1 %vm19884_vm12, %v19592_v53  ;;  %v8896_v13 = vpop.f32.mrb[150].mxu0  ;;  %vm19894_vm12 = vcmp.eq.s32.totalorder %v15552_v41, %v16277_v0 }
 0x792   :  { %v17847_v47 = vadd.f32 %v8895_v35, %v6166_v52  ;;  %v8818_v33 = vadd.f32 %v8817_v16, %v8816_v32  ;;  %v8897_v54 = vpop.f32.mrb[151].mxu0  ;;  %8258 = vmatmul.mubr.msk.f32.gmra.mrb[0].mxu0 %vm19885_vm11, %v19592_v53  ;;  %8227 = vmatprep.mubr.msk.f32.mxu1 %vm19886_vm10, %v19592_v53  ;;  %vm19895_vm11 = vcmp.eq.s32.totalorder %v15558_v60, %v16277_v0 }
 0x793   :  { %v8898_v15 = vadd.f32 %v8897_v54, %v8896_v13  ;;  %8259 = vmatprep.mubr.msk.f32.mxu0 %vm19887_vm1, %v19592_v53  ;;  %vm19896_vm10 = vcmp.eq.s32.totalorder %v15549_v40, %v16277_v0  ;;  %vm19897_vm1 = vcmp.eq.s32.totalorder %v15555_v29, %v16277_v0 }
 0x794   :  { %v6171_v34 = vadd.f32 %v8818_v33, %v17567_v59  ;;  %v8819_v14 = vpop.f32.mrb[136].mxu1 }
 0x795   :  { %v8820_v20 = vpop.f32.mrb[137].mxu1  ;;  %8228 = vmatmul.mubr.msk.f32.gmra.mrb[242].mxu1 %vm19888_vm2, %v19592_v53  ;;  %v8899_v22 = vpop.f32.mrb[152].mxu0  ;;  %vm19898_vm2 = vcmp.eq.s32.totalorder %v15552_v41, %v16336_v2 }
 0x796   :  { %v17866_v38 = vadd.f32 %v8898_v15, %v6171_v34  ;;  %v8821_v1 = vadd.f32 %v8820_v20, %v8819_v14  ;;  %v8900_v18 = vpop.f32.mrb[153].mxu0  ;;  %8260 = vmatmul.mubr.msk.f32.gmra.mrb[2].mxu0 %vm19889_vm7, %v19592_v53  ;;  %8229 = vmatprep.mubr.msk.f32.mxu1 %vm19890_vm3, %v19592_v53  ;;  %vm19899_vm7 = vcmp.eq.s32.totalorder %v15558_v60, %v16336_v2 }
 0x797   :  { %v8901_v59 = vadd.f32 %v8900_v18, %v8899_v22  ;;  %8261 = vmatprep.mubr.msk.f32.mxu0 %vm19891_vm0, %v19592_v53  ;;  %vm19900_vm3 = vcmp.eq.s32.totalorder %v15549_v40, %v16336_v2  ;;  %vm19901_vm0 = vcmp.eq.s32.totalorder %v15555_v29, %v16336_v2 }
 0x798   :  { %v6176_v28 = vadd.f32 %v8821_v1, %v17585_v62  ;;  %v8822_v44 = vpop.f32.mrb[138].mxu1 }
 0x799   :  { %v8823_v46 = vpop.f32.mrb[139].mxu1  ;;  %8230 = vmatmul.mubr.msk.f32.gmra.mrb[244].mxu1 %vm19892_vm9, %v19592_v53  ;;  %v8902_v37 = vpop.f32.mrb[154].mxu0  ;;  %vm19902_vm9 = vcmp.eq.s32.totalorder %v15552_v41, %v16394_v39 }
 0x79a   :  { %v17885_v25 = vadd.f32 %v8901_v59, %v6176_v28  ;;  %v8824_v42 = vadd.f32 %v8823_v46, %v8822_v44  ;;  %v8903_v50 = vpop.f32.mrb[155].mxu0  ;;  %8262 = vmatmul.mubr.msk.f32.gmra.mrb[4].mxu0 %vm19893_vm6, %v19592_v53  ;;  %8231 = vmatprep.mubr.msk.f32.mxu1 %vm19894_vm12, %v19592_v53  ;;  %vm19903_vm6 = vcmp.eq.s32.totalorder %v15558_v60, %v16394_v39 }
 0x79b   :  { %v8904_v62 = vadd.f32 %v8903_v50, %v8902_v37  ;;  %8263 = vmatprep.mubr.msk.f32.mxu0 %vm19895_vm11, %v19592_v53  ;;  %vm19904_vm12 = vcmp.eq.s32.totalorder %v15549_v40, %v16394_v39  ;;  %vm19905_vm11 = vcmp.eq.s32.totalorder %v15555_v29, %v16394_v39 }
 0x79c   :  { %v6181_v10 = vadd.f32 %v8824_v42, %v17603_v63  ;;  %v8825_v36 = vpop.f32.mrb[140].mxu1 }
 0x79d   :  { %v8826_v35 = vpop.f32.mrb[141].mxu1  ;;  %8232 = vmatmul.mubr.msk.f32.gmra.mrb[246].mxu1 %vm19896_vm10, %v19592_v53  ;;  %v8905_v52 = vpop.f32.mrb[156].mxu0  ;;  %vm19906_vm10 = vcmp.eq.s32.totalorder %v15552_v41, %v16456_v31 }
 0x79e   :  { %v17904_v32 = vadd.f32 %v8904_v62, %v6181_v10  ;;  %v8827_v16 = vadd.f32 %v8826_v35, %v8825_v36  ;;  %v8906_v13 = vpop.f32.mrb[157].mxu0  ;;  %8264 = vmatmul.mubr.msk.f32.gmra.mrb[6].mxu0 %vm19897_vm1, %v19592_v53  ;;  %8233 = vmatprep.mubr.msk.f32.mxu1 %vm19898_vm2, %v19592_v53  ;;  %vm19907_vm1 = vcmp.eq.s32.totalorder %v15558_v60, %v16456_v31 }
 0x79f   :  { %v8907_v63 = vadd.f32 %v8906_v13, %v8905_v52  ;;  %8265 = vmatprep.mubr.msk.f32.mxu0 %vm19899_vm7, %v19592_v53  ;;  %vm19908_vm2 = vcmp.eq.s32.totalorder %v15549_v40, %v16456_v31  ;;  %vm19909_vm7 = vcmp.eq.s32.totalorder %v15555_v29, %v16456_v31 }
 0x7a0   :  { %v6186_v33 = vadd.f32 %v8827_v16, %v17621_v56  ;;  %v8828_v54 = vpop.f32.mrb[142].mxu1 }
 0x7a1   :  { %v8829_v15 = vpop.f32.mrb[143].mxu1  ;;  %8234 = vmatmul.mubr.msk.f32.gmra.mrb[248].mxu1 %vm19900_vm3, %v19592_v53  ;;  %v8908_v34 = vpop.f32.mrb[158].mxu0  ;;  %vm19910_vm3 = vcmp.eq.s32.totalorder %v15552_v41, %v16507_v17 }
 0x7a2   :  { %v17923_v14 = vadd.f32 %v8907_v63, %v6186_v33  ;;  %v8830_v20 = vadd.f32 %v8829_v15, %v8828_v54  ;;  %v8909_v22 = vpop.f32.mrb[159].mxu0  ;;  %8266 = vmatmul.mubr.msk.f32.gmra.mrb[8].mxu0 %vm19901_vm0, %v19592_v53  ;;  %8235 = vmatprep.mubr.msk.f32.mxu1 %vm19902_vm9, %v19592_v53  ;;  %vm19911_vm0 = vcmp.eq.s32.totalorder %v15549_v40, %v16507_v17  ;;  %v5744_v54 = vld [vmem:[#allocation2 + $0xc10] sm:$0xff]  ;;  %v5745_v15 = vld [vmem:[#allocation2 + $0xc18] sm:$0xff] }
 0x7a3   :  { %v8910_v56 = vadd.f32 %v8909_v22, %v8908_v34  ;;  %8267 = vmatprep.mubr.msk.f32.mxu0 %vm19903_vm6, %v19592_v53  ;;  %vm19913_vm9 = vcmp.eq.s32.totalorder %v15570_v27, %v19593_v23  ;;  %v10227_v22 = vpack.c.bf16 %v5745_v15, %v5744_v54  ;;  %vm19915_vm6 = vcmp.eq.s32.totalorder %v15567_v26, %v19593_v23 }
 0x7a4   :  { %v6191_v1 = vadd.f32 %v8830_v20, %v17639_v3  ;;  %v8831_v18 = vpop.f32.mrb[144].mxu1 }
 0x7a5   :  { %v8832_v59 = vpop.f32.mrb[145].mxu1  ;;  %8236 = vmatmul.mubr.msk.f32.gmra.mrb[250].mxu1 %vm19904_vm12, %v19592_v53  ;;  %v8911_v28 = vpop.f32.mrb[160].mxu0  ;;  %vm19916_vm12 = vcmp.eq.s32.totalorder %v15564_v4, %v19594_v21 }
 0x7a6   :  { %v17942_v44 = vadd.f32 %v8910_v56, %v6191_v1  ;;  %v8833_v46 = vadd.f32 %v8832_v59, %v8831_v18  ;;  %v8912_v37 = vpop.f32.mrb[161].mxu0  ;;  %8268 = vmatmul.mubr.msk.f32.gmra.mrb[10].mxu0 %vm19905_vm11, %v19592_v53  ;;  %8237 = vmatprep.mubr.msk.f32.mxu1 %vm19906_vm10, %v19592_v53  ;;  %v5746_v1 = vld [vmem:[#allocation2 + $0xc20] sm:$0xff]  ;;  %v5747_v18 = vld [vmem:[#allocation2 + $0xc28] sm:$0xff]  ;;  %vm19917_vm11 = vcmp.eq.s32.totalorder %v15570_v27, %v19594_v21 }
 0x7a7   :  { %v8913_v3 = vadd.f32 %v8912_v37, %v8911_v28  ;;  %8269 = vmatprep.mubr.msk.f32.mxu0 %vm19907_vm1, %v19592_v53  ;;  %vm19918_vm10 = vcmp.eq.s32.totalorder %v15561_v61, %v19594_v21  ;;  %vm19919_vm1 = vcmp.eq.s32.totalorder %v15567_v26, %v19594_v21 }
 0x7a8   :  { %v6196_v42 = vadd.f32 %v8833_v46, %v17657_v57  ;;  %v8834_v50 = vpop.f32.mrb[146].mxu1 }
 0x7a9   :  { %v8835_v62 = vpop.f32.mrb[147].mxu1  ;;  %8238 = vmatmul.mubr.msk.f32.gmra.mrb[252].mxu1 %vm19908_vm2, %v19592_v53  ;;  %v8914_v10 = vpop.f32.mrb[162].mxu0  ;;  %vm19920_vm2 = vcmp.eq.s32.totalorder %v15564_v4, %v19595_v48 }
 0x7aa   :  { %v17961_v36 = vadd.f32 %v8913_v3, %v6196_v42  ;;  %v8836_v35 = vadd.f32 %v8835_v62, %v8834_v50  ;;  %v8915_v52 = vpop.f32.mrb[163].mxu0  ;;  %8270 = vmatmul.mubr.msk.f32.gmra.mrb[12].mxu0 %vm19909_vm7, %v19592_v53  ;;  %8239 = vmatprep.mubr.msk.f32.mxu1 %vm19910_vm3, %v19592_v53  ;;  %v10231_v3 = vpack.c.bf16 %v5747_v18, %v5746_v1  ;;  %v5748_v50 = vld [vmem:[#allocation2 + $0xc30] sm:$0xff]  ;;  %v5749_v62 = vld [vmem:[#allocation2 + $0xc38] sm:$0xff] }
 0x7ab   :  { %v8916_v57 = vadd.f32 %v8915_v52, %v8914_v10  ;;  %8271 = vmatprep.mubr.msk.f32.mxu0 %vm4949_vm5, %v19592_v53  ;;  %vm19912_vm5 = vcmp.eq.s32.totalorder %v15564_v4, %v19593_v23  ;;  %vm19921_vm7 = vcmp.eq.s32.totalorder %v15570_v27, %v19595_v48  ;;  %vm19922_vm3 = vcmp.eq.s32.totalorder %v15561_v61, %v19595_v48 }
 0x7ac   :  { %v6201_v16 = vadd.f32 %v8836_v35, %v17675_v43  ;;  %v8837_v13 = vpop.f32.mrb[148].mxu1 }
 0x7ad   :  { %v8838_v63 = vpop.f32.mrb[149].mxu1  ;;  %8240 = vmatmul.mubr.msk.f32.gmra.mrb[254].mxu1 %vm19911_vm0, %v19592_v53  ;;  %v8917_v33 = vpop.f32.mrb[164].mxu0  ;;  %vm19923_vm0 = vcmp.eq.s32.totalorder %v15567_v26, %v19595_v48 }
 0x7ae   :  { %v17980_v41 = vadd.f32 %v8916_v57, %v6201_v16  ;;  %v8839_v34 = vadd.f32 %v8838_v63, %v8837_v13  ;;  %v8918_v20 = vpop.f32.mrb[165].mxu0  ;;  %8272 = vmatmul.mubr.msk.f32.gmra.mrb[14].mxu0 %vm4948_vm8, %v19592_v53  ;;  %8273 = vmatprep.mubr.msk.f32.mxu1 %vm19912_vm5, %v19592_v53  ;;  %vm19914_vm8 = vcmp.eq.s32.totalorder %v15561_v61, %v19593_v23 }
 0x7af   :  { %v8919_v60 = vadd.f32 %v8918_v20, %v8917_v33  ;;  %8305 = vmatprep.mubr.msk.f32.mxu0 %vm19913_vm9, %v19592_v53  ;;  %v10235_v13 = vpack.c.bf16 %v5749_v62, %v5748_v50  ;;  %vm19924_vm5 = vcmp.eq.s32.totalorder %v15564_v4, %v19599_v6  ;;  %vm19925_vm9 = vcmp.eq.s32.totalorder %v15570_v27, %v19599_v6 }
 0x7b0   :  { %v6206_v40 = vadd.f32 %v8839_v34, %v17693_v58  ;;  %v8840_v43 = vpop.f32.mrb[150].mxu1  ;;  %v19926_v34 = vld [vmem:[#allocation42_spill] sm:$0xff] }
 0x7b1   :  { %v8841_v56 = vpop.f32.mrb[151].mxu1  ;;  %8274 = vmatmul.mubr.msk.f32.vlgmr.msra.gmra.mrb[0].mxu1 %vm19914_vm8, %v19592_v53  ;;  %v8920_v29 = vpop.f32.mrb[166].mxu0  ;;  %vm19927_vm8 = vcmp.eq.s32.totalorder %v15561_v61, %v19599_v6 }
 0x7b2   :  { %v17999_v59 = vadd.f32 %v8919_v60, %v6206_v40  ;;  %v8842_v28 = vadd.f32 %v8841_v56, %v8840_v43  ;;  %10226 = vmatpush3.bf16.msra.mxu1 %v17821_v51  ;;  %v8921_v46 = vpop.f32.mrb[167].mxu0  ;;  %8306 = vmatmul.mubr.msk.f32.vlgmr.msra.gmra.mrb[16].mxu0 %vm19915_vm6, %v19592_v53  ;;  %vm19928_vm6 = vcmp.eq.s32.totalorder %v15567_v26, %v19599_v6 }
 0x7b3   :  { %v8922_v58 = vadd.f32 %v8921_v46, %v8920_v29  ;;  %8275 = vmatprep.mubr.msk.f32.mxu1 %vm19916_vm12, %v19592_v53  ;;  %8307 = vmatprep.mubr.msk.f32.mxu0 %vm19917_vm11, %v19592_v53  ;;  %vm19929_vm12 = vcmp.eq.s32.totalorder %v15564_v4, %v19604_v24  ;;  %vm19930_vm11 = vcmp.eq.s32.totalorder %v15570_v27, %v19604_v24 }
 0x7b4   :  { %v6211_v37 = vadd.f32 %v8842_v28, %v17711_v11  ;;  %v8843_v51 = vpop.f32.mrb[152].mxu1  ;;  %10228 = vmatprep.subr.bf16.mxu1 %v10227_v22 }
 0x7b5   :  { %v8844_v42 = vpop.f32.mrb[153].mxu1  ;;  %8276 = vmatmul.mubr.msk.f32.gmra.mrb[2].mxu1 %vm19918_vm10, %v19592_v53  ;;  %v8923_v23 = vpop.f32.mrb[168].mxu0  ;;  %vm19931_vm10 = vcmp.eq.s32.totalorder %v15561_v61, %v19604_v24 }
 0x7b6   :  { %v18019_v10 = vadd.f32 %v8922_v58, %v6211_v37  ;;  %v8845_v35 = vadd.f32 %v8844_v42, %v8843_v51  ;;  %v8924_v52 = vpop.f32.mrb[169].mxu0  ;;  %8308 = vmatmul.mubr.msk.f32.gmra.mrb[18].mxu0 %vm19919_vm1, %v19592_v53  ;;  %8277 = vmatprep.mubr.msk.f32.mxu1 %vm19920_vm2, %v19592_v53  ;;  %vm19932_vm1 = vcmp.eq.s32.totalorder %v15567_v26, %v19604_v24  ;;  %v19935_v51 = vld [vmem:[#allocation43_spill] sm:$0xff] }
 0x7b7   :  { %v8925_v11 = vadd.f32 %v8924_v52, %v8923_v23  ;;  %8309 = vmatprep.mubr.msk.f32.mxu0 %vm19921_vm7, %v19592_v53  ;;  %10230 = vmatpush3.bf16.msra.mxu1 %v10227_v22  ;;  %vm19933_vm2 = vcmp.eq.s32.totalorder %v15564_v4, %v19609_v12  ;;  %vm19934_vm7 = vcmp.eq.s32.totalorder %v15570_v27, %v19609_v12 }
 0x7b8   :  { %v6216_v57 = vadd.f32 %v8845_v35, %v17729_v5  ;;  %v8846_v16 = vpop.f32.mrb[154].mxu1  ;;  %10232 = vmatprep.subr.bf16.mxu1 %v10231_v3 }
 0x7b9   :  { %v8847_v63 = vpop.f32.mrb[155].mxu1  ;;  %8278 = vmatmul.mubr.msk.f32.gmra.mrb[4].mxu1 %vm19922_vm3, %v19592_v53  ;;  %v8926_v21 = vpop.f32.mrb[170].mxu0  ;;  %vm19936_vm3 = vcmp.eq.s32.totalorder %v15561_v61, %v19609_v12 }
 0x7ba   :  { %v18038_v33 = vadd.f32 %v8925_v11, %v6216_v57  ;;  %v8848_v54 = vadd.f32 %v8847_v63, %v8846_v16  ;;  %v8927_v15 = vpop.f32.mrb[171].mxu0  ;;  %8310 = vmatmul.mubr.msk.f32.gmra.mrb[20].mxu0 %vm19923_vm0, %v19592_v53  ;;  %8279 = vmatprep.mubr.msk.f32.mxu1 %vm19924_vm5, %v19592_v53  ;;  %vm19937_vm0 = vcmp.eq.s32.totalorder %v15567_v26, %v19609_v12 }
 0x7bb   :  { %v8928_v5 = vadd.f32 %v8927_v15, %v8926_v21  ;;  %8311 = vmatprep.mubr.msk.f32.mxu0 %vm19925_vm9, %v19592_v53  ;;  %10234 = vmatpush3.bf16.msra.mxu1 %v10231_v3  ;;  %vm19938_vm5 = vcmp.eq.s32.totalorder %v15564_v4, %v19614_v49  ;;  %vm19939_vm9 = vcmp.eq.s32.totalorder %v15570_v27, %v19614_v49 }
 0x7bc   :  { %v6221_v20 = vadd.f32 %v8848_v54, %v19926_v34  ;;  %v8849_v60 = vpop.f32.mrb[156].mxu1  ;;  %10236 = vmatprep.subr.bf16.mxu1 %v10235_v13 }
 0x7bd   :  { %v8850_v40 = vpop.f32.mrb[157].mxu1  ;;  %8280 = vmatmul.mubr.msk.f32.gmra.mrb[6].mxu1 %vm19927_vm8, %v19592_v53  ;;  %v8929_v48 = vpop.f32.mrb[172].mxu0  ;;  %vm19940_vm8 = vcmp.eq.s32.totalorder %v15561_v61, %v19614_v49 }
 0x7be   :  { %v18057_v43 = vadd.f32 %v8928_v5, %v6221_v20  ;;  %v8851_v22 = vadd.f32 %v8850_v40, %v8849_v60  ;;  %v8930_v56 = vpop.f32.mrb[173].mxu0  ;;  %8312 = vmatmul.mubr.msk.f32.gmra.mrb[22].mxu0 %vm19928_vm6, %v19592_v53  ;;  %8281 = vmatprep.mubr.msk.f32.mxu1 %vm19929_vm12, %v19592_v53  ;;  %vm19941_vm6 = vcmp.eq.s32.totalorder %v15567_v26, %v19614_v49 }
 0x7bf   :  { %v8931_v29 = vadd.f32 %v8930_v56, %v8929_v48  ;;  %8313 = vmatprep.mubr.msk.f32.mxu0 %vm19930_vm11, %v19592_v53  ;;  %10238 = vmatpush3.bf16.msra.mxu1 %v10235_v13  ;;  %vm19942_vm12 = vcmp.eq.s32.totalorder %v15564_v4, %v19619_v30  ;;  %vm19943_vm11 = vcmp.eq.s32.totalorder %v15570_v27, %v19619_v30 }
 0x7c0   :  { %v6226_v1 = vadd.f32 %v8851_v22, %v17765_v19  ;;  %v8852_v18 = vpop.f32.mrb[158].mxu1 }
 0x7c1   :  { %v8853_v28 = vpop.f32.mrb[159].mxu1  ;;  %8282 = vmatmul.mubr.msk.f32.gmra.mrb[8].mxu1 %vm19931_vm10, %v19592_v53  ;;  %v8932_v6 = vpop.f32.mrb[174].mxu0  ;;  %vm19944_vm10 = vcmp.eq.s32.totalorder %v15561_v61, %v19619_v30 }
 0x7c2   :  { %v18076_v46 = vadd.f32 %v8931_v29, %v6226_v1  ;;  %v8854_v58 = vadd.f32 %v8853_v28, %v8852_v18  ;;  %v8933_v37 = vpop.f32.mrb[175].mxu0  ;;  %8314 = vmatmul.mubr.msk.f32.gmra.mrb[24].mxu0 %vm19932_vm1, %v19592_v53  ;;  %8283 = vmatprep.mubr.msk.f32.mxu1 %vm19933_vm2, %v19592_v53  ;;  %vm19945_vm1 = vcmp.eq.s32.totalorder %v15567_v26, %v19619_v30 }
 0x7c3   :  { %v8934_v19 = vadd.f32 %v8933_v37, %v8932_v6  ;;  %8315 = vmatprep.mubr.msk.f32.mxu0 %vm19934_vm7, %v19592_v53  ;;  %vm19946_vm2 = vcmp.eq.s32.totalorder %v15564_v4, %v16086_v55  ;;  %vm19947_vm7 = vcmp.eq.s32.totalorder %v15570_v27, %v16086_v55 }
 0x7c4   :  { %v6231_v3 = vadd.f32 %v8854_v58, %v19935_v51  ;;  %v8967_v42 = vpop.f32.mrb[160].mxu1 }
 0x7c5   :  { %v8968_v23 = vpop.f32.mrb[161].mxu1  ;;  %8284 = vmatmul.mubr.msk.f32.gmra.mrb[10].mxu1 %vm19936_vm3, %v19592_v53  ;;  %v9047_v24 = vpop.f32.mrb[176].mxu0  ;;  %vm19948_vm3 = vcmp.eq.s32.totalorder %v15561_v61, %v16086_v55 }
 0x7c6   :  { %v18095_v50 = vadd.f32 %v8934_v19, %v6231_v3  ;;  %v8969_v62 = vadd.f32 %v8968_v23, %v8967_v42  ;;  %v9048_v35 = vpop.f32.mrb[177].mxu0  ;;  %8316 = vmatmul.mubr.msk.f32.gmra.mrb[26].mxu0 %vm19937_vm0, %v19592_v53  ;;  %8285 = vmatprep.mubr.msk.f32.mxu1 %vm19938_vm5, %v19592_v53  ;;  %vm19949_vm0 = vcmp.eq.s32.totalorder %v15567_v26, %v16086_v55 }
 0x7c7   :  { %v9049_v52 = vadd.f32 %v9048_v35, %v9047_v24  ;;  %8317 = vmatprep.mubr.msk.f32.mxu0 %vm19939_vm9, %v19592_v53  ;;  %vm19950_vm5 = vcmp.eq.s32.totalorder %v15564_v4, %v16160_v45  ;;  %vm19951_vm9 = vcmp.eq.s32.totalorder %v15570_v27, %v16160_v45 }
 0x7c8   :  { %v6446_v11 = vadd.f32 %v8969_v62, %v17806_v9  ;;  %v8970_v57 = vpop.f32.mrb[162].mxu1 }
 0x7c9   :  { %v8971_v16 = vpop.f32.mrb[163].mxu1  ;;  %8286 = vmatmul.mubr.msk.f32.gmra.mrb[12].mxu1 %vm19940_vm8, %v19592_v53  ;;  %v9050_v12 = vpop.f32.mrb[178].mxu0  ;;  %vm19952_vm8 = vcmp.eq.s32.totalorder %v15561_v61, %v16160_v45 }
 0x7ca   :  { %v18114_v13 = vadd.f32 %v9049_v52, %v6446_v11  ;;  %v8972_v63 = vadd.f32 %v8971_v16, %v8970_v57  ;;  %v9051_v21 = vpop.f32.mrb[179].mxu0  ;;  %8318 = vmatmul.mubr.msk.f32.gmra.mrb[28].mxu0 %vm19941_vm6, %v19592_v53  ;;  %8287 = vmatprep.mubr.msk.f32.mxu1 %vm19942_vm12, %v19592_v53  ;;  %vm19953_vm6 = vcmp.eq.s32.totalorder %v15567_v26, %v16160_v45 }
 0x7cb   :  { %v9052_v9 = vadd.f32 %v9051_v21, %v9050_v12  ;;  %8319 = vmatprep.mubr.msk.f32.mxu0 %vm19943_vm11, %v19592_v53  ;;  %vm19954_vm12 = vcmp.eq.s32.totalorder %v15564_v4, %v16218_v8  ;;  %vm19955_vm11 = vcmp.eq.s32.totalorder %v15570_v27, %v16218_v8 }
 0x7cc   :  { %v6451_v54 = vadd.f32 %v8972_v63, %v17827_v7  ;;  %v8973_v15 = vpop.f32.mrb[164].mxu1 }
 0x7cd   :  { %v8974_v5 = vpop.f32.mrb[165].mxu1  ;;  %8288 = vmatmul.mubr.msk.f32.gmra.mrb[14].mxu1 %vm19944_vm10, %v19592_v53  ;;  %v9053_v49 = vpop.f32.mrb[180].mxu0  ;;  %vm19956_vm10 = vcmp.eq.s32.totalorder %v15561_v61, %v16218_v8 }
 0x7ce   :  { %v18133_v34 = vadd.f32 %v9052_v9, %v6451_v54  ;;  %v8975_v20 = vadd.f32 %v8974_v5, %v8973_v15  ;;  %v9054_v60 = vpop.f32.mrb[181].mxu0  ;;  %8320 = vmatmul.mubr.msk.f32.gmra.mrb[30].mxu0 %vm19945_vm1, %v19592_v53  ;;  %8289 = vmatprep.mubr.msk.f32.mxu1 %vm19946_vm2, %v19592_v53  ;;  %vm19957_vm1 = vcmp.eq.s32.totalorder %v15567_v26, %v16218_v8 }
 0x7cf   :  { %v9055_v7 = vadd.f32 %v9054_v60, %v9053_v49  ;;  %8321 = vmatprep.mubr.msk.f32.mxu0 %vm19947_vm7, %v19592_v53  ;;  %vm19958_vm2 = vcmp.eq.s32.totalorder %v15564_v4, %v16277_v0  ;;  %vm19959_vm7 = vcmp.eq.s32.totalorder %v15570_v27, %v16277_v0 }
 0x7d0   :  { %v6456_v40 = vadd.f32 %v8975_v20, %v17847_v47  ;;  %v8976_v48 = vpop.f32.mrb[166].mxu1 }
 0x7d1   :  { %v8977_v22 = vpop.f32.mrb[167].mxu1  ;;  %8290 = vmatmul.mubr.msk.f32.gmra.mrb[16].mxu1 %vm19948_vm3, %v19592_v53  ;;  %v9056_v30 = vpop.f32.mrb[182].mxu0  ;;  %vm19960_vm3 = vcmp.eq.s32.totalorder %v15561_v61, %v16277_v0 }
 0x7d2   :  { %v18152_v56 = vadd.f32 %v9055_v7, %v6456_v40  ;;  %v8978_v29 = vadd.f32 %v8977_v22, %v8976_v48  ;;  %v9057_v1 = vpop.f32.mrb[183].mxu0  ;;  %8322 = vmatmul.mubr.msk.f32.gmra.mrb[32].mxu0 %vm19949_vm0, %v19592_v53  ;;  %8291 = vmatprep.mubr.msk.f32.mxu1 %vm19950_vm5, %v19592_v53  ;;  %vm19961_vm0 = vcmp.eq.s32.totalorder %v15567_v26, %v16277_v0 }
 0x7d3   :  { %v9058_v47 = vadd.f32 %v9057_v1, %v9056_v30  ;;  %8323 = vmatprep.mubr.msk.f32.mxu0 %vm19951_vm9, %v19592_v53  ;;  %vm19962_vm5 = vcmp.eq.s32.totalorder %v15564_v4, %v16336_v2  ;;  %vm19963_vm9 = vcmp.eq.s32.totalorder %v15570_v27, %v16336_v2 }
 0x7d4   :  { %v6461_v18 = vadd.f32 %v8978_v29, %v17866_v38  ;;  %v8979_v28 = vpop.f32.mrb[168].mxu1 }
 0x7d5   :  { %v8980_v6 = vpop.f32.mrb[169].mxu1  ;;  %8292 = vmatmul.mubr.msk.f32.gmra.mrb[18].mxu1 %vm19952_vm8, %v19592_v53  ;;  %v9059_v55 = vpop.f32.mrb[184].mxu0  ;;  %vm19964_vm8 = vcmp.eq.s32.totalorder %v15561_v61, %v16336_v2 }
 0x7d6   :  { %v18171_v58 = vadd.f32 %v9058_v47, %v6461_v18  ;;  %v8981_v37 = vadd.f32 %v8980_v6, %v8979_v28  ;;  %v9060_v19 = vpop.f32.mrb[185].mxu0  ;;  %8324 = vmatmul.mubr.msk.f32.gmra.mrb[34].mxu0 %vm19953_vm6, %v19592_v53  ;;  %8293 = vmatprep.mubr.msk.f32.mxu1 %vm19954_vm12, %v19592_v53  ;;  %vm19965_vm6 = vcmp.eq.s32.totalorder %v15567_v26, %v16336_v2 }
 0x7d7   :  { %v9061_v38 = vadd.f32 %v9060_v19, %v9059_v55  ;;  %8325 = vmatprep.mubr.msk.f32.mxu0 %vm19955_vm11, %v19592_v53  ;;  %vm19966_vm12 = vcmp.eq.s32.totalorder %v15564_v4, %v16394_v39  ;;  %vm19967_vm11 = vcmp.eq.s32.totalorder %v15570_v27, %v16394_v39 }
 0x7d8   :  { %v6466_v51 = vadd.f32 %v8981_v37, %v17885_v25  ;;  %v8982_v3 = vpop.f32.mrb[170].mxu1 }
 0x7d9   :  { %v8983_v42 = vpop.f32.mrb[171].mxu1  ;;  %8294 = vmatmul.mubr.msk.f32.gmra.mrb[20].mxu1 %vm19956_vm10, %v19592_v53  ;;  %v9062_v45 = vpop.f32.mrb[186].mxu0  ;;  %vm19968_vm10 = vcmp.eq.s32.totalorder %v15561_v61, %v16394_v39 }
 0x7da   :  { %v18190_v23 = vadd.f32 %v9061_v38, %v6466_v51  ;;  %v8984_v24 = vadd.f32 %v8983_v42, %v8982_v3  ;;  %v9063_v62 = vpop.f32.mrb[187].mxu0  ;;  %8326 = vmatmul.mubr.msk.f32.gmra.mrb[36].mxu0 %vm19957_vm1, %v19592_v53  ;;  %8295 = vmatprep.mubr.msk.f32.mxu1 %vm19958_vm2, %v19592_v53  ;;  %vm19969_vm1 = vcmp.eq.s32.totalorder %v15567_v26, %v16394_v39 }
 0x7db   :  { %v9064_v25 = vadd.f32 %v9063_v62, %v9062_v45  ;;  %8327 = vmatprep.mubr.msk.f32.mxu0 %vm19959_vm7, %v19592_v53  ;;  %vm19970_vm2 = vcmp.eq.s32.totalorder %v15564_v4, %v16456_v31  ;;  %vm19971_vm7 = vcmp.eq.s32.totalorder %v15570_v27, %v16456_v31  ;;  %v19974_v27 = vld [vmem:[#allocation68_spill] sm:$0xff] }
 0x7dc   :  { %v6471_v35 = vadd.f32 %v8984_v24, %v17904_v32  ;;  %v8985_v52 = vpop.f32.mrb[172].mxu1 }
 0x7dd   :  { %v8986_v11 = vpop.f32.mrb[173].mxu1  ;;  %8296 = vmatmul.mubr.msk.f32.gmra.mrb[22].mxu1 %vm19960_vm3, %v19592_v53  ;;  %v9065_v8 = vpop.f32.mrb[188].mxu0  ;;  %vm19972_vm3 = vcmp.eq.s32.totalorder %v15561_v61, %v16456_v31  ;;  %v19975_v61 = vld [vmem:[#allocation19_spill] sm:$0xff] }
 0x7de   :  { %v18209_v57 = vadd.f32 %v9064_v25, %v6471_v35  ;;  %v8987_v16 = vadd.f32 %v8986_v11, %v8985_v52  ;;  %v9066_v12 = vpop.f32.mrb[189].mxu0  ;;  %8328 = vmatmul.mubr.msk.f32.gmra.mrb[38].mxu0 %vm19961_vm0, %v19592_v53  ;;  %8297 = vmatprep.mubr.msk.f32.mxu1 %vm19962_vm5, %v19592_v53  ;;  %vm19973_vm0 = vcmp.eq.s32.totalorder %v15567_v26, %v16456_v31  ;;  %vm5750_vm5 = vcmask 523264   ;;  %v19976_v25 = vld [vmem:[#allocation51_spill] sm:$0xff]  ;;  %v19977_v52 = vld [vmem:[#allocation38_spill] sm:$0xff] }
 0x7df   :  { %v9067_v32 = vadd.f32 %v9066_v12, %v9065_v8  ;;  %8329 = vmatprep.mubr.msk.f32.mxu0 %vm19963_vm9, %v19592_v53  ;;  %v19978_v12 = vld [vmem:[#allocation22_spill] sm:$0xff] }
 0x7e0   :  { %v6476_v63 = vadd.f32 %v8987_v16, %v17923_v14  ;;  %v8988_v21 = vpop.f32.mrb[174].mxu1 }
 0x7e1   :  { %v8989_v9 = vpop.f32.mrb[175].mxu1  ;;  %8298 = vmatmul.mubr.msk.f32.gmra.mrb[24].mxu1 %vm19964_vm8, %v19592_v53  ;;  %v9068_v0 = vpop.f32.mrb[190].mxu0 }
 0x7e2   :  { %v18228_v54 = vadd.f32 %v9067_v32, %v6476_v63  ;;  %v8990_v15 = vadd.f32 %v8989_v9, %v8988_v21  ;;  %v9069_v5 = vpop.f32.mrb[191].mxu0  ;;  %8330 = vmatmul.mubr.msk.f32.gmra.mrb[40].mxu0 %vm19965_vm6, %v19592_v53  ;;  %8299 = vmatprep.mubr.msk.f32.mxu1 %vm19966_vm12, %v19592_v53 }
 0x7e3   :  { %v9070_v14 = vadd.f32 %v9069_v5, %v9068_v0  ;;  %8331 = vmatprep.mubr.msk.f32.mxu0 %vm19967_vm11, %v19592_v53  ;;  %v19979_v0 = vld [vmem:[#allocation117_spill] sm:$0xff] }
 0x7e4   :  { %v6481_v49 = vadd.f32 %v8990_v15, %v17942_v44  ;;  %v8991_v20 = vpop.f32.mrb[176].mxu1 }
 0x7e5   :  { %v8992_v60 = vpop.f32.mrb[177].mxu1  ;;  %8300 = vmatmul.mubr.msk.f32.gmra.mrb[26].mxu1 %vm19968_vm10, %v19592_v53  ;;  %v9071_v2 = vpop.f32.mrb[192].mxu0 }
 0x7e6   :  { %v18247_v7 = vadd.f32 %v9070_v14, %v6481_v49  ;;  %v8993_v40 = vadd.f32 %v8992_v60, %v8991_v20  ;;  %v9072_v48 = vpop.f32.mrb[193].mxu0  ;;  %8332 = vmatmul.mubr.msk.f32.gmra.mrb[42].mxu0 %vm19969_vm1, %v19592_v53  ;;  %8301 = vmatprep.mubr.msk.f32.mxu1 %vm19970_vm2, %v19592_v53  ;;  %v19980_v49 = vld [vmem:[#allocation55_spill] sm:$0xff] }
 0x7e7   :  { %v9073_v44 = vadd.f32 %v9072_v48, %v9071_v2  ;;  %8333 = vmatprep.mubr.msk.f32.mxu0 %vm19971_vm7, %v19592_v53  ;;  %v19981_v48 = vld [vmem:[#allocation40_spill] sm:$0xff] }
 0x7e8   :  { %v6486_v22 = vadd.f32 %v8993_v40, %v17961_v36  ;;  %v8994_v30 = vpop.f32.mrb[178].mxu1 }
 0x7e9   :  { %v8995_v29 = vpop.f32.mrb[179].mxu1  ;;  %8302 = vmatmul.mubr.msk.f32.gmra.mrb[28].mxu1 %vm19972_vm3, %v19592_v53  ;;  %v9074_v39 = vpop.f32.mrb[194].mxu0 }
 0x7ea   :  { %v18266_v1 = vadd.f32 %v9073_v44, %v6486_v22  ;;  %v8996_v47 = vadd.f32 %v8995_v29, %v8994_v30  ;;  %v9075_v18 = vpop.f32.mrb[195].mxu0  ;;  %8334 = vmatmul.mubr.msk.f32.gmra.mrb[44].mxu0 %vm19973_vm0, %v19592_v53  ;;  %8303 = vmatprep.mubr.msk.f32.mxu1 %vm4951_vm15, %v19592_v53  ;;  %v19982_v29 = vld [vmem:[#allocation41_spill] sm:$0xff] }
 0x7eb   :  { %v9076_v36 = vadd.f32 %v9075_v18, %v9074_v39  ;;  %8335 = vmatprep.mubr.msk.f32.mxu0 %vm4953_vm13, %v19592_v53 }
 0x7ec   :  { %v6491_v28 = vadd.f32 %v8996_v47, %v17980_v41  ;;  %v8997_v6 = vpop.f32.mrb[180].mxu1 }
 0x7ed   :  { %v8998_v55 = vpop.f32.mrb[181].mxu1  ;;  %8304 = vmatmul.mubr.msk.f32.gmra.mrb[30].mxu1 %vm4950_vm4, %v19592_v53  ;;  %v9077_v31 = vpop.f32.mrb[196].mxu0 }
 0x7ee   :  { %v18285_v37 = vadd.f32 %v9076_v36, %v6491_v28  ;;  %v8999_v4 = vadd.f32 %v8998_v55, %v8997_v6  ;;  %v9078_v19 = vpop.f32.mrb[197].mxu0  ;;  %8336 = vmatmul.mubr.msk.f32.gmra.mrb[46].mxu0 %vm4952_vm14, %v19592_v53  ;;  %9643 = vmatprep.mubr.msk.f32.mxu1 %vm5750_vm5, %v19974_v27  ;;  %v19983_v28 = vld [vmem:[#allocation72_spill] sm:$0xff] }
 0x7ef   :  { %v9079_v41 = vadd.f32 %v9078_v19, %v9077_v31 }
 0x7f0   :  { %v6496_v38 = vadd.f32 %v8999_v4, %v17999_v59  ;;  %v9000_v51 = vpop.f32.mrb[182].mxu1  ;;  %v19984_v4 = vld [vmem:[#allocation73_spill] sm:$0xff] }
 0x7f1   :  { %v9001_v3 = vpop.f32.mrb[183].mxu1  ;;  %9644 = vmatmul.mubr.msk.f32.vlgmr.msra.gmra.mrb[32].mxu1 %vm5750_vm5, %v19975_v61  ;;  %v9080_v42 = vpop.f32.mrb[198].mxu0 }
 0x7f2   :  { %v18296_v45 = vadd.f32 %v9079_v41, %v6496_v38  ;;  %v9002_v24 = vadd.f32 %v9001_v3, %v9000_v51  ;;  %v9081_v62 = vpop.f32.mrb[199].mxu0  ;;  %9646 = vmatprep.mubr.msk.f32.mxu1 %vm5750_vm5, %v19976_v25  ;;  %v19985_v51 = vld [vmem:[#allocation24_spill] sm:$0xff] }
 0x7f3   :  { %v9082_v26 = vadd.f32 %v9081_v62, %v9080_v42 }
 0x7f4   :  { %v6501_v17 = vadd.f32 %v9002_v24, %v18019_v10  ;;  %v9003_v53 = vpop.f32.mrb[184].mxu1  ;;  %v19986_v24 = vld [vmem:[#allocation25_spill] sm:$0xff] }
 0x7f5   :  { %v9004_v35 = vpop.f32.mrb[185].mxu1  ;;  %9647 = vmatmul.mubr.msk.f32.gmra.mrb[34].mxu1 %vm5750_vm5, %v19977_v52  ;;  %v9083_v59 = vpop.f32.mrb[200].mxu0 }
 0x7f6   :  { %v18303_v11 = vadd.f32 %v9082_v26, %v6501_v17  ;;  %v9005_v8 = vadd.f32 %v9004_v35, %v9003_v53  ;;  %v9084_v16 = vpop.f32.mrb[201].mxu0  ;;  %9649 = vmatprep.mubr.msk.f32.mxu1 %vm5750_vm5, %v19978_v12  ;;  %v19987_v53 = vld [vmem:[#allocation56_spill] sm:$0xff] }
 0x7f7   :  { %v9085_v32 = vadd.f32 %v9084_v16, %v9083_v59 }
 0x7f8   :  { %v6506_v63 = vadd.f32 %v9005_v8, %v18038_v33  ;;  %v9006_v21 = vpop.f32.mrb[186].mxu1  ;;  %v19988_v8 = vld [vmem:[#allocation57_spill] sm:$0xff] }
 0x7f9   :  { %v9007_v9 = vpop.f32.mrb[187].mxu1  ;;  %9650 = vmatmul.mubr.msk.f32.gmra.mrb[36].mxu1 %vm5750_vm5, %v19979_v0  ;;  %v9086_v10 = vpop.f32.mrb[202].mxu0 }
 0x7fa   :  { %v18310_v15 = vadd.f32 %v9085_v32, %v6506_v63  ;;  %v9008_v5 = vadd.f32 %v9007_v9, %v9006_v21  ;;  %v9087_v14 = vpop.f32.mrb[203].mxu0  ;;  %9652 = vmatprep.mubr.msk.f32.mxu1 %vm5750_vm5, %v19980_v49  ;;  %v19989_v21 = vld [vmem:[#allocation116_spill] sm:$0xff] }
 0x7fb   :  { %v9088_v20 = vadd.f32 %v9087_v14, %v9086_v10 }
 0x7fc   :  { %v6511_v60 = vadd.f32 %v9008_v5, %v18057_v43  ;;  %v9009_v2 = vpop.f32.mrb[188].mxu1 }
 0x7fd   :  { %v9010_v40 = vpop.f32.mrb[189].mxu1  ;;  %9653 = vmatmul.mubr.msk.f32.gmra.mrb[38].mxu1 %vm5750_vm5, %v19981_v48  ;;  %v9089_v33 = vpop.f32.mrb[204].mxu0 }
 0x7fe   :  { %v18317_v44 = vadd.f32 %v9088_v20, %v6511_v60  ;;  %v9011_v22 = vadd.f32 %v9010_v40, %v9009_v2  ;;  %v9090_v30 = vpop.f32.mrb[205].mxu0  ;;  %9655 = vmatprep.mubr.msk.f32.mxu1 %vm5750_vm5, %v19982_v29 }
 0x7ff   :  { %v9091_v39 = vadd.f32 %v9090_v30, %v9089_v33 }
 0x800   :  { %v6516_v47 = vadd.f32 %v9011_v22, %v18076_v46  ;;  %v9012_v18 = vpop.f32.mrb[190].mxu1 }
 0x801   :  { %v9013_v36 = vpop.f32.mrb[191].mxu1  ;;  %9656 = vmatmul.mubr.msk.f32.gmra.mrb[40].mxu1 %vm5750_vm5, %v19983_v28  ;;  %v9092_v43 = vpop.f32.mrb[206].mxu0 }
 0x802   :  { %v18324_v6 = vadd.f32 %v9091_v39, %v6516_v47  ;;  %v9014_v55 = vadd.f32 %v9013_v36, %v9012_v18  ;;  %v9093_v31 = vpop.f32.mrb[207].mxu0  ;;  %9658 = vmatprep.mubr.msk.f32.mxu1 %vm5750_vm5, %v19984_v4 }
 0x803   :  { %v9094_v19 = vadd.f32 %v9093_v31, %v9092_v43 }
 0x804   :  { %v6521_v27 = vadd.f32 %v9014_v55, %v18095_v50  ;;  %v9127_v41 = vpop.f32.mrb[192].mxu1 }
 0x805   :  { %v9128_v38 = vpop.f32.mrb[193].mxu1  ;;  %9659 = vmatmul.mubr.msk.f32.gmra.mrb[42].mxu1 %vm5750_vm5, %v19985_v51  ;;  %v9207_v46 = vpop.f32.mrb[208].mxu0 }
 0x806   :  { %v18331_v3 = vadd.f32 %v9094_v19, %v6521_v27  ;;  %v9129_v61 = vadd.f32 %v9128_v38, %v9127_v41  ;;  %v9208_v42 = vpop.f32.mrb[209].mxu0  ;;  %9661 = vmatprep.mubr.msk.f32.mxu1 %vm5750_vm5, %v19986_v24 }
 0x807   :  { %v9209_v62 = vadd.f32 %v9208_v42, %v9207_v46 }
 0x808   :  { %v6736_v25 = vadd.f32 %v9129_v61, %v18114_v13  ;;  %v9130_v26 = vpop.f32.mrb[194].mxu1 }
 0x809   :  { %v9131_v17 = vpop.f32.mrb[195].mxu1  ;;  %9662 = vmatmul.mubr.msk.f32.gmra.mrb[44].mxu1 %vm5750_vm5, %v19987_v53  ;;  %v9210_v50 = vpop.f32.mrb[210].mxu0 }
 0x80a   :  { %v18338_v35 = vadd.f32 %v9209_v62, %v6736_v25  ;;  %v9132_v52 = vadd.f32 %v9131_v17, %v9130_v26  ;;  %v9211_v59 = vpop.f32.mrb[211].mxu0  ;;  %9664 = vmatprep.mubr.msk.f32.mxu1 %vm5750_vm5, %v19988_v8 }
 0x80b   :  { %v9212_v16 = vadd.f32 %v9211_v59, %v9210_v50 }
 0x80c   :  { %v6741_v12 = vadd.f32 %v9132_v52, %v18133_v34  ;;  %v9133_v32 = vpop.f32.mrb[196].mxu1 }
 0x80d   :  { %v9134_v63 = vpop.f32.mrb[197].mxu1  ;;  %9665 = vmatmul.mubr.msk.f32.gmra.mrb[46].mxu1 %vm5750_vm5, %v19989_v21  ;;  %v9213_v13 = vpop.f32.mrb[212].mxu0 }
 0x80e   :  { %v18345_v9 = vadd.f32 %v9212_v16, %v6741_v12  ;;  %v9135_v0 = vadd.f32 %v9134_v63, %v9133_v32  ;;  %v9214_v10 = vpop.f32.mrb[213].mxu0 }
 0x80f   :  { %v9215_v5 = vadd.f32 %v9214_v10, %v9213_v13 }
 0x810   :  { %v6746_v14 = vadd.f32 %v9135_v0, %v18152_v56  ;;  %v9136_v49 = vpop.f32.mrb[198].mxu1 }
 0x811   :  { %v9137_v20 = vpop.f32.mrb[199].mxu1  ;;  %v9216_v60 = vpop.f32.mrb[214].mxu0 }
 0x812   :  { %v18348_v2 = vadd.f32 %v9215_v5, %v6746_v14  ;;  %v9138_v40 = vadd.f32 %v9137_v20, %v9136_v49  ;;  %v9217_v34 = vpop.f32.mrb[215].mxu0 }
 0x813   :  { %v9218_v48 = vadd.f32 %v9217_v34, %v9216_v60 }
 0x814   :  { %v6751_v33 = vadd.f32 %v9138_v40, %v18171_v58  ;;  %v9139_v22 = vpop.f32.mrb[200].mxu1 }
 0x815   :  { %v9140_v30 = vpop.f32.mrb[201].mxu1  ;;  %v9219_v29 = vpop.f32.mrb[216].mxu0 }
 0x816   :  { %v18351_v39 = vadd.f32 %v9218_v48, %v6751_v33  ;;  %v9141_v47 = vadd.f32 %v9140_v30, %v9139_v22  ;;  %v9220_v18 = vpop.f32.mrb[217].mxu0 }
 0x817   :  { %v9221_v36 = vadd.f32 %v9220_v18, %v9219_v29 }
 0x818   :  { %v6756_v56 = vadd.f32 %v9141_v47, %v18190_v23  ;;  %v9142_v28 = vpop.f32.mrb[202].mxu1 }
 0x819   :  { %v9143_v43 = vpop.f32.mrb[203].mxu1  ;;  %v9222_v55 = vpop.f32.mrb[218].mxu0 }
 0x81a   :  { %v18354_v31 = vadd.f32 %v9221_v36, %v6756_v56  ;;  %v9144_v4 = vadd.f32 %v9143_v43, %v9142_v28  ;;  %v9223_v19 = vpop.f32.mrb[219].mxu0 }
 0x81b   :  { %v9224_v27 = vadd.f32 %v9223_v19, %v9222_v55 }
 0x81c   :  { %v6761_v58 = vadd.f32 %v9144_v4, %v18209_v57  ;;  %v9145_v41 = vpop.f32.mrb[204].mxu1 }
 0x81d   :  { %v9146_v38 = vpop.f32.mrb[205].mxu1  ;;  %v9225_v51 = vpop.f32.mrb[220].mxu0 }
 0x81e   :  { %v18357_v46 = vadd.f32 %v9224_v27, %v6761_v58  ;;  %v9147_v61 = vadd.f32 %v9146_v38, %v9145_v41  ;;  %v9226_v42 = vpop.f32.mrb[221].mxu0 }
 0x81f   :  { %v9227_v24 = vadd.f32 %v9226_v42, %v9225_v51 }
 0x820   :  { %v6766_v23 = vadd.f32 %v9147_v61, %v18228_v54  ;;  %v9148_v62 = vpop.f32.mrb[206].mxu1 }
 0x821   :  { %v9149_v25 = vpop.f32.mrb[207].mxu1  ;;  %v9228_v26 = vpop.f32.mrb[222].mxu0 }
 0x822   :  { %v18360_v17 = vadd.f32 %v9227_v24, %v6766_v23  ;;  %v9150_v53 = vadd.f32 %v9149_v25, %v9148_v62  ;;  %v9229_v50 = vpop.f32.mrb[223].mxu0 }
 0x823   :  { %v9230_v52 = vadd.f32 %v9229_v50, %v9228_v26 }
 0x824   :  { %v6771_v57 = vadd.f32 %v9150_v53, %v18247_v7  ;;  %v9151_v59 = vpop.f32.mrb[208].mxu1 }
 0x825   :  { %v9152_v8 = vpop.f32.mrb[209].mxu1  ;;  %v9231_v16 = vpop.f32.mrb[224].mxu0 }
 0x826   :  { %v18363_v12 = vadd.f32 %v9230_v52, %v6771_v57  ;;  %v9153_v32 = vadd.f32 %v9152_v8, %v9151_v59  ;;  %v9232_v63 = vpop.f32.mrb[225].mxu0 }
 0x827   :  { %v9233_v21 = vadd.f32 %v9232_v63, %v9231_v16 }
 0x828   :  { %v6776_v54 = vadd.f32 %v9153_v32, %v18266_v1  ;;  %v9154_v13 = vpop.f32.mrb[210].mxu1 }
 0x829   :  { %v9155_v0 = vpop.f32.mrb[211].mxu1  ;;  %v9234_v10 = vpop.f32.mrb[226].mxu0 }
 0x82a   :  { %v18366_v5 = vadd.f32 %v9233_v21, %v6776_v54  ;;  %v9156_v14 = vadd.f32 %v9155_v0, %v9154_v13  ;;  %v9235_v49 = vpop.f32.mrb[227].mxu0 }
 0x82b   :  { %v9236_v20 = vadd.f32 %v9235_v49, %v9234_v10 }
 0x82c   :  { %v6781_v7 = vadd.f32 %v9156_v14, %v18285_v37  ;;  %v9157_v60 = vpop.f32.mrb[212].mxu1 }
 0x82d   :  { %v9158_v40 = vpop.f32.mrb[213].mxu1  ;;  %v9237_v34 = vpop.f32.mrb[228].mxu0 }
 0x82e   :  { %v18369_v48 = vadd.f32 %v9236_v20, %v6781_v7  ;;  %v9159_v33 = vadd.f32 %v9158_v40, %v9157_v60  ;;  %v9238_v22 = vpop.f32.mrb[229].mxu0 }
 0x82f   :  { %v9239_v30 = vadd.f32 %v9238_v22, %v9237_v34 }
 0x830   :  { %v6786_v1 = vadd.f32 %v9159_v33, %v18296_v45  ;;  %v9160_v29 = vpop.f32.mrb[214].mxu1 }
 0x831   :  { %v9161_v47 = vpop.f32.mrb[215].mxu1  ;;  %v9240_v18 = vpop.f32.mrb[230].mxu0 }
 0x832   :  { %v18372_v36 = vadd.f32 %v9239_v30, %v6786_v1  ;;  %v9162_v56 = vadd.f32 %v9161_v47, %v9160_v29  ;;  %v9241_v28 = vpop.f32.mrb[231].mxu0 }
 0x833   :  { %v9242_v43 = vadd.f32 %v9241_v28, %v9240_v18 }
 0x834   :  { %v6791_v37 = vadd.f32 %v9162_v56, %v18303_v11  ;;  %v9163_v55 = vpop.f32.mrb[216].mxu1 }
 0x835   :  { %v9164_v4 = vpop.f32.mrb[217].mxu1  ;;  %v9243_v19 = vpop.f32.mrb[232].mxu0 }
 0x836   :  { %v18375_v27 = vadd.f32 %v9242_v43, %v6791_v37  ;;  %v9165_v58 = vadd.f32 %v9164_v4, %v9163_v55  ;;  %v9244_v41 = vpop.f32.mrb[233].mxu0 }
 0x837   :  { %v9245_v38 = vadd.f32 %v9244_v41, %v9243_v19 }
 0x838   :  { %v6796_v45 = vadd.f32 %v9165_v58, %v18310_v15  ;;  %v9166_v51 = vpop.f32.mrb[218].mxu1 }
 0x839   :  { %v9167_v61 = vpop.f32.mrb[219].mxu1  ;;  %v9246_v42 = vpop.f32.mrb[234].mxu0 }
 0x83a   :  { %v18378_v24 = vadd.f32 %v9245_v38, %v6796_v45  ;;  %v9168_v23 = vadd.f32 %v9167_v61, %v9166_v51  ;;  %v9247_v62 = vpop.f32.mrb[235].mxu0 }
 0x83b   :  { %v9248_v25 = vadd.f32 %v9247_v62, %v9246_v42 }
 0x83c   :  { %v6801_v11 = vadd.f32 %v9168_v23, %v18317_v44  ;;  %v9169_v26 = vpop.f32.mrb[220].mxu1 }
 0x83d   :  { %v9170_v53 = vpop.f32.mrb[221].mxu1  ;;  %v9249_v50 = vpop.f32.mrb[236].mxu0 }
 0x83e   :  { %v18381_v52 = vadd.f32 %v9248_v25, %v6801_v11  ;;  %v9171_v57 = vadd.f32 %v9170_v53, %v9169_v26  ;;  %v9250_v59 = vpop.f32.mrb[237].mxu0 }
 0x83f   :  { %v9251_v8 = vadd.f32 %v9250_v59, %v9249_v50 }
 0x840   :  { %v6806_v15 = vadd.f32 %v9171_v57, %v18324_v6  ;;  %v9172_v16 = vpop.f32.mrb[222].mxu1 }
 0x841   :  { %v9173_v32 = vpop.f32.mrb[223].mxu1  ;;  %v9252_v63 = vpop.f32.mrb[238].mxu0 }
 0x842   :  { %v18384_v21 = vadd.f32 %v9251_v8, %v6806_v15  ;;  %v9174_v54 = vadd.f32 %v9173_v32, %v9172_v16  ;;  %v9253_v13 = vpop.f32.mrb[239].mxu0 }
 0x843   :  { %v9254_v0 = vadd.f32 %v9253_v13, %v9252_v63 }
 0x844   :  { %v6811_v44 = vadd.f32 %v9174_v54, %v18331_v3  ;;  %v9287_v10 = vpop.f32.mrb[224].mxu1 }
 0x845   :  { %v9288_v14 = vpop.f32.mrb[225].mxu1  ;;  %v9367_v49 = vpop.f32.mrb[240].mxu0 }
 0x846   :  { %v18387_v20 = vadd.f32 %v9254_v0, %v6811_v44  ;;  %v9289_v7 = vadd.f32 %v9288_v14, %v9287_v10  ;;  %v9368_v60 = vpop.f32.mrb[241].mxu0 }
 0x847   :  { %v9369_v40 = vadd.f32 %v9368_v60, %v9367_v49 }
 0x848   :  { %v7026_v6 = vadd.f32 %v9289_v7, %v18338_v35  ;;  %v9290_v34 = vpop.f32.mrb[226].mxu1 }
 0x849   :  { %v9291_v33 = vpop.f32.mrb[227].mxu1  ;;  %v9370_v22 = vpop.f32.mrb[242].mxu0 }
 0x84a   :  { %v18390_v30 = vadd.f32 %v9369_v40, %v7026_v6  ;;  %v9292_v1 = vadd.f32 %v9291_v33, %v9290_v34  ;;  %v9371_v29 = vpop.f32.mrb[243].mxu0 }
 0x84b   :  { %v9372_v47 = vadd.f32 %v9371_v29, %v9370_v22 }
 0x84c   :  { %v7031_v3 = vadd.f32 %v9292_v1, %v18345_v9  ;;  %v9293_v18 = vpop.f32.mrb[228].mxu1 }
 0x84d   :  { %v9294_v56 = vpop.f32.mrb[229].mxu1  ;;  %v9373_v28 = vpop.f32.mrb[244].mxu0 }
 0x84e   :  { %v18393_v43 = vadd.f32 %v9372_v47, %v7031_v3  ;;  %v9295_v37 = vadd.f32 %v9294_v56, %v9293_v18  ;;  %v9374_v55 = vpop.f32.mrb[245].mxu0 }
 0x84f   :  { %v9375_v4 = vadd.f32 %v9374_v55, %v9373_v28 }
 0x850   :  { %v7036_v35 = vadd.f32 %v9295_v37, %v18348_v2  ;;  %v9296_v19 = vpop.f32.mrb[230].mxu1 }
 0x851   :  { %v9297_v58 = vpop.f32.mrb[231].mxu1  ;;  %v9376_v41 = vpop.f32.mrb[246].mxu0 }
 0x852   :  { %v18396_v38 = vadd.f32 %v9375_v4, %v7036_v35  ;;  %v9298_v45 = vadd.f32 %v9297_v58, %v9296_v19  ;;  %v9377_v51 = vpop.f32.mrb[247].mxu0 }
 0x853   :  { %v9378_v61 = vadd.f32 %v9377_v51, %v9376_v41 }
 0x854   :  { %v7041_v9 = vadd.f32 %v9298_v45, %v18351_v39  ;;  %v9299_v42 = vpop.f32.mrb[232].mxu1 }
 0x855   :  { %v9300_v23 = vpop.f32.mrb[233].mxu1  ;;  %v9379_v62 = vpop.f32.mrb[248].mxu0 }
 0x856   :  { %v18399_v25 = vadd.f32 %v9378_v61, %v7041_v9  ;;  %v9301_v11 = vadd.f32 %v9300_v23, %v9299_v42  ;;  %v9380_v26 = vpop.f32.mrb[249].mxu0 }
 0x857   :  { %v9381_v53 = vadd.f32 %v9380_v26, %v9379_v62 }
 0x858   :  { %v7046_v2 = vadd.f32 %v9301_v11, %v18354_v31  ;;  %v9302_v50 = vpop.f32.mrb[234].mxu1 }
 0x859   :  { %v9303_v57 = vpop.f32.mrb[235].mxu1  ;;  %v9382_v59 = vpop.f32.mrb[250].mxu0 }
 0x85a   :  { %v18402_v8 = vadd.f32 %v9381_v53, %v7046_v2  ;;  %v9304_v15 = vadd.f32 %v9303_v57, %v9302_v50  ;;  %v9383_v16 = vpop.f32.mrb[251].mxu0 }
 0x85b   :  { %v9384_v32 = vadd.f32 %v9383_v16, %v9382_v59 }
 0x85c   :  { %v7051_v39 = vadd.f32 %v9304_v15, %v18357_v46  ;;  %v9305_v63 = vpop.f32.mrb[236].mxu1 }
 0x85d   :  { %v9306_v54 = vpop.f32.mrb[237].mxu1  ;;  %v9385_v13 = vpop.f32.mrb[252].mxu0 }
 0x85e   :  { %v18405_v0 = vadd.f32 %v9384_v32, %v7051_v39  ;;  %v9307_v44 = vadd.f32 %v9306_v54, %v9305_v63  ;;  %v9386_v10 = vpop.f32.mrb[253].mxu0 }
 0x85f   :  { %v9387_v14 = vadd.f32 %v9386_v10, %v9385_v13 }
 0x860   :  { %v7056_v31 = vadd.f32 %v9307_v44, %v18360_v17  ;;  %v9308_v49 = vpop.f32.mrb[238].mxu1 }
 0x861   :  { %v9309_v7 = vpop.f32.mrb[239].mxu1  ;;  %v9388_v60 = vpop.f32.mrb[254].mxu0 }
 0x862   :  { %v18408_v40 = vadd.f32 %v9387_v14, %v7056_v31  ;;  %v9310_v6 = vadd.f32 %v9309_v7, %v9308_v49  ;;  %v9389_v34 = vpop.f32.mrb[255].mxu0 }
 0x863   :  { %v9390_v33 = vadd.f32 %v9389_v34, %v9388_v60 }
 0x864   :  { %v7061_v46 = vadd.f32 %v9310_v6, %v18363_v12  ;;  %v9311_v22 = vpop.f32.mrb[240].mxu1 }
 0x865   :  { %v9312_v1 = vpop.f32.mrb[241].mxu1  ;;  %v9391_v29 = vpop.f32.mrb[0].mxu0 }
 0x866   :  { %v18411_v47 = vadd.f32 %v9390_v33, %v7061_v46  ;;  %v9313_v3 = vadd.f32 %v9312_v1, %v9311_v22  ;;  %v9392_v18 = vpop.f32.mrb[1].mxu0 }
 0x867   :  { %v9393_v56 = vadd.f32 %v9392_v18, %v9391_v29 }
 0x868   :  { %v7066_v17 = vadd.f32 %v9313_v3, %v18366_v5  ;;  %v9314_v28 = vpop.f32.mrb[242].mxu1 }
 0x869   :  { %v9315_v37 = vpop.f32.mrb[243].mxu1  ;;  %v9394_v55 = vpop.f32.mrb[2].mxu0 }
 0x86a   :  { %v18414_v4 = vadd.f32 %v9393_v56, %v7066_v17  ;;  %v9316_v35 = vadd.f32 %v9315_v37, %v9314_v28  ;;  %v9395_v19 = vpop.f32.mrb[3].mxu0 }
 0x86b   :  { %v9396_v58 = vadd.f32 %v9395_v19, %v9394_v55 }
 0x86c   :  { %v7071_v12 = vadd.f32 %v9316_v35, %v18369_v48  ;;  %v9317_v41 = vpop.f32.mrb[244].mxu1 }
 0x86d   :  { %v9318_v45 = vpop.f32.mrb[245].mxu1  ;;  %v9397_v51 = vpop.f32.mrb[4].mxu0 }
 0x86e   :  { %v18417_v61 = vadd.f32 %v9396_v58, %v7071_v12  ;;  %v9319_v9 = vadd.f32 %v9318_v45, %v9317_v41  ;;  %v9398_v42 = vpop.f32.mrb[5].mxu0 }
 0x86f   :  { %v9399_v23 = vadd.f32 %v9398_v42, %v9397_v51 }
 0x870   :  { %v7076_v5 = vadd.f32 %v9319_v9, %v18372_v36  ;;  %v9320_v62 = vpop.f32.mrb[246].mxu1 }
 0x871   :  { %v9321_v11 = vpop.f32.mrb[247].mxu1  ;;  %v9400_v26 = vpop.f32.mrb[6].mxu0 }
 0x872   :  { %v18420_v53 = vadd.f32 %v9399_v23, %v7076_v5  ;;  %v9322_v2 = vadd.f32 %v9321_v11, %v9320_v62  ;;  %v9401_v50 = vpop.f32.mrb[7].mxu0 }
 0x873   :  { %v9402_v57 = vadd.f32 %v9401_v50, %v9400_v26 }
 0x874   :  { %v7081_v48 = vadd.f32 %v9322_v2, %v18375_v27  ;;  %v9323_v59 = vpop.f32.mrb[248].mxu1 }
 0x875   :  { %v9324_v15 = vpop.f32.mrb[249].mxu1  ;;  %v9403_v16 = vpop.f32.mrb[8].mxu0 }
 0x876   :  { %v18423_v32 = vadd.f32 %v9402_v57, %v7081_v48  ;;  %v9325_v39 = vadd.f32 %v9324_v15, %v9323_v59  ;;  %v9404_v63 = vpop.f32.mrb[9].mxu0 }
 0x877   :  { %v9405_v54 = vadd.f32 %v9404_v63, %v9403_v16 }
 0x878   :  { %v7086_v36 = vadd.f32 %v9325_v39, %v18378_v24  ;;  %v9326_v13 = vpop.f32.mrb[250].mxu1 }
 0x879   :  { %v9327_v44 = vpop.f32.mrb[251].mxu1  ;;  %v9406_v10 = vpop.f32.mrb[10].mxu0 }
 0x87a   :  { %v18426_v14 = vadd.f32 %v9405_v54, %v7086_v36  ;;  %v9328_v31 = vadd.f32 %v9327_v44, %v9326_v13  ;;  %v9407_v49 = vpop.f32.mrb[11].mxu0 }
 0x87b   :  { %v9408_v7 = vadd.f32 %v9407_v49, %v9406_v10 }
 0x87c   :  { %v7091_v27 = vadd.f32 %v9328_v31, %v18381_v52  ;;  %v9329_v60 = vpop.f32.mrb[252].mxu1 }
 0x87d   :  { %v9330_v6 = vpop.f32.mrb[253].mxu1  ;;  %v9409_v34 = vpop.f32.mrb[12].mxu0 }
 0x87e   :  { %v18429_v33 = vadd.f32 %v9408_v7, %v7091_v27  ;;  %v9331_v46 = vadd.f32 %v9330_v6, %v9329_v60  ;;  %v9410_v22 = vpop.f32.mrb[13].mxu0 }
 0x87f   :  { %v9411_v1 = vadd.f32 %v9410_v22, %v9409_v34 }
 0x880   :  { %v7096_v24 = vadd.f32 %v9331_v46, %v18384_v21  ;;  %v9332_v29 = vpop.f32.mrb[254].mxu1 }
 0x881   :  { %v9333_v3 = vpop.f32.mrb[255].mxu1  ;;  %v9412_v18 = vpop.f32.mrb[14].mxu0 }
 0x882   :  { %v18432_v56 = vadd.f32 %v9411_v1, %v7096_v24  ;;  %v9334_v17 = vadd.f32 %v9333_v3, %v9332_v29  ;;  %v9413_v28 = vpop.f32.mrb[15].mxu0 }
 0x883   :  { %v9414_v37 = vadd.f32 %v9413_v28, %v9412_v18 }
 0x884   :  { %v7101_v52 = vadd.f32 %v9334_v17, %v18387_v20  ;;  %v9447_v55 = vpop.f32.mrb[0].mxu1 }
 0x885   :  { %v9448_v35 = vpop.f32.mrb[1].mxu1  ;;  %v9527_v19 = vpop.f32.mrb[16].mxu0 }
 0x886   :  { %v18435_v58 = vadd.f32 %v9414_v37, %v7101_v52  ;;  %v9449_v12 = vadd.f32 %v9448_v35, %v9447_v55  ;;  %v9528_v41 = vpop.f32.mrb[17].mxu0 }
 0x887   :  { %v9529_v45 = vadd.f32 %v9528_v41, %v9527_v19 }
 0x888   :  { %v7316_v21 = vadd.f32 %v9449_v12, %v18390_v30  ;;  %v9450_v51 = vpop.f32.mrb[2].mxu1 }
 0x889   :  { %v9451_v9 = vpop.f32.mrb[3].mxu1  ;;  %v9530_v42 = vpop.f32.mrb[18].mxu0 }
 0x88a   :  { %v9452_v23 = vadd.f32 %v9451_v9, %v9450_v51  ;;  %v9531_v5 = vpop.f32.mrb[19].mxu0  ;;  %v18438_v62 = vadd.f32 %v9529_v45, %v7316_v21 }
 0x88b   :  { %v9532_v11 = vadd.f32 %v9531_v5, %v9530_v42 }
 0x88c   :  { %v7321_v20 = vadd.f32 %v9452_v23, %v18393_v43  ;;  %v9453_v26 = vpop.f32.mrb[4].mxu1 }
 0x88d   :  { %v9454_v2 = vpop.f32.mrb[5].mxu1  ;;  %v9533_v50 = vpop.f32.mrb[20].mxu0 }
 0x88e   :  { %v9455_v57 = vadd.f32 %v9454_v2, %v9453_v26  ;;  %v9534_v48 = vpop.f32.mrb[21].mxu0  ;;  %v18441_v59 = vadd.f32 %v9532_v11, %v7321_v20 }
 0x88f   :  { %v9535_v15 = vadd.f32 %v9534_v48, %v9533_v50 }
 0x890   :  { %v7326_v30 = vadd.f32 %v9455_v57, %v18396_v38  ;;  %v9456_v16 = vpop.f32.mrb[6].mxu1 }
 0x891   :  { %v9457_v39 = vpop.f32.mrb[7].mxu1  ;;  %v9536_v63 = vpop.f32.mrb[22].mxu0 }
 0x892   :  { %v9458_v54 = vadd.f32 %v9457_v39, %v9456_v16  ;;  %v9537_v36 = vpop.f32.mrb[23].mxu0  ;;  %v18444_v13 = vadd.f32 %v9535_v15, %v7326_v30 }
 0x893   :  { %v9538_v44 = vadd.f32 %v9537_v36, %v9536_v63 }
 0x894   :  { %v7331_v43 = vadd.f32 %v9458_v54, %v18399_v25  ;;  %v9459_v10 = vpop.f32.mrb[8].mxu1 }
 0x895   :  { %v9460_v31 = vpop.f32.mrb[9].mxu1  ;;  %v9539_v49 = vpop.f32.mrb[24].mxu0 }
 0x896   :  { %v9461_v7 = vadd.f32 %v9460_v31, %v9459_v10  ;;  %v9540_v27 = vpop.f32.mrb[25].mxu0  ;;  %v18447_v60 = vadd.f32 %v9538_v44, %v7331_v43 }
 0x897   :  { %v9541_v6 = vadd.f32 %v9540_v27, %v9539_v49 }
 0x898   :  { %v7336_v38 = vadd.f32 %v9461_v7, %v18402_v8  ;;  %v9462_v34 = vpop.f32.mrb[10].mxu1 }
 0x899   :  { %v9463_v46 = vpop.f32.mrb[11].mxu1  ;;  %v9542_v22 = vpop.f32.mrb[26].mxu0 }
 0x89a   :  { %v9464_v1 = vadd.f32 %v9463_v46, %v9462_v34  ;;  %v9543_v24 = vpop.f32.mrb[27].mxu0  ;;  %v18450_v29 = vadd.f32 %v9541_v6, %v7336_v38 }
 0x89b   :  { %v9544_v3 = vadd.f32 %v9543_v24, %v9542_v22 }
 0x89c   :  { %v7341_v25 = vadd.f32 %v9464_v1, %v18405_v0  ;;  %v9465_v18 = vpop.f32.mrb[12].mxu1 }
 0x89d   :  { %v9466_v17 = vpop.f32.mrb[13].mxu1  ;;  %v9545_v28 = vpop.f32.mrb[28].mxu0 }
 0x89e   :  { %v9467_v37 = vadd.f32 %v9466_v17, %v9465_v18  ;;  %v9546_v52 = vpop.f32.mrb[29].mxu0  ;;  %v18453_v55 = vadd.f32 %v9544_v3, %v7341_v25 }
 0x89f   :  { %v9547_v35 = vadd.f32 %v9546_v52, %v9545_v28 }
 0x8a0   :  { %v7346_v8 = vadd.f32 %v9467_v37, %v18408_v40  ;;  %v9468_v19 = vpop.f32.mrb[14].mxu1 }
 0x8a1   :  { %v9469_v12 = vpop.f32.mrb[15].mxu1  ;;  %v9548_v41 = vpop.f32.mrb[30].mxu0 }
 0x8a2   :  { %v9470_v45 = vadd.f32 %v9469_v12, %v9468_v19  ;;  %v9549_v21 = vpop.f32.mrb[31].mxu0  ;;  %v18456_v51 = vadd.f32 %v9547_v35, %v7346_v8 }
 0x8a3   :  { %v9550_v9 = vadd.f32 %v9549_v21, %v9548_v41 }
 0x8a4   :  { %v7351_v0 = vadd.f32 %v9470_v45, %v18411_v47  ;;  %v9471_v42 = vpop.f32.mrb[16].mxu1 }
 0x8a5   :  { %v9472_v23 = vpop.f32.mrb[17].mxu1  ;;  %v9551_v5 = vpop.f32.mrb[32].mxu0 }
 0x8a6   :  { %v9473_v11 = vadd.f32 %v9472_v23, %v9471_v42  ;;  %v9552_v20 = vpop.f32.mrb[33].mxu0  ;;  %v18459_v26 = vadd.f32 %v9550_v9, %v7351_v0 }
 0x8a7   :  { %v9553_v2 = vadd.f32 %v9552_v20, %v9551_v5 }
 0x8a8   :  { %v7356_v40 = vadd.f32 %v9473_v11, %v18414_v4  ;;  %v9474_v50 = vpop.f32.mrb[18].mxu1 }
 0x8a9   :  { %v9475_v57 = vpop.f32.mrb[19].mxu1  ;;  %v9554_v48 = vpop.f32.mrb[34].mxu0 }
 0x8aa   :  { %v9476_v15 = vadd.f32 %v9475_v57, %v9474_v50  ;;  %v9555_v30 = vpop.f32.mrb[35].mxu0  ;;  %v18462_v16 = vadd.f32 %v9553_v2, %v7356_v40 }
 0x8ab   :  { %v9556_v39 = vadd.f32 %v9555_v30, %v9554_v48 }
 0x8ac   :  { %v7361_v47 = vadd.f32 %v9476_v15, %v18417_v61  ;;  %v9477_v63 = vpop.f32.mrb[20].mxu1 }
 0x8ad   :  { %v9478_v54 = vpop.f32.mrb[21].mxu1  ;;  %v9557_v36 = vpop.f32.mrb[36].mxu0 }
 0x8ae   :  { %v9479_v44 = vadd.f32 %v9478_v54, %v9477_v63  ;;  %v9558_v43 = vpop.f32.mrb[37].mxu0  ;;  %v18465_v10 = vadd.f32 %v9556_v39, %v7361_v47 }
 0x8af   :  { %v9559_v31 = vadd.f32 %v9558_v43, %v9557_v36 }
 0x8b0   :  { %v7366_v4 = vadd.f32 %v9479_v44, %v18420_v53  ;;  %v9480_v49 = vpop.f32.mrb[22].mxu1 }
 0x8b1   :  { %v9481_v7 = vpop.f32.mrb[23].mxu1  ;;  %v9560_v27 = vpop.f32.mrb[38].mxu0 }
 0x8b2   :  { %v9482_v6 = vadd.f32 %v9481_v7, %v9480_v49  ;;  %v9561_v38 = vpop.f32.mrb[39].mxu0  ;;  %v18468_v34 = vadd.f32 %v9559_v31, %v7366_v4 }
 0x8b3   :  { %v9562_v46 = vadd.f32 %v9561_v38, %v9560_v27 }
 0x8b4   :  { %v7371_v61 = vadd.f32 %v9482_v6, %v18423_v32  ;;  %v9483_v22 = vpop.f32.mrb[24].mxu1 }
 0x8b5   :  { %v9484_v1 = vpop.f32.mrb[25].mxu1  ;;  %v9563_v24 = vpop.f32.mrb[40].mxu0 }
 0x8b6   :  { %v9485_v3 = vadd.f32 %v9484_v1, %v9483_v22  ;;  %v9564_v25 = vpop.f32.mrb[41].mxu0  ;;  %v7516_v18 = vadd.f32 %v9562_v46, %v7371_v61 }
 0x8b7   :  { %v9565_v17 = vadd.f32 %v9564_v25, %v9563_v24 }
 0x8b8   :  { %v7376_v28 = vadd.f32 %v9485_v3, %v18426_v14  ;;  %v9486_v53 = vpop.f32.mrb[26].mxu1 }
 0x8b9   :  { %v9487_v37 = vpop.f32.mrb[27].mxu1  ;;  %v9566_v52 = vpop.f32.mrb[42].mxu0 }
 0x8ba   :  { %v9488_v35 = vadd.f32 %v9487_v37, %v9486_v53  ;;  %v9567_v8 = vpop.f32.mrb[43].mxu0  ;;  %v7521_v19 = vadd.f32 %v9565_v17, %v7376_v28 }
 0x8bb   :  { %v9568_v12 = vadd.f32 %v9567_v8, %v9566_v52 }
 0x8bc   :  { %v7381_v41 = vadd.f32 %v9488_v35, %v18429_v33  ;;  %v9489_v45 = vpop.f32.mrb[28].mxu1 }
 0x8bd   :  { %v9490_v32 = vpop.f32.mrb[29].mxu1  ;;  %v9569_v21 = vpop.f32.mrb[44].mxu0 }
 0x8be   :  { %v9491_v9 = vadd.f32 %v9490_v32, %v9489_v45  ;;  %v9570_v0 = vpop.f32.mrb[45].mxu0  ;;  %v7526_v42 = vadd.f32 %v9568_v12, %v7381_v41 }
 0x8bf   :  { %v9571_v23 = vadd.f32 %v9570_v0, %v9569_v21 }
 0x8c0   :  { %v7386_v5 = vadd.f32 %v9491_v9, %v18432_v56  ;;  %v9492_v11 = vpop.f32.mrb[30].mxu1 }
 0x8c1   :  { %v9493_v14 = vpop.f32.mrb[31].mxu1  ;;  %v9572_v20 = vpop.f32.mrb[46].mxu0 }
 0x8c2   :  { %v9494_v2 = vadd.f32 %v9493_v14, %v9492_v11  ;;  %v9573_v40 = vpop.f32.mrb[47].mxu0  ;;  %v7531_v50 = vadd.f32 %v9571_v23, %v7386_v5 }
 0x8c3   :  { %v9574_v57 = vadd.f32 %v9573_v40, %v9572_v20 }
 0x8c4   :  { %v7391_v48 = vadd.f32 %v9494_v2, %v18435_v58  ;;  %v9645_v15 = vpop.f32.mrb[32].mxu1 }
 0x8c5   :  { %v7611_v33 = vadd.f32 %v9645_v15, %v18441_v59  ;;  %v7605_v30 = vpop.f32.mrb[33].mxu1 }
 0x8c6   :  { %v7606_v39 = vadd.f32 %v7605_v30, %v18438_v62  ;;  %v7536_v47 = vadd.f32 %v9574_v57, %v7391_v48 }
 0x8c7   :  { %7685 = vst.msk [vmem:[%s18556_s6 + $0x8] sm:$0xff] %vm5750_vm5, %v7611_v33 }
 0x8c8   :  { %7684 = vst.msk [vmem:[%s18556_s6] sm:$0xff] %vm5750_vm5, %v7606_v39  ;;  %v9648_v56 = vpop.f32.mrb[34].mxu1 }
 0x8c9   :  { %v7621_v58 = vadd.f32 %v9648_v56, %v18447_v60  ;;  %v7615_v63 = vpop.f32.mrb[35].mxu1 }
 0x8ca   :  { %v7616_v59 = vadd.f32 %v7615_v63, %v18444_v13 }
 0x8cb   :  { %7687 = vst.msk [vmem:[%s18556_s6 + $0x18] sm:$0xff] %vm5750_vm5, %v7621_v58 }
 0x8cc   :  { %7686 = vst.msk [vmem:[%s18556_s6 + $0x10] sm:$0xff] %vm5750_vm5, %v7616_v59  ;;  %v9651_v62 = vpop.f32.mrb[36].mxu1 }
 0x8cd   :  { %v7631_v54 = vadd.f32 %v9651_v62, %v18453_v55  ;;  %v7625_v36 = vpop.f32.mrb[37].mxu1 }
 0x8ce   :  { %v7626_v44 = vadd.f32 %v7625_v36, %v18450_v29 }
 0x8cf   :  { %7689 = vst.msk [vmem:[%s18556_s6 + $0x28] sm:$0xff] %vm5750_vm5, %v7631_v54 }
 0x8d0   :  { %7688 = vst.msk [vmem:[%s18556_s6 + $0x20] sm:$0xff] %vm5750_vm5, %v7626_v44  ;;  %v9654_v13 = vpop.f32.mrb[38].mxu1 }
 0x8d1   :  { %v7641_v60 = vadd.f32 %v9654_v13, %v18459_v26  ;;  %v7635_v43 = vpop.f32.mrb[39].mxu1 }
 0x8d2   :  { %v7636_v31 = vadd.f32 %v7635_v43, %v18456_v51 }
 0x8d3   :  { %7691 = vst.msk [vmem:[%s18556_s6 + $0x38] sm:$0xff] %vm5750_vm5, %v7641_v60 }
 0x8d4   :  { %7690 = vst.msk [vmem:[%s18556_s6 + $0x30] sm:$0xff] %vm5750_vm5, %v7636_v31  ;;  %v9657_v29 = vpop.f32.mrb[40].mxu1 }
 0x8d5   :  { %v7651_v55 = vadd.f32 %v9657_v29, %v18465_v10  ;;  %v7645_v4 = vpop.f32.mrb[41].mxu1 }
 0x8d6   :  { %v7646_v49 = vadd.f32 %v7645_v4, %v18462_v16 }
 0x8d7   :  { %7693 = vst.msk [vmem:[%s18556_s6 + $0x48] sm:$0xff] %vm5750_vm5, %v7651_v55 }
 0x8d8   :  { %7692 = vst.msk [vmem:[%s18556_s6 + $0x40] sm:$0xff] %vm5750_vm5, %v7646_v49  ;;  %v9660_v51 = vpop.f32.mrb[42].mxu1 }
 0x8d9   :  { %v7661_v26 = vadd.f32 %v9660_v51, %v7516_v18  ;;  %v7655_v7 = vpop.f32.mrb[43].mxu1 }
 0x8da   :  { %v7656_v27 = vadd.f32 %v7655_v7, %v18468_v34 }
 0x8db   :  { %7695 = vst.msk [vmem:[%s18556_s6 + $0x58] sm:$0xff] %vm5750_vm5, %v7661_v26 }
 0x8dc   :  { %7694 = vst.msk [vmem:[%s18556_s6 + $0x50] sm:$0xff] %vm5750_vm5, %v7656_v27  ;;  %v9663_v16 = vpop.f32.mrb[44].mxu1 }
 0x8dd   :  { %v7671_v10 = vadd.f32 %v9663_v16, %v7526_v42  ;;  %v7665_v6 = vpop.f32.mrb[45].mxu1 }
 0x8de   :  { %v7666_v38 = vadd.f32 %v7665_v6, %v7521_v19 }
 0x8df   :  { %7697 = vst.msk [vmem:[%s18556_s6 + $0x68] sm:$0xff] %vm5750_vm5, %v7671_v10 }
 0x8e0   :  { %7696 = vst.msk [vmem:[%s18556_s6 + $0x60] sm:$0xff] %vm5750_vm5, %v7666_v38  ;;  %v9666_v34 = vpop.f32.mrb[46].mxu1 }
 0x8e1   :  { %v7681_v46 = vadd.f32 %v9666_v34, %v7536_v47  ;;  %v7675_v61 = vpop.f32.mrb[47].mxu1 }
 0x8e2   :  { %v7676_v22 = vadd.f32 %v7675_v61, %v7531_v50 }
 0x8e3   :  { %7699 = vst.msk [vmem:[%s18556_s6 + $0x78] sm:$0xff] %vm5750_vm5, %v7681_v46 }
 0x8e4   :  { %7698 = vst.msk [vmem:[%s18556_s6 + $0x70] sm:$0xff] %vm5750_vm5, %v7676_v22 }
 0x8e5   :  { %7720 = vsyncmov [#allocation6] }
 0x8e8   :  { %s7721_s28 = vpop.sfrf %7720 }
 0x8e9   :  { %p8353_p8 = scmp.ne.s32.totalorder %s7721_s28, 0 }
 0x8eb   :  { %7725 = shalt.err (%p8353_p8)  }
 0x8ec   :  { %7727 = vsyncmov [#allocation6 + $0x1] }
 0x8ef   :  { %s7728_s29 = vpop.sfrf %7727 }
 0x8f0   :  { %p8354_p9 = scmp.ne.s32.totalorder %s7728_s29, 0 }
 0x8f2   :  { %7732 = shalt.err (%p8354_p9)  }
 0x8f3   :  { %7734 = vsyncmov [#allocation6 + $0x2] }
 0x8f6   :  { %s7735_s2 = vpop.sfrf %7734 }
 0x8f7   :  { %p8355_p10 = scmp.ne.s32.totalorder %s7735_s2, 0 }
 0x8f9   :  { %7739 = shalt.err (%p8355_p10)  }
 0x8fa   :  { %7741 = vsyncmov [#allocation6 + $0x3] }
 0x8fd   :  { %s7742_s30 = vpop.sfrf %7741 }
 0x8fe   :  { %p8356_p11 = scmp.ne.s32.totalorder %s7742_s30, 0 }
 0x900   :  { %7746 = shalt.err (%p8356_p11)  }

</bundles_post_ra>
